<compile_context>
chip_gen: v7x
topology: tpu7x:2x2x1
jax: 0.10.0
libtpu: 0.0.40
codegen_flags: <defaults>
</compile_context>

<pallas_src>
import jax
import jax.numpy as jnp
from jax.experimental import pallas as pl
from jax.experimental.pallas import tpu as pltpu

_MAX_TILE_M = 4096           # cap on the conv M-tile (lane axis of the output)
_HEAD_TILE_SMALL = 1152      # lcm(36, 128): whole samples per tile, 128-aligned
_HEAD_TILE_BIG = 4608        # 128 samples/tile -> 128-lane-wide head output blocks
_HALO = 128                  # halo block width; >= max tap offset (2*Wh + 2 <= 82)
_VMEM_LIMIT = 48 * 1024 * 1024


def _round_up(x, m):
    return ((x + m - 1) // m) * m


def _selu(x):
    alpha = 1.6732632423543772
    scale = 1.0507009873554805
    neg = alpha * (jnp.exp(jnp.minimum(x, 0.0)) - 1.0)
    return scale * jnp.where(x > 0, x, neg)


# ------------------------------ Pallas kernels -------------------------------
def _tap_accumulate(b_ref, h_ref, w_ref, offsets, tm):
    """9-tap space-to-depth conv: sum_t W[t] @ x[:, off_t : off_t + tm] (f32 acc)."""
    x = jnp.concatenate([b_ref[...], h_ref[...]], axis=1)       # (4Cin, tm + HALO)
    acc = None
    for t, off in enumerate(offsets):
        d = jnp.dot(w_ref[t], x[:, off:off + tm],
                    preferred_element_type=jnp.float32)
        acc = d if acc is None else acc + d
    return acc                                                   # (Cout, tm) f32


def _make_conv_kernel(offsets):
    def kernel(b_ref, h_ref, w_ref, bias_ref, o_ref):
        tm = o_ref.shape[1]
        acc = _tap_accumulate(b_ref, h_ref, w_ref, offsets, tm)
        o_ref[...] = _selu(acc + bias_ref[...]).astype(o_ref.dtype)
    return kernel


def _make_conv_head_kernel(offsets):
    def kernel(b_ref, h_ref, w_ref, bias_ref, wh_ref, sel_ref, bh_ref, o_ref):
        tm = sel_ref.shape[0]
        acc = _tap_accumulate(b_ref, h_ref, w_ref, offsets, tm)
        act = _selu(acc + bias_ref[...])                         # (32, tm) f32
        # Head: per-(channel, dense position) weight (zero on invalid positions),
        # channel reduce, then a tiny bf16 0/1 segment-sum matmul (36 dense
        # positions of a sample -> that sample).  bf16 = review's sanctioned
        # fallback for killing the f32 sel operand.
        tmp = jnp.sum(act * wh_ref[...], axis=0, keepdims=True)  # (1, tm) f32
        head = jnp.dot(tmp.astype(jnp.bfloat16), sel_ref[...],
                       preferred_element_type=jnp.float32)       # (1, tile_n)
        o_ref[...] = head + bh_ref[...]
    return kernel


# ------------------------------ JAX-side glue ---------------------------------
def _space_to_depth_flat(a):
    """(C, N, H, W) -> ((4C, N*Hh*Wh), Hh, Wh); channel blocks ordered (p, q)."""
    C, N, H, W = a.shape
    hh, wh = (H + 1) // 2, (W + 1) // 2
    phases = []
    for p in range(2):
        for q in range(2):
            ph = a[:, :, p::2, q::2]
            ph = jnp.pad(ph, ((0, 0), (0, 0),
                              (0, hh - ph.shape[2]), (0, wh - ph.shape[3])))
            phases.append(ph)
    b = jnp.concatenate(phases, axis=0).reshape(4 * C, N * hh * wh)
    return b, hh, wh


def _tap_offsets(wh):
    return tuple(ai * wh + aj for ai in range(3) for aj in range(3))


def _compiler_params():
    return pltpu.CompilerParams(dimension_semantics=("parallel",),
                                vmem_limit_bytes=_VMEM_LIMIT)


def conv2d_selu(a_cnhw, w_packed, b_col):
    """Conv2d(k=5, stride=2, VALID) + SELU.  (Cin, N, H, W) bf16 -> (Cout, N, OH, OW) bf16."""
    C, N, H, W = a_cnhw.shape
    n_taps, Cout, C4 = w_packed.shape
    OH, OW = (H - 5) // 2 + 1, (W - 5) // 2 + 1
    b2, hh, wh = _space_to_depth_flat(a_cnhw)
    M = b2.shape[1]
    # >= 2 grid steps whenever possible (v7x megacore sharding), VMEM-friendly cap.
    tile = min(_MAX_TILE_M, max(128, _round_up(-(-M // 2), 128)))
    Mpad = _round_up(M, tile)
    b2 = jnp.pad(b2, ((0, 0), (0, Mpad + _HALO - M)))            # tail pad >= max offset
    offsets = _tap_offsets(wh)
    n_tiles = Mpad // tile
    halo_blocks = tile // _HALO
    out = pl.pallas_call(
        _make_conv_kernel(offsets),
        out_shape=jax.ShapeDtypeStruct((Cout, Mpad), jnp.bfloat16),
        grid=(n_tiles,),
        in_specs=[
            pl.BlockSpec((C4, tile), lambda m: (0, m)),                       # main block
            pl.BlockSpec((C4, _HALO), lambda m, _hb=halo_blocks: (0, (m + 1) * _hb)),  # halo
            pl.BlockSpec((n_taps, Cout, C4), lambda m: (0, 0, 0)),            # tap weights
            pl.BlockSpec((Cout, 1), lambda m: (0, 0)),                        # bias
        ],
        out_specs=pl.BlockSpec((Cout, tile), lambda m: (0, m)),
        compiler_params=_compiler_params(),
        cost_estimate=pl.CostEstimate(
            flops=2 * n_taps * Cout * C4 * Mpad,
            transcendentals=Cout * Mpad,
            bytes_accessed=2 * C4 * (Mpad + n_tiles * _HALO)
                           + 2 * n_taps * Cout * C4 + 4 * Cout + 2 * Cout * Mpad),
    )(b2, b2, w_packed, b_col)
    dense = out[:, :M].reshape(Cout, N, hh, wh)
    return dense[:, :, :OH, :OW]


def conv2d_selu_head(a_cnhw, w_packed, b_col, wh_cyx, bh):
    """conv3 + SELU + fused Linear(448, 1) head.  Returns (N, 1) f32."""
    C, N, H, W = a_cnhw.shape
    n_taps, Cout, C4 = w_packed.shape
    OH, OW = (H - 5) // 2 + 1, (W - 5) // 2 + 1                  # 2, 7
    b2, hh, wh = _space_to_depth_flat(a_cnhw)                    # hh=4, wh=9
    pos = hh * wh                                                # 36 dense positions / sample
    M = b2.shape[1]                                              # N * 36
    tile = _HEAD_TILE_SMALL if M <= _HEAD_TILE_SMALL else _HEAD_TILE_BIG
    Mpad = _round_up(M, tile)
    tile_n = tile // pos
    n_pad = Mpad // pos
    b2 = jnp.pad(b2, ((0, 0), (0, Mpad + _HALO - M)))
    offsets = _tap_offsets(wh)
    halo_blocks = tile // _HALO
    # Head weight per (channel, dense position): zero at invalid (y>=OH or x>=OW)
    # positions, tiled across the samples of one tile; bf16 resident constant.
    wh_dense = jnp.zeros((Cout, hh, wh), jnp.float32).at[:, :OH, :OW].set(wh_cyx)
    wh_tiled = jnp.tile(wh_dense.reshape(Cout, pos), (1, tile_n)).astype(jnp.bfloat16)
    # 0/1 segment-sum matrix (dense positions -> sample), bf16 (not f32).
    sel = (jnp.arange(tile)[:, None] // pos
           == jnp.arange(tile_n)[None, :]).astype(jnp.bfloat16)
    head = pl.pallas_call(
        _make_conv_head_kernel(offsets),
        out_shape=jax.ShapeDtypeStruct((1, n_pad), jnp.float32),
        grid=(Mpad // tile,),
        in_specs=[
            pl.BlockSpec((C4, tile), lambda m: (0, m)),
            pl.BlockSpec((C4, _HALO), lambda m, _hb=halo_blocks: (0, (m + 1) * _hb)),
            pl.BlockSpec((n_taps, Cout, C4), lambda m: (0, 0, 0)),
            pl.BlockSpec((Cout, 1), lambda m: (0, 0)),
            pl.BlockSpec((Cout, tile), lambda m: (0, 0)),
            pl.BlockSpec((tile, tile_n), lambda m: (0, 0)),
            pl.BlockSpec((1, 1), lambda m: (0, 0)),
        ],
        out_specs=pl.BlockSpec((1, tile_n), lambda m: (0, m)),
        compiler_params=_compiler_params(),
    )(b2, b2, w_packed, b_col, wh_tiled, sel, bh)
    return head[0, :N].reshape(N, 1)


# ------------------------------ Params / packing ------------------------------
def xavier_uniform(key, shape, fan_in, fan_out):
    bound = jnp.sqrt(6.0 / (fan_in + fan_out))
    return jax.random.uniform(key, shape, jnp.float32, -bound, bound)


def init_params(key):
    ks = jax.random.split(key, 8)
    return {
        "w1": xavier_uniform(ks[0], (16, 3, 5, 5), 3 * 25, 16 * 25),
        "b1": jax.random.uniform(ks[1], (16,), jnp.float32, -0.1, 0.1),
        "w2": xavier_uniform(ks[2], (32, 16, 5, 5), 16 * 25, 32 * 25),
        "b2": jax.random.uniform(ks[3], (32,), jnp.float32, -0.1, 0.1),
        "w3": xavier_uniform(ks[4], (32, 32, 5, 5), 32 * 25, 32 * 25),
        "b3": jax.random.uniform(ks[5], (32,), jnp.float32, -0.1, 0.1),
        "wh": xavier_uniform(ks[6], (1, 448), 448, 1),
        "bh": jax.random.uniform(ks[7], (1,), jnp.float32, -0.1, 0.1),
    }


def _pack_conv_w(w):
    """(Cout, Cin, 5, 5) -> (9, Cout, 4*Cin) bf16 taps of the space-to-depth conv.

    Tap (ai, aj) holds W[:, :, 2*ai+p, 2*aj+q] in channel block (p*2+q)*Cin; taps
    falling outside the 5x5 kernel stay zero, so any phase-padding / out-of-window
    garbage they would read contributes nothing."""
    Cout, Cin, KH, KW = w.shape
    wp = jnp.zeros((9, Cout, 4 * Cin), jnp.float32)
    for ai in range(3):
        for aj in range(3):
            for p in range(2):
                for q in range(2):
                    ki, kj = 2 * ai + p, 2 * aj + q
                    if ki < KH and kj < KW:
                        blk = (p * 2 + q) * Cin
                        wp = wp.at[ai * 3 + aj, :, blk:blk + Cin].set(w[:, :, ki, kj])
    return wp.astype(jnp.bfloat16)


def pack_params(params):
    """One-time packing outside the hot path (no contraction-dim padding at all)."""
    return {
        "w1": _pack_conv_w(params["w1"]),
        "b1": params["b1"].reshape(-1, 1).astype(jnp.float32),
        "w2": _pack_conv_w(params["w2"]),
        "b2": params["b2"].reshape(-1, 1).astype(jnp.float32),
        "w3": _pack_conv_w(params["w3"]),
        "b3": params["b3"].reshape(-1, 1).astype(jnp.float32),
        # PyTorch .view() flattens conv3 output as (c, h, w): (1, 448) -> (32, 2, 7).
        "wh": params["wh"].reshape(32, 2, 7).astype(jnp.float32),
        "bh": params["bh"].reshape(1, 1).astype(jnp.float32),
    }


def convolutional_regressor_forward(packed, x):
    """x: (N, 3, 40, 80) NCHW float32 -> (N, 1) float32."""
    xc = jnp.transpose(x, (1, 0, 2, 3)).astype(jnp.bfloat16)       # CNHW, bf16, once
    a1 = conv2d_selu(xc, packed["w1"], packed["b1"])               # (16, N, 18, 38)
    a2 = conv2d_selu(a1, packed["w2"], packed["b2"])               # (32, N, 7, 17)
    return conv2d_selu_head(a2, packed["w3"], packed["b3"],
                            packed["wh"], packed["bh"])            # (N, 1)


# ------------------------------ Reference (sanity) ----------------------------
def _reference_forward(params, x):
    def conv(z, w, b, stride):
        out = jax.lax.conv_general_dilated(
            z, w, window_strides=(stride, stride), padding="VALID",
            dimension_numbers=("NCHW", "OIHW", "NCHW"))
        return out + b.reshape(1, -1, 1, 1)
    o = jax.nn.selu(conv(x, params["w1"], params["b1"], 2))
    o = jax.nn.selu(conv(o, params["w2"], params["b2"], 2))
    o = jax.nn.selu(conv(o, params["w3"], params["b3"], 2))
    flat = o.reshape(o.shape[0], -1)
    return flat @ params["wh"].T + params["bh"]


if __name__ == "__main__":
    key = jax.random.PRNGKey(0)
    pkey, xkey = jax.random.split(key)
    params = init_params(pkey)
    packed = pack_params(params)
    # Input spatial size (40, 80) is what makes the flattened feature = 32*2*7 = 448.
    x = jax.random.normal(xkey, (2, 3, 40, 80), dtype=jnp.float32)

    out = jax.jit(convolutional_regressor_forward)(packed, x)
    out = jax.block_until_ready(out)
    assert out.shape == (2, 1), out.shape
    assert out.dtype == jnp.float32, out.dtype

    # Loose tolerance: kernel path uses bf16 matmul operands with f32 accumulation.
    ref = _reference_forward(params, x)
    assert jnp.allclose(out, ref, rtol=1e-1, atol=2e-1), (out, ref)
    print("KERNEL_OK")
</pallas_src>

<mosaic_0001>
module attributes {stable_mosaic.version = 11 : i64} {
  func.func @kernel(%arg0: i32, %arg1: memref<12x896xbf16, #tpu.memory_space<vmem>>, %arg2: memref<12x128xbf16, #tpu.memory_space<vmem>>, %arg3: memref<9x16x12xbf16, #tpu.memory_space<vmem>>, %arg4: memref<16x1xf32, #tpu.memory_space<vmem>>, %arg5: memref<16x896xbf16, #tpu.memory_space<vmem>>) attributes {dimension_semantics = [#tpu.dimension_semantics<parallel>], iteration_bounds = array<i64: 2>, scalar_prefetch = 0 : i64, scratch_operands = 0 : i64, tpu.core_type = #tpu.core_type<tc>, window_params = [{transform_indices = @transform_0, window_bounds = array<i64: 12, 896>}, {transform_indices = @transform_1, window_bounds = array<i64: 12, 128>}, {pipeline_mode = #tpu.pipeline_mode<synchronous>, transform_indices = @transform_2, window_bounds = array<i64: 9, 16, 12>}, {pipeline_mode = #tpu.pipeline_mode<synchronous>, transform_indices = @transform_3, window_bounds = array<i64: 16, 1>}, {transform_indices = @transform_4, window_bounds = array<i64: 16, 896>}]} {
    %c0 = arith.constant 0 : index
    %c0_0 = arith.constant 0 : index
    %0 = vector.load %arg1[%c0, %c0_0] : memref<12x896xbf16, #tpu.memory_space<vmem>>, vector<12x896xbf16>
    %c0_1 = arith.constant 0 : index
    %c0_2 = arith.constant 0 : index
    %1 = vector.load %arg2[%c0_1, %c0_2] : memref<12x128xbf16, #tpu.memory_space<vmem>>, vector<12x128xbf16>
    %2 = tpu.concatenate %0, %1 in 1 : vector<12x896xbf16>, vector<12x128xbf16> -> vector<12x1024xbf16>
    %c0_3 = arith.constant 0 : index
    %c0_4 = arith.constant 0 : index
    %c0_5 = arith.constant 0 : index
    %3 = vector.load %arg3[%c0_3, %c0_4, %c0_5] : memref<9x16x12xbf16, #tpu.memory_space<vmem>>, vector<1x16x12xbf16>
    %4 = vector.shape_cast %3 : vector<1x16x12xbf16> to vector<16x12xbf16>
    %5 = vector.extract_strided_slice %2 {offsets = [0, 0], sizes = [12, 896], strides = [1, 1]} : vector<12x1024xbf16> to vector<12x896xbf16>
    %cst = arith.constant dense<0.000000e+00> : vector<16x896xf32>
    %6 = tpu.matmul %4, %5, %cst {dimension_numbers = #tpu.dot_dimension_numbers<[1], [0], [0], [1], [0, 0, 1, 1], [], []>} : vector<16x12xbf16>, vector<12x896xbf16>, vector<16x896xf32> -> vector<16x896xf32>
    %c1 = arith.constant 1 : index
    %c0_6 = arith.constant 0 : index
    %c0_7 = arith.constant 0 : index
    %7 = vector.load %arg3[%c1, %c0_6, %c0_7] : memref<9x16x12xbf16, #tpu.memory_space<vmem>>, vector<1x16x12xbf16>
    %8 = vector.shape_cast %7 : vector<1x16x12xbf16> to vector<16x12xbf16>
    %9 = vector.extract_strided_slice %2 {offsets = [0, 1], sizes = [12, 896], strides = [1, 1]} : vector<12x1024xbf16> to vector<12x896xbf16>
    %cst_8 = arith.constant dense<0.000000e+00> : vector<16x896xf32>
    %10 = tpu.matmul %8, %9, %cst_8 {dimension_numbers = #tpu.dot_dimension_numbers<[1], [0], [0], [1], [0, 0, 1, 1], [], []>} : vector<16x12xbf16>, vector<12x896xbf16>, vector<16x896xf32> -> vector<16x896xf32>
    %11 = arith.addf %6, %10 : vector<16x896xf32>
    %c2 = arith.constant 2 : index
    %c0_9 = arith.constant 0 : index
    %c0_10 = arith.constant 0 : index
    %12 = vector.load %arg3[%c2, %c0_9, %c0_10] : memref<9x16x12xbf16, #tpu.memory_space<vmem>>, vector<1x16x12xbf16>
    %13 = vector.shape_cast %12 : vector<1x16x12xbf16> to vector<16x12xbf16>
    %14 = vector.extract_strided_slice %2 {offsets = [0, 2], sizes = [12, 896], strides = [1, 1]} : vector<12x1024xbf16> to vector<12x896xbf16>
    %cst_11 = arith.constant dense<0.000000e+00> : vector<16x896xf32>
    %15 = tpu.matmul %13, %14, %cst_11 {dimension_numbers = #tpu.dot_dimension_numbers<[1], [0], [0], [1], [0, 0, 1, 1], [], []>} : vector<16x12xbf16>, vector<12x896xbf16>, vector<16x896xf32> -> vector<16x896xf32>
    %16 = arith.addf %11, %15 : vector<16x896xf32>
    %c3 = arith.constant 3 : index
    %c0_12 = arith.constant 0 : index
    %c0_13 = arith.constant 0 : index
    %17 = vector.load %arg3[%c3, %c0_12, %c0_13] : memref<9x16x12xbf16, #tpu.memory_space<vmem>>, vector<1x16x12xbf16>
    %18 = vector.shape_cast %17 : vector<1x16x12xbf16> to vector<16x12xbf16>
    %19 = vector.extract_strided_slice %2 {offsets = [0, 40], sizes = [12, 896], strides = [1, 1]} : vector<12x1024xbf16> to vector<12x896xbf16>
    %cst_14 = arith.constant dense<0.000000e+00> : vector<16x896xf32>
    %20 = tpu.matmul %18, %19, %cst_14 {dimension_numbers = #tpu.dot_dimension_numbers<[1], [0], [0], [1], [0, 0, 1, 1], [], []>} : vector<16x12xbf16>, vector<12x896xbf16>, vector<16x896xf32> -> vector<16x896xf32>
    %21 = arith.addf %16, %20 : vector<16x896xf32>
    %c4 = arith.constant 4 : index
    %c0_15 = arith.constant 0 : index
    %c0_16 = arith.constant 0 : index
    %22 = vector.load %arg3[%c4, %c0_15, %c0_16] : memref<9x16x12xbf16, #tpu.memory_space<vmem>>, vector<1x16x12xbf16>
    %23 = vector.shape_cast %22 : vector<1x16x12xbf16> to vector<16x12xbf16>
    %24 = vector.extract_strided_slice %2 {offsets = [0, 41], sizes = [12, 896], strides = [1, 1]} : vector<12x1024xbf16> to vector<12x896xbf16>
    %cst_17 = arith.constant dense<0.000000e+00> : vector<16x896xf32>
    %25 = tpu.matmul %23, %24, %cst_17 {dimension_numbers = #tpu.dot_dimension_numbers<[1], [0], [0], [1], [0, 0, 1, 1], [], []>} : vector<16x12xbf16>, vector<12x896xbf16>, vector<16x896xf32> -> vector<16x896xf32>
    %26 = arith.addf %21, %25 : vector<16x896xf32>
    %c5 = arith.constant 5 : index
    %c0_18 = arith.constant 0 : index
    %c0_19 = arith.constant 0 : index
    %27 = vector.load %arg3[%c5, %c0_18, %c0_19] : memref<9x16x12xbf16, #tpu.memory_space<vmem>>, vector<1x16x12xbf16>
    %28 = vector.shape_cast %27 : vector<1x16x12xbf16> to vector<16x12xbf16>
    %29 = vector.extract_strided_slice %2 {offsets = [0, 42], sizes = [12, 896], strides = [1, 1]} : vector<12x1024xbf16> to vector<12x896xbf16>
    %cst_20 = arith.constant dense<0.000000e+00> : vector<16x896xf32>
    %30 = tpu.matmul %28, %29, %cst_20 {dimension_numbers = #tpu.dot_dimension_numbers<[1], [0], [0], [1], [0, 0, 1, 1], [], []>} : vector<16x12xbf16>, vector<12x896xbf16>, vector<16x896xf32> -> vector<16x896xf32>
    %31 = arith.addf %26, %30 : vector<16x896xf32>
    %c6 = arith.constant 6 : index
    %c0_21 = arith.constant 0 : index
    %c0_22 = arith.constant 0 : index
    %32 = vector.load %arg3[%c6, %c0_21, %c0_22] : memref<9x16x12xbf16, #tpu.memory_space<vmem>>, vector<1x16x12xbf16>
    %33 = vector.shape_cast %32 : vector<1x16x12xbf16> to vector<16x12xbf16>
    %34 = vector.extract_strided_slice %2 {offsets = [0, 80], sizes = [12, 896], strides = [1, 1]} : vector<12x1024xbf16> to vector<12x896xbf16>
    %cst_23 = arith.constant dense<0.000000e+00> : vector<16x896xf32>
    %35 = tpu.matmul %33, %34, %cst_23 {dimension_numbers = #tpu.dot_dimension_numbers<[1], [0], [0], [1], [0, 0, 1, 1], [], []>} : vector<16x12xbf16>, vector<12x896xbf16>, vector<16x896xf32> -> vector<16x896xf32>
    %36 = arith.addf %31, %35 : vector<16x896xf32>
    %c7 = arith.constant 7 : index
    %c0_24 = arith.constant 0 : index
    %c0_25 = arith.constant 0 : index
    %37 = vector.load %arg3[%c7, %c0_24, %c0_25] : memref<9x16x12xbf16, #tpu.memory_space<vmem>>, vector<1x16x12xbf16>
    %38 = vector.shape_cast %37 : vector<1x16x12xbf16> to vector<16x12xbf16>
    %39 = vector.extract_strided_slice %2 {offsets = [0, 81], sizes = [12, 896], strides = [1, 1]} : vector<12x1024xbf16> to vector<12x896xbf16>
    %cst_26 = arith.constant dense<0.000000e+00> : vector<16x896xf32>
    %40 = tpu.matmul %38, %39, %cst_26 {dimension_numbers = #tpu.dot_dimension_numbers<[1], [0], [0], [1], [0, 0, 1, 1], [], []>} : vector<16x12xbf16>, vector<12x896xbf16>, vector<16x896xf32> -> vector<16x896xf32>
    %41 = arith.addf %36, %40 : vector<16x896xf32>
    %c8 = arith.constant 8 : index
    %c0_27 = arith.constant 0 : index
    %c0_28 = arith.constant 0 : index
    %42 = vector.load %arg3[%c8, %c0_27, %c0_28] : memref<9x16x12xbf16, #tpu.memory_space<vmem>>, vector<1x16x12xbf16>
    %43 = vector.shape_cast %42 : vector<1x16x12xbf16> to vector<16x12xbf16>
    %44 = vector.extract_strided_slice %2 {offsets = [0, 82], sizes = [12, 896], strides = [1, 1]} : vector<12x1024xbf16> to vector<12x896xbf16>
    %cst_29 = arith.constant dense<0.000000e+00> : vector<16x896xf32>
    %45 = tpu.matmul %43, %44, %cst_29 {dimension_numbers = #tpu.dot_dimension_numbers<[1], [0], [0], [1], [0, 0, 1, 1], [], []>} : vector<16x12xbf16>, vector<12x896xbf16>, vector<16x896xf32> -> vector<16x896xf32>
    %46 = arith.addf %41, %45 : vector<16x896xf32>
    %c0_30 = arith.constant 0 : index
    %c0_31 = arith.constant 0 : index
    %47 = vector.load %arg4[%c0_30, %c0_31] : memref<16x1xf32, #tpu.memory_space<vmem>>, vector<16x1xf32>
    %48 = vector.broadcast %47 : vector<16x1xf32> to vector<16x896xf32>
    %49 = arith.addf %46, %48 : vector<16x896xf32>
    %cst_32 = arith.constant 0.000000e+00 : f32
    %50 = vector.broadcast %cst_32 : f32 to vector<16x896xf32>
    %51 = arith.minimumf %49, %50 : vector<16x896xf32>
    %52 = math.exp %51 : vector<16x896xf32>
    %cst_33 = arith.constant 1.000000e+00 : f32
    %53 = vector.broadcast %cst_33 : f32 to vector<16x896xf32>
    %54 = arith.subf %52, %53 : vector<16x896xf32>
    %cst_34 = arith.constant 1.67326319 : f32
    %55 = vector.broadcast %cst_34 : f32 to vector<16x896xf32>
    %56 = arith.mulf %55, %54 : vector<16x896xf32>
    %cst_35 = arith.constant 0.000000e+00 : f32
    %57 = vector.broadcast %cst_35 : f32 to vector<16x896xf32>
    %58 = arith.cmpf ogt, %49, %57 : vector<16x896xf32>
    %59 = arith.select %58, %49, %56 : vector<16x896xi1>, vector<16x896xf32>
    %cst_36 = arith.constant 1.05070102 : f32
    %60 = vector.broadcast %cst_36 : f32 to vector<16x896xf32>
    %61 = arith.mulf %60, %59 : vector<16x896xf32>
    %62 = arith.truncf %61 : vector<16x896xf32> to vector<16x896xbf16>
    %c0_37 = arith.constant 0 : index
    %c0_38 = arith.constant 0 : index
    %63 = vector.load %arg5[%c0_37, %c0_38] : memref<16x896xbf16, #tpu.memory_space<vmem>>, vector<16x896xbf16>
    tpu.vector_store %arg5[%c0_37, %c0_38], %62 {strides = array<i32>} : memref<16x896xbf16, #tpu.memory_space<vmem>>, vector<16x896xbf16>,
    return
  }
  func.func @transform_0(%arg0: i32) -> (i32, i32) {
    %c0_i32 = arith.constant 0 : i32
    %c0_i32_0 = arith.constant 0 : i32
    return %c0_i32, %arg0 : i32, i32
  }
  func.func @transform_1(%arg0: i32) -> (i32, i32) {
    %c1_i32 = arith.constant 1 : i32
    %0 = arith.addi %arg0, %c1_i32 : i32
    %c7_i32 = arith.constant 7 : i32
    %1 = arith.muli %0, %c7_i32 : i32
    %c0_i32 = arith.constant 0 : i32
    %c0_i32_0 = arith.constant 0 : i32
    return %c0_i32, %1 : i32, i32
  }
  func.func @transform_2(%arg0: i32) -> (i32, i32, i32) {
    %c0_i32 = arith.constant 0 : i32
    %c0_i32_0 = arith.constant 0 : i32
    %c0_i32_1 = arith.constant 0 : i32
    %c0_i32_2 = arith.constant 0 : i32
    return %c0_i32, %c0_i32_0, %c0_i32_1 : i32, i32, i32
  }
  func.func @transform_3(%arg0: i32) -> (i32, i32) {
    %c0_i32 = arith.constant 0 : i32
    %c0_i32_0 = arith.constant 0 : i32
    %c0_i32_1 = arith.constant 0 : i32
    return %c0_i32, %c0_i32_0 : i32, i32
  }
  func.func @transform_4(%arg0: i32) -> (i32, i32) {
    %c0_i32 = arith.constant 0 : i32
    %c0_i32_0 = arith.constant 0 : i32
    return %c0_i32, %arg0 : i32, i32
  }
}

module attributes {stable_mosaic.version = 11 : i64} {
  func.func @kernel(%arg0: i32, %arg1: memref<64x256xbf16, #tpu.memory_space<vmem>>, %arg2: memref<64x128xbf16, #tpu.memory_space<vmem>>, %arg3: memref<9x32x64xbf16, #tpu.memory_space<vmem>>, %arg4: memref<32x1xf32, #tpu.memory_space<vmem>>, %arg5: memref<32x256xbf16, #tpu.memory_space<vmem>>) attributes {dimension_semantics = [#tpu.dimension_semantics<parallel>], iteration_bounds = array<i64: 2>, scalar_prefetch = 0 : i64, scratch_operands = 0 : i64, tpu.core_type = #tpu.core_type<tc>, window_params = [{transform_indices = @transform_0, window_bounds = array<i64: 64, 256>}, {transform_indices = @transform_1, window_bounds = array<i64: 64, 128>}, {pipeline_mode = #tpu.pipeline_mode<synchronous>, transform_indices = @transform_2, window_bounds = array<i64: 9, 32, 64>}, {pipeline_mode = #tpu.pipeline_mode<synchronous>, transform_indices = @transform_3, window_bounds = array<i64: 32, 1>}, {transform_indices = @transform_4, window_bounds = array<i64: 32, 256>}]} {
    %c0 = arith.constant 0 : index
    %c0_0 = arith.constant 0 : index
    %0 = vector.load %arg1[%c0, %c0_0] : memref<64x256xbf16, #tpu.memory_space<vmem>>, vector<64x256xbf16>
    %c0_1 = arith.constant 0 : index
    %c0_2 = arith.constant 0 : index
    %1 = vector.load %arg2[%c0_1, %c0_2] : memref<64x128xbf16, #tpu.memory_space<vmem>>, vector<64x128xbf16>
    %2 = tpu.concatenate %0, %1 in 1 : vector<64x256xbf16>, vector<64x128xbf16> -> vector<64x384xbf16>
    %c0_3 = arith.constant 0 : index
    %c0_4 = arith.constant 0 : index
    %c0_5 = arith.constant 0 : index
    %3 = vector.load %arg3[%c0_3, %c0_4, %c0_5] : memref<9x32x64xbf16, #tpu.memory_space<vmem>>, vector<1x32x64xbf16>
    %4 = vector.shape_cast %3 : vector<1x32x64xbf16> to vector<32x64xbf16>
    %5 = vector.extract_strided_slice %2 {offsets = [0, 0], sizes = [64, 256], strides = [1, 1]} : vector<64x384xbf16> to vector<64x256xbf16>
    %cst = arith.constant dense<0.000000e+00> : vector<32x256xf32>
    %6 = tpu.matmul %4, %5, %cst {dimension_numbers = #tpu.dot_dimension_numbers<[1], [0], [0], [1], [0, 0, 1, 1], [], []>} : vector<32x64xbf16>, vector<64x256xbf16>, vector<32x256xf32> -> vector<32x256xf32>
    %c1 = arith.constant 1 : index
    %c0_6 = arith.constant 0 : index
    %c0_7 = arith.constant 0 : index
    %7 = vector.load %arg3[%c1, %c0_6, %c0_7] : memref<9x32x64xbf16, #tpu.memory_space<vmem>>, vector<1x32x64xbf16>
    %8 = vector.shape_cast %7 : vector<1x32x64xbf16> to vector<32x64xbf16>
    %9 = vector.extract_strided_slice %2 {offsets = [0, 1], sizes = [64, 256], strides = [1, 1]} : vector<64x384xbf16> to vector<64x256xbf16>
    %cst_8 = arith.constant dense<0.000000e+00> : vector<32x256xf32>
    %10 = tpu.matmul %8, %9, %cst_8 {dimension_numbers = #tpu.dot_dimension_numbers<[1], [0], [0], [1], [0, 0, 1, 1], [], []>} : vector<32x64xbf16>, vector<64x256xbf16>, vector<32x256xf32> -> vector<32x256xf32>
    %11 = arith.addf %6, %10 : vector<32x256xf32>
    %c2 = arith.constant 2 : index
    %c0_9 = arith.constant 0 : index
    %c0_10 = arith.constant 0 : index
    %12 = vector.load %arg3[%c2, %c0_9, %c0_10] : memref<9x32x64xbf16, #tpu.memory_space<vmem>>, vector<1x32x64xbf16>
    %13 = vector.shape_cast %12 : vector<1x32x64xbf16> to vector<32x64xbf16>
    %14 = vector.extract_strided_slice %2 {offsets = [0, 2], sizes = [64, 256], strides = [1, 1]} : vector<64x384xbf16> to vector<64x256xbf16>
    %cst_11 = arith.constant dense<0.000000e+00> : vector<32x256xf32>
    %15 = tpu.matmul %13, %14, %cst_11 {dimension_numbers = #tpu.dot_dimension_numbers<[1], [0], [0], [1], [0, 0, 1, 1], [], []>} : vector<32x64xbf16>, vector<64x256xbf16>, vector<32x256xf32> -> vector<32x256xf32>
    %16 = arith.addf %11, %15 : vector<32x256xf32>
    %c3 = arith.constant 3 : index
    %c0_12 = arith.constant 0 : index
    %c0_13 = arith.constant 0 : index
    %17 = vector.load %arg3[%c3, %c0_12, %c0_13] : memref<9x32x64xbf16, #tpu.memory_space<vmem>>, vector<1x32x64xbf16>
    %18 = vector.shape_cast %17 : vector<1x32x64xbf16> to vector<32x64xbf16>
    %19 = vector.extract_strided_slice %2 {offsets = [0, 19], sizes = [64, 256], strides = [1, 1]} : vector<64x384xbf16> to vector<64x256xbf16>
    %cst_14 = arith.constant dense<0.000000e+00> : vector<32x256xf32>
    %20 = tpu.matmul %18, %19, %cst_14 {dimension_numbers = #tpu.dot_dimension_numbers<[1], [0], [0], [1], [0, 0, 1, 1], [], []>} : vector<32x64xbf16>, vector<64x256xbf16>, vector<32x256xf32> -> vector<32x256xf32>
    %21 = arith.addf %16, %20 : vector<32x256xf32>
    %c4 = arith.constant 4 : index
    %c0_15 = arith.constant 0 : index
    %c0_16 = arith.constant 0 : index
    %22 = vector.load %arg3[%c4, %c0_15, %c0_16] : memref<9x32x64xbf16, #tpu.memory_space<vmem>>, vector<1x32x64xbf16>
    %23 = vector.shape_cast %22 : vector<1x32x64xbf16> to vector<32x64xbf16>
    %24 = vector.extract_strided_slice %2 {offsets = [0, 20], sizes = [64, 256], strides = [1, 1]} : vector<64x384xbf16> to vector<64x256xbf16>
    %cst_17 = arith.constant dense<0.000000e+00> : vector<32x256xf32>
    %25 = tpu.matmul %23, %24, %cst_17 {dimension_numbers = #tpu.dot_dimension_numbers<[1], [0], [0], [1], [0, 0, 1, 1], [], []>} : vector<32x64xbf16>, vector<64x256xbf16>, vector<32x256xf32> -> vector<32x256xf32>
    %26 = arith.addf %21, %25 : vector<32x256xf32>
    %c5 = arith.constant 5 : index
    %c0_18 = arith.constant 0 : index
    %c0_19 = arith.constant 0 : index
    %27 = vector.load %arg3[%c5, %c0_18, %c0_19] : memref<9x32x64xbf16, #tpu.memory_space<vmem>>, vector<1x32x64xbf16>
    %28 = vector.shape_cast %27 : vector<1x32x64xbf16> to vector<32x64xbf16>
    %29 = vector.extract_strided_slice %2 {offsets = [0, 21], sizes = [64, 256], strides = [1, 1]} : vector<64x384xbf16> to vector<64x256xbf16>
    %cst_20 = arith.constant dense<0.000000e+00> : vector<32x256xf32>
    %30 = tpu.matmul %28, %29, %cst_20 {dimension_numbers = #tpu.dot_dimension_numbers<[1], [0], [0], [1], [0, 0, 1, 1], [], []>} : vector<32x64xbf16>, vector<64x256xbf16>, vector<32x256xf32> -> vector<32x256xf32>
    %31 = arith.addf %26, %30 : vector<32x256xf32>
    %c6 = arith.constant 6 : index
    %c0_21 = arith.constant 0 : index
    %c0_22 = arith.constant 0 : index
    %32 = vector.load %arg3[%c6, %c0_21, %c0_22] : memref<9x32x64xbf16, #tpu.memory_space<vmem>>, vector<1x32x64xbf16>
    %33 = vector.shape_cast %32 : vector<1x32x64xbf16> to vector<32x64xbf16>
    %34 = vector.extract_strided_slice %2 {offsets = [0, 38], sizes = [64, 256], strides = [1, 1]} : vector<64x384xbf16> to vector<64x256xbf16>
    %cst_23 = arith.constant dense<0.000000e+00> : vector<32x256xf32>
    %35 = tpu.matmul %33, %34, %cst_23 {dimension_numbers = #tpu.dot_dimension_numbers<[1], [0], [0], [1], [0, 0, 1, 1], [], []>} : vector<32x64xbf16>, vector<64x256xbf16>, vector<32x256xf32> -> vector<32x256xf32>
    %36 = arith.addf %31, %35 : vector<32x256xf32>
    %c7 = arith.constant 7 : index
    %c0_24 = arith.constant 0 : index
    %c0_25 = arith.constant 0 : index
    %37 = vector.load %arg3[%c7, %c0_24, %c0_25] : memref<9x32x64xbf16, #tpu.memory_space<vmem>>, vector<1x32x64xbf16>
    %38 = vector.shape_cast %37 : vector<1x32x64xbf16> to vector<32x64xbf16>
    %39 = vector.extract_strided_slice %2 {offsets = [0, 39], sizes = [64, 256], strides = [1, 1]} : vector<64x384xbf16> to vector<64x256xbf16>
    %cst_26 = arith.constant dense<0.000000e+00> : vector<32x256xf32>
    %40 = tpu.matmul %38, %39, %cst_26 {dimension_numbers = #tpu.dot_dimension_numbers<[1], [0], [0], [1], [0, 0, 1, 1], [], []>} : vector<32x64xbf16>, vector<64x256xbf16>, vector<32x256xf32> -> vector<32x256xf32>
    %41 = arith.addf %36, %40 : vector<32x256xf32>
    %c8 = arith.constant 8 : index
    %c0_27 = arith.constant 0 : index
    %c0_28 = arith.constant 0 : index
    %42 = vector.load %arg3[%c8, %c0_27, %c0_28] : memref<9x32x64xbf16, #tpu.memory_space<vmem>>, vector<1x32x64xbf16>
    %43 = vector.shape_cast %42 : vector<1x32x64xbf16> to vector<32x64xbf16>
    %44 = vector.extract_strided_slice %2 {offsets = [0, 40], sizes = [64, 256], strides = [1, 1]} : vector<64x384xbf16> to vector<64x256xbf16>
    %cst_29 = arith.constant dense<0.000000e+00> : vector<32x256xf32>
    %45 = tpu.matmul %43, %44, %cst_29 {dimension_numbers = #tpu.dot_dimension_numbers<[1], [0], [0], [1], [0, 0, 1, 1], [], []>} : vector<32x64xbf16>, vector<64x256xbf16>, vector<32x256xf32> -> vector<32x256xf32>
    %46 = arith.addf %41, %45 : vector<32x256xf32>
    %c0_30 = arith.constant 0 : index
    %c0_31 = arith.constant 0 : index
    %47 = vector.load %arg4[%c0_30, %c0_31] : memref<32x1xf32, #tpu.memory_space<vmem>>, vector<32x1xf32>
    %48 = vector.broadcast %47 : vector<32x1xf32> to vector<32x256xf32>
    %49 = arith.addf %46, %48 : vector<32x256xf32>
    %cst_32 = arith.constant 0.000000e+00 : f32
    %50 = vector.broadcast %cst_32 : f32 to vector<32x256xf32>
    %51 = arith.minimumf %49, %50 : vector<32x256xf32>
    %52 = math.exp %51 : vector<32x256xf32>
    %cst_33 = arith.constant 1.000000e+00 : f32
    %53 = vector.broadcast %cst_33 : f32 to vector<32x256xf32>
    %54 = arith.subf %52, %53 : vector<32x256xf32>
    %cst_34 = arith.constant 1.67326319 : f32
    %55 = vector.broadcast %cst_34 : f32 to vector<32x256xf32>
    %56 = arith.mulf %55, %54 : vector<32x256xf32>
    %cst_35 = arith.constant 0.000000e+00 : f32
    %57 = vector.broadcast %cst_35 : f32 to vector<32x256xf32>
    %58 = arith.cmpf ogt, %49, %57 : vector<32x256xf32>
    %59 = arith.select %58, %49, %56 : vector<32x256xi1>, vector<32x256xf32>
    %cst_36 = arith.constant 1.05070102 : f32
    %60 = vector.broadcast %cst_36 : f32 to vector<32x256xf32>
    %61 = arith.mulf %60, %59 : vector<32x256xf32>
    %62 = arith.truncf %61 : vector<32x256xf32> to vector<32x256xbf16>
    %c0_37 = arith.constant 0 : index
    %c0_38 = arith.constant 0 : index
    %63 = vector.load %arg5[%c0_37, %c0_38] : memref<32x256xbf16, #tpu.memory_space<vmem>>, vector<32x256xbf16>
    tpu.vector_store %arg5[%c0_37, %c0_38], %62 {strides = array<i32>} : memref<32x256xbf16, #tpu.memory_space<vmem>>, vector<32x256xbf16>,
    return
  }
  func.func @transform_0(%arg0: i32) -> (i32, i32) {
    %c0_i32 = arith.constant 0 : i32
    %c0_i32_0 = arith.constant 0 : i32
    return %c0_i32, %arg0 : i32, i32
  }
  func.func @transform_1(%arg0: i32) -> (i32, i32) {
    %c1_i32 = arith.constant 1 : i32
    %0 = arith.addi %arg0, %c1_i32 : i32
    %c2_i32 = arith.constant 2 : i32
    %1 = arith.muli %0, %c2_i32 : i32
    %c0_i32 = arith.constant 0 : i32
    %c0_i32_0 = arith.constant 0 : i32
    return %c0_i32, %1 : i32, i32
  }
  func.func @transform_2(%arg0: i32) -> (i32, i32, i32) {
    %c0_i32 = arith.constant 0 : i32
    %c0_i32_0 = arith.constant 0 : i32
    %c0_i32_1 = arith.constant 0 : i32
    %c0_i32_2 = arith.constant 0 : i32
    return %c0_i32, %c0_i32_0, %c0_i32_1 : i32, i32, i32
  }
  func.func @transform_3(%arg0: i32) -> (i32, i32) {
    %c0_i32 = arith.constant 0 : i32
    %c0_i32_0 = arith.constant 0 : i32
    %c0_i32_1 = arith.constant 0 : i32
    return %c0_i32, %c0_i32_0 : i32, i32
  }
  func.func @transform_4(%arg0: i32) -> (i32, i32) {
    %c0_i32 = arith.constant 0 : i32
    %c0_i32_0 = arith.constant 0 : i32
    return %c0_i32, %arg0 : i32, i32
  }
}

module attributes {stable_mosaic.version = 11 : i64} {
  func.func @kernel(%arg0: i32, %arg1: memref<128x1152xbf16, #tpu.memory_space<vmem>>, %arg2: memref<128x128xbf16, #tpu.memory_space<vmem>>, %arg3: memref<9x32x128xbf16, #tpu.memory_space<vmem>>, %arg4: memref<32x1xf32, #tpu.memory_space<vmem>>, %arg5: memref<32x1152xbf16, #tpu.memory_space<vmem>>, %arg6: memref<1152x32xbf16, #tpu.memory_space<vmem>>, %arg7: memref<1x1xf32, #tpu.memory_space<vmem>>, %arg8: memref<1x32xf32, #tpu.memory_space<vmem>>) attributes {dimension_semantics = [#tpu.dimension_semantics<parallel>], iteration_bounds = array<i64: 1>, scalar_prefetch = 0 : i64, scratch_operands = 0 : i64, tpu.core_type = #tpu.core_type<tc>, window_params = [{transform_indices = @transform_0, window_bounds = array<i64: 128, 1152>}, {transform_indices = @transform_1, window_bounds = array<i64: 128, 128>}, {pipeline_mode = #tpu.pipeline_mode<synchronous>, transform_indices = @transform_2, window_bounds = array<i64: 9, 32, 128>}, {pipeline_mode = #tpu.pipeline_mode<synchronous>, transform_indices = @transform_3, window_bounds = array<i64: 32, 1>}, {pipeline_mode = #tpu.pipeline_mode<synchronous>, transform_indices = @transform_4, window_bounds = array<i64: 32, 1152>}, {pipeline_mode = #tpu.pipeline_mode<synchronous>, transform_indices = @transform_5, window_bounds = array<i64: 1152, 32>}, {pipeline_mode = #tpu.pipeline_mode<synchronous>, transform_indices = @transform_6, window_bounds = array<i64: 1, 1>}, {transform_indices = @transform_7, window_bounds = array<i64: 1, 32>}]} {
    %c0 = arith.constant 0 : index
    %c0_0 = arith.constant 0 : index
    %0 = vector.load %arg1[%c0, %c0_0] : memref<128x1152xbf16, #tpu.memory_space<vmem>>, vector<128x1152xbf16>
    %c0_1 = arith.constant 0 : index
    %c0_2 = arith.constant 0 : index
    %1 = vector.load %arg2[%c0_1, %c0_2] : memref<128x128xbf16, #tpu.memory_space<vmem>>, vector<128x128xbf16>
    %2 = tpu.concatenate %0, %1 in 1 : vector<128x1152xbf16>, vector<128x128xbf16> -> vector<128x1280xbf16>
    %c0_3 = arith.constant 0 : index
    %c0_4 = arith.constant 0 : index
    %c0_5 = arith.constant 0 : index
    %3 = vector.load %arg3[%c0_3, %c0_4, %c0_5] : memref<9x32x128xbf16, #tpu.memory_space<vmem>>, vector<1x32x128xbf16>
    %4 = vector.shape_cast %3 : vector<1x32x128xbf16> to vector<32x128xbf16>
    %5 = vector.extract_strided_slice %2 {offsets = [0, 0], sizes = [128, 1152], strides = [1, 1]} : vector<128x1280xbf16> to vector<128x1152xbf16>
    %cst = arith.constant dense<0.000000e+00> : vector<32x1152xf32>
    %6 = tpu.matmul %4, %5, %cst {dimension_numbers = #tpu.dot_dimension_numbers<[1], [0], [0], [1], [0, 0, 1, 1], [], []>} : vector<32x128xbf16>, vector<128x1152xbf16>, vector<32x1152xf32> -> vector<32x1152xf32>
    %c1 = arith.constant 1 : index
    %c0_6 = arith.constant 0 : index
    %c0_7 = arith.constant 0 : index
    %7 = vector.load %arg3[%c1, %c0_6, %c0_7] : memref<9x32x128xbf16, #tpu.memory_space<vmem>>, vector<1x32x128xbf16>
    %8 = vector.shape_cast %7 : vector<1x32x128xbf16> to vector<32x128xbf16>
    %9 = vector.extract_strided_slice %2 {offsets = [0, 1], sizes = [128, 1152], strides = [1, 1]} : vector<128x1280xbf16> to vector<128x1152xbf16>
    %cst_8 = arith.constant dense<0.000000e+00> : vector<32x1152xf32>
    %10 = tpu.matmul %8, %9, %cst_8 {dimension_numbers = #tpu.dot_dimension_numbers<[1], [0], [0], [1], [0, 0, 1, 1], [], []>} : vector<32x128xbf16>, vector<128x1152xbf16>, vector<32x1152xf32> -> vector<32x1152xf32>
    %11 = arith.addf %6, %10 : vector<32x1152xf32>
    %c2 = arith.constant 2 : index
    %c0_9 = arith.constant 0 : index
    %c0_10 = arith.constant 0 : index
    %12 = vector.load %arg3[%c2, %c0_9, %c0_10] : memref<9x32x128xbf16, #tpu.memory_space<vmem>>, vector<1x32x128xbf16>
    %13 = vector.shape_cast %12 : vector<1x32x128xbf16> to vector<32x128xbf16>
    %14 = vector.extract_strided_slice %2 {offsets = [0, 2], sizes = [128, 1152], strides = [1, 1]} : vector<128x1280xbf16> to vector<128x1152xbf16>
    %cst_11 = arith.constant dense<0.000000e+00> : vector<32x1152xf32>
    %15 = tpu.matmul %13, %14, %cst_11 {dimension_numbers = #tpu.dot_dimension_numbers<[1], [0], [0], [1], [0, 0, 1, 1], [], []>} : vector<32x128xbf16>, vector<128x1152xbf16>, vector<32x1152xf32> -> vector<32x1152xf32>
    %16 = arith.addf %11, %15 : vector<32x1152xf32>
    %c3 = arith.constant 3 : index
    %c0_12 = arith.constant 0 : index
    %c0_13 = arith.constant 0 : index
    %17 = vector.load %arg3[%c3, %c0_12, %c0_13] : memref<9x32x128xbf16, #tpu.memory_space<vmem>>, vector<1x32x128xbf16>
    %18 = vector.shape_cast %17 : vector<1x32x128xbf16> to vector<32x128xbf16>
    %19 = vector.extract_strided_slice %2 {offsets = [0, 9], sizes = [128, 1152], strides = [1, 1]} : vector<128x1280xbf16> to vector<128x1152xbf16>
    %cst_14 = arith.constant dense<0.000000e+00> : vector<32x1152xf32>
    %20 = tpu.matmul %18, %19, %cst_14 {dimension_numbers = #tpu.dot_dimension_numbers<[1], [0], [0], [1], [0, 0, 1, 1], [], []>} : vector<32x128xbf16>, vector<128x1152xbf16>, vector<32x1152xf32> -> vector<32x1152xf32>
    %21 = arith.addf %16, %20 : vector<32x1152xf32>
    %c4 = arith.constant 4 : index
    %c0_15 = arith.constant 0 : index
    %c0_16 = arith.constant 0 : index
    %22 = vector.load %arg3[%c4, %c0_15, %c0_16] : memref<9x32x128xbf16, #tpu.memory_space<vmem>>, vector<1x32x128xbf16>
    %23 = vector.shape_cast %22 : vector<1x32x128xbf16> to vector<32x128xbf16>
    %24 = vector.extract_strided_slice %2 {offsets = [0, 10], sizes = [128, 1152], strides = [1, 1]} : vector<128x1280xbf16> to vector<128x1152xbf16>
    %cst_17 = arith.constant dense<0.000000e+00> : vector<32x1152xf32>
    %25 = tpu.matmul %23, %24, %cst_17 {dimension_numbers = #tpu.dot_dimension_numbers<[1], [0], [0], [1], [0, 0, 1, 1], [], []>} : vector<32x128xbf16>, vector<128x1152xbf16>, vector<32x1152xf32> -> vector<32x1152xf32>
    %26 = arith.addf %21, %25 : vector<32x1152xf32>
    %c5 = arith.constant 5 : index
    %c0_18 = arith.constant 0 : index
    %c0_19 = arith.constant 0 : index
    %27 = vector.load %arg3[%c5, %c0_18, %c0_19] : memref<9x32x128xbf16, #tpu.memory_space<vmem>>, vector<1x32x128xbf16>
    %28 = vector.shape_cast %27 : vector<1x32x128xbf16> to vector<32x128xbf16>
    %29 = vector.extract_strided_slice %2 {offsets = [0, 11], sizes = [128, 1152], strides = [1, 1]} : vector<128x1280xbf16> to vector<128x1152xbf16>
    %cst_20 = arith.constant dense<0.000000e+00> : vector<32x1152xf32>
    %30 = tpu.matmul %28, %29, %cst_20 {dimension_numbers = #tpu.dot_dimension_numbers<[1], [0], [0], [1], [0, 0, 1, 1], [], []>} : vector<32x128xbf16>, vector<128x1152xbf16>, vector<32x1152xf32> -> vector<32x1152xf32>
    %31 = arith.addf %26, %30 : vector<32x1152xf32>
    %c6 = arith.constant 6 : index
    %c0_21 = arith.constant 0 : index
    %c0_22 = arith.constant 0 : index
    %32 = vector.load %arg3[%c6, %c0_21, %c0_22] : memref<9x32x128xbf16, #tpu.memory_space<vmem>>, vector<1x32x128xbf16>
    %33 = vector.shape_cast %32 : vector<1x32x128xbf16> to vector<32x128xbf16>
    %34 = vector.extract_strided_slice %2 {offsets = [0, 18], sizes = [128, 1152], strides = [1, 1]} : vector<128x1280xbf16> to vector<128x1152xbf16>
    %cst_23 = arith.constant dense<0.000000e+00> : vector<32x1152xf32>
    %35 = tpu.matmul %33, %34, %cst_23 {dimension_numbers = #tpu.dot_dimension_numbers<[1], [0], [0], [1], [0, 0, 1, 1], [], []>} : vector<32x128xbf16>, vector<128x1152xbf16>, vector<32x1152xf32> -> vector<32x1152xf32>
    %36 = arith.addf %31, %35 : vector<32x1152xf32>
    %c7 = arith.constant 7 : index
    %c0_24 = arith.constant 0 : index
    %c0_25 = arith.constant 0 : index
    %37 = vector.load %arg3[%c7, %c0_24, %c0_25] : memref<9x32x128xbf16, #tpu.memory_space<vmem>>, vector<1x32x128xbf16>
    %38 = vector.shape_cast %37 : vector<1x32x128xbf16> to vector<32x128xbf16>
    %39 = vector.extract_strided_slice %2 {offsets = [0, 19], sizes = [128, 1152], strides = [1, 1]} : vector<128x1280xbf16> to vector<128x1152xbf16>
    %cst_26 = arith.constant dense<0.000000e+00> : vector<32x1152xf32>
    %40 = tpu.matmul %38, %39, %cst_26 {dimension_numbers = #tpu.dot_dimension_numbers<[1], [0], [0], [1], [0, 0, 1, 1], [], []>} : vector<32x128xbf16>, vector<128x1152xbf16>, vector<32x1152xf32> -> vector<32x1152xf32>
    %41 = arith.addf %36, %40 : vector<32x1152xf32>
    %c8 = arith.constant 8 : index
    %c0_27 = arith.constant 0 : index
    %c0_28 = arith.constant 0 : index
    %42 = vector.load %arg3[%c8, %c0_27, %c0_28] : memref<9x32x128xbf16, #tpu.memory_space<vmem>>, vector<1x32x128xbf16>
    %43 = vector.shape_cast %42 : vector<1x32x128xbf16> to vector<32x128xbf16>
    %44 = vector.extract_strided_slice %2 {offsets = [0, 20], sizes = [128, 1152], strides = [1, 1]} : vector<128x1280xbf16> to vector<128x1152xbf16>
    %cst_29 = arith.constant dense<0.000000e+00> : vector<32x1152xf32>
    %45 = tpu.matmul %43, %44, %cst_29 {dimension_numbers = #tpu.dot_dimension_numbers<[1], [0], [0], [1], [0, 0, 1, 1], [], []>} : vector<32x128xbf16>, vector<128x1152xbf16>, vector<32x1152xf32> -> vector<32x1152xf32>
    %46 = arith.addf %41, %45 : vector<32x1152xf32>
    %c0_30 = arith.constant 0 : index
    %c0_31 = arith.constant 0 : index
    %47 = vector.load %arg4[%c0_30, %c0_31] : memref<32x1xf32, #tpu.memory_space<vmem>>, vector<32x1xf32>
    %48 = vector.broadcast %47 : vector<32x1xf32> to vector<32x1152xf32>
    %49 = arith.addf %46, %48 : vector<32x1152xf32>
    %cst_32 = arith.constant 0.000000e+00 : f32
    %50 = vector.broadcast %cst_32 : f32 to vector<32x1152xf32>
    %51 = arith.minimumf %49, %50 : vector<32x1152xf32>
    %52 = math.exp %51 : vector<32x1152xf32>
    %cst_33 = arith.constant 1.000000e+00 : f32
    %53 = vector.broadcast %cst_33 : f32 to vector<32x1152xf32>
    %54 = arith.subf %52, %53 : vector<32x1152xf32>
    %cst_34 = arith.constant 1.67326319 : f32
    %55 = vector.broadcast %cst_34 : f32 to vector<32x1152xf32>
    %56 = arith.mulf %55, %54 : vector<32x1152xf32>
    %cst_35 = arith.constant 0.000000e+00 : f32
    %57 = vector.broadcast %cst_35 : f32 to vector<32x1152xf32>
    %58 = arith.cmpf ogt, %49, %57 : vector<32x1152xf32>
    %59 = arith.select %58, %49, %56 : vector<32x1152xi1>, vector<32x1152xf32>
    %cst_36 = arith.constant 1.05070102 : f32
    %60 = vector.broadcast %cst_36 : f32 to vector<32x1152xf32>
    %61 = arith.mulf %60, %59 : vector<32x1152xf32>
    %c0_37 = arith.constant 0 : index
    %c0_38 = arith.constant 0 : index
    %62 = vector.load %arg5[%c0_37, %c0_38] : memref<32x1152xbf16, #tpu.memory_space<vmem>>, vector<32x1152xbf16>
    %63 = arith.extf %62 : vector<32x1152xbf16> to vector<32x1152xf32>
    %64 = arith.mulf %61, %63 : vector<32x1152xf32>
    %cst_39 = arith.constant dense<0.000000e+00> : vector<1152xf32>
    %65 = vector.multi_reduction <add>, %64, %cst_39 [0] : vector<32x1152xf32> to vector<1152xf32>
    %66 = vector.shape_cast %65 : vector<1152xf32> to vector<1x1152xf32>
    %67 = arith.truncf %66 : vector<1x1152xf32> to vector<1x1152xbf16>
    %c0_40 = arith.constant 0 : index
    %c0_41 = arith.constant 0 : index
    %68 = vector.load %arg6[%c0_40, %c0_41] : memref<1152x32xbf16, #tpu.memory_space<vmem>>, vector<1152x32xbf16>
    %cst_42 = arith.constant dense<0.000000e+00> : vector<1x32xf32>
    %69 = tpu.matmul %67, %68, %cst_42 {dimension_numbers = #tpu.dot_dimension_numbers<[1], [0], [0], [1], [0, 0, 1, 1], [], []>} : vector<1x1152xbf16>, vector<1152x32xbf16>, vector<1x32xf32> -> vector<1x32xf32>
    %c0_43 = arith.constant 0 : index
    %c0_44 = arith.constant 0 : index
    %70 = vector.load %arg7[%c0_43, %c0_44] : memref<1x1xf32, #tpu.memory_space<vmem>>, vector<1x1xf32>
    %71 = vector.broadcast %70 : vector<1x1xf32> to vector<1x32xf32>
    %72 = arith.addf %69, %71 : vector<1x32xf32>
    %c0_45 = arith.constant 0 : index
    %c0_46 = arith.constant 0 : index
    %73 = vector.load %arg8[%c0_45, %c0_46] : memref<1x32xf32, #tpu.memory_space<vmem>>, vector<1x32xf32>
    tpu.vector_store %arg8[%c0_45, %c0_46], %72 {strides = array<i32>} : memref<1x32xf32, #tpu.memory_space<vmem>>, vector<1x32xf32>,
    return
  }
  func.func @transform_0(%arg0: i32) -> (i32, i32) {
    %c0_i32 = arith.constant 0 : i32
    %c0_i32_0 = arith.constant 0 : i32
    return %c0_i32, %arg0 : i32, i32
  }
  func.func @transform_1(%arg0: i32) -> (i32, i32) {
    %c1_i32 = arith.constant 1 : i32
    %0 = arith.addi %arg0, %c1_i32 : i32
    %c9_i32 = arith.constant 9 : i32
    %1 = arith.muli %0, %c9_i32 : i32
    %c0_i32 = arith.constant 0 : i32
    %c0_i32_0 = arith.constant 0 : i32
    return %c0_i32, %1 : i32, i32
  }
  func.func @transform_2(%arg0: i32) -> (i32, i32, i32) {
    %c0_i32 = arith.constant 0 : i32
    %c0_i32_0 = arith.constant 0 : i32
    %c0_i32_1 = arith.constant 0 : i32
    %c0_i32_2 = arith.constant 0 : i32
    return %c0_i32, %c0_i32_0, %c0_i32_1 : i32, i32, i32
  }
  func.func @transform_3(%arg0: i32) -> (i32, i32) {
    %c0_i32 = arith.constant 0 : i32
    %c0_i32_0 = arith.constant 0 : i32
    %c0_i32_1 = arith.constant 0 : i32
    return %c0_i32, %c0_i32_0 : i32, i32
  }
  func.func @transform_4(%arg0: i32) -> (i32, i32) {
    %c0_i32 = arith.constant 0 : i32
    %c0_i32_0 = arith.constant 0 : i32
    %c0_i32_1 = arith.constant 0 : i32
    return %c0_i32, %c0_i32_0 : i32, i32
  }
  func.func @transform_5(%arg0: i32) -> (i32, i32) {
    %c0_i32 = arith.constant 0 : i32
    %c0_i32_0 = arith.constant 0 : i32
    %c0_i32_1 = arith.constant 0 : i32
    return %c0_i32, %c0_i32_0 : i32, i32
  }
  func.func @transform_6(%arg0: i32) -> (i32, i32) {
    %c0_i32 = arith.constant 0 : i32
    %c0_i32_0 = arith.constant 0 : i32
    %c0_i32_1 = arith.constant 0 : i32
    return %c0_i32, %c0_i32_0 : i32, i32
  }
  func.func @transform_7(%arg0: i32) -> (i32, i32) {
    %c0_i32 = arith.constant 0 : i32
    %c0_i32_0 = arith.constant 0 : i32
    return %c0_i32, %arg0 : i32, i32
  }
}

</mosaic_0001>

<bundles_post_ra>
// kernel: convolutional_regressor_forward.3
= control target key start
LH: loop header
LB: loop body
LE: loop exit
PB: predicated region body
PF: predicated region fallthrough
CT: control target
= control target key end

     0   :  { %s4997_s0 = inlined_call_operand.vmem [shape: bf16[12,1920], index: 0, kind: input, shape index: {}, may-alias: {0,1}]   ;;  %s4998_s1 = inlined_call_operand.vmem [shape: bf16[12,1920], index: 1, kind: input, shape index: {}, may-alias: {0,1}]   ;;  %s4999_s2 = inlined_call_operand.vmem [shape: bf16[9,16,12], index: 2, kind: input, shape index: {}]   ;;  %s5000_s3 = inlined_call_operand.vmem [shape: f32[16,1], index: 3, kind: input, shape index: {}]   ;;  %s5001_s4 = inlined_call_operand.vmem [shape: bf16[16,1792], index: 4, kind: output, shape index: {}]  }
   0x1   :  { %5004 = sst [smem:[#allocation7_spill]] %s4997_s0 }
   0x2   :  { %s4023_s15 = smov 0   ;;  %s4025_s16 = smov 0  }
   0x3   :  { %s4027_s17 = smov 0   ;;  %s4029_s18 = smov 0  }
   0x4   :  { %s4031_s19 = smov 0  }
   0x5 LB: > { %5005 = sst [smem:[#allocation5_spill]] %s3915_s18  ;;  %s5002_s20 = sadd.s32 4294967295, %s3919_s19   ;;  %s3919_s19 = sphi %s4031_s19, %s5025_s19   ;;  %s3915_s18 = sphi %s4029_s18, %s5022_s18   ;;  %s3911_s17 = sphi %s4027_s17, %s5021_s17   ;;  %s3907_s16 = sphi %s4025_s16, %s5024_s16   ;;  %s3903_s15 = sphi %s4023_s15, %s5023_s15  }
   0x6   : > { %s4050_s21 = sadd.s32 1, %s3919_s19   ;;  %s21_s23 = sadd.s32 1, %s3915_s18 }
   0x7   : > { %s18_s22 = ssub.s32 %s3919_s19, %s4050_s21  ;;  %p28_p1 = scmp.ne.s32.totalorder %s3915_s18, %s3911_s17 }
   0x8   : > { %p19_p0 = scmp.eq.s32.totalorder %s18_s22, 0  ;;  %p29_p2 = scmp.eq.s32.totalorder %s3919_s19, 0 }
   0x9   : > { %s45_s24 = smul.u32 7, %s4050_s21  ;;  %s46_s26 = sadd.s32 1, %s4050_s21 }
   0xa   : > { %s4060_s25 = scalar_select %p19_p0, %s3915_s18, %s21_s23  }
   0xb   : > { %p30_p3 = por %p29_p2, %p28_p1  ;;  %s47_s27 = smul.u32 7, %s46_s26 }
   0xc   : > { %5006 = sst [smem:[#allocation6_spill]] %s4060_s25  ;;  %p58_p4 = scmp.ne.s32.totalorder %s3907_s16, %s3903_s15 }
   0xd   : > { %p130_p5 = scmp.eq.s32.totalorder %s5002_s20, 1  ;;  %s48_s28 = ssub.s32 %s45_s24, %s47_s27 }
   0xe   : > { %s51_s29 = sadd.s32 1, %s3907_s16  ;;  %p49_p6 = scmp.eq.s32.totalorder %s48_s28, 0 }
   0xf   : > { %p4071_p7 = por %p58_p4, %p29_p2  ;;  %p4078_p8 = por %p130_p5, %p28_p1 }
  0x10   : > { %s4083_s6 = scalar_select %p49_p6, %s3907_s16, %s51_s29  }
  0x11   : > { %p3246_p9 = scmp.ge.s32.totalorder %s3919_s19, 2 }
  0x13   : > { %158 = sbr.rel (%p3246_p9) target bundleno = 206 (0xce), region = 24 }
  0x1a   : > { %161 = sbr.rel (!%p30_p3) target bundleno = 199 (0xc7), region = 28  ;;  %s163_s7 = sand.u32 (%p30_p3), 1, %s3915_s18  }
  0x1b   : > { %s166_s8 = smul.u32 (%p30_p3), 7, %s3919_s19  ;;  %s5009_s0 = sld [smem:[#allocation7_spill]] (%p30_p3) }
  0x1c   : > { %s3584_s9 = smul.u32 (%p30_p3), 56, %s163_s7 }
  0x1d   : > { %s167_s10 = ssub.s32 (%p30_p3), 15, %s166_s8  ;;  %s3402_s11 = smul.u32 (%p30_p3), 28, %s3919_s19 }
  0x1e   : > { %p168_p10 = scmp.lt.s32.totalorder (%p30_p3), %s167_s10, 7  ;;  %s4096_s24 = scalar_lea.vmem (%p30_p3), [#allocation2], %s3584_s9  }
  0x21   : > { %s4092_s14 = scalar_lea.vmem %s5009_s0, %s3402_s11   ;;  %s5027_s10 = smov (!%p168_p10, %s167_s10), 7 }
  0x22   : > { %s3247_s22 = sshll.u32 %s5027_s10, 7  ;;  %s4094_s23 = sshll.u32 %s5027_s10, 2 }
  0x23   : > { %p3251_p11 = scmp.eq.s32.totalorder %s3247_s22, 0 }
  0x24   : > { %p178_p12 = scmp.lt.u32.totalorder (!%p3251_p11), %s4094_s23, 8 }
  0x25   : > { %177 = sbr.rel (%p3251_p11) target bundleno = 199 (0xc7), region = 32 }
  0x2c   : > { %181 = sbr.rel (%p178_p12) target bundleno = 190 (0xbe), region = 36  ;;  %s4100_s26 = sand.u32 (!%p178_p12), 7, %s4094_s23  }
  0x2d   : > { %p199_p13 = scmp.eq.s32.totalorder (!%p178_p12), %s4100_s26, 0  ;;  %p3252_p0 = scmp.ne.s32.totalorder (!%p178_p12), %s4100_s26, 0 }
  0x33   : > { %202 = sbr.rel (%p3252_p0) target bundleno = 118 (0x76), region = 51  ;;  %s203_s27 = sshrl.u32 (!%p3252_p0), %s4094_s23, 3 }
  0x34   : > { %s4107_s28 = sshrl.u32 (!%p3252_p0), %s203_s27, 5 }
  0x35   : > { %p3253_p1 = scmp.le.s32.totalorder (!%p3252_p0), %s4107_s28, 0 }
  0x3a   : > { %3166 = sbr.rel (%p3253_p1) target bundleno = 98 (0x62), region = 238  ;;  %s5010_s29 = smov (!%p3253_p1), %s4096_s24 }
  0x3b   : > { %s5011_s7 = smov (!%p3253_p1), %s4092_s14  ;;  %s4116_s8 = smov (!%p3253_p1), 0  }
  0x3c   : > { %s4118_s9 = smov (!%p3253_p1), 0  }
  0x41 LB: >> { %v222_v0 = vld [vmem:[%s3927_s7 + $0x18] sm:$0xff]  ;;  %v224_v1 = vld [vmem:[%s3927_s7 + $0x20] sm:$0xff]  ;;  %v226_v2 = vld [vmem:[%s3927_s7 + $0x28] sm:$0xff]  ;;  %s344_s10 = sadd.s32 1, %s3931_s8  ;;  %s210_s9 = sadd.s32 1, %s3935_s9   ;;  %s3935_s9 = sphi %s4118_s9, %s210_s9   ;;  %s3931_s8 = sphi %s4116_s8, %s5014_s8   ;;  %s3927_s7 = sphi %s5011_s7, %s5013_s7   ;;  %s3923_s29 = sphi %s5010_s29, %s5012_s29  }
  0x42   : >> { %223 = vst [vmem:[%s3923_s29 + $0x18] sm:$0xff] %v222_v0  ;;  %225 = vst [vmem:[%s3923_s29 + $0x20] sm:$0xff] %v224_v1  ;;  %v228_v3 = vld [vmem:[%s3927_s7 + $0x30] sm:$0xff]  ;;  %v230_v4 = vld [vmem:[%s3927_s7 + $0x38] sm:$0xff]  ;;  %p345_p2 = scmp.ge.s32.totalorder %s344_s10, %s4107_s28  ;;  %p209_p3 = scmp.ge.s32.totalorder %s210_s9, %s4107_s28 }
  0x43   : >> { %227 = vst [vmem:[%s3923_s29 + $0x28] sm:$0xff] %v226_v2  ;;  %v232_v5 = vld [vmem:[%s3927_s7 + $0x40] sm:$0xff]  ;;  %229 = vst [vmem:[%s3923_s29 + $0x30] sm:$0xff] %v228_v3  ;;  %v234_v6 = vld [vmem:[%s3927_s7 + $0x48] sm:$0xff] }
  0x44   : >> { %231 = vst [vmem:[%s3923_s29 + $0x38] sm:$0xff] %v230_v4  ;;  %233 = vst [vmem:[%s3923_s29 + $0x40] sm:$0xff] %v232_v5  ;;  %v236_v7 = vld [vmem:[%s3927_s7 + $0x50] sm:$0xff]  ;;  %v238_v8 = vld [vmem:[%s3927_s7 + $0x58] sm:$0xff]  ;;  %s5029_s10 = smov (%p345_p2, %s344_s10), 0 }
  0x45   : >> { %235 = vst [vmem:[%s3923_s29 + $0x48] sm:$0xff] %v234_v6  ;;  %237 = vst [vmem:[%s3923_s29 + $0x50] sm:$0xff] %v236_v7  ;;  %v240_v9 = vld [vmem:[%s3927_s7 + $0x60] sm:$0xff]  ;;  %v242_v10 = vld [vmem:[%s3927_s7 + $0x68] sm:$0xff]  ;;  %s3254_s11 = sshll.u32 %s5029_s10, 8  ;;  %s5014_s8 = smov %s5029_s10 }
  0x46   : >> { %239 = vst [vmem:[%s3923_s29 + $0x58] sm:$0xff] %v238_v8  ;;  %v244_v11 = vld [vmem:[%s3927_s7 + $0x70] sm:$0xff]  ;;  %241 = vst [vmem:[%s3923_s29 + $0x60] sm:$0xff] %v240_v9  ;;  %v246_v12 = vld [vmem:[%s3927_s7 + $0x78] sm:$0xff]  ;;  %s4189_s12 = scalar_lea.vmem %s4092_s14, %s3254_s11   ;;  %s4192_s13 = scalar_lea.vmem %s4096_s24, %s3254_s11 [#allocation2]  }
  0x47   : >> { %243 = vst [vmem:[%s3923_s29 + $0x68] sm:$0xff] %v242_v10  ;;  %245 = vst [vmem:[%s3923_s29 + $0x70] sm:$0xff] %v244_v11  ;;  %v248_v13 = vld [vmem:[%s3927_s7 + $0x80] sm:$0xff]  ;;  %v250_v14 = vld [vmem:[%s3927_s7 + $0x88] sm:$0xff] }
  0x48   : >> { %247 = vst [vmem:[%s3923_s29 + $0x78] sm:$0xff] %v246_v12  ;;  %249 = vst [vmem:[%s3923_s29 + $0x80] sm:$0xff] %v248_v13  ;;  %v252_v15 = vld [vmem:[%s3927_s7 + $0x90] sm:$0xff]  ;;  %v254_v16 = vld [vmem:[%s3927_s7 + $0x98] sm:$0xff] }
  0x49   : >> { %251 = vst [vmem:[%s3923_s29 + $0x88] sm:$0xff] %v250_v14  ;;  %v256_v17 = vld [vmem:[%s3927_s7 + $0xa0] sm:$0xff]  ;;  %253 = vst [vmem:[%s3923_s29 + $0x90] sm:$0xff] %v252_v15  ;;  %v258_v18 = vld [vmem:[%s3927_s7 + $0xa8] sm:$0xff] }
  0x4a   : >> { %255 = vst [vmem:[%s3923_s29 + $0x98] sm:$0xff] %v254_v16  ;;  %257 = vst [vmem:[%s3923_s29 + $0xa0] sm:$0xff] %v256_v17  ;;  %v260_v19 = vld [vmem:[%s3927_s7 + $0xb0] sm:$0xff]  ;;  %v262_v20 = vld [vmem:[%s3927_s7 + $0xb8] sm:$0xff] }
  0x4b   : >> { %259 = vst [vmem:[%s3923_s29 + $0xa8] sm:$0xff] %v258_v18  ;;  %261 = vst [vmem:[%s3923_s29 + $0xb0] sm:$0xff] %v260_v19  ;;  %v264_v21 = vld [vmem:[%s3927_s7 + $0xc0] sm:$0xff]  ;;  %v266_v22 = vld [vmem:[%s3927_s7 + $0xc8] sm:$0xff] }
  0x4c   : >> { %263 = vst [vmem:[%s3923_s29 + $0xb8] sm:$0xff] %v262_v20  ;;  %v268_v23 = vld [vmem:[%s3927_s7 + $0xd0] sm:$0xff]  ;;  %265 = vst [vmem:[%s3923_s29 + $0xc0] sm:$0xff] %v264_v21  ;;  %v270_v24 = vld [vmem:[%s3927_s7 + $0xd8] sm:$0xff] }
  0x4d   : >> { %267 = vst [vmem:[%s3923_s29 + $0xc8] sm:$0xff] %v266_v22  ;;  %269 = vst [vmem:[%s3923_s29 + $0xd0] sm:$0xff] %v268_v23  ;;  %v272_v25 = vld [vmem:[%s3927_s7 + $0xe0] sm:$0xff]  ;;  %v274_v26 = vld [vmem:[%s3927_s7 + $0xe8] sm:$0xff] }
  0x4e   : >> { %271 = vst [vmem:[%s3923_s29 + $0xd8] sm:$0xff] %v270_v24  ;;  %273 = vst [vmem:[%s3923_s29 + $0xe0] sm:$0xff] %v272_v25  ;;  %v276_v27 = vld [vmem:[%s3927_s7 + $0xf0] sm:$0xff]  ;;  %v278_v28 = vld [vmem:[%s3927_s7 + $0xf8] sm:$0xff] }
  0x4f   : >> { %275 = vst [vmem:[%s3923_s29 + $0xe8] sm:$0xff] %v274_v26  ;;  %v216_v29 = vld [vmem:[%s3927_s7] sm:$0xff]  ;;  %277 = vst [vmem:[%s3923_s29 + $0xf0] sm:$0xff] %v276_v27  ;;  %v218_v30 = vld [vmem:[%s3927_s7 + $0x8] sm:$0xff] }
  0x50   : >> { %279 = vst [vmem:[%s3923_s29 + $0xf8] sm:$0xff] %v278_v28  ;;  %217 = vst [vmem:[%s3923_s29] sm:$0xff] %v216_v29  ;;  %v220_v31 = vld [vmem:[%s3927_s7 + $0x10] sm:$0xff]  ;;  %v280_v32 = vld [vmem:[%s3927_s7 + $0x3c] sm:$0xff] }
  0x51   : >> { %219 = vst [vmem:[%s3923_s29 + $0x8] sm:$0xff] %v218_v30  ;;  %221 = vst [vmem:[%s3923_s29 + $0x10] sm:$0xff] %v220_v31  ;;  %v282_v33 = vld [vmem:[%s3927_s7 + $0x44] sm:$0xff]  ;;  %v284_v34 = vld [vmem:[%s3927_s7 + $0x4c] sm:$0xff] }
  0x52   : >> { %281 = vst [vmem:[%s3923_s29 + $0x1c] sm:$0xff] %v280_v32  ;;  %v286_v35 = vld [vmem:[%s3927_s7 + $0x54] sm:$0xff]  ;;  %283 = vst [vmem:[%s3923_s29 + $0x24] sm:$0xff] %v282_v33  ;;  %v288_v36 = vld [vmem:[%s3927_s7 + $0x5c] sm:$0xff] }
  0x53   : >> { %285 = vst [vmem:[%s3923_s29 + $0x2c] sm:$0xff] %v284_v34  ;;  %287 = vst [vmem:[%s3923_s29 + $0x34] sm:$0xff] %v286_v35  ;;  %v290_v37 = vld [vmem:[%s3927_s7 + $0x64] sm:$0xff]  ;;  %v292_v38 = vld [vmem:[%s3927_s7 + $0x6c] sm:$0xff] }
  0x54   : >> { %289 = vst [vmem:[%s3923_s29 + $0x3c] sm:$0xff] %v288_v36  ;;  %291 = vst [vmem:[%s3923_s29 + $0x44] sm:$0xff] %v290_v37  ;;  %v294_v39 = vld [vmem:[%s3927_s7 + $0x74] sm:$0xff]  ;;  %v296_v40 = vld [vmem:[%s3927_s7 + $0x7c] sm:$0xff] }
  0x55   : >> { %293 = vst [vmem:[%s3923_s29 + $0x4c] sm:$0xff] %v292_v38  ;;  %v298_v41 = vld [vmem:[%s3927_s7 + $0x84] sm:$0xff]  ;;  %295 = vst [vmem:[%s3923_s29 + $0x54] sm:$0xff] %v294_v39  ;;  %v300_v42 = vld [vmem:[%s3927_s7 + $0x8c] sm:$0xff] }
  0x56   : >> { %297 = vst [vmem:[%s3923_s29 + $0x5c] sm:$0xff] %v296_v40  ;;  %299 = vst [vmem:[%s3923_s29 + $0x64] sm:$0xff] %v298_v41  ;;  %v302_v43 = vld [vmem:[%s3927_s7 + $0x94] sm:$0xff]  ;;  %v304_v44 = vld [vmem:[%s3927_s7 + $0x9c] sm:$0xff] }
  0x57   : >> { %301 = vst [vmem:[%s3923_s29 + $0x6c] sm:$0xff] %v300_v42  ;;  %303 = vst [vmem:[%s3923_s29 + $0x74] sm:$0xff] %v302_v43  ;;  %v306_v45 = vld [vmem:[%s3927_s7 + $0xa4] sm:$0xff]  ;;  %v308_v46 = vld [vmem:[%s3927_s7 + $0xac] sm:$0xff] }
  0x58   : >> { %305 = vst [vmem:[%s3923_s29 + $0x7c] sm:$0xff] %v304_v44  ;;  %v310_v47 = vld [vmem:[%s3927_s7 + $0xb4] sm:$0xff]  ;;  %307 = vst [vmem:[%s3923_s29 + $0x84] sm:$0xff] %v306_v45  ;;  %v312_v48 = vld [vmem:[%s3927_s7 + $0xbc] sm:$0xff] }
  0x59   : >> { %309 = vst [vmem:[%s3923_s29 + $0x8c] sm:$0xff] %v308_v46  ;;  %311 = vst [vmem:[%s3923_s29 + $0x94] sm:$0xff] %v310_v47  ;;  %v314_v49 = vld [vmem:[%s3927_s7 + $0xc4] sm:$0xff]  ;;  %v316_v50 = vld [vmem:[%s3927_s7 + $0xcc] sm:$0xff] }
  0x5a   : >> { %313 = vst [vmem:[%s3923_s29 + $0x9c] sm:$0xff] %v312_v48  ;;  %315 = vst [vmem:[%s3923_s29 + $0xa4] sm:$0xff] %v314_v49  ;;  %v318_v51 = vld [vmem:[%s3927_s7 + $0xd4] sm:$0xff]  ;;  %v320_v52 = vld [vmem:[%s3927_s7 + $0xdc] sm:$0xff] }
  0x5b   : >> { %317 = vst [vmem:[%s3923_s29 + $0xac] sm:$0xff] %v316_v50  ;;  %v322_v53 = vld [vmem:[%s3927_s7 + $0xe4] sm:$0xff]  ;;  %319 = vst [vmem:[%s3923_s29 + $0xb4] sm:$0xff] %v318_v51  ;;  %v324_v54 = vld [vmem:[%s3927_s7 + $0xec] sm:$0xff]  ;;  %212 = sbr.rel (!%p209_p3) target bundleno = 65 (0x41), region = 244 }
  0x5c   : >> { %321 = vst [vmem:[%s3923_s29 + $0xbc] sm:$0xff] %v320_v52  ;;  %323 = vst [vmem:[%s3923_s29 + $0xc4] sm:$0xff] %v322_v53  ;;  %v326_v55 = vld [vmem:[%s3927_s7 + $0xf4] sm:$0xff]  ;;  %v328_v56 = vld [vmem:[%s3927_s7 + $0xfc] sm:$0xff] }
  0x5d   : >> { %325 = vst [vmem:[%s3923_s29 + $0xcc] sm:$0xff] %v324_v54  ;;  %327 = vst [vmem:[%s3923_s29 + $0xd4] sm:$0xff] %v326_v55  ;;  %v330_v57 = vld [vmem:[%s3927_s7 + $0x104] sm:$0xff]  ;;  %v332_v58 = vld [vmem:[%s3927_s7 + $0x10c] sm:$0xff] }
  0x5e   : >> { %329 = vst [vmem:[%s3923_s29 + $0xdc] sm:$0xff] %v328_v56  ;;  %v334_v59 = vld [vmem:[%s3927_s7 + $0x114] sm:$0xff]  ;;  %331 = vst [vmem:[%s3923_s29 + $0xe4] sm:$0xff] %v330_v57  ;;  %v336_v60 = vld [vmem:[%s3927_s7 + $0x11c] sm:$0xff] }
  0x5f   : >> { %333 = vst [vmem:[%s3923_s29 + $0xec] sm:$0xff] %v332_v58  ;;  %335 = vst [vmem:[%s3923_s29 + $0xf4] sm:$0xff] %v334_v59  ;;  %v338_v61 = vld [vmem:[%s3927_s7 + $0x124] sm:$0xff]  ;;  %v340_v62 = vld [vmem:[%s3927_s7 + $0x12c] sm:$0xff] }
  0x60   : >> { %337 = vst [vmem:[%s3923_s29 + $0xfc] sm:$0xff] %v336_v60  ;;  %339 = vst [vmem:[%s3923_s29 + $0x104] sm:$0xff] %v338_v61  ;;  %v342_v63 = vld [vmem:[%s3927_s7 + $0x134] sm:$0xff]  ;;  %s5013_s7 = smov %s4189_s12 }
  0x61   : >> { %341 = vst [vmem:[%s3923_s29 + $0x10c] sm:$0xff] %v340_v62  ;;  %343 = vst [vmem:[%s3923_s29 + $0x114] sm:$0xff] %v342_v63  ;;  %s5012_s29 = smov %s4192_s13 }
  0x62 PF: > { %s4286_s22 = sand.u32 31, %s203_s27   ;;  %s3403_s11 = sshll.u32 %s4107_s28, 12 }
  0x63   : > { %s355_s20 = sshra.s32 %s3403_s11, 4  ;;  %p3259_p4 = scmp.le.s32.totalorder %s4286_s22, 0 }
  0x64   : > { %s4290_s0 = scalar_lea.vmem %s4092_s14, %s355_s20   ;;  %s359_s13 = scalar_lea.vmem %s4096_s24, %s355_s20 [#allocation2]  }
  0x65   : > { %3180 = sbr.rel (%p3259_p4) target bundleno = 118 (0x76), region = 249  ;;  %s3937_s10 = smov (!%p3259_p4), %s359_s13  }
  0x66   : > { %s3941_s9 = smov (!%p3259_p4), %s4290_s0   ;;  %s3945_s12 = smov (!%p3259_p4), 0  }
  0x67   : > { %s3949_s29 = smov (!%p3259_p4), 0  }
  0x6c LB: >> { %v371_v0 = vld [vmem:[%s3943_s9] sm:$0xff]  ;;  %s375_s27 = sadd.s32 1, %s3947_s12  ;;  %s365_s29 = sadd.s32 1, %s3951_s29   ;;  %s3951_s29 = sphi %s3949_s29, %s365_s29   ;;  %s3947_s12 = sphi %s3945_s12, %s3946_s12   ;;  %s3943_s9 = sphi %s3941_s9, %s380_s9   ;;  %s3939_s10 = sphi %s3937_s10, %s381_s10  }
  0x6d   : >> { %v373_v1 = vld [vmem:[%s3943_s9 + $0x3c] sm:$0xff]  ;;  %372 = vst [vmem:[%s3939_s10] sm:$0xff] %v371_v0  ;;  %p376_p5 = scmp.ge.s32.totalorder %s375_s27, %s4286_s22  ;;  %p364_p6 = scmp.ge.s32.totalorder %s365_s29, %s4286_s22 }
  0x6e   : >> { %374 = vst [vmem:[%s3939_s10 + $0x1c] sm:$0xff] %v373_v1 }
  0x6f   : >> { %s5031_s27 = smov (%p376_p5, %s375_s27), 0  ;;  %367 = sbr.rel (!%p364_p6) target bundleno = 108 (0x6c), region = 255 }
  0x70   : >> { %s3260_s20 = sshll.u32 %s5031_s27, 3  ;;  %s3946_s12 = smov %s5031_s27  }
  0x71   : >> { %s380_s9 = scalar_lea.vmem %s4290_s0, %s3260_s20   ;;  %s381_s10 = scalar_lea.vmem %s359_s13, %s3260_s20 [#allocation2]  }
  0x76 PF: > { %384 = sbr.rel (%p199_p13) target bundleno = 190 (0xbe), region = 69  ;;  %s386_s28 = ssub.s32 (!%p199_p13), %s4094_s23, %s4100_s26 }
  0x77   : > { %s390_s7 = sshrl.u32 (!%p199_p13), %s4094_s23, 3  ;;  %s4304_s8 = scalar_lea.vmem (!%p199_p13), %s4092_s14, %s386_s28 }
  0x78   : > { %s4307_s11 = scalar_lea.vmem (!%p199_p13), %s4096_s24, %s386_s28 [#allocation2]  ;;  %s4311_s10 = sshrl.u32 (!%p199_p13), %s390_s7, 5 }
  0x79   : > { %p3262_p9 = scmp.le.s32.totalorder (!%p199_p13), %s4311_s10, 0 }
  0x7d   : > { %3194 = sbr.rel (%p3262_p9) target bundleno = 165 (0xa5), region = 260  ;;  %s5015_s0 = smov (!%p3262_p9), %s4096_s24 }
  0x7e   : > { %s5016_s22 = smov (!%p3262_p9), %s4092_s14  ;;  %s4320_s13 = smov (!%p3262_p9), 0  }
  0x7f   : > { %s4322_s9 = smov (!%p3262_p9), 0  }
  0x84 LB: >> { %v409_v2 = vld [vmem:[%s3959_s22 + $0x18] sm:$0xff]  ;;  %v411_v3 = vld [vmem:[%s3959_s22 + $0x20] sm:$0xff]  ;;  %v413_v4 = vld [vmem:[%s3959_s22 + $0x28] sm:$0xff]  ;;  %s531_s12 = sadd.s32 1, %s3963_s13  ;;  %s397_s9 = sadd.s32 1, %s3967_s9   ;;  %s3967_s9 = sphi %s4322_s9, %s397_s9   ;;  %s3963_s13 = sphi %s4320_s13, %s5019_s13   ;;  %s3959_s22 = sphi %s5016_s22, %s5018_s22   ;;  %s3955_s0 = sphi %s5015_s0, %s5017_s0  }
  0x85   : >> { %410 = vst [vmem:[%s3955_s0 + $0x18] sm:$0xff] %v409_v2  ;;  %412 = vst [vmem:[%s3955_s0 + $0x20] sm:$0xff] %v411_v3  ;;  %v415_v5 = vld [vmem:[%s3959_s22 + $0x30] sm:$0xff]  ;;  %v417_v6 = vld [vmem:[%s3959_s22 + $0x38] sm:$0xff]  ;;  %p532_p10 = scmp.ge.s32.totalorder %s531_s12, %s4311_s10  ;;  %p396_p11 = scmp.ge.s32.totalorder %s397_s9, %s4311_s10 }
  0x86   : >> { %414 = vst [vmem:[%s3955_s0 + $0x28] sm:$0xff] %v413_v4  ;;  %v419_v7 = vld [vmem:[%s3959_s22 + $0x40] sm:$0xff]  ;;  %416 = vst [vmem:[%s3955_s0 + $0x30] sm:$0xff] %v415_v5  ;;  %v421_v8 = vld [vmem:[%s3959_s22 + $0x48] sm:$0xff] }
  0x87   : >> { %418 = vst [vmem:[%s3955_s0 + $0x38] sm:$0xff] %v417_v6  ;;  %420 = vst [vmem:[%s3955_s0 + $0x40] sm:$0xff] %v419_v7  ;;  %v423_v9 = vld [vmem:[%s3959_s22 + $0x50] sm:$0xff]  ;;  %v425_v10 = vld [vmem:[%s3959_s22 + $0x58] sm:$0xff]  ;;  %s5033_s12 = smov (%p532_p10, %s531_s12), 0 }
  0x88   : >> { %422 = vst [vmem:[%s3955_s0 + $0x48] sm:$0xff] %v421_v8  ;;  %424 = vst [vmem:[%s3955_s0 + $0x50] sm:$0xff] %v423_v9  ;;  %v427_v11 = vld [vmem:[%s3959_s22 + $0x60] sm:$0xff]  ;;  %v429_v12 = vld [vmem:[%s3959_s22 + $0x68] sm:$0xff]  ;;  %s3263_s29 = sshll.u32 %s5033_s12, 8  ;;  %s5019_s13 = smov %s5033_s12 }
  0x89   : >> { %426 = vst [vmem:[%s3955_s0 + $0x58] sm:$0xff] %v425_v10  ;;  %v431_v13 = vld [vmem:[%s3959_s22 + $0x70] sm:$0xff]  ;;  %428 = vst [vmem:[%s3955_s0 + $0x60] sm:$0xff] %v427_v11  ;;  %v433_v14 = vld [vmem:[%s3959_s22 + $0x78] sm:$0xff]  ;;  %s4393_s27 = scalar_lea.vmem %s4092_s14, %s3263_s29   ;;  %s4396_s20 = scalar_lea.vmem %s4096_s24, %s3263_s29 [#allocation2]  }
  0x8a   : >> { %430 = vst [vmem:[%s3955_s0 + $0x68] sm:$0xff] %v429_v12  ;;  %432 = vst [vmem:[%s3955_s0 + $0x70] sm:$0xff] %v431_v13  ;;  %v435_v15 = vld [vmem:[%s3959_s22 + $0x80] sm:$0xff]  ;;  %v437_v16 = vld [vmem:[%s3959_s22 + $0x88] sm:$0xff] }
  0x8b   : >> { %434 = vst [vmem:[%s3955_s0 + $0x78] sm:$0xff] %v433_v14  ;;  %436 = vst [vmem:[%s3955_s0 + $0x80] sm:$0xff] %v435_v15  ;;  %v439_v17 = vld [vmem:[%s3959_s22 + $0x90] sm:$0xff]  ;;  %v441_v18 = vld [vmem:[%s3959_s22 + $0x98] sm:$0xff] }
  0x8c   : >> { %438 = vst [vmem:[%s3955_s0 + $0x88] sm:$0xff] %v437_v16  ;;  %v443_v19 = vld [vmem:[%s3959_s22 + $0xa0] sm:$0xff]  ;;  %440 = vst [vmem:[%s3955_s0 + $0x90] sm:$0xff] %v439_v17  ;;  %v445_v20 = vld [vmem:[%s3959_s22 + $0xa8] sm:$0xff] }
  0x8d   : >> { %442 = vst [vmem:[%s3955_s0 + $0x98] sm:$0xff] %v441_v18  ;;  %444 = vst [vmem:[%s3955_s0 + $0xa0] sm:$0xff] %v443_v19  ;;  %v447_v21 = vld [vmem:[%s3959_s22 + $0xb0] sm:$0xff]  ;;  %v449_v22 = vld [vmem:[%s3959_s22 + $0xb8] sm:$0xff] }
  0x8e   : >> { %446 = vst [vmem:[%s3955_s0 + $0xa8] sm:$0xff] %v445_v20  ;;  %448 = vst [vmem:[%s3955_s0 + $0xb0] sm:$0xff] %v447_v21  ;;  %v451_v23 = vld [vmem:[%s3959_s22 + $0xc0] sm:$0xff]  ;;  %v453_v24 = vld [vmem:[%s3959_s22 + $0xc8] sm:$0xff] }
  0x8f   : >> { %450 = vst [vmem:[%s3955_s0 + $0xb8] sm:$0xff] %v449_v22  ;;  %v455_v25 = vld [vmem:[%s3959_s22 + $0xd0] sm:$0xff]  ;;  %452 = vst [vmem:[%s3955_s0 + $0xc0] sm:$0xff] %v451_v23  ;;  %v457_v26 = vld [vmem:[%s3959_s22 + $0xd8] sm:$0xff] }
  0x90   : >> { %454 = vst [vmem:[%s3955_s0 + $0xc8] sm:$0xff] %v453_v24  ;;  %456 = vst [vmem:[%s3955_s0 + $0xd0] sm:$0xff] %v455_v25  ;;  %v459_v27 = vld [vmem:[%s3959_s22 + $0xe0] sm:$0xff]  ;;  %v461_v28 = vld [vmem:[%s3959_s22 + $0xe8] sm:$0xff] }
  0x91   : >> { %458 = vst [vmem:[%s3955_s0 + $0xd8] sm:$0xff] %v457_v26  ;;  %460 = vst [vmem:[%s3955_s0 + $0xe0] sm:$0xff] %v459_v27  ;;  %v463_v29 = vld [vmem:[%s3959_s22 + $0xf0] sm:$0xff]  ;;  %v465_v30 = vld [vmem:[%s3959_s22 + $0xf8] sm:$0xff] }
  0x92   : >> { %462 = vst [vmem:[%s3955_s0 + $0xe8] sm:$0xff] %v461_v28  ;;  %v403_v31 = vld [vmem:[%s3959_s22] sm:$0xff]  ;;  %464 = vst [vmem:[%s3955_s0 + $0xf0] sm:$0xff] %v463_v29  ;;  %v405_v32 = vld [vmem:[%s3959_s22 + $0x8] sm:$0xff] }
  0x93   : >> { %466 = vst [vmem:[%s3955_s0 + $0xf8] sm:$0xff] %v465_v30  ;;  %404 = vst [vmem:[%s3955_s0] sm:$0xff] %v403_v31  ;;  %v407_v33 = vld [vmem:[%s3959_s22 + $0x10] sm:$0xff]  ;;  %v467_v34 = vld [vmem:[%s3959_s22 + $0x3c] sm:$0xff] }
  0x94   : >> { %406 = vst [vmem:[%s3955_s0 + $0x8] sm:$0xff] %v405_v32  ;;  %408 = vst [vmem:[%s3955_s0 + $0x10] sm:$0xff] %v407_v33  ;;  %v469_v35 = vld [vmem:[%s3959_s22 + $0x44] sm:$0xff]  ;;  %v471_v36 = vld [vmem:[%s3959_s22 + $0x4c] sm:$0xff] }
  0x95   : >> { %468 = vst [vmem:[%s3955_s0 + $0x1c] sm:$0xff] %v467_v34  ;;  %v473_v37 = vld [vmem:[%s3959_s22 + $0x54] sm:$0xff]  ;;  %470 = vst [vmem:[%s3955_s0 + $0x24] sm:$0xff] %v469_v35  ;;  %v475_v38 = vld [vmem:[%s3959_s22 + $0x5c] sm:$0xff] }
  0x96   : >> { %472 = vst [vmem:[%s3955_s0 + $0x2c] sm:$0xff] %v471_v36  ;;  %474 = vst [vmem:[%s3955_s0 + $0x34] sm:$0xff] %v473_v37  ;;  %v477_v39 = vld [vmem:[%s3959_s22 + $0x64] sm:$0xff]  ;;  %v479_v40 = vld [vmem:[%s3959_s22 + $0x6c] sm:$0xff] }
  0x97   : >> { %476 = vst [vmem:[%s3955_s0 + $0x3c] sm:$0xff] %v475_v38  ;;  %478 = vst [vmem:[%s3955_s0 + $0x44] sm:$0xff] %v477_v39  ;;  %v481_v41 = vld [vmem:[%s3959_s22 + $0x74] sm:$0xff]  ;;  %v483_v42 = vld [vmem:[%s3959_s22 + $0x7c] sm:$0xff] }
  0x98   : >> { %480 = vst [vmem:[%s3955_s0 + $0x4c] sm:$0xff] %v479_v40  ;;  %v485_v43 = vld [vmem:[%s3959_s22 + $0x84] sm:$0xff]  ;;  %482 = vst [vmem:[%s3955_s0 + $0x54] sm:$0xff] %v481_v41  ;;  %v487_v44 = vld [vmem:[%s3959_s22 + $0x8c] sm:$0xff] }
  0x99   : >> { %484 = vst [vmem:[%s3955_s0 + $0x5c] sm:$0xff] %v483_v42  ;;  %486 = vst [vmem:[%s3955_s0 + $0x64] sm:$0xff] %v485_v43  ;;  %v489_v45 = vld [vmem:[%s3959_s22 + $0x94] sm:$0xff]  ;;  %v491_v46 = vld [vmem:[%s3959_s22 + $0x9c] sm:$0xff] }
  0x9a   : >> { %488 = vst [vmem:[%s3955_s0 + $0x6c] sm:$0xff] %v487_v44  ;;  %490 = vst [vmem:[%s3955_s0 + $0x74] sm:$0xff] %v489_v45  ;;  %v493_v47 = vld [vmem:[%s3959_s22 + $0xa4] sm:$0xff]  ;;  %v495_v48 = vld [vmem:[%s3959_s22 + $0xac] sm:$0xff] }
  0x9b   : >> { %492 = vst [vmem:[%s3955_s0 + $0x7c] sm:$0xff] %v491_v46  ;;  %v497_v49 = vld [vmem:[%s3959_s22 + $0xb4] sm:$0xff]  ;;  %494 = vst [vmem:[%s3955_s0 + $0x84] sm:$0xff] %v493_v47  ;;  %v499_v50 = vld [vmem:[%s3959_s22 + $0xbc] sm:$0xff] }
  0x9c   : >> { %496 = vst [vmem:[%s3955_s0 + $0x8c] sm:$0xff] %v495_v48  ;;  %498 = vst [vmem:[%s3955_s0 + $0x94] sm:$0xff] %v497_v49  ;;  %v501_v51 = vld [vmem:[%s3959_s22 + $0xc4] sm:$0xff]  ;;  %v503_v52 = vld [vmem:[%s3959_s22 + $0xcc] sm:$0xff] }
  0x9d   : >> { %500 = vst [vmem:[%s3955_s0 + $0x9c] sm:$0xff] %v499_v50  ;;  %502 = vst [vmem:[%s3955_s0 + $0xa4] sm:$0xff] %v501_v51  ;;  %v505_v53 = vld [vmem:[%s3959_s22 + $0xd4] sm:$0xff]  ;;  %v507_v54 = vld [vmem:[%s3959_s22 + $0xdc] sm:$0xff] }
  0x9e   : >> { %504 = vst [vmem:[%s3955_s0 + $0xac] sm:$0xff] %v503_v52  ;;  %v509_v55 = vld [vmem:[%s3959_s22 + $0xe4] sm:$0xff]  ;;  %506 = vst [vmem:[%s3955_s0 + $0xb4] sm:$0xff] %v505_v53  ;;  %v511_v56 = vld [vmem:[%s3959_s22 + $0xec] sm:$0xff]  ;;  %399 = sbr.rel (!%p396_p11) target bundleno = 132 (0x84), region = 266 }
  0x9f   : >> { %508 = vst [vmem:[%s3955_s0 + $0xbc] sm:$0xff] %v507_v54  ;;  %510 = vst [vmem:[%s3955_s0 + $0xc4] sm:$0xff] %v509_v55  ;;  %v513_v57 = vld [vmem:[%s3959_s22 + $0xf4] sm:$0xff]  ;;  %v515_v58 = vld [vmem:[%s3959_s22 + $0xfc] sm:$0xff] }
  0xa0   : >> { %512 = vst [vmem:[%s3955_s0 + $0xcc] sm:$0xff] %v511_v56  ;;  %514 = vst [vmem:[%s3955_s0 + $0xd4] sm:$0xff] %v513_v57  ;;  %v517_v59 = vld [vmem:[%s3959_s22 + $0x104] sm:$0xff]  ;;  %v519_v60 = vld [vmem:[%s3959_s22 + $0x10c] sm:$0xff] }
  0xa1   : >> { %516 = vst [vmem:[%s3955_s0 + $0xdc] sm:$0xff] %v515_v58  ;;  %v521_v61 = vld [vmem:[%s3959_s22 + $0x114] sm:$0xff]  ;;  %518 = vst [vmem:[%s3955_s0 + $0xe4] sm:$0xff] %v517_v59  ;;  %v523_v62 = vld [vmem:[%s3959_s22 + $0x11c] sm:$0xff] }
  0xa2   : >> { %520 = vst [vmem:[%s3955_s0 + $0xec] sm:$0xff] %v519_v60  ;;  %522 = vst [vmem:[%s3955_s0 + $0xf4] sm:$0xff] %v521_v61  ;;  %v525_v63 = vld [vmem:[%s3959_s22 + $0x124] sm:$0xff]  ;;  %v527_v0 = vld [vmem:[%s3959_s22 + $0x12c] sm:$0xff] }
  0xa3   : >> { %524 = vst [vmem:[%s3955_s0 + $0xfc] sm:$0xff] %v523_v62  ;;  %526 = vst [vmem:[%s3955_s0 + $0x104] sm:$0xff] %v525_v63  ;;  %v529_v1 = vld [vmem:[%s3959_s22 + $0x134] sm:$0xff]  ;;  %s5018_s22 = smov %s4393_s27 }
  0xa4   : >> { %528 = vst [vmem:[%s3955_s0 + $0x10c] sm:$0xff] %v527_v0  ;;  %530 = vst [vmem:[%s3955_s0 + $0x114] sm:$0xff] %v529_v1  ;;  %s5017_s0 = smov %s4396_s20 }
  0xa5 PF: > { %s4490_s28 = sand.u32 31, %s390_s7   ;;  %s3405_s29 = sshll.u32 %s4311_s10, 12 }
  0xa6   : > { %s542_s25 = sshra.s32 %s3405_s29, 4  ;;  %p3268_p12 = scmp.le.s32.totalorder %s4490_s28, 0 }
  0xa7   : > { %s4494_s18 = scalar_lea.vmem %s4092_s14, %s542_s25   ;;  %s546_s20 = scalar_lea.vmem %s4096_s24, %s542_s25 [#allocation2]  }
  0xa8   : > { %3208 = sbr.rel (%p3268_p12) target bundleno = 185 (0xb9), region = 271  ;;  %s3969_s12 = smov (!%p3268_p12), %s546_s20  }
  0xa9   : > { %s3973_s9 = smov (!%p3268_p12), %s4494_s18   ;;  %s3977_s27 = smov (!%p3268_p12), 0  }
  0xaa   : > { %s3981_s0 = smov (!%p3268_p12), 0  }
  0xaf LB: >> { %v558_v2 = vld [vmem:[%s3975_s9] sm:$0xff]  ;;  %s562_s7 = sadd.s32 1, %s3979_s27  ;;  %s552_s0 = sadd.s32 1, %s3983_s0   ;;  %s3983_s0 = sphi %s3981_s0, %s552_s0   ;;  %s3979_s27 = sphi %s3977_s27, %s3978_s27   ;;  %s3975_s9 = sphi %s3973_s9, %s567_s9   ;;  %s3971_s12 = sphi %s3969_s12, %s568_s12  }
  0xb0   : >> { %v560_v3 = vld [vmem:[%s3975_s9 + $0x3c] sm:$0xff]  ;;  %559 = vst [vmem:[%s3971_s12] sm:$0xff] %v558_v2  ;;  %p563_p13 = scmp.ge.s32.totalorder %s562_s7, %s4490_s28  ;;  %p551_p0 = scmp.ge.s32.totalorder %s552_s0, %s4490_s28 }
  0xb1   : >> { %561 = vst [vmem:[%s3971_s12 + $0x1c] sm:$0xff] %v560_v3 }
  0xb2   : >> { %s5035_s7 = smov (%p563_p13, %s562_s7), 0  ;;  %554 = sbr.rel (!%p551_p0) target bundleno = 175 (0xaf), region = 277 }
  0xb3   : >> { %s3269_s25 = sshll.u32 %s5035_s7, 3  ;;  %s3978_s27 = smov %s5035_s7  }
  0xb4   : >> { %s567_s9 = scalar_lea.vmem %s4494_s18, %s3269_s25   ;;  %s568_s12 = scalar_lea.vmem %s546_s20, %s3269_s25 [#allocation2]  }
  0xb9 PF: > { %s3985_s10 = smov 0  }
  0xba   : > { %s569_s22 = sshllo.u32 %s3985_s10, %s4100_s26 }
  0xbb   : > { %v578_v4 = vld [vmem:[%s4304_s8] sm:%s569_s22] }
  0xbc   : > { %v580_v5 = vld [vmem:[%s4304_s8 + $0x3c] sm:%s569_s22]  ;;  %579 = vst [vmem:[%s4307_s11] sm:%s569_s22] %v578_v4 }
  0xbd   : > { %581 = vst [vmem:[%s4307_s11 + $0x1c] sm:%s569_s22] %v580_v5 }
  0xbe PF: > { %p3271_p1 = scmp.ge.u32.totalorder %s4094_s23, 8 }
  0xbf   : > { %s3986_s13 = smov (!%p3271_p1), 0  }
  0xc0   : > { %184 = sbr.rel (%p3271_p1) target bundleno = 199 (0xc7), region = 40  ;;  %s185_s18 = sshllo.u32 (!%p3271_p1), %s3986_s13, %s4094_s23 }
  0xc1   : > { %v194_v6 = vld [vmem:[%s4092_s14] sm:%s185_s18] (!%p3271_p1) }
  0xc2   : > { %v196_v7 = vld [vmem:[%s4092_s14 + $0x3c] sm:%s185_s18] (!%p3271_p1)  ;;  %195 = vst [vmem:[%s4096_s24] sm:%s185_s18] (!%p3271_p1), %v194_v6 }
  0xc3   : > { %197 = vst [vmem:[%s4096_s24 + $0x1c] sm:%s185_s18] (!%p3271_p1), %v196_v7 }
  0xc7 PF: > { %585 = sbr.rel (!%p4071_p7) target bundleno = 206 (0xce), region = 94  ;;  %s587_s26 = sand.u32 (%p4071_p7), 1, %s3907_s16  }
  0xc8   : > { %s3122_s8 = smul.u32 (%p4071_p7), 28, %s3919_s19  ;;  %s3272_s11 = sshll.u32 (%p4071_p7), %s587_s26, 3 }
  0xc9   : > { %s589_s14 = scalar_lea.vmem (%p4071_p7), [#allocation3], %s3272_s11 }
  0xca   : > { %s3123_s20 = scalar_lea.vmem (%p4071_p7), %s4998_s1, %s3122_s8 }
  0xcb   : > { %v3273_v8 = vld [vmem:[%s3123_s20 + $0x1c] sm:$0xf] (%p4071_p7)  ;;  %v3274_v9 = vld [vmem:[%s3123_s20 + $0x58] sm:$0xf] (%p4071_p7) }
  0xcc   : > { %610 = vst [vmem:[%s589_s14] sm:$0xf] (%p4071_p7), %v3273_v8  ;;  %612 = vst [vmem:[%s589_s14 + $0x4] sm:$0xf] (%p4071_p7), %v3274_v9 }
  0xce PF: > { %p3275_p2 = scmp.ge.s32.totalorder %s3919_s19, 1  ;;  %p638_p7 = scmp.lt.s32.totalorder %s3919_s19, 3 }
  0xd0   : > { %p639_p3 = pnand %p3275_p2, %p638_p7 }
  0xd1   : > { %s645_s30 = sand.u32 (!%p639_p3), 1, %s3911_s17   ;;  %s652_s24 = sand.u32 (!%p639_p3), 1, %s3903_s15   ;;  %v3987_v10 = vmov (!%p639_p3), 0   ;;  %vm759_vm0 = vcmask (!%p639_p3), 1039360   ;;  %vm771_vm1 = vcmask (!%p639_p3), 1045504   ;;  %v3780_v26 = vld [vmem:[%s4999_s2 + $0x8] sm:$0xff] (!%p639_p3)  }
  0xd2   : > { %642 = sbr.rel (%p639_p3) target bundleno = 730 (0x2da), region = 135  ;;  %868 = vmatprep.mubr.bf16.mxu1 (!%p639_p3), %v3987_v10  ;;  %825 = vmatprep.mubr.bf16.mxu0 (!%p639_p3), %v3987_v10  ;;  %s3276_s12 = sshll.u32 (!%p639_p3), %s652_s24, 3  ;;  %vm767_vm2 = vcmask (!%p639_p3), 97280   ;;  %v3996_v29 = vmov (!%p639_p3), 0.0   ;;  %vm3997_vm3 = vmmov (!%p639_p3), 0   ;;  %vm1186_vm4 = vcmask (!%p639_p3), 1031168  }
  0xd3   : > { %s4523_s23 = smul.u32 (!%p639_p3), 56, %s645_s30  ;;  %3767 = vset.pattern.permute.xlu0 (!%p639_p3), %v3987_v10  ;;  %3768 = vset.pattern.permute.xlu1 (!%p639_p3), %v3987_v10  ;;  %s3988_s17 = smov (!%p639_p3), 127   ;;  %v3781_v46 = vld [vmem:[%s4999_s2] sm:$0xff] (!%p639_p3)   ;;  %v2843_v48 = vld [vmem:[%s5000_s3 + $0x8] sm:$0xff] (!%p639_p3)  ;;  %vm1426_vm5 = vcmask (!%p639_p3), 719872   ;;  %v3782_v3 = vld [vmem:[%s4999_s2 + $0x10] sm:$0xff] (!%p639_p3)  }
  0xd4   : > { %s654_s15 = scalar_lea.vmem (!%p639_p3), [#allocation3], %s3276_s12  ;;  %s3989_s27 = smov (!%p639_p3), 126   ;;  %v2842_v47 = vld [vmem:[%s5000_s3] sm:$0xff] (!%p639_p3)  ;;  %vm1666_vm6 = vcmask (!%p639_p3), 711680   ;;  %vm1906_vm7 = vcmask (!%p639_p3), 703488   ;;  %vm2146_vm8 = vcmask (!%p639_p3), 392192  }
  0xd5   : > { %s647_s9 = scalar_lea.vmem (!%p639_p3), [#allocation2], %s4523_s23  ;;  %v4551_v18 = vld [vmem:[%s654_s15] sm:$0x3f] (!%p639_p3)   ;;  %s3990_s0 = smov (!%p639_p3), 88   ;;  %vm2386_vm9 = vcmask (!%p639_p3), 384000   ;;  %vm2626_vm10 = vcmask (!%p639_p3), 375808  }
  0xd6   : > { %v4531_v11 = vld [vmem:[%s647_s9 + $0x10] ss:$28 sps:$4 sm:$0x3f] (!%p639_p3)   ;;  %v4533_v12 = vld [vmem:[%s647_s9 + $0x8] ss:$28 sps:$4 sm:$0x3f] (!%p639_p3)  }
  0xd7   : > { %751 = vrot.lane.b32.xlu1 (!%p639_p3), %v4531_v11, %s3988_s17  ;;  %747 = vrot.lane.b32.xlu0 (!%p639_p3), %v4533_v12, %s3988_s17  ;;  %v4537_v13 = vld [vmem:[%s647_s9 + $0xc] ss:$28 sps:$4 sm:$0x3f] (!%p639_p3)   ;;  %v4539_v14 = vld [vmem:[%s647_s9] ss:$28 sps:$4 sm:$0x3f] (!%p639_p3)  }
  0xd8   : > { %v4542_v15 = vld [vmem:[%s647_s9 + $0x18] ss:$28 sps:$4 sm:$0x3f] (!%p639_p3)   ;;  %v4545_v16 = vld [vmem:[%s647_s9 + $0x4] ss:$28 sps:$4 sm:$0x3f] (!%p639_p3)  }
  0xd9   : > { %v4547_v17 = vld [vmem:[%s647_s9 + $0x14] ss:$28 sps:$4 sm:$0x3f]   ;;  %s3991_s7 = smov 87   ;;  %s3992_s25 = smov 86   ;;  %v978_v42 = vsel %vm771_vm1, %v4533_v12, 0 }
  0xda   : > { %s3993_s10 = smov 48   ;;  %s3994_s22 = smov 47   ;;  %v972_v44 = vsel %vm771_vm1, %v4539_v14, 0  ;;  %v990_v51 = vsel %vm771_vm1, %v4542_v15, 0  ;;  %v984_v54 = vsel %vm771_vm1, %v4531_v11, 0 }
  0xdb   : > { %743 = vrot.lane.b32.xlu1 %v4539_v14, %s3988_s17  ;;  %749 = vrot.lane.b32.xlu0 %v4537_v13, %s3988_s17  ;;  %s3995_s13 = smov 46   ;;  %s4940_s26 = scalar_lea.vmem [#allocation4], %s4523_s23 }
  0xdc   : > { %s5020_s23 = sadd.s32 (%p4078_p8), 4294967295, %s3919_s19  }
  0xdd   : > { %s3415_s8 = smul.u32 (%p4078_p8), 28, %s5020_s23 }
  0xdf   : > { %755 = vrot.lane.b32.xlu1 %v4542_v15, %s3988_s17  ;;  %745 = vrot.lane.b32.xlu0 %v4545_v16, %s3988_s17  ;;  %s3041_s28 = scalar_lea.vmem (%p4078_p8), %s5001_s4, %s3415_s8 }
  0xe3   : > { %753 = vrot.lane.b32.xlu1 %v4547_v17, %s3988_s17  ;;  %757 = vrot.lane.b32.xlu0 %v4551_v18, %s3988_s17 }
  0xe7   : > { %1176 = vrot.lane.b32.xlu1 %v4537_v13, %s3989_s27  ;;  %1174 = vrot.lane.b32.xlu0 %v4533_v12, %s3989_s27 }
  0xeb   : > { %1170 = vrot.lane.b32.xlu1 %v4539_v14, %s3989_s27  ;;  %1178 = vrot.lane.b32.xlu0 %v4531_v11, %s3989_s27 }
  0xef   : > { %1182 = vrot.lane.b32.xlu1 %v4542_v15, %s3989_s27  ;;  %1172 = vrot.lane.b32.xlu0 %v4545_v16, %s3989_s27 }
  0xf3   : > { %1180 = vrot.lane.b32.xlu1 %v4547_v17, %s3989_s27  ;;  %1184 = vrot.lane.b32.xlu0 %v4551_v18, %s3989_s27 }
  0xf7   : > { %1416 = vrot.lane.b32.xlu1 %v4537_v13, %s3990_s0  ;;  %1414 = vrot.lane.b32.xlu0 %v4533_v12, %s3990_s0 }
  0xfb   : > { %1410 = vrot.lane.b32.xlu1 %v4539_v14, %s3990_s0  ;;  %1418 = vrot.lane.b32.xlu0 %v4531_v11, %s3990_s0 }
  0xff   : > { %1422 = vrot.lane.b32.xlu1 %v4542_v15, %s3990_s0  ;;  %1412 = vrot.lane.b32.xlu0 %v4545_v16, %s3990_s0 }
 0x103   : > { %1420 = vrot.lane.b32.xlu1 %v4547_v17, %s3990_s0  ;;  %1424 = vrot.lane.b32.xlu0 %v4551_v18, %s3990_s0 }
 0x107   : > { %1656 = vrot.lane.b32.xlu1 %v4537_v13, %s3991_s7  ;;  %1654 = vrot.lane.b32.xlu0 %v4533_v12, %s3991_s7 }
 0x10b   : > { %1650 = vrot.lane.b32.xlu1 %v4539_v14, %s3991_s7  ;;  %1658 = vrot.lane.b32.xlu0 %v4531_v11, %s3991_s7 }
 0x10f   : > { %1662 = vrot.lane.b32.xlu1 %v4542_v15, %s3991_s7  ;;  %1652 = vrot.lane.b32.xlu0 %v4545_v16, %s3991_s7 }
 0x113   : > { %1660 = vrot.lane.b32.xlu1 %v4547_v17, %s3991_s7  ;;  %1664 = vrot.lane.b32.xlu0 %v4551_v18, %s3991_s7 }
 0x117   : > { %1896 = vrot.lane.b32.xlu1 %v4537_v13, %s3992_s25  ;;  %1894 = vrot.lane.b32.xlu0 %v4533_v12, %s3992_s25 }
 0x11b   : > { %1890 = vrot.lane.b32.xlu1 %v4539_v14, %s3992_s25  ;;  %1898 = vrot.lane.b32.xlu0 %v4531_v11, %s3992_s25 }
 0x11f   : > { %1902 = vrot.lane.b32.xlu1 %v4542_v15, %s3992_s25  ;;  %1892 = vrot.lane.b32.xlu0 %v4545_v16, %s3992_s25 }
 0x123   : > { %1900 = vrot.lane.b32.xlu1 %v4547_v17, %s3992_s25  ;;  %1904 = vrot.lane.b32.xlu0 %v4551_v18, %s3992_s25 }
 0x127   : > { %2136 = vrot.lane.b32.xlu1 %v4537_v13, %s3993_s10  ;;  %2134 = vrot.lane.b32.xlu0 %v4533_v12, %s3993_s10 }
 0x12b   : > { %2130 = vrot.lane.b32.xlu1 %v4539_v14, %s3993_s10  ;;  %2138 = vrot.lane.b32.xlu0 %v4531_v11, %s3993_s10 }
 0x12f   : > { %2142 = vrot.lane.b32.xlu1 %v4542_v15, %s3993_s10  ;;  %2132 = vrot.lane.b32.xlu0 %v4545_v16, %s3993_s10 }
 0x133   : > { %2140 = vrot.lane.b32.xlu1 %v4547_v17, %s3993_s10  ;;  %2144 = vrot.lane.b32.xlu0 %v4551_v18, %s3993_s10 }
 0x137   : > { %2376 = vrot.lane.b32.xlu1 %v4537_v13, %s3994_s22  ;;  %2374 = vrot.lane.b32.xlu0 %v4533_v12, %s3994_s22 }
 0x13b   : > { %2370 = vrot.lane.b32.xlu1 %v4539_v14, %s3994_s22  ;;  %2378 = vrot.lane.b32.xlu0 %v4531_v11, %s3994_s22 }
 0x13f   : > { %2382 = vrot.lane.b32.xlu1 %v4542_v15, %s3994_s22  ;;  %2372 = vrot.lane.b32.xlu0 %v4545_v16, %s3994_s22 }
 0x143   : > { %2380 = vrot.lane.b32.xlu1 %v4547_v17, %s3994_s22  ;;  %2384 = vrot.lane.b32.xlu0 %v4551_v18, %s3994_s22 }
 0x147   : > { %2616 = vrot.lane.b32.xlu1 %v4537_v13, %s3995_s13  ;;  %2614 = vrot.lane.b32.xlu0 %v4533_v12, %s3995_s13 }
 0x149   : > { %v752_v19 = vpop.permute.xlu1 %751  ;;  %v748_v20 = vpop.permute.xlu0 %747 }
 0x14b   : > { %2610 = vrot.lane.b32.xlu1 %v4539_v14, %s3995_s13  ;;  %2618 = vrot.lane.b32.xlu0 %v4531_v11, %s3995_s13 }
 0x14d   : > { %v744_v21 = vpop.permute.xlu1 %743  ;;  %v750_v22 = vpop.permute.xlu0 %749 }
 0x14e   : > { %v763_v23 = vsel %vm759_vm0, %v750_v22, %v752_v19  ;;  %v762_v24 = vsel %vm759_vm0, %v748_v20, %v750_v22 }
 0x14f   : > { %2622 = vrot.lane.b32.xlu1 %v4542_v15, %s3995_s13  ;;  %3290 = vmatprep.subr.msk.bf16.mxu1 %vm771_vm1, %v763_v23  ;;  %v779_v25 = vsel %vm771_vm1, %v762_v24, 0  ;;  %v3783_v24 = vld [vmem:[%s4999_s2 + $0x18] sm:$0xff]  }
 0x150   : > { %2612 = vrot.lane.b32.xlu0 %v4545_v16, %s3995_s13  ;;  %837 = vmatpush1.bf16.msra.mxu1 %v779_v25 }
 0x151   : > { %v756_v27 = vpop.permute.xlu1 %755  ;;  %v746_v28 = vpop.permute.xlu0 %745  ;;  %3434 = vmatprep.subr.bf16.mxu1 %v3996_v29 }
 0x152   : > { %v761_v30 = vsel %vm759_vm0, %v746_v28, %v748_v20  ;;  %v760_v31 = vsel %vm759_vm0, %v744_v21, %v746_v28 }
 0x153   : > { %2620 = vrot.lane.b32.xlu1 %v4547_v17, %s3995_s13  ;;  %3288 = vmatprep.subr.msk.bf16.mxu0 %vm771_vm1, %v761_v30  ;;  %v773_v32 = vsel %vm771_vm1, %v760_v31, 0 }
 0x154   : > { %3291 = vmatmul.mubr.msk.bf16.vlgmr.msra.gmra.mrb[0].mxu1 %vm767_vm2, %v3780_v26  ;;  %794 = vmatpush1.bf16.msra.mxu0 %v773_v32 }
 0x155   : > { %v754_v33 = vpop.permute.xlu1 %753  ;;  %3436 = vmatprep.mubr.msk.bf16.mxu1 %vm3997_vm3, %v3996_v29  ;;  %v758_v34 = vpop.permute.xlu0 %757  ;;  %2624 = vrot.lane.b32.xlu0 %v4551_v18, %s3995_s13 }
 0x156   : > { %v764_v35 = vsel %vm759_vm0, %v752_v19, %v754_v33  ;;  %v765_v36 = vsel %vm759_vm0, %v754_v33, %v756_v27  ;;  %v766_v37 = vsel %vm759_vm0, %v756_v27, %v758_v34 }
 0x157   : > { %v785_v38 = vsel %vm771_vm1, %v764_v35, 0  ;;  %3292 = vmatprep.subr.msk.bf16.mxu0 %vm771_vm1, %v765_v36  ;;  %v791_v39 = vsel %vm771_vm1, %v766_v37, 0  ;;  %3289 = vmatmul.mubr.msk.bf16.vlgmr.msra.gmra.mrb[0].mxu0 %vm767_vm2, %v3780_v26 }
 0x158   : > { %880 = vmatpush1.bf16.msra.mxu0 %v785_v38  ;;  %3435 = vmatpush3.bf16.msra.mxu1 %v791_v39 }
 0x159   : > { %v1177_v40 = vpop.permute.xlu1 %1176  ;;  %v1175_v41 = vpop.permute.xlu0 %1174  ;;  %911 = vmatprep.mubr.bf16.mxu0 %v3987_v10  ;;  %3298 = vmatprep.subr.msk.bf16.mxu1 %vm771_vm1, %v4537_v13 }
 0x15a   : > { %3296 = vmatprep.subr.msk.bf16.mxu0 %vm771_vm1, %v4545_v16  ;;  %2846 = vperm.xlu0 %3767, %v2842_v47   ;;  %v1189_v56 = vsel %vm1186_vm4, %v1175_v41, %v1177_v40 }
 0x15b   : > { %2851 = vperm.xlu1 %3768, %v2843_v48   ;;  %v1204_v59 = vsel %vm771_vm1, %v1189_v56, 0 }
 0x15c   : > { %3437 = vmatmul.mubr.msk.bf16.vlgmr.msra.gmra.mrb[4].mxu1 %vm767_vm2, %v3780_v26 }
 0x15d   : > { %1036 = vmatpush1.bf16.msra.mxu1 %v978_v42  ;;  %1067 = vmatprep.mubr.bf16.mxu1 %v3987_v10  ;;  %v1171_v43 = vpop.permute.xlu1 %1170  ;;  %v1179_v45 = vpop.permute.xlu0 %1178 }
 0x15e   : > { %3440 = vmatprep.subr.bf16.mxu1 %v3996_v29  ;;  %v1190_v52 = vsel %vm1186_vm4, %v1177_v40, %v1179_v45 }
 0x15f   : > { %3293 = vmatmul.mubr.msk.bf16.vlgmr.msra.gmra.mrb[4].mxu0 %vm767_vm2, %v3780_v26 }
 0x160   : > { %993 = vmatpush1.bf16.msra.mxu0 %v972_v44  ;;  %1024 = vmatprep.mubr.bf16.mxu0 %v3987_v10 }
 0x161   : > { %v1183_v49 = vpop.permute.xlu1 %1182  ;;  %v1173_v50 = vpop.permute.xlu0 %1172  ;;  %3300 = vmatprep.subr.msk.bf16.mxu0 %vm771_vm1, %v4547_v17 }
 0x162   : > { %v1188_v57 = vsel %vm1186_vm4, %v1173_v50, %v1175_v41  ;;  %v1187_v61 = vsel %vm1186_vm4, %v1171_v43, %v1173_v50 }
 0x163   : > { %v1198_v63 = vsel %vm771_vm1, %v1187_v61, 0 }
 0x164   : > { %3299 = vmatmul.mubr.msk.bf16.vlgmr.msra.gmra.mrb[0].mxu1 %vm767_vm2, %v3781_v46 }
 0x165   : > { %3441 = vmatpush3.bf16.msra.mxu1 %v990_v51  ;;  %3442 = vmatprep.mubr.msk.bf16.mxu1 %vm3997_vm3, %v3996_v29  ;;  %v1181_v53 = vpop.permute.xlu1 %1180  ;;  %v1185_v55 = vpop.permute.xlu0 %1184 }
 0x166   : > { %3308 = vmatprep.subr.msk.bf16.mxu1 %vm771_vm1, %v1190_v52  ;;  %v1193_v1 = vsel %vm1186_vm4, %v1183_v49, %v1185_v55  ;;  %v1192_v2 = vsel %vm1186_vm4, %v1181_v53, %v1183_v49  ;;  %v1191_v8 = vsel %vm1186_vm4, %v1179_v45, %v1181_v53  ;;  %v3784_v45 = vld [vmem:[%s4999_s2 + $0x20] sm:$0xff]  }
 0x167   : > { %3297 = vmatmul.mubr.msk.bf16.vlgmr.msra.gmra.mrb[0].mxu0 %vm767_vm2, %v3781_v46  ;;  %v1216_v5 = vsel %vm771_vm1, %v1193_v1, 0  ;;  %v1210_v14 = vsel %vm771_vm1, %v1191_v8, 0  ;;  %v3785_v1 = vld [vmem:[%s4999_s2 + $0x28] sm:$0xff]  }
 0x168   : > { %1079 = vmatpush1.bf16.msra.mxu0 %v984_v54  ;;  %1110 = vmatprep.mubr.bf16.mxu0 %v3987_v10 }
 0x169   : > { %v1417_v58 = vpop.permute.xlu1 %1416  ;;  %3306 = vmatprep.subr.msk.bf16.mxu0 %vm771_vm1, %v1188_v57  ;;  %v1415_v60 = vpop.permute.xlu0 %1414 }
 0x16a   : > { %v1429_v12 = vsel %vm1426_vm5, %v1415_v60, %v1417_v58 }
 0x16b   : > { %v1444_v16 = vsel %vm771_vm1, %v1429_v12, 0 }
 0x16c   : > { %3443 = vmatmul.mubr.msk.bf16.vlgmr.msra.gmra.mrb[8].mxu1 %vm767_vm2, %v3781_v46 }
 0x16d   : > { %1262 = vmatpush1.bf16.msra.mxu1 %v1204_v59  ;;  %1293 = vmatprep.mubr.bf16.mxu1 %v3987_v10  ;;  %v1411_v62 = vpop.permute.xlu1 %1410  ;;  %v1419_v0 = vpop.permute.xlu0 %1418 }
 0x16e   : > { %3446 = vmatprep.subr.bf16.mxu1 %v3996_v29  ;;  %v1430_v7 = vsel %vm1426_vm5, %v1417_v58, %v1419_v0 }
 0x16f   : > { %3301 = vmatmul.mubr.msk.bf16.vlgmr.msra.gmra.mrb[4].mxu0 %vm767_vm2, %v3781_v46 }
 0x170   : > { %1219 = vmatpush1.bf16.msra.mxu0 %v1198_v63  ;;  %1250 = vmatprep.mubr.bf16.mxu0 %v3987_v10 }
 0x171   : > { %v1423_v4 = vpop.permute.xlu1 %1422  ;;  %3310 = vmatprep.subr.msk.bf16.mxu0 %vm771_vm1, %v1192_v2  ;;  %v1413_v6 = vpop.permute.xlu0 %1412 }
 0x172   : > { %v1428_v13 = vsel %vm1426_vm5, %v1413_v6, %v1415_v60  ;;  %v1427_v18 = vsel %vm1426_vm5, %v1411_v62, %v1413_v6 }
 0x173   : > { %v1438_v20 = vsel %vm771_vm1, %v1427_v18, 0 }
 0x174   : > { %3309 = vmatmul.mubr.msk.bf16.vlgmr.msra.gmra.mrb[0].mxu1 %vm767_vm2, %v3782_v3 }
 0x175   : > { %3447 = vmatpush3.bf16.msra.mxu1 %v1216_v5  ;;  %3448 = vmatprep.mubr.msk.bf16.mxu1 %vm3997_vm3, %v3996_v29  ;;  %v1421_v9 = vpop.permute.xlu1 %1420  ;;  %v1425_v11 = vpop.permute.xlu0 %1424 }
 0x176   : > { %3318 = vmatprep.subr.msk.bf16.mxu1 %vm771_vm1, %v1430_v7  ;;  %v1433_v22 = vsel %vm1426_vm5, %v1423_v4, %v1425_v11  ;;  %v1432_v23 = vsel %vm1426_vm5, %v1421_v9, %v1423_v4  ;;  %v1431_v30 = vsel %vm1426_vm5, %v1419_v0, %v1421_v9 }
 0x177   : > { %3307 = vmatmul.mubr.msk.bf16.vlgmr.msra.gmra.mrb[0].mxu0 %vm767_vm2, %v3782_v3  ;;  %v1456_v26 = vsel %vm771_vm1, %v1433_v22, 0  ;;  %v1450_v35 = vsel %vm771_vm1, %v1431_v30, 0  ;;  %v3786_v22 = vld [vmem:[%s4999_s2 + $0x30] sm:$0xff]  }
 0x178   : > { %1305 = vmatpush1.bf16.msra.mxu0 %v1210_v14  ;;  %1336 = vmatprep.mubr.bf16.mxu0 %v3987_v10 }
 0x179   : > { %v1657_v15 = vpop.permute.xlu1 %1656  ;;  %3316 = vmatprep.subr.msk.bf16.mxu0 %vm771_vm1, %v1428_v13  ;;  %v1655_v17 = vpop.permute.xlu0 %1654 }
 0x17a   : > { %v1669_v33 = vsel %vm1666_vm6, %v1655_v17, %v1657_v15 }
 0x17b   : > { %v1684_v37 = vsel %vm771_vm1, %v1669_v33, 0 }
 0x17c   : > { %3449 = vmatmul.mubr.msk.bf16.vlgmr.msra.gmra.mrb[12].mxu1 %vm767_vm2, %v3782_v3 }
 0x17d   : > { %1502 = vmatpush1.bf16.msra.mxu1 %v1444_v16  ;;  %1533 = vmatprep.mubr.bf16.mxu1 %v3987_v10  ;;  %v1651_v19 = vpop.permute.xlu1 %1650  ;;  %v1659_v21 = vpop.permute.xlu0 %1658 }
 0x17e   : > { %3452 = vmatprep.subr.bf16.mxu1 %v3996_v29  ;;  %v1670_v28 = vsel %vm1666_vm6, %v1657_v15, %v1659_v21 }
 0x17f   : > { %3311 = vmatmul.mubr.msk.bf16.vlgmr.msra.gmra.mrb[4].mxu0 %vm767_vm2, %v3782_v3 }
 0x180   : > { %1459 = vmatpush1.bf16.msra.mxu0 %v1438_v20  ;;  %1490 = vmatprep.mubr.bf16.mxu0 %v3987_v10 }
 0x181   : > { %v1663_v25 = vpop.permute.xlu1 %1662  ;;  %3320 = vmatprep.subr.msk.bf16.mxu0 %vm771_vm1, %v1432_v23  ;;  %v1653_v27 = vpop.permute.xlu0 %1652 }
 0x182   : > { %v1668_v34 = vsel %vm1666_vm6, %v1653_v27, %v1655_v17  ;;  %v1667_v39 = vsel %vm1666_vm6, %v1651_v19, %v1653_v27 }
 0x183   : > { %v1678_v41 = vsel %vm771_vm1, %v1667_v39, 0 }
 0x184   : > { %3319 = vmatmul.mubr.msk.bf16.vlgmr.msra.gmra.mrb[0].mxu1 %vm767_vm2, %v3783_v24 }
 0x185   : > { %3453 = vmatpush3.bf16.msra.mxu1 %v1456_v26  ;;  %3454 = vmatprep.mubr.msk.bf16.mxu1 %vm3997_vm3, %v3996_v29  ;;  %v1661_v31 = vpop.permute.xlu1 %1660  ;;  %v1665_v32 = vpop.permute.xlu0 %1664 }
 0x186   : > { %3328 = vmatprep.subr.msk.bf16.mxu1 %vm771_vm1, %v1670_v28  ;;  %v1673_v43 = vsel %vm1666_vm6, %v1663_v25, %v1665_v32  ;;  %v1672_v44 = vsel %vm1666_vm6, %v1661_v31, %v1663_v25  ;;  %v1671_v50 = vsel %vm1666_vm6, %v1659_v21, %v1661_v31 }
 0x187   : > { %3317 = vmatmul.mubr.msk.bf16.vlgmr.msra.gmra.mrb[0].mxu0 %vm767_vm2, %v3783_v24  ;;  %v1696_v47 = vsel %vm771_vm1, %v1673_v43, 0  ;;  %v1690_v55 = vsel %vm771_vm1, %v1671_v50, 0 }
 0x188   : > { %1545 = vmatpush1.bf16.msra.mxu0 %v1450_v35  ;;  %1576 = vmatprep.mubr.bf16.mxu0 %v3987_v10 }
 0x189   : > { %v1897_v36 = vpop.permute.xlu1 %1896  ;;  %3326 = vmatprep.subr.msk.bf16.mxu0 %vm771_vm1, %v1668_v34  ;;  %v1895_v38 = vpop.permute.xlu0 %1894 }
 0x18a   : > { %v1909_v53 = vsel %vm1906_vm7, %v1895_v38, %v1897_v36 }
 0x18b   : > { %v1924_v57 = vsel %vm771_vm1, %v1909_v53, 0 }
 0x18c   : > { %3455 = vmatmul.mubr.msk.bf16.vlgmr.msra.gmra.mrb[16].mxu1 %vm767_vm2, %v3783_v24 }
 0x18d   : > { %1742 = vmatpush1.bf16.msra.mxu1 %v1684_v37  ;;  %1773 = vmatprep.mubr.bf16.mxu1 %v3987_v10  ;;  %v1891_v40 = vpop.permute.xlu1 %1890  ;;  %v1899_v42 = vpop.permute.xlu0 %1898 }
 0x18e   : > { %3458 = vmatprep.subr.bf16.mxu1 %v3996_v29  ;;  %v1910_v49 = vsel %vm1906_vm7, %v1897_v36, %v1899_v42 }
 0x18f   : > { %3321 = vmatmul.mubr.msk.bf16.vlgmr.msra.gmra.mrb[4].mxu0 %vm767_vm2, %v3783_v24 }
 0x190   : > { %1699 = vmatpush1.bf16.msra.mxu0 %v1678_v41  ;;  %1730 = vmatprep.mubr.bf16.mxu0 %v3987_v10 }
 0x191   : > { %v1903_v46 = vpop.permute.xlu1 %1902  ;;  %3330 = vmatprep.subr.msk.bf16.mxu0 %vm771_vm1, %v1672_v44  ;;  %v1893_v48 = vpop.permute.xlu0 %1892 }
 0x192   : > { %v1908_v54 = vsel %vm1906_vm7, %v1893_v48, %v1895_v38  ;;  %v1907_v59 = vsel %vm1906_vm7, %v1891_v40, %v1893_v48 }
 0x193   : > { %v1918_v61 = vsel %vm771_vm1, %v1907_v59, 0  ;;  %v3788_v59 = vld [vmem:[%s4999_s2 + $0x40] sm:$0xff]  }
 0x194   : > { %3329 = vmatmul.mubr.msk.bf16.vlgmr.msra.gmra.mrb[0].mxu1 %vm767_vm2, %v3784_v45 }
 0x195   : > { %3459 = vmatpush3.bf16.msra.mxu1 %v1696_v47  ;;  %3460 = vmatprep.mubr.msk.bf16.mxu1 %vm3997_vm3, %v3996_v29  ;;  %v1901_v51 = vpop.permute.xlu1 %1900  ;;  %v1905_v52 = vpop.permute.xlu0 %1904 }
 0x196   : > { %3338 = vmatprep.subr.msk.bf16.mxu1 %vm771_vm1, %v1910_v49  ;;  %v1913_v63 = vsel %vm1906_vm7, %v1903_v46, %v1905_v52  ;;  %v1912_v0 = vsel %vm1906_vm7, %v1901_v51, %v1903_v46  ;;  %v1911_v6 = vsel %vm1906_vm7, %v1899_v42, %v1901_v51  ;;  %v3787_v42 = vld [vmem:[%s4999_s2 + $0x38] sm:$0xff]  }
 0x197   : > { %3327 = vmatmul.mubr.msk.bf16.vlgmr.msra.gmra.mrb[0].mxu0 %vm767_vm2, %v3784_v45  ;;  %v1936_v3 = vsel %vm771_vm1, %v1913_v63, 0  ;;  %v1930_v12 = vsel %vm771_vm1, %v1911_v6, 0 }
 0x198   : > { %1785 = vmatpush1.bf16.msra.mxu0 %v1690_v55  ;;  %1816 = vmatprep.mubr.bf16.mxu0 %v3987_v10 }
 0x199   : > { %v2137_v56 = vpop.permute.xlu1 %2136  ;;  %3336 = vmatprep.subr.msk.bf16.mxu0 %vm771_vm1, %v1908_v54  ;;  %v2135_v58 = vpop.permute.xlu0 %2134 }
 0x19a   : > { %v2149_v9 = vsel %vm2146_vm8, %v2135_v58, %v2137_v56 }
 0x19b   : > { %v2164_v14 = vsel %vm771_vm1, %v2149_v9, 0 }
 0x19c   : > { %3461 = vmatmul.mubr.msk.bf16.vlgmr.msra.gmra.mrb[20].mxu1 %vm767_vm2, %v3784_v45 }
 0x19d   : > { %1982 = vmatpush1.bf16.msra.mxu1 %v1924_v57  ;;  %2013 = vmatprep.mubr.bf16.mxu1 %v3987_v10  ;;  %v2131_v60 = vpop.permute.xlu1 %2130  ;;  %v2139_v62 = vpop.permute.xlu0 %2138 }
 0x19e   : > { %3464 = vmatprep.subr.bf16.mxu1 %v3996_v29  ;;  %v2150_v5 = vsel %vm2146_vm8, %v2137_v56, %v2139_v62 }
 0x19f   : > { %3331 = vmatmul.mubr.msk.bf16.vlgmr.msra.gmra.mrb[4].mxu0 %vm767_vm2, %v3784_v45 }
 0x1a0   : > { %1939 = vmatpush1.bf16.msra.mxu0 %v1918_v61  ;;  %1970 = vmatprep.mubr.bf16.mxu0 %v3987_v10 }
 0x1a1   : > { %v2143_v2 = vpop.permute.xlu1 %2142  ;;  %3340 = vmatprep.subr.msk.bf16.mxu0 %vm771_vm1, %v1912_v0  ;;  %v2133_v4 = vpop.permute.xlu0 %2132 }
 0x1a2   : > { %v2148_v11 = vsel %vm2146_vm8, %v2133_v4, %v2135_v58  ;;  %v2147_v16 = vsel %vm2146_vm8, %v2131_v60, %v2133_v4 }
 0x1a3   : > { %v2158_v18 = vsel %vm771_vm1, %v2147_v16, 0 }
 0x1a4   : > { %3339 = vmatmul.mubr.msk.bf16.vlgmr.msra.gmra.mrb[0].mxu1 %vm767_vm2, %v3785_v1 }
 0x1a5   : > { %3465 = vmatpush3.bf16.msra.mxu1 %v1936_v3  ;;  %3466 = vmatprep.mubr.msk.bf16.mxu1 %vm3997_vm3, %v3996_v29  ;;  %v2141_v7 = vpop.permute.xlu1 %2140  ;;  %v2145_v8 = vpop.permute.xlu0 %2144 }
 0x1a6   : > { %3348 = vmatprep.subr.msk.bf16.mxu1 %vm771_vm1, %v2150_v5  ;;  %v2153_v20 = vsel %vm2146_vm8, %v2143_v2, %v2145_v8  ;;  %v2152_v21 = vsel %vm2146_vm8, %v2141_v7, %v2143_v2  ;;  %v2151_v27 = vsel %vm2146_vm8, %v2139_v62, %v2141_v7 }
 0x1a7   : > { %3337 = vmatmul.mubr.msk.bf16.vlgmr.msra.gmra.mrb[0].mxu0 %vm767_vm2, %v3785_v1  ;;  %v2176_v24 = vsel %vm771_vm1, %v2153_v20, 0  ;;  %v2170_v33 = vsel %vm771_vm1, %v2151_v27, 0 }
 0x1a8   : > { %2025 = vmatpush1.bf16.msra.mxu0 %v1930_v12  ;;  %2056 = vmatprep.mubr.bf16.mxu0 %v3987_v10 }
 0x1a9   : > { %v2377_v13 = vpop.permute.xlu1 %2376  ;;  %3346 = vmatprep.subr.msk.bf16.mxu0 %vm771_vm1, %v2148_v11  ;;  %v2375_v15 = vpop.permute.xlu0 %2374 }
 0x1aa   : > { %v2389_v31 = vsel %vm2386_vm9, %v2375_v15, %v2377_v13 }
 0x1ab   : > { %v2404_v34 = vsel %vm771_vm1, %v2389_v31, 0 }
 0x1ac   : > { %3467 = vmatmul.mubr.msk.bf16.vlgmr.msra.gmra.mrb[24].mxu1 %vm767_vm2, %v3785_v1 }
 0x1ad   : > { %2222 = vmatpush1.bf16.msra.mxu1 %v2164_v14  ;;  %2253 = vmatprep.mubr.bf16.mxu1 %v3987_v10  ;;  %v2371_v17 = vpop.permute.xlu1 %2370  ;;  %v2379_v19 = vpop.permute.xlu0 %2378 }
 0x1ae   : > { %3470 = vmatprep.subr.bf16.mxu1 %v3996_v29  ;;  %v2390_v26 = vsel %vm2386_vm9, %v2377_v13, %v2379_v19 }
 0x1af   : > { %3341 = vmatmul.mubr.msk.bf16.vlgmr.msra.gmra.mrb[4].mxu0 %vm767_vm2, %v3785_v1 }
 0x1b0   : > { %2179 = vmatpush1.bf16.msra.mxu0 %v2158_v18  ;;  %2210 = vmatprep.mubr.bf16.mxu0 %v3987_v10 }
 0x1b1   : > { %v2383_v23 = vpop.permute.xlu1 %2382  ;;  %3350 = vmatprep.subr.msk.bf16.mxu0 %vm771_vm1, %v2152_v21  ;;  %v2373_v25 = vpop.permute.xlu0 %2372 }
 0x1b2   : > { %v2388_v32 = vsel %vm2386_vm9, %v2373_v25, %v2375_v15  ;;  %v2387_v36 = vsel %vm2386_vm9, %v2371_v17, %v2373_v25 }
 0x1b3   : > { %v2398_v38 = vsel %vm771_vm1, %v2387_v36, 0 }
 0x1b4   : > { %3349 = vmatmul.mubr.msk.bf16.vlgmr.msra.gmra.mrb[0].mxu1 %vm767_vm2, %v3786_v22 }
 0x1b5   : > { %3471 = vmatpush3.bf16.msra.mxu1 %v2176_v24  ;;  %3472 = vmatprep.mubr.msk.bf16.mxu1 %vm3997_vm3, %v3996_v29  ;;  %v2385_v28 = vpop.permute.xlu0 %2384  ;;  %v2381_v30 = vpop.permute.xlu1 %2380 }
 0x1b6   : > { %3358 = vmatprep.subr.msk.bf16.mxu1 %vm771_vm1, %v2390_v26  ;;  %v2393_v40 = vsel %vm2386_vm9, %v2383_v23, %v2385_v28  ;;  %v2392_v41 = vsel %vm2386_vm9, %v2381_v30, %v2383_v23  ;;  %v2391_v47 = vsel %vm2386_vm9, %v2379_v19, %v2381_v30 }
 0x1b7   : > { %3347 = vmatmul.mubr.msk.bf16.vlgmr.msra.gmra.mrb[0].mxu0 %vm767_vm2, %v3786_v22  ;;  %v2416_v43 = vsel %vm771_vm1, %v2393_v40, 0  ;;  %v2410_v50 = vsel %vm771_vm1, %v2391_v47, 0 }
 0x1b8   : > { %2265 = vmatpush1.bf16.msra.mxu0 %v2170_v33  ;;  %2296 = vmatprep.mubr.bf16.mxu0 %v3987_v10 }
 0x1b9   : > { %3356 = vmatprep.subr.msk.bf16.mxu0 %vm771_vm1, %v2388_v32  ;;  %v2615_v35 = vpop.permute.xlu0 %2614  ;;  %v2617_v37 = vpop.permute.xlu1 %2616 }
 0x1ba   : > { %v2629_v48 = vsel %vm2626_vm10, %v2615_v35, %v2617_v37 }
 0x1bb   : > { %v2644_v52 = vsel %vm771_vm1, %v2629_v48, 0 }
 0x1bc   : > { %3473 = vmatmul.mubr.msk.bf16.vlgmr.msra.gmra.mrb[28].mxu1 %vm767_vm2, %v3786_v22 }
 0x1bd   : > { %2462 = vmatpush1.bf16.msra.mxu1 %v2404_v34  ;;  %2493 = vmatprep.mubr.bf16.mxu1 %v3987_v10  ;;  %v2619_v39 = vpop.permute.xlu0 %2618  ;;  %v2611_v44 = vpop.permute.xlu1 %2610 }
 0x1be   : > { %3476 = vmatprep.subr.bf16.mxu1 %v3996_v29  ;;  %v2630_v45 = vsel %vm2626_vm10, %v2617_v37, %v2619_v39 }
 0x1bf   : > { %3351 = vmatmul.mubr.msk.bf16.vlgmr.msra.gmra.mrb[4].mxu0 %vm767_vm2, %v3786_v22 }
 0x1c0   : > { %2419 = vmatpush1.bf16.msra.mxu0 %v2398_v38  ;;  %2450 = vmatprep.mubr.bf16.mxu0 %v3987_v10 }
 0x1c1   : > { %3360 = vmatprep.subr.msk.bf16.mxu0 %vm771_vm1, %v2392_v41  ;;  %v2623_v51 = vpop.permute.xlu1 %2622 }
 0x1c2   : > { %v2613_v46 = vpop.permute.xlu0 %2612 }
 0x1c3   : > { %v2628_v49 = vsel %vm2626_vm10, %v2613_v46, %v2615_v35  ;;  %v2627_v53 = vsel %vm2626_vm10, %v2611_v44, %v2613_v46 }
 0x1c4   : > { %3359 = vmatmul.mubr.msk.bf16.vlgmr.msra.gmra.mrb[0].mxu1 %vm767_vm2, %v3787_v42  ;;  %v2638_v55 = vsel %vm771_vm1, %v2627_v53, 0 }
 0x1c5   : > { %3477 = vmatpush3.bf16.msra.mxu1 %v2416_v43  ;;  %3478 = vmatprep.mubr.msk.bf16.mxu1 %vm3997_vm3, %v3996_v29  ;;  %v2621_v56 = vpop.permute.xlu1 %2620 }
 0x1c6   : > { %3368 = vmatprep.subr.msk.bf16.mxu1 %vm771_vm1, %v2630_v45  ;;  %v2632_v57 = vsel %vm2626_vm10, %v2621_v56, %v2623_v51  ;;  %v2631_v61 = vsel %vm2626_vm10, %v2619_v39, %v2621_v56 }
 0x1c7   : > { %3357 = vmatmul.mubr.msk.bf16.vlgmr.msra.gmra.mrb[0].mxu0 %vm767_vm2, %v3787_v42  ;;  %v2625_v54 = vpop.permute.xlu0 %2624  ;;  %v2650_v62 = vsel %vm771_vm1, %v2631_v61, 0 }
 0x1c8   : > { %2505 = vmatpush1.bf16.msra.mxu0 %v2410_v50  ;;  %2536 = vmatprep.mubr.bf16.mxu0 %v3987_v10  ;;  %v2633_v58 = vsel %vm2626_vm10, %v2623_v51, %v2625_v54 }
 0x1c9   : > { %3366 = vmatprep.subr.msk.bf16.mxu0 %vm771_vm1, %v2628_v49  ;;  %v2656_v60 = vsel %vm771_vm1, %v2633_v58, 0 }
 0x1cc   : > { %3479 = vmatmul.mubr.msk.bf16.vlgmr.msra.gmra.mrb[32].mxu1 %vm767_vm2, %v3787_v42 }
 0x1cd   : > { %2702 = vmatpush1.bf16.msra.mxu1 %v2644_v52  ;;  %2733 = vmatprep.mubr.bf16.mxu1 %v3987_v10 }
 0x1ce   : > { %3482 = vmatprep.subr.bf16.mxu1 %v3996_v29 }
 0x1cf   : > { %3361 = vmatmul.mubr.msk.bf16.vlgmr.msra.gmra.mrb[4].mxu0 %vm767_vm2, %v3787_v42 }
 0x1d0   : > { %2659 = vmatpush1.bf16.msra.mxu0 %v2638_v55  ;;  %2690 = vmatprep.mubr.bf16.mxu0 %v3987_v10 }
 0x1d1   : > { %3370 = vmatprep.subr.msk.bf16.mxu0 %vm771_vm1, %v2632_v57 }
 0x1d4   : > { %3369 = vmatmul.mubr.msk.bf16.vlgmr.msra.gmra.mrb[0].mxu1 %vm767_vm2, %v3788_v59 }
 0x1d5   : > { %3483 = vmatpush3.bf16.msra.mxu1 %v2656_v60  ;;  %3484 = vmatprep.mubr.msk.bf16.mxu1 %vm3997_vm3, %v3996_v29 }
 0x1d7   : > { %3367 = vmatmul.mubr.msk.bf16.vlgmr.msra.gmra.mrb[0].mxu0 %vm767_vm2, %v3788_v59 }
 0x1d8   : > { %2745 = vmatpush1.bf16.msra.mxu0 %v2650_v62  ;;  %2776 = vmatprep.mubr.bf16.mxu0 %v3987_v10 }
 0x1d9   : > { %v2847_v45 = vpop.permute.xlu0 %2846 }
 0x1da   : > { %v4866_v47 = vpop.permute.xlu1 %2851 }
 0x1dc   : > { %3485 = vmatmul.mubr.msk.bf16.vlgmr.msra.gmra.mrb[36].mxu1 %vm767_vm2, %v3788_v59 }
 0x1df   : > { %3371 = vmatmul.mubr.msk.bf16.vlgmr.msra.gmra.mrb[4].mxu0 %vm767_vm2, %v3788_v59 }
 0x22f   : > { %v956_v63 = vpop.f32.mrb[4].mxu1 }
 0x230   : > { %v3438_v0 = vpop.f32.mrb[5].mxu1 }
 0x231   : > { %v959_v1 = vpop.f32.mrb[6].mxu1 }
 0x232   : > { %v3439_v2 = vpop.f32.mrb[7].mxu1 }
 0x23f   : > { %v1155_v3 = vpop.f32.mrb[8].mxu1 }
 0x240   : > { %v1156_v4 = vadd.f32 %v1155_v3, %v956_v63  ;;  %v3444_v5 = vpop.f32.mrb[9].mxu1 }
 0x241   : > { %v1158_v6 = vpop.f32.mrb[10].mxu1 }
 0x242   : > { %v1159_v29 = vadd.f32 %v1158_v6, %v959_v1  ;;  %v3445_v7 = vpop.f32.mrb[11].mxu1 }
 0x24f   : > { %v1381_v8 = vpop.f32.mrb[12].mxu1 }
 0x250   : > { %v1394_v9 = vadd.f32 %v1381_v8, %v1156_v4  ;;  %v3450_v11 = vpop.f32.mrb[13].mxu1 }
 0x251   : > { %v1384_v12 = vpop.f32.mrb[14].mxu1 }
 0x252   : > { %v1401_v13 = vadd.f32 %v1384_v12, %v1159_v29  ;;  %v3451_v10 = vpop.f32.mrb[15].mxu1 }
 0x25f   : > { %v1621_v14 = vpop.f32.mrb[16].mxu1 }
 0x260   : > { %v1634_v15 = vadd.f32 %v1621_v14, %v1394_v9  ;;  %v3456_v16 = vpop.f32.mrb[17].mxu1 }
 0x261   : > { %v1624_v17 = vpop.f32.mrb[18].mxu1 }
 0x262   : > { %v1641_v18 = vadd.f32 %v1624_v17, %v1401_v13  ;;  %v3457_v19 = vpop.f32.mrb[19].mxu1 }
 0x26f   : > { %v1861_v20 = vpop.f32.mrb[20].mxu1 }
 0x270   : > { %v1874_v21 = vadd.f32 %v1861_v20, %v1634_v15  ;;  %v3462_v22 = vpop.f32.mrb[21].mxu1 }
 0x271   : > { %v1864_v23 = vpop.f32.mrb[22].mxu1 }
 0x272   : > { %v1881_v24 = vadd.f32 %v1864_v23, %v1641_v18  ;;  %v3463_v25 = vpop.f32.mrb[23].mxu1 }
 0x27f   : > { %v2101_v26 = vpop.f32.mrb[24].mxu1 }
 0x280   : > { %v2114_v27 = vadd.f32 %v2101_v26, %v1874_v21  ;;  %v3468_v28 = vpop.f32.mrb[25].mxu1 }
 0x281   : > { %v2104_v30 = vpop.f32.mrb[26].mxu1 }
 0x282   : > { %v2121_v31 = vadd.f32 %v2104_v30, %v1881_v24  ;;  %v3469_v32 = vpop.f32.mrb[27].mxu1 }
 0x28f   : > { %v2341_v33 = vpop.f32.mrb[28].mxu1 }
 0x290   : > { %v2354_v34 = vadd.f32 %v2341_v33, %v2114_v27  ;;  %v3474_v35 = vpop.f32.mrb[29].mxu1 }
 0x291   : > { %v2344_v36 = vpop.f32.mrb[30].mxu1 }
 0x292   : > { %v2361_v37 = vadd.f32 %v2344_v36, %v2121_v31  ;;  %v3475_v38 = vpop.f32.mrb[31].mxu1 }
 0x29f   : > { %v2581_v39 = vpop.f32.mrb[32].mxu1 }
 0x2a0   : > { %v2594_v40 = vadd.f32 %v2581_v39, %v2354_v34  ;;  %v3480_v41 = vpop.f32.mrb[33].mxu1 }
 0x2a1   : > { %v2584_v42 = vpop.f32.mrb[34].mxu1 }
 0x2a2   : > { %v2601_v43 = vadd.f32 %v2584_v42, %v2361_v37  ;;  %v3481_v44 = vpop.f32.mrb[35].mxu1 }
 0x2a7   : > { %v2735_v46 = vpop.f32.mrb[0].mxu1 }
 0x2a8   : > { %v4868_v48 = vadd.f32 %v2847_v45, %v2735_v46  ;;  %v2737_v49 = vpop.f32.mrb[1].mxu1 }
 0x2a9   : > { %v4870_v50 = vadd.f32 %v2847_v45, %v2737_v49  ;;  %v2739_v51 = vpop.f32.mrb[2].mxu1 }
 0x2aa   : > { %v2870_v52 = vmin.f32 %v4868_v48, 0.0  ;;  %v4874_v53 = vadd.f32 %v4866_v47, %v2739_v51  ;;  %v2741_v54 = vpop.f32.mrb[3].mxu1  ;;  %v2692_v57 = vpop.f32.mrb[0].mxu0  ;;  %vm2940_vm11 = vcmp.gt.f32.partialorder %v4868_v48, 0.0 }
 0x2ab   : > { %v2871_v55 = vmin.f32 %v4870_v50, 0.0  ;;  %v4878_v56 = vadd.f32 %v4866_v47, %v2741_v54  ;;  %v4881_v60 = vadd.f32 %v2847_v45, %v2692_v57  ;;  %v2694_v61 = vpop.f32.mrb[1].mxu0  ;;  %vm2941_vm12 = vcmp.gt.f32.partialorder %v4870_v50, 0.0 }
 0x2ac   : > { %v2886_v58 = vmul.f32 1.442695, %v2870_v52  ;;  %v2877_v59 = vmin.f32 %v4874_v53, 0.0  ;;  %v4884_v0 = vadd.f32 %v2847_v45, %v2694_v61  ;;  %v2696_v1 = vpop.f32.mrb[2].mxu0  ;;  %vm2947_vm13 = vcmp.gt.f32.partialorder %v4874_v53, 0.0 }
 0x2ad   : > { %v2888_v62 = vmul.f32 1.442695, %v2871_v55  ;;  %v2878_v63 = vmin.f32 %v4878_v56, 0.0  ;;  %v2868_v3 = vmin.f32 %v4881_v60, 0.0  ;;  %v2698_v4 = vpop.f32.mrb[3].mxu0  ;;  %v4889_v8 = vadd.f32 %v4866_v47, %v2696_v1 }
 0x2ae   : > { %3789 = vpow2.f32 %v2886_v58  ;;  %v2900_v2 = vmul.f32 1.442695, %v2877_v59  ;;  %v2869_v6 = vmin.f32 %v4884_v0, 0.0  ;;  %v4892_v9 = vadd.f32 %v4866_v47, %v2698_v4 }
 0x2af   : > { %3791 = vpow2.f32 %v2888_v62  ;;  %v2902_v5 = vmul.f32 1.442695, %v2878_v63  ;;  %v2821_v29 = vpop.f32.mrb[36].mxu1  ;;  %v2882_v7 = vmul.f32 1.442695, %v2868_v3  ;;  %v2875_v14 = vmin.f32 %v4889_v8, 0.0 }
 0x2b0   : > { %3793 = vpow2.f32 %v2900_v2  ;;  %v3486_v11 = vpop.f32.mrb[37].mxu1  ;;  %v2884_v12 = vmul.f32 1.442695, %v2869_v6  ;;  %v2834_v13 = vadd.f32 %v2821_v29, %v2594_v40  ;;  %v2876_v15 = vmin.f32 %v4892_v9, 0.0 }
 0x2b1   : > { %3795 = vpow2.f32 %v2902_v5  ;;  %v2824_v10 = vpop.f32.mrb[38].mxu1  ;;  %v2896_v20 = vmul.f32 1.442695, %v2875_v14  ;;  %vm2948_vm14 = vcmp.gt.f32.partialorder %v4878_v56, 0.0  ;;  %vm2938_vm15 = vcmp.gt.f32.partialorder %v4881_v60, 0.0 }
 0x2b2   : > { %3797 = vpow2.f32 %v2882_v7  ;;  %v3487_v16 = vpop.f32.mrb[39].mxu1  ;;  %v4896_v17 = vadd.f32 %v2847_v45, %v2834_v13  ;;  %v2841_v18 = vadd.f32 %v2824_v10, %v2601_v43  ;;  %v2778_v19 = vpop.f32.mrb[4].mxu0  ;;  %v2898_v21 = vmul.f32 1.442695, %v2876_v15 }
 0x2b3   : > { %3799 = vpow2.f32 %v2884_v12  ;;  %v4898_v22 = vadd.f32 %v2847_v45, %v2778_v19  ;;  %v2780_v23 = vpop.f32.mrb[5].mxu0  ;;  %vm2939_vm0 = vcmp.gt.f32.partialorder %v4884_v0, 0.0  ;;  %vm2945_vm1 = vcmp.gt.f32.partialorder %v4889_v8, 0.0 }
 0x2b4   : > { %v2874_v24 = vmin.f32 %v4896_v17, 0.0  ;;  %v4902_v25 = vadd.f32 %v4866_v47, %v2841_v18  ;;  %v4904_v26 = vadd.f32 %v2847_v45, %v2780_v23  ;;  %v2782_v27 = vpop.f32.mrb[6].mxu0  ;;  %3801 = vpow2.f32 %v2896_v20 }
 0x2b5   : > { %v2872_v28 = vmin.f32 %v4898_v22, 0.0  ;;  %v4909_v30 = vadd.f32 %v4866_v47, %v2782_v27  ;;  %v2784_v31 = vpop.f32.mrb[7].mxu0  ;;  %3803 = vpow2.f32 %v2898_v21  ;;  %vm2946_vm2 = vcmp.gt.f32.partialorder %v4892_v9, 0.0 }
 0x2b6   : > { %v2894_v32 = vmul.f32 1.442695, %v2874_v24  ;;  %v2881_v33 = vmin.f32 %v4902_v25, 0.0  ;;  %v2873_v36 = vmin.f32 %v4904_v26, 0.0  ;;  %v4918_v51 = vadd.f32 %v4866_v47, %v2784_v31 }
 0x2b7   : > { %v2890_v35 = vmul.f32 1.442695, %v2872_v28  ;;  %v2879_v37 = vmin.f32 %v4909_v30, 0.0  ;;  %vm2944_vm3 = vcmp.gt.f32.partialorder %v4896_v17, 0.0  ;;  %vm2942_vm4 = vcmp.gt.f32.partialorder %v4898_v22, 0.0 }
 0x2b8   : > { %v3790_v34 = vpop.eup %3789  ;;  %3805 = vpow2.f32 %v2894_v32  ;;  %v2908_v40 = vmul.f32 1.442695, %v2881_v33  ;;  %v2892_v43 = vmul.f32 1.442695, %v2873_v36  ;;  %v2880_v5 = vmin.f32 %v4918_v51, 0.0 }
 0x2b9   : > { %v3792_v38 = vpop.eup %3791  ;;  %v3375_v39 = vadd.f32 -1.0, %v3790_v34  ;;  %3807 = vpow2.f32 %v2890_v35  ;;  %v2904_v44 = vmul.f32 1.442695, %v2879_v37  ;;  %vm2951_vm5 = vcmp.gt.f32.partialorder %v4902_v25, 0.0 }
 0x2ba   : > { %v3794_v41 = vpop.eup %3793  ;;  %v3376_v42 = vadd.f32 -1.0, %v3792_v38  ;;  %3809 = vpow2.f32 %v2908_v40  ;;  %v2906_v16 = vmul.f32 1.442695, %v2880_v5  ;;  %vm2943_vm6 = vcmp.gt.f32.partialorder %v4904_v26, 0.0 }
 0x2bb   : > { %v3796_v45 = vpop.eup %3795  ;;  %v2926_v46 = vmul.f32 1.6732632, %v3375_v39  ;;  %v3382_v49 = vadd.f32 -1.0, %v3794_v41  ;;  %3811 = vpow2.f32 %v2892_v43  ;;  %vm2949_vm7 = vcmp.gt.f32.partialorder %v4909_v30, 0.0 }
 0x2bc   : > { %v3798_v52 = vpop.eup %3797  ;;  %v2927_v54 = vmul.f32 1.6732632, %v3376_v42  ;;  %v3383_v55 = vadd.f32 -1.0, %v3796_v45  ;;  %3813 = vpow2.f32 %v2904_v44  ;;  %vm2950_vm8 = vcmp.gt.f32.partialorder %v4918_v51, 0.0 }
 0x2bd   : > { %v3800_v57 = vpop.eup %3799  ;;  %v2954_v58 = vsel %vm2940_vm11, %v4868_v48, %v2926_v46  ;;  %v2933_v59 = vmul.f32 1.6732632, %v3382_v49  ;;  %v3373_v61 = vadd.f32 -1.0, %v3798_v52  ;;  %3815 = vpow2.f32 %v2906_v16 }
 0x2be   : > { %v2968_v62 = vmul.f32 1.050701, %v2954_v58  ;;  %v2955_v47 = vsel %vm2941_vm12, %v4870_v50, %v2927_v54  ;;  %v2934_v63 = vmul.f32 1.6732632, %v3383_v55  ;;  %v3374_v1 = vadd.f32 -1.0, %v3800_v57  ;;  %v3802_v48 = vpop.eup %3801 }
 0x2bf   : > { %v2969_v2 = vmul.f32 1.050701, %v2955_v47  ;;  %v2961_v3 = vsel %vm2947_vm13, %v4874_v53, %v2933_v59  ;;  %v2924_v4 = vmul.f32 1.6732632, %v3373_v61  ;;  %v3804_v50 = vpop.eup %3803  ;;  %v3380_v13 = vadd.f32 -1.0, %v3802_v48 }
 0x2c0   : > { %v2962_v6 = vsel %vm2948_vm14, %v4878_v56, %v2934_v63  ;;  %v2975_v29 = vmul.f32 1.050701, %v2961_v3  ;;  %v2925_v7 = vmul.f32 1.6732632, %v3374_v1  ;;  %v3381_v15 = vadd.f32 -1.0, %v3804_v50 }
 0x2c1   : > { %v3408_v11 = vpack.c.bf16 %v2969_v2, %v2968_v62  ;;  %v2976_v12 = vmul.f32 1.050701, %v2962_v6  ;;  %v2952_v53 = vsel %vm2938_vm15, %v4881_v60, %v2924_v4  ;;  %v2931_v20 = vmul.f32 1.6732632, %v3380_v13 }
 0x2c2   : > { %v2966_v10 = vmul.f32 1.050701, %v2952_v53  ;;  %v2953_v14 = vsel %vm2939_vm0, %v4884_v0, %v2925_v7  ;;  %v3806_v18 = vpop.eup %3805  ;;  %v2932_v23 = vmul.f32 1.6732632, %v3381_v15 }
 0x2c3   : > { %3025 = vst [vmem:[%s4940_s26 + $0x8] sm:$0xff] %v3408_v11  ;;  %v3412_v56 = vpack.c.bf16 %v2976_v12, %v2975_v29  ;;  %v2967_v19 = vmul.f32 1.050701, %v2953_v14  ;;  %v3808_v21 = vpop.eup %3807  ;;  %v3379_v60 = vadd.f32 -1.0, %v3806_v18  ;;  %v2959_v27 = vsel %vm2945_vm1, %v4889_v8, %v2931_v20 }
 0x2c4   : > { %v3810_v0 = vpop.eup %3809  ;;  %v3377_v28 = vadd.f32 -1.0, %v3808_v21  ;;  %v2973_v32 = vmul.f32 1.050701, %v2959_v27  ;;  %v2960_v33 = vsel %vm2946_vm2, %v4892_v9, %v2932_v23 }
 0x2c5   : > { %3029 = vst [vmem:[%s4940_s26 + $0x24] sm:$0xff] %v3412_v56  ;;  %v3407_v24 = vpack.c.bf16 %v2967_v19, %v2966_v10  ;;  %v3812_v31 = vpop.eup %3811  ;;  %v2930_v34 = vmul.f32 1.6732632, %v3379_v60  ;;  %v3386_v35 = vadd.f32 -1.0, %v3810_v0  ;;  %v2974_v37 = vmul.f32 1.050701, %v2960_v33 }
 0x2c6   : > { %v3814_v36 = vpop.eup %3813  ;;  %v2928_v38 = vmul.f32 1.6732632, %v3377_v28  ;;  %v3378_v39 = vadd.f32 -1.0, %v3812_v31 }
 0x2c7   : > { %3024 = vst [vmem:[%s4940_s26] sm:$0xff] %v3407_v24  ;;  %v2958_v40 = vsel %vm2944_vm3, %v4896_v17, %v2930_v34  ;;  %v2937_v8 = vmul.f32 1.6732632, %v3386_v35  ;;  %v3384_v41 = vadd.f32 -1.0, %v3814_v36  ;;  %v3411_v42 = vpack.c.bf16 %v2974_v37, %v2973_v32  ;;  %v3816_v58 = vpop.eup %3815 }
 0x2c8   : > { %v2972_v43 = vmul.f32 1.050701, %v2958_v40  ;;  %v2956_v9 = vsel %vm2942_vm4, %v4898_v22, %v2928_v38  ;;  %v2929_v44 = vmul.f32 1.6732632, %v3378_v39  ;;  %v3385_v59 = vadd.f32 -1.0, %v3816_v58 }
 0x2c9   : > { %v2965_v45 = vsel %vm2951_vm5, %v4902_v25, %v2937_v8  ;;  %v2970_v46 = vmul.f32 1.050701, %v2956_v9  ;;  %3028 = vst [vmem:[%s4940_s26 + $0x1c] sm:$0xff] %v3411_v42  ;;  %v2935_v54 = vmul.f32 1.6732632, %v3384_v41 }
 0x2ca   : > { %v3410_v49 = vpack.c.bf16 %v2972_v43, %v2972_v43  ;;  %v2979_v17 = vmul.f32 1.050701, %v2965_v45  ;;  %v2957_v52 = vsel %vm2943_vm6, %v4904_v26, %v2929_v44  ;;  %v2936_v61 = vmul.f32 1.6732632, %v3385_v59  ;;  %v3058_v1 = vld [vmem:[%s4940_s26 + $0x8] sm:$0xff] (%p4078_p8) }
 0x2cb   : > { %v2971_v55 = vmul.f32 1.050701, %v2957_v52  ;;  %v2963_v25 = vsel %vm2949_vm7, %v4909_v30, %v2935_v54  ;;  %3038 = sbr.rel (!%p4078_p8) target bundleno = 730 (0x2da), region = 147  ;;  %3059 = vst [vmem:[%s3041_s28 + $0x8] sm:$0xff] (%p4078_p8), %v3058_v1 }
 0x2cc   : > { %3027 = vst [vmem:[%s4940_s26 + $0x18] sm:$0xf] %v3410_v49  ;;  %v3414_v57 = vpack.c.bf16 %v2979_v17, %v2979_v17  ;;  %v2977_v62 = vmul.f32 1.050701, %v2963_v25  ;;  %v2964_v26 = vsel %vm2950_vm8, %v4918_v51, %v2936_v61  ;;  %v3064_v3 = vld [vmem:[%s4940_s26 + $0x24] sm:$0xff] (%p4078_p8) }
 0x2cd   : > { %v3409_v22 = vpack.c.bf16 %v2971_v55, %v2970_v46  ;;  %v2978_v47 = vmul.f32 1.050701, %v2964_v26  ;;  %3065 = vst [vmem:[%s3041_s28 + $0x40] sm:$0xff] (%p4078_p8), %v3064_v3 }
 0x2ce   : > { %3031 = vst [vmem:[%s4940_s26 + $0x34] sm:$0xf] %v3414_v57  ;;  %v3056_v30 = vld [vmem:[%s4940_s26] sm:$0xff] (%p4078_p8) }
 0x2cf   : > { %3026 = vst [vmem:[%s4940_s26 + $0x10] sm:$0xff] %v3409_v22  ;;  %v3413_v63 = vpack.c.bf16 %v2978_v47, %v2977_v62  ;;  %3057 = vst [vmem:[%s3041_s28] sm:$0xff] (%p4078_p8), %v3056_v30 }
 0x2d0   : > { %v3062_v2 = vld [vmem:[%s4940_s26 + $0x1c] sm:$0xff] (%p4078_p8) }
 0x2d1   : > { %3030 = vst [vmem:[%s4940_s26 + $0x2c] sm:$0xff] %v3413_v63  ;;  %3063 = vst [vmem:[%s3041_s28 + $0x38] sm:$0xff] (%p4078_p8), %v3062_v2 }
 0x2d3   : > { %v3396_v5 = vld [vmem:[%s4940_s26 + $0x18] sm:$0xf] }
 0x2d4   : > { %3397 = vst [vmem:[%s3041_s28 + $0x18] sm:$0xf] %v3396_v5 }
 0x2d5   : > { %v3398_v48 = vld [vmem:[%s4940_s26 + $0x34] sm:$0xf] }
 0x2d6   : > { %v3060_v51 = vld [vmem:[%s4940_s26 + $0x10] sm:$0xff]  ;;  %3399 = vst [vmem:[%s3041_s28 + $0x50] sm:$0xf] %v3398_v48 }
 0x2d7   : > { %3061 = vst [vmem:[%s3041_s28 + $0x10] sm:$0xff] %v3060_v51 }
 0x2d8   : > { %v3066_v4 = vld [vmem:[%s4940_s26 + $0x2c] sm:$0xff] }
 0x2d9   : > { %3067 = vst [vmem:[%s3041_s28 + $0x48] sm:$0xff] %v3066_v4 }
 0x2da PF: > { %s5021_s17 = sld [smem:[#allocation5_spill]]  ;;  %s5022_s18 = sld [smem:[#allocation6_spill]] }
 0x2db   : > { %p11_p8 = scmp.ge.s32.totalorder %s4050_s21, 4   ;;  %s5023_s15 = smov %s3907_s16 }
 0x2dc   : > { %s5024_s16 = smov %s4083_s6  ;;  %s5025_s19 = smov %s4050_s21 }
 0x2dd   :  { %13 = sbr.rel (!%p11_p8) target bundleno = 5 (0x5), region = 288 }

// kernel: convolutional_regressor_forward.4
= control target key start
LH: loop header
LB: loop body
LE: loop exit
PB: predicated region body
PF: predicated region fallthrough
CT: control target
= control target key end

     0   :  { %s3670_s0 = inlined_call_operand.vmem [shape: bf16[64,640], index: 0, kind: input, shape index: {}, may-alias: {0,1}]   ;;  %s3671_s1 = inlined_call_operand.vmem [shape: bf16[64,640], index: 1, kind: input, shape index: {}, may-alias: {0,1}]   ;;  %s3672_s2 = inlined_call_operand.vmem [shape: bf16[9,32,64], index: 2, kind: input, shape index: {}]   ;;  %s3673_s3 = inlined_call_operand.vmem [shape: f32[32,1], index: 3, kind: input, shape index: {}]   ;;  %s3674_s4 = inlined_call_operand.vmem [shape: bf16[32,512], index: 4, kind: output, shape index: {}]  }
   0x1   :  { %3676 = sst [smem:[#allocation6_spill]] %s3670_s0 }
   0x2   :  { %s2889_s15 = smov 0   ;;  %s2891_s16 = smov 0  }
   0x3   :  { %s2893_s17 = smov 0   ;;  %s2895_s18 = smov 0  }
   0x4   :  { %s2897_s19 = smov 0  }
   0x5 LB: > { %s3675_s20 = sadd.s32 4294967295, %s2787_s19   ;;  %s2916_s21 = sadd.s32 1, %s2787_s19   ;;  %s2787_s19 = sphi %s2897_s19, %s3699_s19   ;;  %s2783_s18 = sphi %s2895_s18, %s3698_s18   ;;  %s2779_s17 = sphi %s2893_s17, %s3697_s17   ;;  %s2775_s16 = sphi %s2891_s16, %s3696_s16   ;;  %s2771_s15 = sphi %s2889_s15, %s3695_s15  }
   0x6   : > { %s18_s22 = ssub.s32 %s2787_s19, %s2916_s21  ;;  %s21_s23 = sadd.s32 1, %s2783_s18 }
   0x7   : > { %p19_p0 = scmp.eq.s32.totalorder %s18_s22, 0  ;;  %p28_p1 = scmp.ne.s32.totalorder %s2783_s18, %s2779_s17 }
   0x8   : > { %p29_p2 = scmp.eq.s32.totalorder %s2787_s19, 0  ;;  %s2366_s24 = sshll.u32 %s2787_s19, 1 }
   0x9   : > { %s2926_s25 = scalar_select %p19_p0, %s2783_s18, %s21_s23  }
   0xa   : > { %p30_p3 = por %p29_p2, %p28_p1  ;;  %s2367_s26 = sadd.s32 2, %s2366_s24 }
   0xb   : > { %3677 = sst [smem:[#allocation5_spill]] %s2926_s25  ;;  %s2369_s27 = sadd.s32 2, %s2367_s26 }
   0xc   : > { %s51_s28 = sadd.s32 1, %s2775_s16  ;;  %s48_s29 = ssub.s32 %s2367_s26, %s2369_s27 }
   0xd   : > { %p58_p4 = scmp.ne.s32.totalorder %s2775_s16, %s2771_s15  ;;  %p49_p5 = scmp.eq.s32.totalorder %s48_s29, 0 }
   0xe   : > { %p130_p6 = scmp.eq.s32.totalorder %s3675_s20, 1  ;;  %p2227_p9 = scmp.ge.s32.totalorder %s2787_s19, 2 }
   0xf   : > { %p2936_p7 = por %p58_p4, %p29_p2 }
  0x10   : > { %s2941_s5 = scalar_select %p49_p5, %s2775_s16, %s51_s28  }
  0x11   : > { %p2946_p8 = por %p130_p6, %p28_p1  ;;  %158 = sbr.rel (%p2227_p9) target bundleno = 167 (0xa7), region = 24 }
  0x18   : > { %161 = sbr.rel (!%p30_p3) target bundleno = 158 (0x9e), region = 28  ;;  %s163_s7 = sand.u32 (%p30_p3), 1, %s2783_s18  }
  0x19   : > { %s167_s8 = ssub.s32 (%p30_p3), 5, %s2366_s24  ;;  %s2228_s9 = sshll.u32 (%p30_p3), %s163_s7, 6 }
  0x1a   : > { %p168_p10 = scmp.lt.s32.totalorder (%p30_p3), %s167_s8, 2  ;;  %s2370_s10 = sshll.u32 (%p30_p3), %s2787_s19, 3 }
  0x1b   : > { %s3680_s0 = sld [smem:[#allocation6_spill]] (%p30_p3)  ;;  %s2960_s23 = scalar_lea.vmem (%p30_p3), [#allocation2], %s2228_s9  }
  0x1f   : > { %s3701_s8 = smov (!%p168_p10, %s167_s8), 2 }
  0x20   : > { %s2230_s14 = sshll.u32 %s3701_s8, 9  ;;  %s2958_s22 = sshll.u32 %s3701_s8, 2 }
  0x21   : > { %s2956_s13 = scalar_lea.vmem %s3680_s0, %s2370_s10   ;;  %p2234_p11 = scmp.eq.s32.totalorder %s2230_s14, 0 }
  0x22   : > { %p178_p12 = scmp.lt.u32.totalorder (!%p2234_p11), %s2958_s22, 8 }
  0x23   : > { %177 = sbr.rel (%p2234_p11) target bundleno = 158 (0x9e), region = 32 }
  0x2a   : > { %181 = sbr.rel (%p178_p12) target bundleno = 147 (0x93), region = 36  ;;  %s2964_s24 = sand.u32 (!%p178_p12), 7, %s2958_s22  }
  0x2b   : > { %p211_p13 = scmp.eq.s32.totalorder (!%p178_p12), %s2964_s24, 0  ;;  %p2235_p0 = scmp.ne.s32.totalorder (!%p178_p12), %s2964_s24, 0 }
  0x31   : > { %214 = sbr.rel (%p2235_p0) target bundleno = 93 (0x5d), region = 51  ;;  %s215_s26 = sshrl.u32 (!%p2235_p0), %s2958_s22, 3 }
  0x32   : > { %s2971_s27 = sshrl.u32 (!%p2235_p0), %s215_s26, 3 }
  0x33   : > { %p2236_p1 = scmp.le.s32.totalorder (!%p2235_p0), %s2971_s27, 0 }
  0x38   : > { %2145 = sbr.rel (%p2236_p1) target bundleno = 73 (0x49), region = 244  ;;  %s3681_s28 = smov (!%p2236_p1), %s2960_s23 }
  0x39   : > { %s3682_s29 = smov (!%p2236_p1), %s2956_s13  ;;  %s2980_s7 = smov (!%p2236_p1), 0  }
  0x3a   : > { %s2982_s8 = smov (!%p2236_p1), 0  }
  0x3f LB: >> { %v228_v0 = vld [vmem:[%s2795_s29] sm:$0xff]  ;;  %v244_v1 = vld [vmem:[%s2795_s29 + $0x14] sm:$0xff]  ;;  %v260_v2 = vld [vmem:[%s2795_s29 + $0x28] sm:$0xff]  ;;  %s356_s9 = sadd.s32 1, %s2799_s7  ;;  %s222_s8 = sadd.s32 1, %s2803_s8   ;;  %s2803_s8 = sphi %s2982_s8, %s222_s8   ;;  %s2799_s7 = sphi %s2980_s7, %s3683_s7   ;;  %s2795_s29 = sphi %s3682_s29, %s361_s29   ;;  %s2791_s28 = sphi %s3681_s28, %s362_s28  }
  0x40   : >> { %229 = vst [vmem:[%s2791_s28] sm:$0xff] %v228_v0  ;;  %245 = vst [vmem:[%s2791_s28 + $0x8] sm:$0xff] %v244_v1  ;;  %v276_v3 = vld [vmem:[%s2795_s29 + $0x3c] sm:$0xff]  ;;  %v292_v4 = vld [vmem:[%s2795_s29 + $0x50] sm:$0xff]  ;;  %p357_p2 = scmp.ge.s32.totalorder %s356_s9, %s2971_s27  ;;  %p221_p3 = scmp.ge.s32.totalorder %s222_s8, %s2971_s27 }
  0x41   : >> { %261 = vst [vmem:[%s2791_s28 + $0x10] sm:$0xff] %v260_v2  ;;  %v308_v5 = vld [vmem:[%s2795_s29 + $0x64] sm:$0xff]  ;;  %277 = vst [vmem:[%s2791_s28 + $0x18] sm:$0xff] %v276_v3  ;;  %v324_v6 = vld [vmem:[%s2795_s29 + $0x78] sm:$0xff] }
  0x42   : >> { %293 = vst [vmem:[%s2791_s28 + $0x20] sm:$0xff] %v292_v4  ;;  %309 = vst [vmem:[%s2791_s28 + $0x28] sm:$0xff] %v308_v5  ;;  %v340_v7 = vld [vmem:[%s2795_s29 + $0x8c] sm:$0xff]  ;;  %v342_v8 = vld [vmem:[%s2795_s29 + $0x94] sm:$0xff]  ;;  %s3703_s9 = smov (%p357_p2, %s356_s9), 0  ;;  %224 = sbr.rel (!%p221_p3) target bundleno = 63 (0x3f), region = 250 }
  0x43   : >> { %325 = vst [vmem:[%s2791_s28 + $0x30] sm:$0xff] %v324_v6  ;;  %341 = vst [vmem:[%s2791_s28 + $0x38] sm:$0xff] %v340_v7  ;;  %v344_v9 = vld [vmem:[%s2795_s29 + $0x9c] sm:$0xff]  ;;  %v346_v10 = vld [vmem:[%s2795_s29 + $0xa4] sm:$0xff]  ;;  %s2237_s10 = sshll.u32 %s3703_s9, 6  ;;  %s3683_s7 = smov %s3703_s9 }
  0x44   : >> { %343 = vst [vmem:[%s2791_s28 + $0x40] sm:$0xff] %v342_v8  ;;  %v348_v11 = vld [vmem:[%s2795_s29 + $0xac] sm:$0xff]  ;;  %345 = vst [vmem:[%s2791_s28 + $0x48] sm:$0xff] %v344_v9  ;;  %v350_v12 = vld [vmem:[%s2795_s29 + $0xb4] sm:$0xff] }
  0x45   : >> { %347 = vst [vmem:[%s2791_s28 + $0x50] sm:$0xff] %v346_v10  ;;  %349 = vst [vmem:[%s2791_s28 + $0x58] sm:$0xff] %v348_v11  ;;  %v352_v13 = vld [vmem:[%s2795_s29 + $0xbc] sm:$0xff]  ;;  %v354_v14 = vld [vmem:[%s2795_s29 + $0xc4] sm:$0xff]  ;;  %s361_s29 = scalar_lea.vmem %s2956_s13, %s2237_s10  }
  0x46   : >> { %351 = vst [vmem:[%s2791_s28 + $0x60] sm:$0xff] %v350_v12  ;;  %353 = vst [vmem:[%s2791_s28 + $0x68] sm:$0xff] %v352_v13 }
  0x47   : >> { %355 = vst [vmem:[%s2791_s28 + $0x70] sm:$0xff] %v354_v14  ;;  %s362_s28 = scalar_lea.vmem %s2960_s23, %s2237_s10 [#allocation2]  }
  0x49 PF: > { %s3042_s11 = sand.u32 7, %s215_s26   ;;  %s2371_s12 = sshll.u32 %s2971_s27, 10 }
  0x4a   : > { %s367_s14 = sshra.s32 %s2371_s12, 4  ;;  %p2242_p4 = scmp.le.s32.totalorder %s3042_s11, 0 }
  0x4b   : > { %s3046_s10 = scalar_lea.vmem %s2956_s13, %s367_s14   ;;  %s3049_s20 = scalar_lea.vmem %s2960_s23, %s367_s14 [#allocation2]  }
  0x4c   : > { %2159 = sbr.rel (%p2242_p4) target bundleno = 93 (0x5d), region = 255  ;;  %s3684_s28 = smov (!%p2242_p4), %s3049_s20 }
  0x4d   : > { %s3685_s29 = smov (!%p2242_p4), %s3046_s10  ;;  %s3058_s7 = smov (!%p2242_p4), 0  }
  0x4e   : > { %s3060_s8 = smov (!%p2242_p4), 0  }
  0x53 LB: >> { %v383_v15 = vld [vmem:[%s2811_s29] sm:$0xff]  ;;  %v385_v16 = vld [vmem:[%s2811_s29 + $0x14] sm:$0xff]  ;;  %v387_v17 = vld [vmem:[%s2811_s29 + $0x28] sm:$0xff]  ;;  %s399_s26 = sadd.s32 1, %s2815_s7  ;;  %s377_s8 = sadd.s32 1, %s2819_s8   ;;  %s2819_s8 = sphi %s3060_s8, %s377_s8   ;;  %s2815_s7 = sphi %s3058_s7, %s3686_s7   ;;  %s2811_s29 = sphi %s3685_s29, %s404_s29   ;;  %s2807_s28 = sphi %s3684_s28, %s405_s28  }
  0x54   : >> { %384 = vst [vmem:[%s2807_s28] sm:$0xff] %v383_v15  ;;  %386 = vst [vmem:[%s2807_s28 + $0x8] sm:$0xff] %v385_v16  ;;  %v389_v18 = vld [vmem:[%s2811_s29 + $0x3c] sm:$0xff]  ;;  %v391_v19 = vld [vmem:[%s2811_s29 + $0x50] sm:$0xff]  ;;  %p400_p5 = scmp.ge.s32.totalorder %s399_s26, %s3042_s11  ;;  %p376_p6 = scmp.ge.s32.totalorder %s377_s8, %s3042_s11 }
  0x55   : >> { %388 = vst [vmem:[%s2807_s28 + $0x10] sm:$0xff] %v387_v17  ;;  %v393_v20 = vld [vmem:[%s2811_s29 + $0x64] sm:$0xff]  ;;  %390 = vst [vmem:[%s2807_s28 + $0x18] sm:$0xff] %v389_v18  ;;  %v395_v21 = vld [vmem:[%s2811_s29 + $0x78] sm:$0xff] }
  0x56   : >> { %392 = vst [vmem:[%s2807_s28 + $0x20] sm:$0xff] %v391_v19  ;;  %394 = vst [vmem:[%s2807_s28 + $0x28] sm:$0xff] %v393_v20  ;;  %v397_v22 = vld [vmem:[%s2811_s29 + $0x8c] sm:$0xff]  ;;  %s3705_s26 = smov (%p400_p5, %s399_s26), 0  ;;  %379 = sbr.rel (!%p376_p6) target bundleno = 83 (0x53), region = 261 }
  0x57   : >> { %396 = vst [vmem:[%s2807_s28 + $0x30] sm:$0xff] %v395_v21  ;;  %398 = vst [vmem:[%s2807_s28 + $0x38] sm:$0xff] %v397_v22  ;;  %s2243_s27 = sshll.u32 %s3705_s26, 3  ;;  %s3686_s7 = smov %s3705_s26 }
  0x58   : >> { %s404_s29 = scalar_lea.vmem %s3046_s10, %s2243_s27   ;;  %s405_s28 = scalar_lea.vmem %s3049_s20, %s2243_s27 [#allocation2]  }
  0x5d PF: > { %408 = sbr.rel (%p211_p13) target bundleno = 147 (0x93), region = 69  ;;  %s410_s9 = ssub.s32 (!%p211_p13), %s2958_s22, %s2964_s24 }
  0x5e   : > { %s414_s12 = sshrl.u32 (!%p211_p13), %s2958_s22, 3  ;;  %s3084_s14 = scalar_lea.vmem (!%p211_p13), %s2956_s13, %s410_s9 }
  0x5f   : > { %s3087_s27 = scalar_lea.vmem (!%p211_p13), %s2960_s23, %s410_s9 [#allocation2]  ;;  %s3091_s8 = sshrl.u32 (!%p211_p13), %s414_s12, 3 }
  0x60   : > { %p2245_p9 = scmp.le.s32.totalorder (!%p211_p13), %s3091_s8, 0 }
  0x64   : > { %2173 = sbr.rel (%p2245_p9) target bundleno = 117 (0x75), region = 266  ;;  %s3687_s20 = smov (!%p2245_p9), %s2960_s23 }
  0x65   : > { %s3688_s11 = smov (!%p2245_p9), %s2956_s13  ;;  %s3100_s10 = smov (!%p2245_p9), 0  }
  0x66   : > { %s3102_s28 = smov (!%p2245_p9), 0  }
  0x6b LB: >> { %v427_v23 = vld [vmem:[%s2827_s11] sm:$0xff]  ;;  %v443_v24 = vld [vmem:[%s2827_s11 + $0x14] sm:$0xff]  ;;  %v459_v25 = vld [vmem:[%s2827_s11 + $0x28] sm:$0xff]  ;;  %s555_s29 = sadd.s32 1, %s2831_s10  ;;  %s421_s28 = sadd.s32 1, %s2835_s28   ;;  %s2835_s28 = sphi %s3102_s28, %s421_s28   ;;  %s2831_s10 = sphi %s3100_s10, %s3689_s10   ;;  %s2827_s11 = sphi %s3688_s11, %s560_s11   ;;  %s2823_s20 = sphi %s3687_s20, %s561_s20  }
  0x6c   : >> { %428 = vst [vmem:[%s2823_s20] sm:$0xff] %v427_v23  ;;  %444 = vst [vmem:[%s2823_s20 + $0x8] sm:$0xff] %v443_v24  ;;  %v475_v26 = vld [vmem:[%s2827_s11 + $0x3c] sm:$0xff]  ;;  %v491_v27 = vld [vmem:[%s2827_s11 + $0x50] sm:$0xff]  ;;  %p556_p10 = scmp.ge.s32.totalorder %s555_s29, %s3091_s8  ;;  %p420_p11 = scmp.ge.s32.totalorder %s421_s28, %s3091_s8 }
  0x6d   : >> { %460 = vst [vmem:[%s2823_s20 + $0x10] sm:$0xff] %v459_v25  ;;  %v507_v28 = vld [vmem:[%s2827_s11 + $0x64] sm:$0xff]  ;;  %476 = vst [vmem:[%s2823_s20 + $0x18] sm:$0xff] %v475_v26  ;;  %v523_v29 = vld [vmem:[%s2827_s11 + $0x78] sm:$0xff] }
  0x6e   : >> { %492 = vst [vmem:[%s2823_s20 + $0x20] sm:$0xff] %v491_v27  ;;  %508 = vst [vmem:[%s2823_s20 + $0x28] sm:$0xff] %v507_v28  ;;  %v539_v30 = vld [vmem:[%s2827_s11 + $0x8c] sm:$0xff]  ;;  %v541_v31 = vld [vmem:[%s2827_s11 + $0x94] sm:$0xff]  ;;  %s3707_s29 = smov (%p556_p10, %s555_s29), 0  ;;  %423 = sbr.rel (!%p420_p11) target bundleno = 107 (0x6b), region = 272 }
  0x6f   : >> { %524 = vst [vmem:[%s2823_s20 + $0x30] sm:$0xff] %v523_v29  ;;  %540 = vst [vmem:[%s2823_s20 + $0x38] sm:$0xff] %v539_v30  ;;  %v543_v32 = vld [vmem:[%s2827_s11 + $0x9c] sm:$0xff]  ;;  %v545_v33 = vld [vmem:[%s2827_s11 + $0xa4] sm:$0xff]  ;;  %s2246_s7 = sshll.u32 %s3707_s29, 6  ;;  %s3689_s10 = smov %s3707_s29 }
  0x70   : >> { %542 = vst [vmem:[%s2823_s20 + $0x40] sm:$0xff] %v541_v31  ;;  %v547_v34 = vld [vmem:[%s2827_s11 + $0xac] sm:$0xff]  ;;  %544 = vst [vmem:[%s2823_s20 + $0x48] sm:$0xff] %v543_v32  ;;  %v549_v35 = vld [vmem:[%s2827_s11 + $0xb4] sm:$0xff] }
  0x71   : >> { %546 = vst [vmem:[%s2823_s20 + $0x50] sm:$0xff] %v545_v33  ;;  %548 = vst [vmem:[%s2823_s20 + $0x58] sm:$0xff] %v547_v34  ;;  %v551_v36 = vld [vmem:[%s2827_s11 + $0xbc] sm:$0xff]  ;;  %v553_v37 = vld [vmem:[%s2827_s11 + $0xc4] sm:$0xff]  ;;  %s560_s11 = scalar_lea.vmem %s2956_s13, %s2246_s7  }
  0x72   : >> { %550 = vst [vmem:[%s2823_s20 + $0x60] sm:$0xff] %v549_v35  ;;  %552 = vst [vmem:[%s2823_s20 + $0x68] sm:$0xff] %v551_v36 }
  0x73   : >> { %554 = vst [vmem:[%s2823_s20 + $0x70] sm:$0xff] %v553_v37  ;;  %s561_s20 = scalar_lea.vmem %s2960_s23, %s2246_s7 [#allocation2]  }
  0x75 PF: > { %s3162_s26 = sand.u32 7, %s414_s12   ;;  %s2373_s9 = sshll.u32 %s3091_s8, 10 }
  0x76   : > { %s566_s7 = sshra.s32 %s2373_s9, 4  ;;  %p2251_p12 = scmp.le.s32.totalorder %s3162_s26, 0 }
  0x77   : > { %s3166_s0 = scalar_lea.vmem %s2956_s13, %s566_s7   ;;  %s3169_s25 = scalar_lea.vmem %s2960_s23, %s566_s7 [#allocation2]  }
  0x78   : > { %2187 = sbr.rel (%p2251_p12) target bundleno = 137 (0x89), region = 277  ;;  %s3690_s20 = smov (!%p2251_p12), %s3169_s25 }
  0x79   : > { %s3691_s11 = smov (!%p2251_p12), %s3166_s0  ;;  %s3178_s10 = smov (!%p2251_p12), 0  }
  0x7a   : > { %s3180_s28 = smov (!%p2251_p12), 0  }
  0x7f LB: >> { %v582_v38 = vld [vmem:[%s2843_s11] sm:$0xff]  ;;  %v584_v39 = vld [vmem:[%s2843_s11 + $0x14] sm:$0xff]  ;;  %v586_v40 = vld [vmem:[%s2843_s11 + $0x28] sm:$0xff]  ;;  %s598_s12 = sadd.s32 1, %s2847_s10  ;;  %s576_s28 = sadd.s32 1, %s2851_s28   ;;  %s2851_s28 = sphi %s3180_s28, %s576_s28   ;;  %s2847_s10 = sphi %s3178_s10, %s3692_s10   ;;  %s2843_s11 = sphi %s3691_s11, %s603_s11   ;;  %s2839_s20 = sphi %s3690_s20, %s604_s20  }
  0x80   : >> { %583 = vst [vmem:[%s2839_s20] sm:$0xff] %v582_v38  ;;  %585 = vst [vmem:[%s2839_s20 + $0x8] sm:$0xff] %v584_v39  ;;  %v588_v41 = vld [vmem:[%s2843_s11 + $0x3c] sm:$0xff]  ;;  %v590_v42 = vld [vmem:[%s2843_s11 + $0x50] sm:$0xff]  ;;  %p599_p13 = scmp.ge.s32.totalorder %s598_s12, %s3162_s26  ;;  %p575_p0 = scmp.ge.s32.totalorder %s576_s28, %s3162_s26 }
  0x81   : >> { %587 = vst [vmem:[%s2839_s20 + $0x10] sm:$0xff] %v586_v40  ;;  %v592_v43 = vld [vmem:[%s2843_s11 + $0x64] sm:$0xff]  ;;  %589 = vst [vmem:[%s2839_s20 + $0x18] sm:$0xff] %v588_v41  ;;  %v594_v44 = vld [vmem:[%s2843_s11 + $0x78] sm:$0xff] }
  0x82   : >> { %591 = vst [vmem:[%s2839_s20 + $0x20] sm:$0xff] %v590_v42  ;;  %593 = vst [vmem:[%s2839_s20 + $0x28] sm:$0xff] %v592_v43  ;;  %v596_v45 = vld [vmem:[%s2843_s11 + $0x8c] sm:$0xff]  ;;  %s3709_s12 = smov (%p599_p13, %s598_s12), 0  ;;  %578 = sbr.rel (!%p575_p0) target bundleno = 127 (0x7f), region = 283 }
  0x83   : >> { %595 = vst [vmem:[%s2839_s20 + $0x30] sm:$0xff] %v594_v44  ;;  %597 = vst [vmem:[%s2839_s20 + $0x38] sm:$0xff] %v596_v45  ;;  %s2252_s8 = sshll.u32 %s3709_s12, 3  ;;  %s3692_s10 = smov %s3709_s12 }
  0x84   : >> { %s603_s11 = scalar_lea.vmem %s3166_s0, %s2252_s8   ;;  %s604_s20 = scalar_lea.vmem %s3169_s25, %s2252_s8 [#allocation2]  }
  0x89 PF: > { %s2853_s29 = smov 0  }
  0x8a   : > { %s605_s9 = sshllo.u32 %s2853_s29, %s2964_s24 }
  0x8b   : > { %v614_v46 = vld [vmem:[%s3084_s14] sm:%s605_s9]  ;;  %v616_v47 = vld [vmem:[%s3084_s14 + $0x14] sm:%s605_s9] }
  0x8c   : > { %615 = vst [vmem:[%s3087_s27] sm:%s605_s9] %v614_v46  ;;  %617 = vst [vmem:[%s3087_s27 + $0x8] sm:%s605_s9] %v616_v47 }
  0x8d   : > { %v618_v48 = vld [vmem:[%s3084_s14 + $0x28] sm:%s605_s9]  ;;  %v620_v49 = vld [vmem:[%s3084_s14 + $0x3c] sm:%s605_s9] }
  0x8e   : > { %619 = vst [vmem:[%s3087_s27 + $0x10] sm:%s605_s9] %v618_v48  ;;  %621 = vst [vmem:[%s3087_s27 + $0x18] sm:%s605_s9] %v620_v49 }
  0x8f   : > { %v622_v50 = vld [vmem:[%s3084_s14 + $0x50] sm:%s605_s9]  ;;  %v624_v51 = vld [vmem:[%s3084_s14 + $0x64] sm:%s605_s9] }
  0x90   : > { %623 = vst [vmem:[%s3087_s27 + $0x20] sm:%s605_s9] %v622_v50  ;;  %625 = vst [vmem:[%s3087_s27 + $0x28] sm:%s605_s9] %v624_v51 }
  0x91   : > { %v626_v52 = vld [vmem:[%s3084_s14 + $0x78] sm:%s605_s9]  ;;  %v628_v53 = vld [vmem:[%s3084_s14 + $0x8c] sm:%s605_s9] }
  0x92   : > { %627 = vst [vmem:[%s3087_s27 + $0x30] sm:%s605_s9] %v626_v52  ;;  %629 = vst [vmem:[%s3087_s27 + $0x38] sm:%s605_s9] %v628_v53 }
  0x93 PF: > { %p2254_p1 = scmp.ge.u32.totalorder %s2958_s22, 8 }
  0x94   : > { %s2854_s0 = smov (!%p2254_p1), 0  }
  0x95   : > { %184 = sbr.rel (%p2254_p1) target bundleno = 158 (0x9e), region = 40  ;;  %s185_s25 = sshllo.u32 (!%p2254_p1), %s2854_s0, %s2958_s22 }
  0x96   : > { %v194_v54 = vld [vmem:[%s2956_s13] sm:%s185_s25] (!%p2254_p1)  ;;  %v196_v55 = vld [vmem:[%s2956_s13 + $0x14] sm:%s185_s25] (!%p2254_p1) }
  0x97   : > { %195 = vst [vmem:[%s2960_s23] sm:%s185_s25] (!%p2254_p1), %v194_v54  ;;  %197 = vst [vmem:[%s2960_s23 + $0x8] sm:%s185_s25] (!%p2254_p1), %v196_v55 }
  0x98   : > { %v198_v56 = vld [vmem:[%s2956_s13 + $0x28] sm:%s185_s25] (!%p2254_p1)  ;;  %v200_v57 = vld [vmem:[%s2956_s13 + $0x3c] sm:%s185_s25] (!%p2254_p1) }
  0x99   : > { %199 = vst [vmem:[%s2960_s23 + $0x10] sm:%s185_s25] (!%p2254_p1), %v198_v56  ;;  %201 = vst [vmem:[%s2960_s23 + $0x18] sm:%s185_s25] (!%p2254_p1), %v200_v57 }
  0x9a   : > { %v202_v58 = vld [vmem:[%s2956_s13 + $0x50] sm:%s185_s25] (!%p2254_p1)  ;;  %v204_v59 = vld [vmem:[%s2956_s13 + $0x64] sm:%s185_s25] (!%p2254_p1) }
  0x9b   : > { %203 = vst [vmem:[%s2960_s23 + $0x20] sm:%s185_s25] (!%p2254_p1), %v202_v58  ;;  %205 = vst [vmem:[%s2960_s23 + $0x28] sm:%s185_s25] (!%p2254_p1), %v204_v59 }
  0x9c   : > { %v206_v60 = vld [vmem:[%s2956_s13 + $0x78] sm:%s185_s25]  ;;  %v208_v61 = vld [vmem:[%s2956_s13 + $0x8c] sm:%s185_s25] }
  0x9d   : > { %207 = vst [vmem:[%s2960_s23 + $0x30] sm:%s185_s25] %v206_v60  ;;  %209 = vst [vmem:[%s2960_s23 + $0x38] sm:%s185_s25] %v208_v61 }
  0x9e PF: > { %633 = sbr.rel (!%p2936_p7) target bundleno = 167 (0xa7), region = 94  ;;  %s635_s22 = sand.u32 (%p2936_p7), 1, %s2775_s16  }
  0x9f   : > { %s2256_s24 = sshll.u32 (%p2936_p7), %s2787_s19, 3  ;;  %s2255_s14 = sshll.u32 (%p2936_p7), %s635_s22, 5 }
  0xa0   : > { %s2106_s7 = scalar_lea.vmem (%p2936_p7), %s3671_s1, %s2256_s24  ;;  %s637_s13 = scalar_lea.vmem (%p2936_p7), [#allocation3], %s2255_s14 }
  0xa1   : > { %v2257_v62 = vld [vmem:[%s2106_s7 + $0x8] sm:$0xf] (%p2936_p7)  ;;  %v2258_v63 = vld [vmem:[%s2106_s7 + $0x1c] sm:$0xf] (%p2936_p7)  ;;  %v2259_v0 = vld [vmem:[%s2106_s7 + $0x30] sm:$0xf] (%p2936_p7) }
  0xa2   : > { %658 = vst [vmem:[%s637_s13] sm:$0xf] (%p2936_p7), %v2257_v62  ;;  %660 = vst [vmem:[%s637_s13 + $0x4] sm:$0xf] (%p2936_p7), %v2258_v63  ;;  %v2260_v1 = vld [vmem:[%s2106_s7 + $0x44] sm:$0xf] (%p2936_p7) }
  0xa3   : > { %v2261_v2 = vld [vmem:[%s2106_s7 + $0x58] sm:$0xf] (%p2936_p7)  ;;  %662 = vst [vmem:[%s637_s13 + $0x8] sm:$0xf] (%p2936_p7), %v2259_v0  ;;  %664 = vst [vmem:[%s637_s13 + $0xc] sm:$0xf] (%p2936_p7), %v2260_v1 }
  0xa4   : > { %666 = vst [vmem:[%s637_s13 + $0x10] sm:$0xf] (%p2936_p7), %v2261_v2  ;;  %v2262_v3 = vld [vmem:[%s2106_s7 + $0x6c] sm:$0xf] (%p2936_p7)  ;;  %v2263_v4 = vld [vmem:[%s2106_s7 + $0x80] sm:$0xf] (%p2936_p7) }
  0xa5   : > { %v2264_v5 = vld [vmem:[%s2106_s7 + $0x94] sm:$0xf]  ;;  %668 = vst [vmem:[%s637_s13 + $0x14] sm:$0xf] %v2262_v3  ;;  %670 = vst [vmem:[%s637_s13 + $0x18] sm:$0xf] %v2263_v4 }
  0xa6   : > { %672 = vst [vmem:[%s637_s13 + $0x1c] sm:$0xf] %v2264_v5 }
  0xa7 PF: > { %p2265_p7 = scmp.ge.s32.totalorder %s2787_s19, 1  ;;  %p710_p2 = scmp.lt.s32.totalorder %s2787_s19, 3 }
  0xa9   : > { %p711_p3 = pnand %p2265_p7, %p710_p2 }
  0xaa   : > { %s717_s30 = sand.u32 (!%p711_p3), 1, %s2779_s17   ;;  %s724_s20 = sand.u32 (!%p711_p3), 1, %s2771_s15   ;;  %v2857_v18 = vmov (!%p711_p3), 0   ;;  %vm880_vm0 = vcmask (!%p711_p3), 1039360   ;;  %vm1311_vm1 = vcmask (!%p711_p3), 883712   ;;  %v2651_v59 = vld [vmem:[%s3672_s2 + $0x40] sm:$0xff] (!%p711_p3)  }
  0xab   : > { %714 = sbr.rel (%p711_p3) target bundleno = 739 (0x2e3), region = 135  ;;  %s2266_s23 = sshll.u32 (!%p711_p3), %s717_s30, 6  ;;  %1366 = vmatprep.mubr.bf16.mxu0 (!%p711_p3), %v2857_v18  ;;  %936 = vmatprep.mubr.bf16.mxu1 (!%p711_p3), %v2857_v18  ;;  %v2652_v60 = vld [vmem:[%s3672_s2 + $0x10] sm:$0xff] (!%p711_p3)   ;;  %vm1434_vm2 = vcmask (!%p711_p3), 875520   ;;  %vm897_vm3 = vcmask (!%p711_p3), 523264   ;;  %v2653_v3 = vld [vmem:[%s3672_s2 + $0x18] sm:$0xff] (!%p711_p3)  }
  0xac   : > { %s3246_s11 = scalar_lea.vmem (!%p711_p3), [#allocation2], %s2266_s23  ;;  %s2267_s10 = sshll.u32 (!%p711_p3), %s724_s20, 5  ;;  %2634 = vset.pattern.permute.xlu1 (!%p711_p3), %v2857_v18  ;;  %2633 = vset.pattern.permute.xlu0 (!%p711_p3), %v2857_v18  ;;  %v2654_v4 = vld [vmem:[%s3672_s2 + $0x48] sm:$0xff] (!%p711_p3)   ;;  %vm1065_vm4 = vcmask (!%p711_p3), 1031168   ;;  %vm1557_vm5 = vcmask (!%p711_p3), 736256   ;;  %vm1188_vm6 = vcmask (!%p711_p3), 891904  }
  0xad   : > { %v3249_v6 = vld [vmem:[%s3246_s11 + $0x4] ss:$8 sps:$4 sm:$0xff] (!%p711_p3)   ;;  %s2855_s28 = smov (!%p711_p3), 108   ;;  %s2856_s12 = smov (!%p711_p3), 127   ;;  %v3258_v8 = vld [vmem:[%s3246_s11] ss:$8 sps:$4 sm:$0xff] (!%p711_p3)  }
  0xae   : > { %1289 = vrot.lane.b32.xlu1 (!%p711_p3), %v3249_v6, %s2855_s28  ;;  %858 = vrot.lane.b32.xlu0 (!%p711_p3), %v3249_v6, %s2856_s12  ;;  %s726_s8 = scalar_lea.vmem (!%p711_p3), [#allocation3], %s2267_s10  ;;  %v3267_v10 = vld [vmem:[%s3246_s11 + $0x14] ss:$8 sps:$4 sm:$0xff] (!%p711_p3)   ;;  %v3278_v11 = vld [vmem:[%s3246_s11 + $0x10] ss:$8 sps:$4 sm:$0xff] (!%p711_p3)   ;;  %s2858_s15 = smov (!%p711_p3), 107  }
  0xaf   : > { %v3255_v7 = vld [vmem:[%s726_s8] sm:$0xff] (!%p711_p3)   ;;  %v3264_v9 = vld [vmem:[%s726_s8 + $0x8] sm:$0xff] (!%p711_p3)   ;;  %v3288_v12 = vld [vmem:[%s726_s8 + $0x10] sm:$0xff] (!%p711_p3)   ;;  %s2859_s29 = smov (!%p711_p3), 126   ;;  %s2860_s9 = smov (!%p711_p3), 90   ;;  %vm1680_vm7 = vcmask (!%p711_p3), 728064  }
  0xb0   : > { %v3291_v13 = vld [vmem:[%s3246_s11 + $0x24] ss:$8 sps:$4 sm:$0xff] (!%p711_p3)   ;;  %v3302_v14 = vld [vmem:[%s3246_s11 + $0x20] ss:$8 sps:$4 sm:$0xff] (!%p711_p3)   ;;  %v3308_v15 = vld [vmem:[%s726_s8 + $0x18] sm:$0xff] (!%p711_p3)   ;;  %s2861_s0 = smov (!%p711_p3), 109  }
  0xb1   : > { %v3311_v16 = vld [vmem:[%s3246_s11 + $0x34] ss:$8 sps:$4 sm:$0xff] (!%p711_p3)   ;;  %v3322_v17 = vld [vmem:[%s3246_s11 + $0x30] ss:$8 sps:$4 sm:$0xff] (!%p711_p3)   ;;  %s2862_s25 = smov (!%p711_p3), 89   ;;  %s2863_s20 = smov (!%p711_p3), 88  }
  0xb2   : > { %1291 = vrot.lane.b32.xlu1 %v3255_v7, %s2855_s28  ;;  %860 = vrot.lane.b32.xlu0 %v3255_v7, %s2856_s12  ;;  %vm1803_vm8 = vcmask 719872   ;;  %s2268_s23 = sshll.u32 %s717_s30, 5  ;;  %s3693_s30 = sadd.s32 (%p2946_p8), 4294967295, %s2787_s19  }
  0xb3   : > { %s751_s17 = scalar_lea.vmem [#allocation4], %s2268_s23 }
  0xb6   : > { %1287 = vrot.lane.b32.xlu1 %v3258_v8, %s2855_s28  ;;  %856 = vrot.lane.b32.xlu0 %v3258_v8, %s2856_s12 }
  0xba   : > { %866 = vrot.lane.b32.xlu1 %v3264_v9, %s2856_s12  ;;  %864 = vrot.lane.b32.xlu0 %v3267_v10, %s2856_s12 }
  0xbe   : > { %1297 = vrot.lane.b32.xlu1 %v3264_v9, %s2855_s28  ;;  %1295 = vrot.lane.b32.xlu0 %v3267_v10, %s2855_s28 }
  0xc2   : > { %1293 = vrot.lane.b32.xlu1 %v3278_v11, %s2855_s28  ;;  %862 = vrot.lane.b32.xlu0 %v3278_v11, %s2856_s12 }
  0xc6   : > { %872 = vrot.lane.b32.xlu1 %v3288_v12, %s2856_s12  ;;  %870 = vrot.lane.b32.xlu0 %v3291_v13, %s2856_s12 }
  0xca   : > { %1303 = vrot.lane.b32.xlu1 %v3288_v12, %s2855_s28  ;;  %1301 = vrot.lane.b32.xlu0 %v3291_v13, %s2855_s28 }
  0xce   : > { %1299 = vrot.lane.b32.xlu1 %v3302_v14, %s2855_s28  ;;  %868 = vrot.lane.b32.xlu0 %v3302_v14, %s2856_s12 }
  0xd2   : > { %878 = vrot.lane.b32.xlu1 %v3308_v15, %s2856_s12  ;;  %876 = vrot.lane.b32.xlu0 %v3311_v16, %s2856_s12 }
  0xd6   : > { %1309 = vrot.lane.b32.xlu1 %v3308_v15, %s2855_s28  ;;  %1307 = vrot.lane.b32.xlu0 %v3311_v16, %s2855_s28 }
  0xda   : > { %1305 = vrot.lane.b32.xlu1 %v3322_v17, %s2855_s28  ;;  %874 = vrot.lane.b32.xlu0 %v3322_v17, %s2856_s12 }
  0xde   : > { %1414 = vrot.lane.b32.xlu1 %v3255_v7, %s2858_s15  ;;  %1412 = vrot.lane.b32.xlu0 %v3249_v6, %s2858_s15 }
  0xe2   : > { %1418 = vrot.lane.b32.xlu1 %v3267_v10, %s2858_s15  ;;  %1410 = vrot.lane.b32.xlu0 %v3258_v8, %s2858_s15 }
  0xe6   : > { %1416 = vrot.lane.b32.xlu1 %v3278_v11, %s2858_s15  ;;  %1420 = vrot.lane.b32.xlu0 %v3264_v9, %s2858_s15 }
  0xea   : > { %1426 = vrot.lane.b32.xlu1 %v3288_v12, %s2858_s15  ;;  %1424 = vrot.lane.b32.xlu0 %v3291_v13, %s2858_s15 }
  0xee   : > { %1430 = vrot.lane.b32.xlu1 %v3311_v16, %s2858_s15  ;;  %1422 = vrot.lane.b32.xlu0 %v3302_v14, %s2858_s15 }
  0xf2   : > { %1428 = vrot.lane.b32.xlu1 %v3322_v17, %s2858_s15  ;;  %1432 = vrot.lane.b32.xlu0 %v3308_v15, %s2858_s15 }
  0xf6   : > { %1045 = vrot.lane.b32.xlu1 %v3255_v7, %s2859_s29  ;;  %1043 = vrot.lane.b32.xlu0 %v3249_v6, %s2859_s29 }
  0xfa   : > { %1537 = vrot.lane.b32.xlu1 %v3255_v7, %s2860_s9  ;;  %1535 = vrot.lane.b32.xlu0 %v3249_v6, %s2860_s9 }
  0xfe   : > { %1533 = vrot.lane.b32.xlu1 %v3258_v8, %s2860_s9  ;;  %1041 = vrot.lane.b32.xlu0 %v3258_v8, %s2859_s29 }
 0x102   : > { %1051 = vrot.lane.b32.xlu1 %v3264_v9, %s2859_s29  ;;  %1049 = vrot.lane.b32.xlu0 %v3267_v10, %s2859_s29 }
 0x106   : > { %1543 = vrot.lane.b32.xlu1 %v3264_v9, %s2860_s9  ;;  %1541 = vrot.lane.b32.xlu0 %v3267_v10, %s2860_s9 }
 0x10a   : > { %1539 = vrot.lane.b32.xlu1 %v3278_v11, %s2860_s9  ;;  %1047 = vrot.lane.b32.xlu0 %v3278_v11, %s2859_s29 }
 0x10e   : > { %1057 = vrot.lane.b32.xlu1 %v3288_v12, %s2859_s29  ;;  %1055 = vrot.lane.b32.xlu0 %v3291_v13, %s2859_s29 }
 0x112   : > { %1549 = vrot.lane.b32.xlu1 %v3288_v12, %s2860_s9  ;;  %1547 = vrot.lane.b32.xlu0 %v3291_v13, %s2860_s9 }
 0x116   : > { %1545 = vrot.lane.b32.xlu1 %v3302_v14, %s2860_s9  ;;  %1053 = vrot.lane.b32.xlu0 %v3302_v14, %s2859_s29 }
 0x11a   : > { %1063 = vrot.lane.b32.xlu1 %v3308_v15, %s2859_s29  ;;  %1061 = vrot.lane.b32.xlu0 %v3311_v16, %s2859_s29 }
 0x11e   : > { %1555 = vrot.lane.b32.xlu1 %v3308_v15, %s2860_s9  ;;  %1553 = vrot.lane.b32.xlu0 %v3311_v16, %s2860_s9 }
 0x120   : > { %v1290_v19 = vpop.permute.xlu1 %1289  ;;  %v859_v20 = vpop.permute.xlu0 %858 }
 0x122   : > { %1551 = vrot.lane.b32.xlu1 %v3322_v17, %s2860_s9  ;;  %1059 = vrot.lane.b32.xlu0 %v3322_v17, %s2859_s29 }
 0x124   : > { %v1292_v21 = vpop.permute.xlu1 %1291  ;;  %v861_v22 = vpop.permute.xlu0 %860 }
 0x125   : > { %v882_v23 = vsel %vm880_vm0, %v859_v20, %v861_v22  ;;  %v1313_v24 = vsel %vm1311_vm1, %v1290_v19, %v1292_v21 }
 0x126   : > { %904 = vmatprep.subr.bf16.mxu1 %v882_v23  ;;  %1334 = vmatprep.subr.bf16.mxu0 %v1313_v24  ;;  %v2655_v23 = vld [vmem:[%s3672_s2] sm:$0xff]  }
 0x127   : > { %1168 = vrot.lane.b32.xlu1 %v3255_v7, %s2861_s0  ;;  %1166 = vrot.lane.b32.xlu0 %v3249_v6, %s2861_s0 }
 0x128   : > { %v1288_v25 = vpop.permute.xlu1 %1287  ;;  %v857_v26 = vpop.permute.xlu0 %856 }
 0x129   : > { %v1312_v27 = vsel %vm1311_vm1, %v1288_v25, %v1290_v19  ;;  %v881_v28 = vsel %vm880_vm0, %v857_v26, %v859_v20 }
 0x12a   : > { %1335 = vmatpush1.bf16.msra.mxu0 %v1312_v27  ;;  %905 = vmatpush1.bf16.msra.mxu1 %v881_v28  ;;  %v2657_v27 = vld [vmem:[%s3672_s2 + $0x8] sm:$0xff]   ;;  %v2656_v28 = vld [vmem:[%s3672_s2 + $0x50] sm:$0xff]  }
 0x12b   : > { %1660 = vrot.lane.b32.xlu1 %v3255_v7, %s2862_s25  ;;  %1658 = vrot.lane.b32.xlu0 %v3249_v6, %s2862_s25 }
 0x12c   : > { %v867_v29 = vpop.permute.xlu1 %866  ;;  %v865_v30 = vpop.permute.xlu0 %864 }
 0x12d   : > { %v884_v31 = vsel %vm880_vm0, %v865_v30, %v867_v29 }
 0x12e   : > { %906 = vmatprep.subr.bf16.mxu1 %v884_v31  ;;  %v1887_v31 = vld [vmem:[%s3673_s3] sm:$0xff] }
 0x12f   : > { %1656 = vrot.lane.b32.xlu1 %v3258_v8, %s2862_s25  ;;  %1164 = vrot.lane.b32.xlu0 %v3258_v8, %s2861_s0 }
 0x130   : > { %v1298_v32 = vpop.permute.xlu1 %1297  ;;  %v1296_v33 = vpop.permute.xlu0 %1295 }
 0x131   : > { %v1315_v34 = vsel %vm1311_vm1, %v1296_v33, %v1298_v32 }
 0x132   : > { %1336 = vmatprep.subr.bf16.mxu0 %v1315_v34  ;;  %v1889_v34 = vld [vmem:[%s3673_s3 + $0x10] sm:$0xff] }
 0x133   : > { %1174 = vrot.lane.b32.xlu1 %v3264_v9, %s2861_s0  ;;  %1172 = vrot.lane.b32.xlu0 %v3267_v10, %s2861_s0 }
 0x134   : > { %v1294_v35 = vpop.permute.xlu1 %1293  ;;  %v863_v36 = vpop.permute.xlu0 %862 }
 0x135   : > { %v883_v37 = vsel %vm880_vm0, %v863_v36, %v865_v30  ;;  %v1314_v38 = vsel %vm1311_vm1, %v1294_v35, %v1296_v33  ;;  %v1888_v30 = vld [vmem:[%s3673_s3 + $0x8] sm:$0xff]  ;;  %v2658_v33 = vld [vmem:[%s3672_s2 + $0x58] sm:$0xff]  }
 0x136   : > { %907 = vmatpush1.bf16.msra.mxu1 %v883_v37  ;;  %1337 = vmatpush1.bf16.msra.mxu0 %v1314_v38  ;;  %v1890_v35 = vld [vmem:[%s3673_s3 + $0x18] sm:$0xff] }
 0x137   : > { %1666 = vrot.lane.b32.xlu1 %v3264_v9, %s2862_s25  ;;  %1664 = vrot.lane.b32.xlu0 %v3267_v10, %s2862_s25 }
 0x138   : > { %v873_v39 = vpop.permute.xlu1 %872  ;;  %v871_v40 = vpop.permute.xlu0 %870 }
 0x139   : > { %v886_v41 = vsel %vm880_vm0, %v871_v40, %v873_v39 }
 0x13a   : > { %908 = vmatprep.subr.bf16.mxu1 %v886_v41 }
 0x13b   : > { %1662 = vrot.lane.b32.xlu1 %v3278_v11, %s2862_s25  ;;  %1170 = vrot.lane.b32.xlu0 %v3278_v11, %s2861_s0 }
 0x13c   : > { %v1304_v42 = vpop.permute.xlu1 %1303  ;;  %v1302_v43 = vpop.permute.xlu0 %1301 }
 0x13d   : > { %v1317_v44 = vsel %vm1311_vm1, %v1302_v43, %v1304_v42 }
 0x13e   : > { %1338 = vmatprep.subr.bf16.mxu0 %v1317_v44 }
 0x13f   : > { %1180 = vrot.lane.b32.xlu1 %v3288_v12, %s2861_s0  ;;  %1178 = vrot.lane.b32.xlu0 %v3291_v13, %s2861_s0 }
 0x140   : > { %v1300_v45 = vpop.permute.xlu1 %1299  ;;  %v869_v46 = vpop.permute.xlu0 %868 }
 0x141   : > { %v885_v47 = vsel %vm880_vm0, %v869_v46, %v871_v40  ;;  %v1316_v48 = vsel %vm1311_vm1, %v1300_v45, %v1302_v43 }
 0x142   : > { %909 = vmatpush1.bf16.msra.mxu1 %v885_v47  ;;  %1339 = vmatpush1.bf16.msra.mxu0 %v1316_v48 }
 0x143   : > { %1672 = vrot.lane.b32.xlu1 %v3288_v12, %s2862_s25  ;;  %1670 = vrot.lane.b32.xlu0 %v3291_v13, %s2862_s25 }
 0x144   : > { %v879_v49 = vpop.permute.xlu1 %878  ;;  %v877_v50 = vpop.permute.xlu0 %876 }
 0x145   : > { %v888_v51 = vsel %vm880_vm0, %v877_v50, %v879_v49 }
 0x146   : > { %910 = vmatprep.subr.bf16.mxu1 %v888_v51 }
 0x147   : > { %1668 = vrot.lane.b32.xlu1 %v3302_v14, %s2862_s25  ;;  %1176 = vrot.lane.b32.xlu0 %v3302_v14, %s2861_s0 }
 0x148   : > { %v1310_v52 = vpop.permute.xlu1 %1309  ;;  %v1308_v53 = vpop.permute.xlu0 %1307 }
 0x149   : > { %v1319_v54 = vsel %vm1311_vm1, %v1308_v53, %v1310_v52 }
 0x14a   : > { %1340 = vmatprep.subr.bf16.mxu0 %v1319_v54 }
 0x14b   : > { %1186 = vrot.lane.b32.xlu1 %v3308_v15, %s2861_s0  ;;  %1184 = vrot.lane.b32.xlu0 %v3311_v16, %s2861_s0 }
 0x14c   : > { %v1306_v55 = vpop.permute.xlu1 %1305  ;;  %v875_v56 = vpop.permute.xlu0 %874 }
 0x14d   : > { %v887_v57 = vsel %vm880_vm0, %v875_v56, %v877_v50  ;;  %v1318_v58 = vsel %vm1311_vm1, %v1306_v55, %v1308_v53 }
 0x14e   : > { %911 = vmatpush1.bf16.msra.mxu1 %v887_v57  ;;  %1341 = vmatpush1.bf16.msra.mxu0 %v1318_v58 }
 0x14f   : > { %1678 = vrot.lane.b32.xlu1 %v3308_v15, %s2862_s25  ;;  %1676 = vrot.lane.b32.xlu0 %v3311_v16, %s2862_s25 }
 0x150   : > { %v1415_v61 = vpop.permute.xlu1 %1414  ;;  %v1413_v62 = vpop.permute.xlu0 %1412  ;;  %973 = vmatprep.subr.bf16.mxu1 %v3249_v6 }
 0x151   : > { %v1436_v63 = vsel %vm1434_vm2, %v1413_v62, %v1415_v61  ;;  %2315 = vmatmul.mubr.msk.bf16.vlgmr.msra.gmra.mrb[0].mxu0 %vm897_vm3, %v2651_v59  ;;  %2287 = vmatmul.mubr.msk.bf16.vlgmr.msra.gmra.mrb[0].mxu1 %vm897_vm3, %v2652_v60 }
 0x152   : > { %1457 = vmatprep.subr.bf16.mxu0 %v1436_v63  ;;  %974 = vmatpush1.bf16.msra.mxu1 %v3258_v8 }
 0x153   : > { %1674 = vrot.lane.b32.xlu1 %v3322_v17, %s2862_s25  ;;  %1182 = vrot.lane.b32.xlu0 %v3322_v17, %s2861_s0 }
 0x154   : > { %v1419_v0 = vpop.permute.xlu1 %1418  ;;  %v1411_v1 = vpop.permute.xlu0 %1410  ;;  %975 = vmatprep.subr.bf16.mxu1 %v3267_v10  ;;  %946 = vmatprep.mubr.bf16.mxu1 %v2857_v18 }
 0x155   : > { %v1435_v2 = vsel %vm1434_vm2, %v1411_v1, %v1413_v62  ;;  %1376 = vmatprep.mubr.bf16.mxu0 %v2857_v18 }
 0x156   : > { %1458 = vmatpush1.bf16.msra.mxu0 %v1435_v2  ;;  %976 = vmatpush1.bf16.msra.mxu1 %v3278_v11 }
 0x157   : > { %1783 = vrot.lane.b32.xlu1 %v3255_v7, %s2863_s20  ;;  %1781 = vrot.lane.b32.xlu0 %v3249_v6, %s2863_s20 }
 0x158   : > { %v1417_v5 = vpop.permute.xlu1 %1416  ;;  %v1421_v19 = vpop.permute.xlu0 %1420  ;;  %977 = vmatprep.subr.bf16.mxu1 %v3291_v13 }
 0x159   : > { %v1437_v20 = vsel %vm1434_vm2, %v1417_v5, %v1419_v0  ;;  %v1438_v21 = vsel %vm1434_vm2, %v1419_v0, %v1421_v19  ;;  %2288 = vmatmul.mubr.msk.bf16.gmra.mrb[4].mxu1 %vm897_vm3, %v2653_v3  ;;  %2316 = vmatmul.mubr.msk.bf16.gmra.mrb[4].mxu0 %vm897_vm3, %v2654_v4  ;;  %v2659_v4 = vld [vmem:[%s3672_s2 + $0x20] sm:$0xff]  }
 0x15a   : > { %1459 = vmatprep.subr.bf16.mxu0 %v1438_v21  ;;  %978 = vmatpush1.bf16.msra.mxu1 %v3302_v14  ;;  %v2660_v5 = vld [vmem:[%s3672_s2 + $0x60] sm:$0xff]  }
 0x15b   : > { %1787 = vrot.lane.b32.xlu1 %v3267_v10, %s2863_s20  ;;  %1779 = vrot.lane.b32.xlu0 %v3258_v8, %s2863_s20 }
 0x15c   : > { %1460 = vmatpush1.bf16.msra.mxu0 %v1437_v20  ;;  %v1427_v6 = vpop.permute.xlu1 %1426  ;;  %v1425_v7 = vpop.permute.xlu0 %1424  ;;  %979 = vmatprep.subr.bf16.mxu1 %v3311_v16 }
 0x15d   : > { %v1440_v22 = vsel %vm1434_vm2, %v1425_v7, %v1427_v6  ;;  %1005 = vmatprep.mubr.bf16.mxu1 %v2857_v18  ;;  %1489 = vmatprep.mubr.bf16.mxu0 %v2857_v18 }
 0x15e   : > { %1461 = vmatprep.subr.bf16.mxu0 %v1440_v22  ;;  %980 = vmatpush1.bf16.msra.mxu1 %v3322_v17  ;;  %v2661_v22 = vld [vmem:[%s3672_s2 + $0x28] sm:$0xff]  }
 0x15f   : > { %1785 = vrot.lane.b32.xlu1 %v3278_v11, %s2863_s20  ;;  %1789 = vrot.lane.b32.xlu0 %v3264_v9, %s2863_s20 }
 0x160   : > { %v1431_v8 = vpop.permute.xlu1 %1430  ;;  %v1423_v10 = vpop.permute.xlu0 %1422 }
 0x161   : > { %v1439_v24 = vsel %vm1434_vm2, %v1423_v10, %v1425_v7  ;;  %2291 = vmatmul.mubr.msk.bf16.vlgmr.msra.gmra.mrb[0].mxu1 %vm897_vm3, %v2655_v23  ;;  %v2662_v23 = vld [vmem:[%s3672_s2 + $0x68] sm:$0xff]  }
 0x162   : > { %1462 = vmatpush1.bf16.msra.mxu0 %v1439_v24  ;;  %1015 = vmatprep.mubr.bf16.mxu1 %v2857_v18 }
 0x163   : > { %1795 = vrot.lane.b32.xlu1 %v3288_v12, %s2863_s20  ;;  %1793 = vrot.lane.b32.xlu0 %v3291_v13, %s2863_s20 }
 0x164   : > { %v1429_v25 = vpop.permute.xlu1 %1428  ;;  %v1433_v11 = vpop.permute.xlu0 %1432 }
 0x165   : > { %v1441_v26 = vsel %vm1434_vm2, %v1429_v25, %v1431_v8  ;;  %v1442_v9 = vsel %vm1434_vm2, %v1431_v8, %v1433_v11 }
 0x166   : > { %1463 = vmatprep.subr.bf16.mxu0 %v1442_v9 }
 0x167   : > { %1799 = vrot.lane.b32.xlu1 %v3311_v16, %s2863_s20  ;;  %1791 = vrot.lane.b32.xlu0 %v3302_v14, %s2863_s20 }
 0x168   : > { %1464 = vmatpush1.bf16.msra.mxu0 %v1441_v26  ;;  %v1046_v12 = vpop.permute.xlu1 %1045  ;;  %v1044_v13 = vpop.permute.xlu0 %1043 }
 0x169   : > { %v1067_v29 = vsel %vm1065_vm4, %v1044_v13, %v1046_v12  ;;  %2292 = vmatmul.mubr.msk.bf16.gmra.mrb[4].mxu1 %vm897_vm3, %v2657_v27 }
 0x16a   : > { %1088 = vmatprep.subr.bf16.mxu1 %v1067_v29  ;;  %1120 = vmatprep.mubr.bf16.mxu1 %v2857_v18 }
 0x16b   : > { %1797 = vrot.lane.b32.xlu1 %v3322_v17, %s2863_s20  ;;  %1801 = vrot.lane.b32.xlu0 %v3308_v15, %s2863_s20  ;;  %s2379_s20 = sshll.u32 (%p2946_p8), %s3693_s30, 3 }
 0x16c   : > { %v1538_v14 = vpop.permute.xlu1 %1537  ;;  %v1536_v16 = vpop.permute.xlu0 %1535  ;;  %2323 = vmatmul.mubr.msk.bf16.vlgmr.msra.gmra.mrb[0].mxu0 %vm897_vm3, %v2656_v28  ;;  %s2020_s28 = scalar_lea.vmem (%p2946_p8), %s3674_s4, %s2379_s20 }
 0x16d   : > { %v1559_v32 = vsel %vm1557_vm5, %v1536_v16, %v1538_v14  ;;  %1499 = vmatprep.mubr.bf16.mxu0 %v2857_v18 }
 0x16e   : > { %1580 = vmatprep.subr.bf16.mxu0 %v1559_v32 }
 0x16f   : > { %1898 = vperm.xlu1 %2634, %v1888_v30   ;;  %1893 = vperm.xlu0 %2633, %v1887_v31  }
 0x170   : > { %v1534_v15 = vpop.permute.xlu1 %1533  ;;  %v1042_v17 = vpop.permute.xlu0 %1041 }
 0x171   : > { %v1558_v36 = vsel %vm1557_vm5, %v1534_v15, %v1536_v16  ;;  %v1066_v37 = vsel %vm1065_vm4, %v1042_v17, %v1044_v13 }
 0x172   : > { %1089 = vmatpush1.bf16.msra.mxu1 %v1066_v37  ;;  %1581 = vmatpush1.bf16.msra.mxu0 %v1558_v36 }
 0x173   : > { %1903 = vperm.xlu1 %2634, %v1889_v34   ;;  %1908 = vperm.xlu0 %2633, %v1890_v35  }
 0x174   : > { %v1052_v38 = vpop.permute.xlu1 %1051  ;;  %v1050_v39 = vpop.permute.xlu0 %1049  ;;  %2324 = vmatmul.mubr.msk.bf16.gmra.mrb[4].mxu0 %vm897_vm3, %v2658_v33 }
 0x175   : > { %v1069_v40 = vsel %vm1065_vm4, %v1050_v39, %v1052_v38  ;;  %1612 = vmatprep.mubr.bf16.mxu0 %v2857_v18 }
 0x176   : > { %1090 = vmatprep.subr.bf16.mxu1 %v1069_v40 }
 0x178   : > { %v1544_v41 = vpop.permute.xlu1 %1543  ;;  %v1542_v42 = vpop.permute.xlu0 %1541 }
 0x179   : > { %v1561_v43 = vsel %vm1557_vm5, %v1542_v42, %v1544_v41 }
 0x17a   : > { %1582 = vmatprep.subr.bf16.mxu0 %v1561_v43 }
 0x17c   : > { %v1540_v44 = vpop.permute.xlu1 %1539  ;;  %v1048_v45 = vpop.permute.xlu0 %1047 }
 0x17d   : > { %v1560_v46 = vsel %vm1557_vm5, %v1540_v44, %v1542_v42  ;;  %v1068_v47 = vsel %vm1065_vm4, %v1048_v45, %v1050_v39 }
 0x17e   : > { %1091 = vmatpush1.bf16.msra.mxu1 %v1068_v47  ;;  %1583 = vmatpush1.bf16.msra.mxu0 %v1560_v46 }
 0x180   : > { %v1058_v48 = vpop.permute.xlu1 %1057  ;;  %v1056_v49 = vpop.permute.xlu0 %1055 }
 0x181   : > { %v1071_v50 = vsel %vm1065_vm4, %v1056_v49, %v1058_v48 }
 0x182   : > { %1092 = vmatprep.subr.bf16.mxu1 %v1071_v50  ;;  %v2664_v50 = vld [vmem:[%s3672_s2 + $0x70] sm:$0xff]  }
 0x184   : > { %v1550_v51 = vpop.permute.xlu1 %1549  ;;  %v1548_v52 = vpop.permute.xlu0 %1547 }
 0x185   : > { %v1563_v53 = vsel %vm1557_vm5, %v1548_v52, %v1550_v51 }
 0x186   : > { %1584 = vmatprep.subr.bf16.mxu0 %v1563_v53 }
 0x188   : > { %v1546_v54 = vpop.permute.xlu1 %1545  ;;  %v1054_v55 = vpop.permute.xlu0 %1053 }
 0x189   : > { %v1562_v56 = vsel %vm1557_vm5, %v1546_v54, %v1548_v52  ;;  %v1070_v57 = vsel %vm1065_vm4, %v1054_v55, %v1056_v49  ;;  %v2663_v49 = vld [vmem:[%s3672_s2 + $0x30] sm:$0xff]  }
 0x18a   : > { %1093 = vmatpush1.bf16.msra.mxu1 %v1070_v57  ;;  %1585 = vmatpush1.bf16.msra.mxu0 %v1562_v56  ;;  %v2665_v57 = vld [vmem:[%s3672_s2 + $0x38] sm:$0xff]  }
 0x18c   : > { %v1064_v58 = vpop.permute.xlu1 %1063  ;;  %v1062_v59 = vpop.permute.xlu0 %1061 }
 0x18d   : > { %v1073_v60 = vsel %vm1065_vm4, %v1062_v59, %v1064_v58  ;;  %v2666_v58 = vld [vmem:[%s3672_s2 + $0x78] sm:$0xff]  }
 0x18e   : > { %1094 = vmatprep.subr.bf16.mxu1 %v1073_v60 }
 0x190   : > { %v1556_v61 = vpop.permute.xlu1 %1555  ;;  %v1554_v62 = vpop.permute.xlu0 %1553 }
 0x191   : > { %v1565_v63 = vsel %vm1557_vm5, %v1554_v62, %v1556_v61 }
 0x192   : > { %1586 = vmatprep.subr.bf16.mxu0 %v1565_v63 }
 0x194   : > { %v1552_v0 = vpop.permute.xlu1 %1551  ;;  %v1060_v1 = vpop.permute.xlu0 %1059 }
 0x195   : > { %v1564_v2 = vsel %vm1557_vm5, %v1552_v0, %v1554_v62  ;;  %v1072_v3 = vsel %vm1065_vm4, %v1060_v1, %v1062_v59 }
 0x196   : > { %1095 = vmatpush1.bf16.msra.mxu1 %v1072_v3  ;;  %1587 = vmatpush1.bf16.msra.mxu0 %v1564_v2 }
 0x199   : > { %v1169_v19 = vpop.permute.xlu1 %1168  ;;  %v1167_v20 = vpop.permute.xlu0 %1166  ;;  %2299 = vmatmul.mubr.msk.bf16.vlgmr.msra.gmra.mrb[0].mxu1 %vm897_vm3, %v2659_v4  ;;  %2331 = vmatmul.mubr.msk.bf16.vlgmr.msra.gmra.mrb[0].mxu0 %vm897_vm3, %v2660_v5 }
 0x19a   : > { %v1190_v21 = vsel %vm1188_vm6, %v1167_v20, %v1169_v19  ;;  %1130 = vmatprep.mubr.bf16.mxu1 %v2857_v18  ;;  %1622 = vmatprep.mubr.bf16.mxu0 %v2857_v18 }
 0x19b   : > { %1211 = vmatprep.subr.bf16.mxu1 %v1190_v21 }
 0x19d   : > { %v1661_v6 = vpop.permute.xlu1 %1660  ;;  %v1659_v7 = vpop.permute.xlu0 %1658 }
 0x19e   : > { %v1682_v8 = vsel %vm1680_vm7, %v1659_v7, %v1661_v6  ;;  %v2668_v6 = vld [vmem:[%s3672_s2 + $0x88] sm:$0xff]  }
 0x19f   : > { %1703 = vmatprep.subr.bf16.mxu0 %v1682_v8 }
 0x1a1   : > { %v1657_v10 = vpop.permute.xlu1 %1656  ;;  %v1165_v24 = vpop.permute.xlu0 %1164  ;;  %2300 = vmatmul.mubr.msk.bf16.gmra.mrb[4].mxu1 %vm897_vm3, %v2661_v22  ;;  %2332 = vmatmul.mubr.msk.bf16.gmra.mrb[4].mxu0 %vm897_vm3, %v2662_v23 }
 0x1a2   : > { %v1681_v25 = vsel %vm1680_vm7, %v1657_v10, %v1659_v7  ;;  %v1189_v11 = vsel %vm1188_vm6, %v1165_v24, %v1167_v20  ;;  %1243 = vmatprep.mubr.bf16.mxu1 %v2857_v18  ;;  %1735 = vmatprep.mubr.bf16.mxu0 %v2857_v18 }
 0x1a3   : > { %1212 = vmatpush1.bf16.msra.mxu1 %v1189_v11  ;;  %1704 = vmatpush1.bf16.msra.mxu0 %v1681_v25 }
 0x1a5   : > { %v1175_v26 = vpop.permute.xlu1 %1174  ;;  %v1173_v9 = vpop.permute.xlu0 %1172 }
 0x1a6   : > { %v1192_v27 = vsel %vm1188_vm6, %v1173_v9, %v1175_v26 }
 0x1a7   : > { %1213 = vmatprep.subr.bf16.mxu1 %v1192_v27 }
 0x1a9   : > { %v1667_v12 = vpop.permute.xlu1 %1666  ;;  %v1665_v13 = vpop.permute.xlu0 %1664 }
 0x1aa   : > { %v1684_v28 = vsel %vm1680_vm7, %v1665_v13, %v1667_v12 }
 0x1ab   : > { %1705 = vmatprep.subr.bf16.mxu0 %v1684_v28 }
 0x1ad   : > { %v1663_v29 = vpop.permute.xlu1 %1662  ;;  %v1171_v14 = vpop.permute.xlu0 %1170 }
 0x1ae   : > { %v1683_v16 = vsel %vm1680_vm7, %v1663_v29, %v1665_v13  ;;  %v1191_v30 = vsel %vm1188_vm6, %v1171_v14, %v1173_v9 }
 0x1af   : > { %1214 = vmatpush1.bf16.msra.mxu1 %v1191_v30  ;;  %1706 = vmatpush1.bf16.msra.mxu0 %v1683_v16 }
 0x1b1   : > { %v1181_v31 = vpop.permute.xlu1 %1180  ;;  %v1179_v32 = vpop.permute.xlu0 %1178 }
 0x1b2   : > { %v1194_v15 = vsel %vm1188_vm6, %v1179_v32, %v1181_v31 }
 0x1b3   : > { %1215 = vmatprep.subr.bf16.mxu1 %v1194_v15 }
 0x1b5   : > { %v1673_v17 = vpop.permute.xlu1 %1672  ;;  %v1671_v33 = vpop.permute.xlu0 %1670 }
 0x1b6   : > { %v1686_v34 = vsel %vm1680_vm7, %v1671_v33, %v1673_v17 }
 0x1b7   : > { %1707 = vmatprep.subr.bf16.mxu0 %v1686_v34 }
 0x1b9   : > { %v1669_v35 = vpop.permute.xlu1 %1668  ;;  %v1177_v36 = vpop.permute.xlu0 %1176 }
 0x1ba   : > { %v1685_v37 = vsel %vm1680_vm7, %v1669_v35, %v1671_v33  ;;  %v1193_v38 = vsel %vm1188_vm6, %v1177_v36, %v1179_v32 }
 0x1bb   : > { %1216 = vmatpush1.bf16.msra.mxu1 %v1193_v38  ;;  %1708 = vmatpush1.bf16.msra.mxu0 %v1685_v37 }
 0x1bd   : > { %v1187_v39 = vpop.permute.xlu1 %1186  ;;  %v1185_v40 = vpop.permute.xlu0 %1184 }
 0x1be   : > { %v1196_v41 = vsel %vm1188_vm6, %v1185_v40, %v1187_v39 }
 0x1bf   : > { %1217 = vmatprep.subr.bf16.mxu1 %v1196_v41 }
 0x1c1   : > { %v1679_v42 = vpop.permute.xlu1 %1678  ;;  %v1677_v43 = vpop.permute.xlu0 %1676 }
 0x1c2   : > { %v1688_v44 = vsel %vm1680_vm7, %v1677_v43, %v1679_v42 }
 0x1c3   : > { %1709 = vmatprep.subr.bf16.mxu0 %v1688_v44 }
 0x1c5   : > { %v1675_v45 = vpop.permute.xlu1 %1674  ;;  %v1183_v46 = vpop.permute.xlu0 %1182 }
 0x1c6   : > { %v1687_v47 = vsel %vm1680_vm7, %v1675_v45, %v1677_v43  ;;  %v1195_v48 = vsel %vm1188_vm6, %v1183_v46, %v1185_v40 }
 0x1c7   : > { %1218 = vmatpush1.bf16.msra.mxu1 %v1195_v48  ;;  %1710 = vmatpush1.bf16.msra.mxu0 %v1687_v47 }
 0x1c9   : > { %v1784_v51 = vpop.permute.xlu1 %1783  ;;  %v1782_v52 = vpop.permute.xlu0 %1781 }
 0x1ca   : > { %2307 = vmatmul.mubr.msk.bf16.vlgmr.msra.gmra.mrb[0].mxu1 %vm897_vm3, %v2663_v49  ;;  %2339 = vmatmul.mubr.msk.bf16.vlgmr.msra.gmra.mrb[0].mxu0 %vm897_vm3, %v2664_v50  ;;  %v1805_v53 = vsel %vm1803_vm8, %v1782_v52, %v1784_v51 }
 0x1cb   : > { %1826 = vmatprep.subr.bf16.mxu0 %v1805_v53  ;;  %2382 = vmatprep.subr.bf16.mxu1 %v1805_v53 }
 0x1cc   : > { %1253 = vmatprep.mubr.bf16.mxu1 %v2857_v18  ;;  %1745 = vmatprep.mubr.bf16.mxu0 %v2857_v18 }
 0x1cd   : > { %v1788_v54 = vpop.permute.xlu1 %1787  ;;  %v1780_v55 = vpop.permute.xlu0 %1779 }
 0x1ce   : > { %v1804_v56 = vsel %vm1803_vm8, %v1780_v55, %v1782_v52 }
 0x1cf   : > { %1827 = vmatpush1.bf16.msra.mxu0 %v1804_v56  ;;  %2386 = vmatpush1.bf16.msra.mxu1 %v1804_v56 }
 0x1d1   : > { %v1786_v59 = vpop.permute.xlu1 %1785  ;;  %v1790_v60 = vpop.permute.xlu0 %1789 }
 0x1d2   : > { %v1806_v61 = vsel %vm1803_vm8, %v1786_v59, %v1788_v54  ;;  %2308 = vmatmul.mubr.msk.bf16.gmra.mrb[4].mxu1 %vm897_vm3, %v2665_v57  ;;  %2340 = vmatmul.mubr.msk.bf16.gmra.mrb[4].mxu0 %vm897_vm3, %v2666_v58  ;;  %v1807_v62 = vsel %vm1803_vm8, %v1788_v54, %v1790_v60 }
 0x1d3   : > { %1828 = vmatprep.subr.bf16.mxu0 %v1807_v62  ;;  %2383 = vmatprep.subr.bf16.mxu1 %v1807_v62 }
 0x1d4   : > { %1829 = vmatpush1.bf16.msra.mxu0 %v1806_v61  ;;  %2387 = vmatpush1.bf16.msra.mxu1 %v1806_v61 }
 0x1d5   : > { %v1796_v63 = vpop.permute.xlu1 %1795  ;;  %v1794_v0 = vpop.permute.xlu0 %1793  ;;  %1858 = vmatprep.mubr.bf16.mxu0 %v2857_v18  ;;  %1868 = vmatprep.mubr.bf16.mxu1 %v2857_v18  ;;  %v2667_v18 = vld [vmem:[%s3672_s2 + $0x80] sm:$0xff]  }
 0x1d6   : > { %v1809_v1 = vsel %vm1803_vm8, %v1794_v0, %v1796_v63 }
 0x1d7   : > { %1830 = vmatprep.subr.bf16.mxu0 %v1809_v1  ;;  %2384 = vmatprep.subr.bf16.mxu1 %v1809_v1 }
 0x1d9   : > { %v1800_v2 = vpop.permute.xlu1 %1799  ;;  %v1792_v3 = vpop.permute.xlu0 %1791 }
 0x1da   : > { %v1808_v4 = vsel %vm1803_vm8, %v1792_v3, %v1794_v0 }
 0x1db   : > { %1831 = vmatpush1.bf16.msra.mxu0 %v1808_v4  ;;  %2388 = vmatpush1.bf16.msra.mxu1 %v1808_v4 }
 0x1dd   : > { %v1798_v5 = vpop.permute.xlu1 %1797  ;;  %v1802_v19 = vpop.permute.xlu0 %1801 }
 0x1de   : > { %v1810_v20 = vsel %vm1803_vm8, %v1798_v5, %v1800_v2  ;;  %v1811_v21 = vsel %vm1803_vm8, %v1800_v2, %v1802_v19 }
 0x1df   : > { %1832 = vmatprep.subr.bf16.mxu0 %v1811_v21  ;;  %2385 = vmatprep.subr.bf16.mxu1 %v1811_v21 }
 0x1e0   : > { %1833 = vmatpush1.bf16.msra.mxu0 %v1810_v20  ;;  %2389 = vmatpush1.bf16.msra.mxu1 %v1810_v20 }
 0x1e3   : > { %2347 = vmatmul.mubr.msk.bf16.vlgmr.msra.gmra.mrb[0].mxu0 %vm897_vm3, %v2667_v18  ;;  %2348 = vmatmul.mubr.msk.bf16.vlgmr.msra.gmra.mrb[8].mxu1 %vm897_vm3, %v2668_v6 }
 0x1ee   : > { %v1899_v16 = vpop.permute.xlu1 %1898  ;;  %v1894_v30 = vpop.permute.xlu0 %1893 }
 0x1f2   : > { %v1904_v31 = vpop.permute.xlu1 %1903  ;;  %v1909_v54 = vpop.permute.xlu0 %1908 }
 0x29d   : > { %v1245_v7 = vpop.f32.mrb[0].mxu1 }
 0x29e   : > { %v1247_v22 = vpop.f32.mrb[1].mxu1 }
 0x29f   : > { %v1249_v23 = vpop.f32.mrb[2].mxu1 }
 0x2a0   : > { %v1251_v8 = vpop.f32.mrb[3].mxu1 }
 0x2a5   : > { %v1255_v10 = vpop.f32.mrb[4].mxu1  ;;  %v1747_v24 = vpop.f32.mrb[4].mxu0 }
 0x2a6   : > { %v2394_v25 = vadd.f32 %v1747_v24, %v1255_v10  ;;  %v1257_v11 = vpop.f32.mrb[5].mxu1  ;;  %v1749_v26 = vpop.f32.mrb[5].mxu0 }
 0x2a7   : > { %v2396_v9 = vadd.f32 %v1749_v26, %v1257_v11  ;;  %v1259_v27 = vpop.f32.mrb[6].mxu1  ;;  %v1751_v12 = vpop.f32.mrb[6].mxu0 }
 0x2a8   : > { %v2398_v13 = vadd.f32 %v1751_v12, %v1259_v27  ;;  %v1261_v28 = vpop.f32.mrb[7].mxu1  ;;  %v1753_v29 = vpop.f32.mrb[7].mxu0 }
 0x2a9   : > { %v2400_v14 = vadd.f32 %v1753_v29, %v1261_v28 }
 0x2b6   : > { %v1860_v32 = vpop.f32.mrb[0].mxu0  ;;  %v1870_v15 = vpop.f32.mrb[8].mxu1 }
 0x2b7   : > { %v2390_v17 = vadd.f32 %v1860_v32, %v1245_v7  ;;  %v2395_v33 = vadd.f32 %v2394_v25, %v1870_v15  ;;  %v1862_v34 = vpop.f32.mrb[1].mxu0  ;;  %v1872_v35 = vpop.f32.mrb[9].mxu1 }
 0x2b8   : > { %v2391_v36 = vadd.f32 %v1862_v34, %v1247_v22  ;;  %v2397_v37 = vadd.f32 %v2396_v9, %v1872_v35  ;;  %v1864_v38 = vpop.f32.mrb[2].mxu0  ;;  %v1874_v39 = vpop.f32.mrb[10].mxu1 }
 0x2b9   : > { %v1911_v40 = vadd.f32 %v2390_v17, %v1894_v30  ;;  %v3612_v41 = vadd.f32 %v2395_v33, %v1904_v31  ;;  %v2392_v42 = vadd.f32 %v1864_v38, %v1249_v23  ;;  %v2399_v43 = vadd.f32 %v2398_v13, %v1874_v39  ;;  %v1866_v44 = vpop.f32.mrb[3].mxu0  ;;  %v1876_v45 = vpop.f32.mrb[11].mxu1 }
 0x2ba   : > { %v1912_v46 = vadd.f32 %v2391_v36, %v1894_v30  ;;  %v3614_v47 = vadd.f32 %v2397_v37, %v1904_v31  ;;  %v2393_v48 = vadd.f32 %v1866_v44, %v1251_v8  ;;  %v2401_v49 = vadd.f32 %v2400_v14, %v1876_v45 }
 0x2bb   : > { %v1919_v50 = vmin.f32 %v1911_v40, 0.0  ;;  %v1923_v51 = vmin.f32 %v3612_v41, 0.0  ;;  %v1913_v57 = vadd.f32 %v2392_v42, %v1899_v16  ;;  %v3618_v58 = vadd.f32 %v2399_v43, %v1909_v54 }
 0x2bc   : > { %v1920_v52 = vmin.f32 %v1912_v46, 0.0  ;;  %v1924_v53 = vmin.f32 %v3614_v47, 0.0  ;;  %v3620_v61 = vadd.f32 %v2393_v48, %v1899_v16  ;;  %v3622_v62 = vadd.f32 %v2401_v49, %v1909_v54 }
 0x2bd   : > { %v1927_v55 = vmul.f32 1.442695, %v1919_v50  ;;  %v1935_v56 = vmul.f32 1.442695, %v1923_v51  ;;  %v1921_v63 = vmin.f32 %v1913_v57, 0.0  ;;  %v1925_v0 = vmin.f32 %v3618_v58, 0.0 }
 0x2be   : > { %v1929_v59 = vmul.f32 1.442695, %v1920_v52  ;;  %v1937_v60 = vmul.f32 1.442695, %v1924_v53  ;;  %v1922_v1 = vmin.f32 %v3620_v61, 0.0  ;;  %v1926_v4 = vmin.f32 %v3622_v62, 0.0 }
 0x2bf   : > { %2669 = vpow2.f32 %v1927_v55  ;;  %v1931_v2 = vmul.f32 1.442695, %v1921_v63  ;;  %v1939_v3 = vmul.f32 1.442695, %v1925_v0  ;;  %vm1959_vm9 = vcmp.gt.f32.partialorder %v1911_v40, 0.0 }
 0x2c0   : > { %2671 = vpow2.f32 %v1929_v59  ;;  %v1933_v5 = vmul.f32 1.442695, %v1922_v1  ;;  %v1941_v19 = vmul.f32 1.442695, %v1926_v4  ;;  %vm1960_vm10 = vcmp.gt.f32.partialorder %v1912_v46, 0.0 }
 0x2c1   : > { %2673 = vpow2.f32 %v1935_v56  ;;  %vm1963_vm11 = vcmp.gt.f32.partialorder %v3612_v41, 0.0  ;;  %vm1964_vm12 = vcmp.gt.f32.partialorder %v3614_v47, 0.0  ;;  %vm1961_vm13 = vcmp.gt.f32.partialorder %v1913_v57, 0.0 }
 0x2c2   : > { %2675 = vpow2.f32 %v1937_v60  ;;  %vm1965_vm14 = vcmp.gt.f32.partialorder %v3618_v58, 0.0  ;;  %vm1962_vm15 = vcmp.gt.f32.partialorder %v3620_v61, 0.0  ;;  %vm1966_vm0 = vcmp.gt.f32.partialorder %v3622_v62, 0.0 }
 0x2c3   : > { %2677 = vpow2.f32 %v1931_v2 }
 0x2c4   : > { %2679 = vpow2.f32 %v1939_v3 }
 0x2c5   : > { %2681 = vpow2.f32 %v1933_v5 }
 0x2c6   : > { %2683 = vpow2.f32 %v1941_v19 }
 0x2c9   : > { %v2670_v20 = vpop.eup %2669 }
 0x2ca   : > { %v2672_v21 = vpop.eup %2671  ;;  %v2349_v18 = vadd.f32 -1.0, %v2670_v20 }
 0x2cb   : > { %v2674_v6 = vpop.eup %2673  ;;  %v2350_v7 = vadd.f32 -1.0, %v2672_v21 }
 0x2cc   : > { %v2676_v22 = vpop.eup %2675  ;;  %v1951_v23 = vmul.f32 1.6732632, %v2349_v18  ;;  %v2353_v8 = vadd.f32 -1.0, %v2674_v6 }
 0x2cd   : > { %v2678_v10 = vpop.eup %2677  ;;  %v1952_v24 = vmul.f32 1.6732632, %v2350_v7  ;;  %v2354_v25 = vadd.f32 -1.0, %v2676_v22 }
 0x2ce   : > { %v2680_v11 = vpop.eup %2679  ;;  %v1967_v26 = vsel %vm1959_vm9, %v1911_v40, %v1951_v23  ;;  %v1955_v9 = vmul.f32 1.6732632, %v2353_v8  ;;  %v2351_v27 = vadd.f32 -1.0, %v2678_v10 }
 0x2cf   : > { %v2682_v12 = vpop.eup %2681  ;;  %v1975_v13 = vmul.f32 1.050701, %v1967_v26  ;;  %v1968_v28 = vsel %vm1960_vm10, %v1912_v46, %v1952_v24  ;;  %v1956_v29 = vmul.f32 1.6732632, %v2354_v25  ;;  %v2355_v14 = vadd.f32 -1.0, %v2680_v11 }
 0x2d0   : > { %v2684_v16 = vpop.eup %2683  ;;  %v1976_v30 = vmul.f32 1.050701, %v1968_v28  ;;  %v1971_v31 = vsel %vm1963_vm11, %v3612_v41, %v1955_v9  ;;  %v1953_v32 = vmul.f32 1.6732632, %v2351_v27  ;;  %v2352_v15 = vadd.f32 -1.0, %v2682_v12 }
 0x2d1   : > { %v1972_v17 = vsel %vm1964_vm12, %v3614_v47, %v1956_v29  ;;  %v1979_v33 = vmul.f32 1.050701, %v1971_v31  ;;  %v1957_v34 = vmul.f32 1.6732632, %v2355_v14  ;;  %v2356_v35 = vadd.f32 -1.0, %v2684_v16 }
 0x2d2   : > { %v2375_v36 = vpack.c.bf16 %v1976_v30, %v1975_v13  ;;  %v1980_v37 = vmul.f32 1.050701, %v1972_v17  ;;  %v1969_v38 = vsel %vm1961_vm13, %v1913_v57, %v1953_v32  ;;  %v1954_v39 = vmul.f32 1.6732632, %v2352_v15 }
 0x2d3   : > { %v1977_v40 = vmul.f32 1.050701, %v1969_v38  ;;  %v1973_v42 = vsel %vm1965_vm14, %v3618_v58, %v1957_v34  ;;  %v1958_v41 = vmul.f32 1.6732632, %v2356_v35 }
 0x2d4   : > { %2007 = vst [vmem:[%s751_s17] sm:$0xff] %v2375_v36  ;;  %v2377_v43 = vpack.c.bf16 %v1980_v37, %v1979_v33  ;;  %v1981_v44 = vmul.f32 1.050701, %v1973_v42  ;;  %v1970_v45 = vsel %vm1962_vm15, %v3620_v61, %v1954_v39  ;;  %2017 = sbr.rel (!%p2946_p8) target bundleno = 739 (0x2e3), region = 147 }
 0x2d5   : > { %v1978_v46 = vmul.f32 1.050701, %v1970_v45  ;;  %v1974_v47 = vsel %vm1966_vm0, %v3622_v62, %v1958_v41 }
 0x2d6   : > { %2009 = vst [vmem:[%s751_s17 + $0x10] sm:$0xff] %v2377_v43  ;;  %v1982_v48 = vmul.f32 1.050701, %v1974_v47 }
 0x2d7   : > { %v2376_v49 = vpack.c.bf16 %v1978_v46, %v1977_v40 }
 0x2d8   : > { %v2378_v50 = vpack.c.bf16 %v1982_v48, %v1981_v44 }
 0x2d9   : > { %2008 = vst [vmem:[%s751_s17 + $0x8] sm:$0xff] %v2376_v49 }
 0x2da   : > { %2010 = vst [vmem:[%s751_s17 + $0x18] sm:$0xff] %v2378_v50 }
 0x2db   : > { %v2054_v51 = vld [vmem:[%s751_s17] sm:$0xff] }
 0x2dc   : > { %2055 = vst [vmem:[%s2020_s28] sm:$0xff] %v2054_v51 }
 0x2dd   : > { %v2058_v53 = vld [vmem:[%s751_s17 + $0x10] sm:$0xff] }
 0x2de   : > { %2059 = vst [vmem:[%s2020_s28 + $0x20] sm:$0xff] %v2058_v53 }
 0x2e0   : > { %v2056_v52 = vld [vmem:[%s751_s17 + $0x8] sm:$0xff] }
 0x2e1   : > { %v2060_v54 = vld [vmem:[%s751_s17 + $0x18] sm:$0xff]  ;;  %2057 = vst [vmem:[%s2020_s28 + $0x10] sm:$0xff] %v2056_v52 }
 0x2e2   : > { %2061 = vst [vmem:[%s2020_s28 + $0x30] sm:$0xff] %v2060_v54 }
 0x2e3 PF: > { %s3694_s19 = sld [smem:[#allocation5_spill]]  ;;  %p11_p8 = scmp.ge.s32.totalorder %s2916_s21, 4  }
 0x2e4   : > { %s3695_s15 = smov %s2775_s16  ;;  %s3696_s16 = smov %s2941_s5 }
 0x2e5   : > { %s3697_s17 = smov %s2783_s18  ;;  %13 = sbr.rel (!%p11_p8) target bundleno = 5 (0x5), region = 294 }
 0x2e9   : > { %s3698_s18 = smov %s3694_s19  ;;  %s3699_s19 = smov %s2916_s21 }

// kernel: convolutional_regressor_forward.5
= control target key start
LH: loop header
LB: loop body
LE: loop exit
PB: predicated region body
PF: predicated region fallthrough
CT: control target
= control target key end

     0   :  { %s13289_s0 = inlined_call_operand.vmem [shape: bf16[128,1280], index: 0, kind: input, shape index: {}, may-alias: {0,1}]   ;;  %s13290_s1 = inlined_call_operand.vmem [shape: bf16[128,1280], index: 1, kind: input, shape index: {}, may-alias: {0,1}]   ;;  %s13291_s2 = inlined_call_operand.vmem [shape: bf16[9,32,128], index: 2, kind: input, shape index: {}]   ;;  %s13292_s3 = inlined_call_operand.vmem [shape: f32[32,1], index: 3, kind: input, shape index: {}]   ;;  %s13293_s4 = inlined_call_operand.vmem [shape: bf16[32,1152], index: 4, kind: input, shape index: {}]   ;;  %s13294_s5 = inlined_call_operand.vmem [shape: bf16[1152,32], index: 5, kind: input, shape index: {}]   ;;  %s13295_s6 = inlined_call_operand.<no memory space> [shape: f32[1,1], index: 6, kind: input, shape index: {}]   ;;  %s13296_s7 = inlined_call_operand.vmem [shape: f32[1,32], index: 7, kind: output, shape index: {}]  }
   0x1   :  { %v12_v0 = vstv %s13295_s6 }
   0x2   :  { %13 = vst [vmem:[#allocation2] sm:$0x1] %v12_v0 }
   0x3   :  { %v7356_v1 = vld [vmem:[%s13289_s0 + $0x70] sm:$0xf]  ;;  %v7357_v2 = vld [vmem:[%s13289_s0 + $0x98] sm:$0xf]  ;;  %v8717_v3 = vld [vmem:[%s13289_s0 + $0x8] sm:$0xff]  ;;  %s8654_s26 = smov 127  }
   0x4   :  { %172 = vst [vmem:[#allocation3 + $0x68] sm:$0xf] %v7356_v1  ;;  %174 = vst [vmem:[#allocation3 + $0x8c] sm:$0xf] %v7357_v2  ;;  %v7354_v4 = vld [vmem:[%s13289_s0 + $0x20] sm:$0xf] }
   0x5   :  { %v7355_v5 = vld [vmem:[%s13289_s0 + $0x48] sm:$0xf]  ;;  %v7372_v6 = vld [vmem:[%s13290_s1 + $0x74] sm:$0xf]  ;;  %168 = vst [vmem:[#allocation3 + $0x20] sm:$0xf] %v7354_v4 }
   0x6   :  { %170 = vst [vmem:[#allocation3 + $0x44] sm:$0xf] %v7355_v5  ;;  %226 = vst [vmem:[#allocation4 + $0x8] sm:$0xf] %v7372_v6  ;;  %v7373_v7 = vld [vmem:[%s13290_s1 + $0x9c] sm:$0xf] }
   0x7   :  { %v7370_v8 = vld [vmem:[%s13290_s1 + $0x24] sm:$0xf]  ;;  %v7371_v9 = vld [vmem:[%s13290_s1 + $0x4c] sm:$0xf]  ;;  %228 = vst [vmem:[#allocation4 + $0xc] sm:$0xf] %v7373_v7 }
   0x8   :  { %222 = vst [vmem:[#allocation4] sm:$0xf] %v7370_v8  ;;  %224 = vst [vmem:[#allocation4 + $0x4] sm:$0xf] %v7371_v9  ;;  %v7374_v10 = vld [vmem:[%s13290_s1 + $0xc4] sm:$0xf] }
   0x9   :  { %v7375_v11 = vld [vmem:[%s13290_s1 + $0xec] sm:$0xf]  ;;  %v7358_v12 = vld [vmem:[%s13289_s0 + $0xc0] sm:$0xf]  ;;  %230 = vst [vmem:[#allocation4 + $0x10] sm:$0xf] %v7374_v10 }
   0xa   :  { %232 = vst [vmem:[#allocation4 + $0x14] sm:$0xf] %v7375_v11  ;;  %176 = vst [vmem:[#allocation3 + $0xb0] sm:$0xf] %v7358_v12  ;;  %v7359_v13 = vld [vmem:[%s13289_s0 + $0xe8] sm:$0xf] }
   0xb   :  { %v7376_v14 = vld [vmem:[%s13290_s1 + $0x114] sm:$0xf]  ;;  %v7377_v15 = vld [vmem:[%s13290_s1 + $0x13c] sm:$0xf]  ;;  %178 = vst [vmem:[#allocation3 + $0xd4] sm:$0xf] %v7359_v13 }
   0xc   :  { %234 = vst [vmem:[#allocation4 + $0x18] sm:$0xf] %v7376_v14  ;;  %236 = vst [vmem:[#allocation4 + $0x1c] sm:$0xf] %v7377_v15  ;;  %v7360_v16 = vld [vmem:[%s13289_s0 + $0x110] sm:$0xf] }
   0xd   :  { %v7361_v17 = vld [vmem:[%s13289_s0 + $0x138] sm:$0xf]  ;;  %v7378_v18 = vld [vmem:[%s13290_s1 + $0x164] sm:$0xf]  ;;  %180 = vst [vmem:[#allocation3 + $0xf8] sm:$0xf] %v7360_v16 }
   0xe   :  { %182 = vst [vmem:[#allocation3 + $0x11c] sm:$0xf] %v7361_v17  ;;  %238 = vst [vmem:[#allocation4 + $0x20] sm:$0xf] %v7378_v18  ;;  %v7379_v19 = vld [vmem:[%s13290_s1 + $0x18c] sm:$0xf] }
   0xf   :  { %v7362_v20 = vld [vmem:[%s13289_s0 + $0x160] sm:$0xf]  ;;  %v7363_v21 = vld [vmem:[%s13289_s0 + $0x188] sm:$0xf]  ;;  %240 = vst [vmem:[#allocation4 + $0x24] sm:$0xf] %v7379_v19 }
  0x10   :  { %184 = vst [vmem:[#allocation3 + $0x140] sm:$0xf] %v7362_v20  ;;  %186 = vst [vmem:[#allocation3 + $0x164] sm:$0xf] %v7363_v21  ;;  %v7380_v22 = vld [vmem:[%s13290_s1 + $0x1b4] sm:$0xf] }
  0x11   :  { %v7381_v23 = vld [vmem:[%s13290_s1 + $0x1dc] sm:$0xf]  ;;  %v7364_v24 = vld [vmem:[%s13289_s0 + $0x1b0] sm:$0xf]  ;;  %242 = vst [vmem:[#allocation4 + $0x28] sm:$0xf] %v7380_v22 }
  0x12   :  { %v8312_v25 = vld [vmem:[#allocation3 + $0x68] ss:$36 sps:$4 sm:$0xff]   ;;  %244 = vst [vmem:[#allocation4 + $0x2c] sm:$0xf] %v7381_v23  ;;  %188 = vst [vmem:[#allocation3 + $0x188] sm:$0xf] %v7364_v24 }
  0x13   :  { %v8313_v26 = vld [vmem:[#allocation3 + $0x20] ss:$36 sps:$4 sm:$0xff]   ;;  %883 = vrot.lane.b32.xlu1 %v8312_v25, %s8654_s26  ;;  %v8314_v27 = vld [vmem:[#allocation4 + $0x8] sm:$0xff]   ;;  %v8316_v29 = vld [vmem:[#allocation4 + $0x10] sm:$0xff]   ;;  %s8655_s15 = smov 126   ;;  %vm1007_vm0 = vcmask 1039360  }
  0x14   :  { %863 = vrot.lane.b32.xlu0 %v8313_v26, %s8654_s26  ;;  %v8315_v28 = vld [vmem:[#allocation4] sm:$0xff]   ;;  %v8317_v30 = vld [vmem:[#allocation3 + $0xb0] ss:$36 sps:$4 sm:$0xff]   ;;  %v8318_v31 = vld [vmem:[#allocation4 + $0x18] sm:$0xff]   ;;  %s8657_s12 = smov 119   ;;  %vm1863_vm1 = vcmask 1031168  }
  0x15   :  { %v8319_v32 = vld [vmem:[#allocation3 + $0xf8] ss:$36 sps:$4 sm:$0xff]   ;;  %v7382_v34 = vld [vmem:[%s13290_s1 + $0x204] sm:$0xf]  ;;  %v7383_v36 = vld [vmem:[%s13290_s1 + $0x22c] sm:$0xf] }
  0x16   :  { %v7365_v33 = vld [vmem:[%s13289_s0 + $0x1d8] sm:$0xf]  ;;  %v8320_v35 = vld [vmem:[#allocation4 + $0x20] sm:$0xff]   ;;  %246 = vst [vmem:[#allocation4 + $0x30] sm:$0xf] %v7382_v34  ;;  %v8819_v44 = vld [vmem:[%s13289_s0 + $0x30] sm:$0xff] }
  0x17   :  { %885 = vrot.lane.b32.xlu1 %v8314_v27, %s8654_s26  ;;  %190 = vst [vmem:[#allocation3 + $0x1ac] sm:$0xf] %v7365_v33  ;;  %v7366_v37 = vld [vmem:[%s13289_s0 + $0x200] sm:$0xf]  ;;  %v7367_v38 = vld [vmem:[%s13289_s0 + $0x228] sm:$0xf]  ;;  %v8996_v20 = vcombine.low %v8717_v3, %v8819_v44 }
  0x18   :  { %865 = vrot.lane.b32.xlu0 %v8315_v28, %s8654_s26  ;;  %v8321_v39 = vld [vmem:[#allocation3 + $0x140] ss:$36 sps:$4 sm:$0xff]   ;;  %248 = vst [vmem:[#allocation4 + $0x34] sm:$0xf] %v7383_v36  ;;  %192 = vst [vmem:[#allocation3 + $0x1d0] sm:$0xf] %v7366_v37 }
  0x19   :  { %194 = vst [vmem:[#allocation3 + $0x1f4] sm:$0xf] %v7367_v38  ;;  %v7384_v40 = vld [vmem:[%s13290_s1 + $0x254] sm:$0xf]  ;;  %v7385_v41 = vld [vmem:[%s13290_s1 + $0x27c] sm:$0xf] }
  0x1a   :  { %v7368_v42 = vld [vmem:[%s13289_s0 + $0x250] sm:$0xf]  ;;  %250 = vst [vmem:[#allocation4 + $0x38] sm:$0xf] %v7384_v40  ;;  %252 = vst [vmem:[#allocation4 + $0x3c] sm:$0xf] %v7385_v41 }
  0x1b   :  { %905 = vrot.lane.b32.xlu1 %v8316_v29, %s8654_s26  ;;  %196 = vst [vmem:[#allocation3 + $0x218] sm:$0xf] %v7368_v42  ;;  %v7369_v43 = vld [vmem:[%s13289_s0 + $0x278] sm:$0xf]  ;;  %v8824_v45 = vld [vmem:[%s13289_s0] sm:$0xff]  ;;  %v8830_v46 = vld [vmem:[%s13289_s0 + $0x28] sm:$0xff] }
  0x1c   :  { %903 = vrot.lane.b32.xlu0 %v8317_v30, %s8654_s26  ;;  %198 = vst [vmem:[#allocation3 + $0x23c] sm:$0xf] %v7369_v43  ;;  %v8835_v47 = vld [vmem:[%s13289_s0 + $0x50] sm:$0xff]  ;;  %v8840_v48 = vld [vmem:[%s13289_s0 + $0x78] sm:$0xff]  ;;  %v8850_v51 = vld [vmem:[%s13289_s0 + $0x80] sm:$0xff]  ;;  %v9019_v24 = vcombine.high %v8824_v45, %v8830_v46  ;;  %v9097_v41 = vcombine.low %v8824_v45, %v8830_v46  ;;  %vm2482_vm2 = vcmask 973824  }
  0x1d   :  { %v8322_v49 = vld [vmem:[#allocation4 + $0x28] sm:$0xff]   ;;  %v8845_v50 = vld [vmem:[%s13289_s0 + $0x58] sm:$0xff]  ;;  %v8865_v54 = vld [vmem:[%s13289_s0 + $0xa0] sm:$0xff]  ;;  %vm3101_vm3 = vcmask 965632   ;;  %s8659_s30 = smov 117   ;;  %vm3720_vm4 = vcmask 957440  }
  0x1e   :  { %v8855_v52 = vld [vmem:[%s13289_s0 + $0xa8] sm:$0xff]  ;;  %v8860_v53 = vld [vmem:[%s13289_s0 + $0xd0] sm:$0xff]  ;;  %v8881_v57 = vld [vmem:[%s13289_s0 + $0x118] sm:$0xff]  ;;  %13638 = vst [vmem:[#allocation5_spill] sm:$0xff] %v9019_v24  ;;  %vm4339_vm5 = vcmask 900096   ;;  %s8661_s25 = smov 109  }
  0x1f   :  { %925 = vrot.lane.b32.xlu1 %v8318_v31, %s8654_s26  ;;  %v8870_v55 = vld [vmem:[%s13289_s0 + $0xc8] sm:$0xff]  ;;  %v8876_v56 = vld [vmem:[%s13289_s0 + $0xf0] sm:$0xff]  ;;  %v8886_v58 = vld [vmem:[%s13289_s0 + $0xf8] sm:$0xff]  ;;  %13643 = vst [vmem:[#allocation10_spill] sm:$0xff] %v9097_v41  ;;  %vm4958_vm6 = vcmask 891904   ;;  %s8662_s10 = smov 108  }
  0x20   :  { %923 = vrot.lane.b32.xlu0 %v8319_v32, %s8654_s26  ;;  %v8323_v59 = vld [vmem:[#allocation3 + $0x188] ss:$36 sps:$4 sm:$0xff]   ;;  %v8324_v60 = vld [vmem:[#allocation4 + $0x30] sm:$0xff]   ;;  %v8894_v62 = vld [vmem:[%s13289_s0 + $0x120] sm:$0xff]  ;;  %vm5577_vm7 = vcmask 883712  }
  0x21   :  { %v8325_v61 = vld [vmem:[#allocation3 + $0x1d0] ss:$36 sps:$4 sm:$0xff]   ;;  %v8326_v63 = vld [vmem:[#allocation4 + $0x38] sm:$0xff]   ;;  %v8899_v0 = vld [vmem:[%s13289_s0 + $0x148] sm:$0xff] }
  0x22   :  { %v8904_v1 = vld [vmem:[%s13289_s0 + $0x170] sm:$0xff]  ;;  %v8909_v2 = vld [vmem:[%s13289_s0 + $0x140] sm:$0xff]  ;;  %v8914_v5 = vld [vmem:[%s13289_s0 + $0x168] sm:$0xff] }
  0x23   :  { %945 = vrot.lane.b32.xlu1 %v8320_v35, %s8654_s26  ;;  %v8327_v4 = vld [vmem:[#allocation3 + $0x218] ss:$36 sps:$4 sm:$0xff]   ;;  %v8919_v6 = vld [vmem:[%s13289_s0 + $0x190] sm:$0xff]  ;;  %v8940_v10 = vld [vmem:[%s13289_s0 + $0x1e8] sm:$0xff]  ;;  %v9074_v35 = vcombine.high %v8835_v47, %v8840_v48 }
  0x24   :  { %943 = vrot.lane.b32.xlu0 %v8321_v39, %s8654_s26  ;;  %v8924_v7 = vld [vmem:[%s13289_s0 + $0x1b8] sm:$0xff]  ;;  %v8935_v9 = vld [vmem:[%s13289_s0 + $0x1c0] sm:$0xff]  ;;  %129 = vst [vmem:[#allocation3 + $0x1b8] sm:$0xff] %v8940_v10  ;;  %v8949_v11 = vld [vmem:[%s13289_s0 + $0x210] sm:$0xff] }
  0x25   :  { %v8930_v8 = vld [vmem:[%s13289_s0 + $0x198] sm:$0xff]  ;;  %121 = vst [vmem:[#allocation3 + $0x194] sm:$0xff] %v8935_v9  ;;  %v8954_v12 = vld [vmem:[%s13289_s0 + $0x1e0] sm:$0xff]  ;;  %v8959_v13 = vld [vmem:[%s13289_s0 + $0x208] sm:$0xff] }
  0x26   :  { %113 = vst [vmem:[#allocation3 + $0x170] sm:$0xff] %v8930_v8  ;;  %137 = vst [vmem:[#allocation3 + $0x1dc] sm:$0xff] %v8949_v11  ;;  %v8965_v14 = vld [vmem:[%s13289_s0 + $0x230] sm:$0xff]  ;;  %v8970_v15 = vld [vmem:[%s13289_s0 + $0x258] sm:$0xff] }
  0x27   :  { %965 = vrot.lane.b32.xlu1 %v8322_v49, %s8654_s26  ;;  %v8975_v16 = vld [vmem:[%s13289_s0 + $0x238] sm:$0xff]  ;;  %v8981_v17 = vld [vmem:[%s13289_s0 + $0x260] sm:$0xff]  ;;  %v9004_v21 = vld [vmem:[%s13289_s0 + $0x10] sm:$0xff]  ;;  %13640 = vst [vmem:[#allocation7_spill] sm:$0xff] %v9074_v35 }
  0x28   :  { %963 = vrot.lane.b32.xlu0 %v8323_v59, %s8654_s26  ;;  %145 = vst [vmem:[#allocation3 + $0x200] sm:$0xff] %v8975_v16  ;;  %v8986_v18 = vld [vmem:[%s13289_s0 + $0x18] sm:$0xff]  ;;  %v8991_v19 = vld [vmem:[%s13289_s0 + $0x40] sm:$0xff]  ;;  %153 = vst [vmem:[#allocation3 + $0x224] sm:$0xff] %v8981_v17 }
  0x29   :  { %37 = vst [vmem:[#allocation3 + $0x18] sm:$0xff] %v8986_v18  ;;  %45 = vst [vmem:[#allocation3 + $0x3c] sm:$0xff] %v8991_v19  ;;  %v9009_v22 = vld [vmem:[%s13289_s0 + $0x38] sm:$0xff]  ;;  %v9014_v23 = vld [vmem:[%s13289_s0 + $0x68] sm:$0xff] }
  0x2a   :  { %53 = vst [vmem:[#allocation3 + $0x60] sm:$0xff] %v9014_v23  ;;  %v9025_v25 = vld [vmem:[%s13289_s0 + $0x90] sm:$0xff]  ;;  %v9030_v26 = vld [vmem:[%s13289_s0 + $0x60] sm:$0xff]  ;;  %v9035_v27 = vld [vmem:[%s13289_s0 + $0x88] sm:$0xff] }
  0x2b   :  { %985 = vrot.lane.b32.xlu1 %v8324_v60, %s8654_s26  ;;  %61 = vst [vmem:[#allocation3 + $0x84] sm:$0xff] %v9025_v25  ;;  %v9040_v28 = vcombine.low %v9030_v26, %v9035_v27  ;;  %v9045_v29 = vld [vmem:[%s13289_s0 + $0xb8] sm:$0xff]  ;;  %v9050_v30 = vld [vmem:[%s13289_s0 + $0xe0] sm:$0xff]  ;;  %v66_v31 = vld [vmem:[%s13289_s0 + $0xb0] sm:$0xff] }
  0x2c   :  { %983 = vrot.lane.b32.xlu0 %v8325_v61, %s8654_s26  ;;  %69 = vst [vmem:[#allocation3 + $0xa8] sm:$0xff] %v9045_v29  ;;  %77 = vst [vmem:[#allocation3 + $0xcc] sm:$0xff] %v9050_v30  ;;  %v74_v32 = vld [vmem:[%s13289_s0 + $0xd8] sm:$0xff]  ;;  %v9063_v33 = vld [vmem:[%s13289_s0 + $0x108] sm:$0xff] }
  0x2d   :  { %13639 = vst [vmem:[#allocation6_spill] sm:$0xff] %v9040_v28  ;;  %v9068_v34 = vld [vmem:[%s13289_s0 + $0x130] sm:$0xff]  ;;  %v9076_v36 = vcombine.high %v66_v31, %v74_v32  ;;  %v9078_v37 = vcombine.low %v66_v31, %v74_v32  ;;  %85 = vst [vmem:[#allocation3 + $0xf0] sm:$0xff] %v9063_v33  ;;  %v82_v38 = vld [vmem:[%s13289_s0 + $0x100] sm:$0xff]  ;;  %v9142_v32 = vcombine.low %v8835_v47, %v8840_v48 }
  0x2e   :  { %93 = vst [vmem:[#allocation3 + $0x114] sm:$0xff] %v9068_v34  ;;  %v90_v39 = vld [vmem:[%s13289_s0 + $0x128] sm:$0xff]  ;;  %v9091_v40 = vld [vmem:[%s13289_s0 + $0x158] sm:$0xff]  ;;  %v9107_v49 = vld [vmem:[%s13289_s0 + $0x180] sm:$0xff]  ;;  %v9165_v47 = vcombine.low %v8845_v50, %v8850_v51 }
  0x2f   :  { %1005 = vrot.lane.b32.xlu1 %v8326_v63, %s8654_s26  ;;  %13641 = vst [vmem:[#allocation8_spill] sm:$0xff] %v9076_v36  ;;  %13642 = vst [vmem:[#allocation9_spill] sm:$0xff] %v9078_v37  ;;  %v9099_v42 = vcombine.high %v82_v38, %v90_v39  ;;  %v9101_v43 = vcombine.low %v82_v38, %v90_v39  ;;  %v98_v59 = vld [vmem:[%s13289_s0 + $0x150] sm:$0xff]  ;;  %v106_v45 = vld [vmem:[%s13289_s0 + $0x178] sm:$0xff] }
  0x30   :  { %1003 = vrot.lane.b32.xlu0 %v8327_v4, %s8654_s26  ;;  %101 = vst [vmem:[#allocation3 + $0x138] sm:$0xff] %v9091_v40  ;;  %109 = vst [vmem:[#allocation3 + $0x15c] sm:$0xff] %v9107_v49  ;;  %v9116_v46 = vcombine.high %v98_v59, %v106_v45  ;;  %v9118_v60 = vcombine.low %v98_v59, %v106_v45  ;;  %v9123_v61 = vld [vmem:[%s13289_s0 + $0x1a8] sm:$0xff]  ;;  %v9128_v63 = vld [vmem:[%s13289_s0 + $0x1d0] sm:$0xff] }
  0x31   :  { %13644 = vst [vmem:[#allocation11_spill] sm:$0xff] %v9099_v42  ;;  %13645 = vst [vmem:[#allocation12_spill] sm:$0xff] %v9101_v43  ;;  %v114_v4 = vld [vmem:[%s13289_s0 + $0x1a0] sm:$0xff]  ;;  %v122_v31 = vld [vmem:[%s13289_s0 + $0x1c8] sm:$0xff] }
  0x32   :  { %13646 = vst [vmem:[#allocation13_spill] sm:$0xff] %v9116_v46  ;;  %13647 = vst [vmem:[#allocation14_spill] sm:$0xff] %v9118_v60  ;;  %v9144_v38 = vcombine.high %v114_v4, %v122_v31  ;;  %v9146_v39 = vcombine.low %v114_v4, %v122_v31  ;;  %v8370_v59 = vld [vmem:[%s13291_s2 + $0x10] sm:$0xff]   ;;  %v9154_v45 = vld [vmem:[%s13289_s0 + $0x1f8] sm:$0xff] }
  0x33   :  { %1707 = vrot.lane.b32.xlu1 %v8996_v20, %s8655_s15  ;;  %13648 = vst [vmem:[#allocation15_spill] sm:$0xff] %v9123_v61  ;;  %117 = vst [vmem:[#allocation3 + $0x180] sm:$0xff] %v9123_v61  ;;  %v9159_v61 = vld [vmem:[%s13289_s0 + $0x220] sm:$0xff]  ;;  %v130_v48 = vld [vmem:[%s13289_s0 + $0x1f0] sm:$0xff]  ;;  %7827 = vmatprep.mubr.bf16.mxu0 %v8370_v59 }
  0x34   :  { %1705 = vrot.lane.b32.xlu0 %v9019_v24, %s8655_s15  ;;  %125 = vst [vmem:[#allocation3 + $0x1a4] sm:$0xff] %v9128_v63  ;;  %13649 = vst [vmem:[#allocation16_spill] sm:$0xff] %v9142_v32  ;;  %v138_v4 = vld [vmem:[%s13289_s0 + $0x218] sm:$0xff]  ;;  %v146_v59 = vld [vmem:[%s13289_s0 + $0x240] sm:$0xff] }
  0x35   :  { %13650 = vst [vmem:[#allocation17_spill] sm:$0xff] %v9144_v38  ;;  %13651 = vst [vmem:[#allocation18_spill] sm:$0xff] %v9146_v39  ;;  %v9175_v31 = vcombine.high %v130_v48, %v138_v4  ;;  %v9177_v39 = vcombine.low %v130_v48, %v138_v4  ;;  %v9182_v38 = vld [vmem:[%s13289_s0 + $0x248] sm:$0xff]  ;;  %v9200_v4 = vcombine.low %v8855_v52, %v8860_v53 }
  0x36   :  { %13652 = vst [vmem:[#allocation19_spill] sm:$0xff] %v9154_v45  ;;  %13653 = vst [vmem:[#allocation20_spill] sm:$0xff] %v9159_v61  ;;  %v154_v48 = vld [vmem:[%s13289_s0 + $0x268] sm:$0xff] }
  0x37   :  { %1725 = vrot.lane.b32.xlu1 %v9074_v35, %s8655_s15  ;;  %133 = vst [vmem:[#allocation3 + $0x1c8] sm:$0xff] %v9154_v45  ;;  %141 = vst [vmem:[#allocation3 + $0x1ec] sm:$0xff] %v9159_v61  ;;  %v9188_v45 = vld [vmem:[%s13289_s0 + $0x270] sm:$0xff]  ;;  %v9217_v61 = vcombine.high %v8876_v56, %v8881_v57 }
  0x38   :  { %1703 = vrot.lane.b32.xlu0 %v9097_v41, %s8655_s15  ;;  %13654 = vst [vmem:[#allocation21_spill] sm:$0xff] %v9175_v31  ;;  %13655 = vst [vmem:[#allocation22_spill] sm:$0xff] %v9177_v39  ;;  %v9205_v39 = vcombine.low %v146_v59, %v154_v48  ;;  %v9211_v31 = vcombine.high %v8865_v54, %v8870_v55 }
  0x39   :  { %13656 = vst [vmem:[#allocation23_spill] sm:$0xff] %v9182_v38  ;;  %149 = vst [vmem:[#allocation3 + $0x210] sm:$0xff] %v9182_v38  ;;  %v9203_v38 = vcombine.high %v146_v59, %v154_v48  ;;  %v9223_v59 = vcombine.low %v8865_v54, %v8870_v55  ;;  %v9229_v48 = vcombine.low %v8876_v56, %v8881_v57 }
  0x3a   :  { %13657 = vst [vmem:[#allocation24_spill] sm:$0xff] %v9200_v4  ;;  %157 = vst [vmem:[#allocation3 + $0x234] sm:$0xff] %v9188_v45  ;;  %v9245_v54 = vcombine.low %v8899_v0, %v8904_v1  ;;  %v9251_v55 = vcombine.high %v8909_v2, %v8914_v5  ;;  %v9264_v56 = vcombine.low %v8909_v2, %v8914_v5 }
  0x3b   :  { %1723 = vrot.lane.b32.xlu1 %v9142_v32, %s8655_s15  ;;  %13658 = vst [vmem:[#allocation25_spill] sm:$0xff] %v9203_v38  ;;  %13659 = vst [vmem:[#allocation26_spill] sm:$0xff] %v9205_v39  ;;  %v9235_v39 = vcombine.low %v8886_v58, %v8894_v62  ;;  %v9239_v38 = vcombine.high %v8717_v3, %v8819_v44  ;;  %v9257_v3 = vcombine.high %v8919_v6, %v8924_v7  ;;  %v13308_v44 = vmov 0  }
  0x3c   :  { %1727 = vrot.lane.b32.xlu0 %v9165_v47, %s8655_s15  ;;  %13660 = vst [vmem:[#allocation27_spill] sm:$0xff] %v9211_v31  ;;  %13661 = vst [vmem:[#allocation28_spill] sm:$0xff] %v9217_v61  ;;  %1184 = vmatprep.mubr.bf16.mxu1 %v13308_v44  ;;  %v9270_v57 = vcombine.high %v8845_v50, %v8850_v51  ;;  %v9282_v2 = vcombine.low %v8930_v8, %v8935_v9 }
  0x3d   :  { %13662 = vst [vmem:[#allocation29_spill] sm:$0xff] %v9223_v59  ;;  %13663 = vst [vmem:[#allocation30_spill] sm:$0xff] %v9229_v48  ;;  %8311 = vset.pattern.permute.xlu1 %v13308_v44  ;;  %8310 = vset.pattern.permute.xlu0 %v13308_v44  ;;  %v9288_v50 = vcombine.low %v8940_v10, %v8949_v11  ;;  %v9294_v51 = vcombine.high %v8954_v12, %v8959_v13 }
  0x3e   :  { %13664 = vst [vmem:[#allocation31_spill] sm:$0xff] %v9239_v38  ;;  %13665 = vst [vmem:[#allocation32_spill] sm:$0xff] %v9245_v54  ;;  %v9276_v38 = vcombine.low %v8919_v6, %v8924_v7  ;;  %v9298_v5 = vcombine.high %v8855_v52, %v8860_v53  ;;  %v9304_v6 = vcombine.high %v8965_v14, %v8970_v15 }
  0x3f   :  { %1747 = vrot.lane.b32.xlu1 %v9200_v4, %s8655_s15  ;;  %13666 = vst [vmem:[#allocation33_spill] sm:$0xff] %v9251_v55  ;;  %13667 = vst [vmem:[#allocation34_spill] sm:$0xff] %v9257_v3  ;;  %v9310_v7 = vcombine.low %v8954_v12, %v8959_v13  ;;  %v9316_v52 = vcombine.low %v8965_v14, %v8970_v15  ;;  %v9322_v53 = vcombine.low %v8975_v16, %v8981_v17 }
  0x40   :  { %1745 = vrot.lane.b32.xlu0 %v9211_v31, %s8655_s15  ;;  %13668 = vst [vmem:[#allocation35_spill] sm:$0xff] %v9264_v56  ;;  %13669 = vst [vmem:[#allocation36_spill] sm:$0xff] %v9270_v57  ;;  %v9326_v8 = vcombine.high %v8886_v58, %v8894_v62  ;;  %v9332_v9 = vcombine.low %v8986_v18, %v8991_v19  ;;  %v9338_v10 = vcombine.high %v9004_v21, %v9009_v22 }
  0x41   :  { %13670 = vst [vmem:[#allocation37_spill] sm:$0xff] %v9276_v38  ;;  %13671 = vst [vmem:[#allocation38_spill] sm:$0xff] %v9282_v2  ;;  %v9346_v58 = vcombine.low %v9004_v21, %v9009_v22  ;;  %v9350_v62 = vcombine.high %v8899_v0, %v8904_v1  ;;  %v9360_v11 = vcombine.low %v9014_v23, %v9025_v25 }
  0x42   :  { %13672 = vst [vmem:[#allocation39_spill] sm:$0xff] %v9288_v50  ;;  %13673 = vst [vmem:[#allocation40_spill] sm:$0xff] %v9294_v51  ;;  %v9366_v0 = vcombine.high %v9030_v26, %v9035_v27  ;;  %v9380_v1 = vcombine.low %v9045_v29, %v9050_v30  ;;  %v9396_v12 = vcombine.low %v9063_v33, %v9068_v34 }
  0x43   :  { %1765 = vrot.lane.b32.xlu1 %v9217_v61, %s8655_s15  ;;  %13674 = vst [vmem:[#allocation41_spill] sm:$0xff] %v9298_v5  ;;  %13675 = vst [vmem:[#allocation42_spill] sm:$0xff] %v9304_v6  ;;  %v9422_v22 = vcombine.low %v9091_v40, %v9107_v49  ;;  %v13695_v49 = vld [vmem:[#allocation15_spill] sm:$0xff] }
  0x44   :  { %1743 = vrot.lane.b32.xlu0 %v9223_v59, %s8655_s15  ;;  %13676 = vst [vmem:[#allocation43_spill] sm:$0xff] %v9310_v7  ;;  %13677 = vst [vmem:[#allocation44_spill] sm:$0xff] %v9316_v52 }
  0x45   :  { %13678 = vst [vmem:[#allocation45_spill] sm:$0xff] %v9322_v53  ;;  %13679 = vst [vmem:[#allocation46_spill] sm:$0xff] %v9326_v8 }
  0x46   :  { %13680 = vst [vmem:[#allocation47_spill] sm:$0xff] %v9332_v9  ;;  %13681 = vst [vmem:[#allocation48_spill] sm:$0xff] %v9338_v10 }
  0x47   :  { %1763 = vrot.lane.b32.xlu1 %v9229_v48, %s8655_s15  ;;  %13682 = vst [vmem:[#allocation49_spill] sm:$0xff] %v9346_v58  ;;  %13683 = vst [vmem:[#allocation50_spill] sm:$0xff] %v9350_v62 }
  0x48   :  { %1767 = vrot.lane.b32.xlu0 %v9235_v39, %s8655_s15  ;;  %13684 = vst [vmem:[#allocation51_spill] sm:$0xff] %v9360_v11  ;;  %13685 = vst [vmem:[#allocation52_spill] sm:$0xff] %v9366_v0 }
  0x49   :  { %13686 = vst [vmem:[#allocation53_spill] sm:$0xff] %v9380_v1  ;;  %13687 = vst [vmem:[#allocation54_spill] sm:$0xff] %v9396_v12 }
  0x4a   :  { %13691 = vst [vmem:[#allocation58_spill] sm:$0xff] %v9422_v22 }
  0x4b   :  { %1787 = vrot.lane.b32.xlu1 %v9245_v54, %s8655_s15 }
  0x4c   :  { %1785 = vrot.lane.b32.xlu0 %v9251_v55, %s8655_s15 }
  0x4f   :  { %1805 = vrot.lane.b32.xlu1 %v9257_v3, %s8655_s15 }
  0x50   :  { %1783 = vrot.lane.b32.xlu0 %v9264_v56, %s8655_s15 }
  0x53   :  { %1803 = vrot.lane.b32.xlu1 %v9276_v38, %s8655_s15 }
  0x54   :  { %1807 = vrot.lane.b32.xlu0 %v9282_v2, %s8655_s15 }
  0x57   :  { %1827 = vrot.lane.b32.xlu1 %v9288_v50, %s8655_s15 }
  0x58   :  { %1825 = vrot.lane.b32.xlu0 %v9294_v51, %s8655_s15 }
  0x5b   :  { %1845 = vrot.lane.b32.xlu1 %v9304_v6, %s8655_s15 }
  0x5c   :  { %1823 = vrot.lane.b32.xlu0 %v9310_v7, %s8655_s15 }
  0x5f   :  { %1843 = vrot.lane.b32.xlu1 %v9316_v52, %s8655_s15 }
  0x60   :  { %1847 = vrot.lane.b32.xlu0 %v9322_v53, %s8655_s15 }
  0x63   :  { %1715 = vrot.lane.b32.xlu1 %v9332_v9, %s8655_s15 }
  0x64   :  { %1713 = vrot.lane.b32.xlu0 %v9338_v10, %s8655_s15 }
  0x67   :  { %849 = vrot.lane.b32.xlu1 %v9019_v24, %s8654_s26 }
  0x68   :  { %1711 = vrot.lane.b32.xlu0 %v9346_v58, %s8655_s15 }
  0x6b   :  { %847 = vrot.lane.b32.xlu1 %v9097_v41, %s8654_s26 }
  0x6c   :  { %851 = vrot.lane.b32.xlu0 %v8996_v20, %s8654_s26 }
  0x6f   :  { %1735 = vrot.lane.b32.xlu1 %v9360_v11, %s8655_s15 }
  0x70   :  { %1733 = vrot.lane.b32.xlu0 %v9366_v0, %s8655_s15 }
  0x73   :  { %869 = vrot.lane.b32.xlu1 %v9074_v35, %s8654_s26 }
  0x74   :  { %1731 = vrot.lane.b32.xlu0 %v9040_v28, %s8655_s15 }
  0x77   :  { %867 = vrot.lane.b32.xlu1 %v9142_v32, %s8654_s26 }
  0x78   :  { %871 = vrot.lane.b32.xlu0 %v9165_v47, %s8654_s26 }
  0x7b   :  { %1755 = vrot.lane.b32.xlu1 %v9380_v1, %s8655_s15 }
  0x7c   :  { %1753 = vrot.lane.b32.xlu0 %v9076_v36, %s8655_s15 }
  0x7f   :  { %889 = vrot.lane.b32.xlu1 %v9211_v31, %s8654_s26 }
  0x80   :  { %1751 = vrot.lane.b32.xlu0 %v9078_v37, %s8655_s15 }
  0x83   :  { %887 = vrot.lane.b32.xlu1 %v9223_v59, %s8654_s26 }
  0x84   :  { %891 = vrot.lane.b32.xlu0 %v9200_v4, %s8654_s26 }
  0x85   :  { %v9400_v13 = vpop.permute.xlu1 %883 }
  0x86   :  { %13688 = vst [vmem:[#allocation55_spill] sm:$0xff] %v9400_v13  ;;  %v9402_v14 = vpop.permute.xlu0 %863 }
  0x87   :  { %13689 = vst [vmem:[#allocation56_spill] sm:$0xff] %v9402_v14  ;;  %1775 = vrot.lane.b32.xlu1 %v9396_v12, %s8655_s15  ;;  %v9620_v12 = vld [vmem:[#allocation4 + $0x10] sm:$0xff]  }
  0x88   :  { %1773 = vrot.lane.b32.xlu0 %v9099_v42, %s8655_s15  ;;  %13727 = vst [vmem:[#allocation78_spill] sm:$0xff] %v9620_v12 }
  0x89   :  { %v886_v15 = vpop.permute.xlu1 %885 }
  0x8a   :  { %v866_v16 = vpop.permute.xlu0 %865  ;;  %v1025_v19 = vsel %vm1007_vm0, %v9400_v13, %v886_v15  ;;  %v9450_v15 = vcombine.low %v13695_v49, %v9128_v63  ;;  %v13702_v49 = vld [vmem:[#allocation20_spill] sm:$0xff] }
  0x8b   :  { %v1016_v17 = vsel %vm1007_vm0, %v9402_v14, %v866_v16  ;;  %909 = vrot.lane.b32.xlu1 %v9217_v61, %s8654_s26 }
  0x8c   :  { %7811 = vmatprep.subr.bf16.mxu0 %v1016_v17  ;;  %1771 = vrot.lane.b32.xlu0 %v9101_v43, %s8655_s15  ;;  %13696 = vst [vmem:[#allocation15_spill] sm:$0xff] %v9450_v15 }
  0x8d   :  { %7812 = vmatpush3.bf16.msra.mxu0 %v1016_v17  ;;  %v906_v18 = vpop.permute.xlu1 %905 }
  0x8e   :  { %7813 = vmatprep.subr.bf16.mxu0 %v1025_v19  ;;  %v9416_v21 = vpop.permute.xlu0 %903 }
  0x8f   :  { %13690 = vst [vmem:[#allocation57_spill] sm:$0xff] %v9416_v21  ;;  %907 = vrot.lane.b32.xlu1 %v9229_v48, %s8654_s26  ;;  %v1034_v25 = vsel %vm1007_vm0, %v9416_v21, %v906_v18 }
  0x90   :  { %911 = vrot.lane.b32.xlu0 %v9235_v39, %s8654_s26 }
  0x91   :  { %7814 = vmatpush3.bf16.msra.mxu0 %v1025_v19  ;;  %v926_v23 = vpop.permute.xlu1 %925  ;;  %v13698_v19 = vld [vmem:[#allocation17_spill] sm:$0xff] }
  0x92   :  { %7815 = vmatprep.subr.bf16.mxu0 %v1034_v25  ;;  %v9428_v26 = vpop.permute.xlu0 %923 }
  0x93   :  { %13692 = vst [vmem:[#allocation59_spill] sm:$0xff] %v9428_v26  ;;  %1795 = vrot.lane.b32.xlu1 %v9422_v22, %s8655_s15  ;;  %v1043_v29 = vsel %vm1007_vm0, %v9428_v26, %v926_v23  ;;  %v13711_v26 = vld [vmem:[#allocation23_spill] sm:$0xff]  ;;  %v9560_v22 = vld [vmem:[#allocation4] sm:$0xff]  }
  0x94   :  { %1793 = vrot.lane.b32.xlu0 %v9116_v46, %s8655_s15  ;;  %v9520_v21 = vcombine.low %v13711_v26, %v9188_v45  ;;  %13717 = vst [vmem:[#allocation69_spill] sm:$0xff] %v9560_v22 }
  0x95   :  { %7816 = vmatpush3.bf16.msra.mxu0 %v1034_v25  ;;  %v946_v27 = vpop.permute.xlu1 %945 }
  0x96   :  { %7817 = vmatprep.subr.bf16.mxu0 %v1043_v29  ;;  %v9436_v30 = vpop.permute.xlu0 %943  ;;  %13712 = vst [vmem:[#allocation23_spill] sm:$0xff] %v9520_v21 }
  0x97   :  { %13693 = vst [vmem:[#allocation60_spill] sm:$0xff] %v9436_v30  ;;  %929 = vrot.lane.b32.xlu1 %v9251_v55, %s8654_s26  ;;  %v1052_v34 = vsel %vm1007_vm0, %v9436_v30, %v946_v27  ;;  %v13700_v27 = vld [vmem:[#allocation18_spill] sm:$0xff] }
  0x98   :  { %1791 = vrot.lane.b32.xlu0 %v9118_v60, %s8655_s15 }
  0x99   :  { %7818 = vmatpush3.bf16.msra.mxu0 %v1043_v29  ;;  %v966_v33 = vpop.permute.xlu1 %965 }
  0x9a   :  { %7819 = vmatprep.subr.bf16.mxu0 %v1052_v34  ;;  %v9444_v40 = vpop.permute.xlu0 %963 }
  0x9b   :  { %13694 = vst [vmem:[#allocation61_spill] sm:$0xff] %v9444_v40  ;;  %927 = vrot.lane.b32.xlu1 %v9264_v56, %s8654_s26  ;;  %v1061_v17 = vsel %vm1007_vm0, %v9444_v40, %v966_v33 }
  0x9c   :  { %931 = vrot.lane.b32.xlu0 %v9245_v54, %s8654_s26 }
  0x9d   :  { %7820 = vmatpush3.bf16.msra.mxu0 %v1052_v34  ;;  %v986_v16 = vpop.permute.xlu1 %985 }
  0x9e   :  { %7821 = vmatprep.subr.bf16.mxu0 %v1061_v17  ;;  %v9456_v18 = vpop.permute.xlu0 %983 }
  0x9f   :  { %13697 = vst [vmem:[#allocation62_spill] sm:$0xff] %v9456_v18  ;;  %1815 = vrot.lane.b32.xlu1 %v9450_v15, %s8655_s15  ;;  %v1070_v23 = vsel %vm1007_vm0, %v9456_v18, %v986_v16  ;;  %v13703_v16 = vld [vmem:[#allocation19_spill] sm:$0xff]  ;;  %v13709_v18 = vld [vmem:[#allocation22_spill] sm:$0xff] }
  0xa0   :  { %1813 = vrot.lane.b32.xlu0 %v13698_v19, %s8655_s15 }
  0xa1   :  { %7822 = vmatpush3.bf16.msra.mxu0 %v1061_v17  ;;  %v1006_v63 = vpop.permute.xlu1 %1005  ;;  %v9480_v17 = vcombine.low %v13703_v16, %v13702_v49  ;;  %v13706_v49 = vld [vmem:[#allocation21_spill] sm:$0xff] }
  0xa2   :  { %7823 = vmatprep.subr.bf16.mxu0 %v1070_v23  ;;  %v9464_v25 = vpop.permute.xlu0 %1003 }
  0xa3   :  { %13699 = vst [vmem:[#allocation63_spill] sm:$0xff] %v9464_v25  ;;  %949 = vrot.lane.b32.xlu1 %v9257_v3, %s8654_s26  ;;  %v1079_v29 = vsel %vm1007_vm0, %v9464_v25, %v1006_v63  ;;  %13704 = vst [vmem:[#allocation20_spill] sm:$0xff] %v9480_v17  ;;  %v13707_v25 = vmov 0  }
  0xa4   :  { %1811 = vrot.lane.b32.xlu0 %v13700_v27, %s8655_s15 }
  0xa5   :  { %7824 = vmatpush3.bf16.msra.mxu0 %v1070_v23  ;;  %v9472_v33 = vpop.permute.xlu1 %1707  ;;  %v9487_v23 = vld [vmem:[%s13291_s2 + $0x18] sm:$0xff]  }
  0xa6   :  { %13701 = vst [vmem:[#allocation64_spill] sm:$0xff] %v9472_v33  ;;  %7825 = vmatprep.subr.bf16.mxu0 %v1079_v29  ;;  %v9474_v34 = vpop.permute.xlu0 %1705  ;;  %13705 = vst [vmem:[#allocation19_spill] sm:$0xff] %v9487_v23 }
  0xa7   :  { %947 = vrot.lane.b32.xlu1 %v9276_v38, %s8654_s26 }
  0xa8   :  { %951 = vrot.lane.b32.xlu0 %v9282_v2, %s8654_s26 }
  0xa9   :  { %7826 = vmatpush3.bf16.msra.mxu0 %v1079_v29  ;;  %v9489_v63 = vpop.permute.xlu1 %1725 }
  0xaa   :  { %v9491_v44 = vpop.permute.xlu0 %1703  ;;  %1425 = vmatprep.subr.bf16.mxu0 %v9019_v24 }
  0xab   :  { %1835 = vrot.lane.b32.xlu1 %v9480_v17, %s8655_s15  ;;  %v13713_v17 = vld [vmem:[#allocation25_spill] sm:$0xff] }
  0xac   :  { %1833 = vrot.lane.b32.xlu0 %v13706_v49, %s8655_s15  ;;  %7828 = vmatmul.mubr.bf16.vlgmr.msra.gmra.mrb[0].mxu0 %v9487_v23  ;;  %v13715_v23 = vld [vmem:[#allocation26_spill] sm:$0xff] }
  0xad   :  { %1426 = vmatpush1.bf16.msra.mxu0 %v9097_v41  ;;  %v9500_v16 = vpop.permute.xlu1 %1723  ;;  %1457 = vmatprep.mubr.bf16.mxu0 %v13707_v25 }
  0xae   :  { %v9503_v29 = vpop.permute.xlu0 %1727  ;;  %1427 = vmatprep.subr.bf16.mxu0 %v9074_v35 }
  0xaf   :  { %13708 = vst [vmem:[#allocation65_spill] sm:$0xff] %v9503_v29  ;;  %969 = vrot.lane.b32.xlu1 %v9294_v51, %s8654_s26 }
  0xb0   :  { %1831 = vrot.lane.b32.xlu0 %v13709_v18, %s8655_s15 }
  0xb1   :  { %1428 = vmatpush1.bf16.msra.mxu0 %v9142_v32  ;;  %v9511_v40 = vpop.permute.xlu1 %1747 }
  0xb2   :  { %13710 = vst [vmem:[#allocation66_spill] sm:$0xff] %v9511_v40  ;;  %v9513_v30 = vpop.permute.xlu0 %1745  ;;  %1429 = vmatprep.subr.bf16.mxu0 %v9211_v31 }
  0xb3   :  { %967 = vrot.lane.b32.xlu1 %v9310_v7, %s8654_s26 }
  0xb4   :  { %971 = vrot.lane.b32.xlu0 %v9288_v50, %s8654_s26 }
  0xb5   :  { %1430 = vmatpush1.bf16.msra.mxu0 %v9223_v59  ;;  %v9525_v13 = vpop.permute.xlu1 %1765 }
  0xb6   :  { %v9527_v14 = vpop.permute.xlu0 %1743  ;;  %1431 = vmatprep.subr.bf16.mxu0 %v9217_v61 }
  0xb7   :  { %1855 = vrot.lane.b32.xlu1 %v9520_v21, %s8655_s15 }
  0xb8   :  { %1853 = vrot.lane.b32.xlu0 %v13713_v17, %s8655_s15 }
  0xb9   :  { %1432 = vmatpush1.bf16.msra.mxu0 %v9229_v48  ;;  %v9535_v45 = vpop.permute.xlu1 %1763 }
  0xba   :  { %v9537_v26 = vpop.permute.xlu0 %1767  ;;  %1433 = vmatprep.subr.bf16.mxu0 %v9251_v55  ;;  %v9593_v55 = vld [vmem:[#allocation3 + $0x68] ss:$36 sps:$4 sm:$0xff]  }
  0xbb   :  { %13714 = vst [vmem:[#allocation67_spill] sm:$0xff] %v9537_v26  ;;  %989 = vrot.lane.b32.xlu1 %v9304_v6, %s8654_s26  ;;  %13723 = vst [vmem:[#allocation74_spill] sm:$0xff] %v9593_v55 }
  0xbc   :  { %1851 = vrot.lane.b32.xlu0 %v13715_v23, %s8655_s15 }
  0xbd   :  { %1434 = vmatpush1.bf16.msra.mxu0 %v9264_v56  ;;  %v9545_v21 = vpop.permute.xlu1 %1787 }
  0xbe   :  { %13716 = vst [vmem:[#allocation68_spill] sm:$0xff] %v9545_v21  ;;  %v9547_v50 = vpop.permute.xlu0 %1785  ;;  %1435 = vmatprep.subr.bf16.mxu0 %v9257_v3  ;;  %v9564_v3 = vld [vmem:[#allocation3 + $0x20] ss:$36 sps:$4 sm:$0xff]  }
  0xbf   :  { %987 = vrot.lane.b32.xlu1 %v9316_v52, %s8654_s26  ;;  %13718 = vst [vmem:[#allocation70_spill] sm:$0xff] %v9564_v3 }
  0xc0   :  { %991 = vrot.lane.b32.xlu0 %v9322_v53, %s8654_s26 }
  0xc1   :  { %1436 = vmatpush1.bf16.msra.mxu0 %v9276_v38  ;;  %v9555_v15 = vpop.permute.xlu1 %1805 }
  0xc2   :  { %v9557_v2 = vpop.permute.xlu0 %1783  ;;  %1437 = vmatprep.subr.bf16.mxu0 %v9294_v51  ;;  %v13720_v51 = vld [vmem:[#allocation31_spill] sm:$0xff] }
  0xc3   :  { %1721 = vrot.lane.b32.xlu1 %v9560_v22, %s8655_s15  ;;  %v9581_v22 = vld [vmem:[%s13291_s2] sm:$0xff]  }
  0xc4   :  { %1719 = vrot.lane.b32.xlu0 %v9564_v3, %s8655_s15 }
  0xc5   :  { %1438 = vmatpush1.bf16.msra.mxu0 %v9310_v7  ;;  %v9569_v53 = vpop.permute.xlu1 %1803 }
  0xc6   :  { %v9571_v38 = vpop.permute.xlu0 %1807  ;;  %1439 = vmatprep.subr.bf16.mxu0 %v9304_v6  ;;  %v9589_v6 = vld [vmem:[#allocation4 + $0x8] sm:$0xff]  }
  0xc7   :  { %13719 = vst [vmem:[#allocation71_spill] sm:$0xff] %v9571_v38  ;;  %855 = vrot.lane.b32.xlu1 %v9346_v58, %s8654_s26  ;;  %13722 = vst [vmem:[#allocation73_spill] sm:$0xff] %v9589_v6 }
  0xc8   :  { %853 = vrot.lane.b32.xlu0 %v13720_v51, %s8654_s26 }
  0xc9   :  { %1440 = vmatpush1.bf16.msra.mxu0 %v9316_v52  ;;  %v9584_v7 = vpop.permute.xlu1 %1827 }
  0xca   :  { %13721 = vst [vmem:[#allocation72_spill] sm:$0xff] %v9584_v7  ;;  %v9586_v56 = vpop.permute.xlu0 %1825  ;;  %1531 = vmatprep.subr.bf16.mxu0 %v9338_v10 }
  0xcb   :  { %1741 = vrot.lane.b32.xlu1 %v9589_v6, %s8655_s15  ;;  %v9612_v6 = vld [vmem:[%s13291_s2 + $0x8] sm:$0xff]  }
  0xcc   :  { %1739 = vrot.lane.b32.xlu0 %v9593_v55, %s8655_s15  ;;  %1458 = vmatmul.mubr.bf16.vlgmr.msra.gmra.mrb[4].mxu0 %v9581_v22 }
  0xcd   :  { %1532 = vmatpush1.bf16.msra.mxu0 %v9346_v58  ;;  %v9599_v51 = vpop.permute.xlu1 %1845  ;;  %1467 = vmatprep.mubr.bf16.mxu0 %v13707_v25 }
  0xce   :  { %13724 = vst [vmem:[#allocation75_spill] sm:$0xff] %v9599_v51  ;;  %v9602_v52 = vpop.permute.xlu0 %1823  ;;  %1533 = vmatprep.subr.bf16.mxu0 %v9366_v0  ;;  %v9624_v51 = vld [vmem:[#allocation3 + $0xb0] ss:$36 sps:$4 sm:$0xff]  }
  0xcf   :  { %875 = vrot.lane.b32.xlu1 %v9040_v28, %s8654_s26  ;;  %13728 = vst [vmem:[#allocation79_spill] sm:$0xff] %v9624_v51 }
  0xd0   :  { %873 = vrot.lane.b32.xlu0 %v9270_v57, %s8654_s26 }
  0xd1   :  { %1534 = vmatpush1.bf16.msra.mxu0 %v9040_v28  ;;  %v9615_v58 = vpop.permute.xlu1 %1843 }
  0xd2   :  { %13725 = vst [vmem:[#allocation76_spill] sm:$0xff] %v9615_v58  ;;  %v9617_v54 = vpop.permute.xlu0 %1847  ;;  %1535 = vmatprep.subr.bf16.mxu0 %v9076_v36 }
  0xd3   :  { %13726 = vst [vmem:[#allocation77_spill] sm:$0xff] %v9617_v54  ;;  %1761 = vrot.lane.b32.xlu1 %v9620_v12, %s8655_s15 }
  0xd4   :  { %1759 = vrot.lane.b32.xlu0 %v9624_v51, %s8655_s15  ;;  %1468 = vmatmul.mubr.bf16.gmra.mrb[8].mxu0 %v9612_v6 }
  0xd5   :  { %1536 = vmatpush1.bf16.msra.mxu0 %v9078_v37  ;;  %v9630_v57 = vpop.permute.xlu1 %1715  ;;  %1563 = vmatprep.mubr.bf16.mxu0 %v13707_v25 }
  0xd6   :  { %13729 = vst [vmem:[#allocation80_spill] sm:$0xff] %v9630_v57  ;;  %v9633_v28 = vpop.permute.xlu0 %1713  ;;  %1537 = vmatprep.subr.bf16.mxu0 %v9099_v42  ;;  %v9644_v57 = vld [vmem:[#allocation4 + $0x18] sm:$0xff]  }
  0xd7   :  { %13730 = vst [vmem:[#allocation81_spill] sm:$0xff] %v9633_v28  ;;  %895 = vrot.lane.b32.xlu1 %v9078_v37, %s8654_s26  ;;  %13732 = vst [vmem:[#allocation83_spill] sm:$0xff] %v9644_v57  ;;  %v9648_v28 = vld [vmem:[#allocation3 + $0xf8] ss:$36 sps:$4 sm:$0xff]  }
  0xd8   :  { %893 = vrot.lane.b32.xlu0 %v9298_v5, %s8654_s26  ;;  %13733 = vst [vmem:[#allocation84_spill] sm:$0xff] %v9648_v28 }
  0xd9   :  { %1538 = vmatpush1.bf16.msra.mxu0 %v9101_v43  ;;  %v850_v12 = vpop.permute.xlu1 %849 }
  0xda   :  { %v9641_v58 = vpop.permute.xlu0 %1711  ;;  %1539 = vmatprep.subr.bf16.mxu0 %v9116_v46 }
  0xdb   :  { %13731 = vst [vmem:[#allocation82_spill] sm:$0xff] %v9641_v58  ;;  %1781 = vrot.lane.b32.xlu1 %v9644_v57, %s8655_s15 }
  0xdc   :  { %1779 = vrot.lane.b32.xlu0 %v9648_v28, %s8655_s15 }
  0xdd   :  { %1540 = vmatpush1.bf16.msra.mxu0 %v9118_v60  ;;  %v848_v5 = vpop.permute.xlu1 %847 }
  0xde   :  { %v9653_v37 = vpop.permute.xlu0 %851  ;;  %1541 = vmatprep.subr.bf16.mxu0 %v13698_v19  ;;  %v1008_v58 = vsel %vm1007_vm0, %v848_v5, %v850_v12  ;;  %v9669_v5 = vld [vmem:[#allocation4 + $0x20] sm:$0xff]   ;;  %v8567_v19 = vld [vmem:[#allocation3 + $0x194] sm:$0xff] }
  0xdf   :  { %13734 = vst [vmem:[#allocation85_spill] sm:$0xff] %v9653_v37  ;;  %915 = vrot.lane.b32.xlu1 %v9101_v43, %s8654_s26  ;;  %v1009_v57 = vsel %vm1007_vm0, %v850_v12, %v9653_v37  ;;  %13736 = vst [vmem:[#allocation87_spill] sm:$0xff] %v9669_v5  ;;  %v9673_v43 = vld [vmem:[#allocation3 + $0x140] ss:$36 sps:$4 sm:$0xff]  }
  0xe0   :  { %913 = vrot.lane.b32.xlu0 %v9326_v8, %s8654_s26  ;;  %1152 = vmatprep.subr.bf16.mxu1 %v1009_v57 }
  0xe1   :  { %1153 = vmatpush1.bf16.msra.mxu1 %v1008_v58  ;;  %1542 = vmatpush1.bf16.msra.mxu0 %v13700_v27  ;;  %v9664_v46 = vpop.permute.xlu1 %1735 }
  0xe2   :  { %13735 = vst [vmem:[#allocation86_spill] sm:$0xff] %v9664_v46  ;;  %v9666_v42 = vpop.permute.xlu0 %1733  ;;  %1543 = vmatprep.subr.bf16.mxu0 %v13706_v49  ;;  %v9690_v49 = vld [vmem:[#allocation4 + $0x28] sm:$0xff]  }
  0xe3   :  { %1801 = vrot.lane.b32.xlu1 %v9669_v5, %s8655_s15  ;;  %13739 = vst [vmem:[#allocation90_spill] sm:$0xff] %v9690_v49 }
  0xe4   :  { %1799 = vrot.lane.b32.xlu0 %v9673_v43, %s8655_s15 }
  0xe5   :  { %1544 = vmatpush1.bf16.msra.mxu0 %v13709_v18  ;;  %v870_v57 = vpop.permute.xlu1 %869 }
  0xe6   :  { %v9678_v58 = vpop.permute.xlu0 %1731  ;;  %1545 = vmatprep.subr.bf16.mxu0 %v13713_v17  ;;  %v9696_v17 = vld [vmem:[#allocation3 + $0x188] ss:$36 sps:$4 sm:$0xff]  }
  0xe7   :  { %13737 = vst [vmem:[#allocation88_spill] sm:$0xff] %v9678_v58  ;;  %935 = vrot.lane.b32.xlu1 %v9118_v60, %s8654_s26  ;;  %13740 = vst [vmem:[#allocation91_spill] sm:$0xff] %v9696_v17 }
  0xe8   :  { %933 = vrot.lane.b32.xlu0 %v9350_v62, %s8654_s26  ;;  %v8566_v62 = vld [vmem:[#allocation3 + $0x170] sm:$0xff] }
  0xe9   :  { %1546 = vmatpush1.bf16.msra.mxu0 %v13715_v23  ;;  %v868_v12 = vpop.permute.xlu1 %867  ;;  %v9700_v37 = vcombine.high %v8566_v62, %v8567_v19  ;;  %v9717_v19 = vld [vmem:[#allocation4 + $0x30] sm:$0xff]  }
  0xea   :  { %v9686_v8 = vpop.permute.xlu0 %871  ;;  %7831 = vmatprep.subr.bf16.mxu0 %v9564_v3  ;;  %v1017_v5 = vsel %vm1007_vm0, %v868_v12, %v870_v57  ;;  %13744 = vst [vmem:[#allocation95_spill] sm:$0xff] %v9717_v19 }
  0xeb   :  { %13738 = vst [vmem:[#allocation89_spill] sm:$0xff] %v9686_v8  ;;  %1821 = vrot.lane.b32.xlu1 %v9690_v49, %s8655_s15  ;;  %v1018_v60 = vsel %vm1007_vm0, %v870_v57, %v9686_v8  ;;  %13741 = vst [vmem:[#allocation92_spill] sm:$0xff] %v9700_v37  ;;  %v8570_v57 = vld [vmem:[#allocation3 + $0x1b8] sm:$0xff] }
  0xec   :  { %1819 = vrot.lane.b32.xlu0 %v9696_v17, %s8655_s15  ;;  %1154 = vmatprep.subr.bf16.mxu1 %v1018_v60 }
  0xed   :  { %1155 = vmatpush1.bf16.msra.mxu1 %v1017_v5  ;;  %1564 = vmatmul.mubr.bf16.vlgmr.msra.gmra.mrb[12].mxu0 %v9581_v22  ;;  %v9703_v12 = vpop.permute.xlu1 %1755  ;;  %v9722_v5 = vld [vmem:[#allocation3 + $0x1d0] ss:$36 sps:$4 sm:$0xff]  }
  0xee   :  { %13742 = vst [vmem:[#allocation93_spill] sm:$0xff] %v9703_v12  ;;  %7832 = vmatpush3.bf16.msra.mxu0 %v9564_v3  ;;  %v9706_v49 = vpop.permute.xlu0 %1753  ;;  %1573 = vmatprep.mubr.bf16.mxu0 %v13707_v25  ;;  %v8571_v3 = vld [vmem:[#allocation3 + $0x1dc] sm:$0xff] }
  0xef   :  { %955 = vrot.lane.b32.xlu1 %v13700_v27, %s8654_s26  ;;  %7833 = vmatprep.subr.bf16.mxu0 %v9593_v55 }
  0xf0   :  { %953 = vrot.lane.b32.xlu0 %v9700_v37, %s8654_s26  ;;  %v9726_v37 = vcombine.high %v8570_v57, %v8571_v3 }
  0xf1   :  { %v890_v60 = vpop.permute.xlu1 %889 }
  0xf2   :  { %7834 = vmatpush3.bf16.msra.mxu0 %v9593_v55  ;;  %v9715_v62 = vpop.permute.xlu0 %1751  ;;  %13745 = vst [vmem:[#allocation96_spill] sm:$0xff] %v9726_v37 }
  0xf3   :  { %13743 = vst [vmem:[#allocation94_spill] sm:$0xff] %v9715_v62  ;;  %1841 = vrot.lane.b32.xlu1 %v9717_v19, %s8655_s15  ;;  %7835 = vmatprep.subr.bf16.mxu0 %v9624_v51 }
  0xf4   :  { %1839 = vrot.lane.b32.xlu0 %v9722_v5, %s8655_s15 }
  0xf5   :  { %v888_v27 = vpop.permute.xlu1 %887  ;;  %1574 = vmatmul.mubr.bf16.gmra.mrb[16].mxu0 %v9612_v6 }
  0xf6   :  { %7836 = vmatpush3.bf16.msra.mxu0 %v9624_v51  ;;  %v9730_v55 = vpop.permute.xlu0 %891  ;;  %v1026_v19 = vsel %vm1007_vm0, %v888_v27, %v890_v60  ;;  %7847 = vmatprep.mubr.bf16.mxu0 %v9581_v22  ;;  %v9746_v22 = vld [vmem:[#allocation4 + $0x38] sm:$0xff]  }
  0xf7   :  { %975 = vrot.lane.b32.xlu1 %v13709_v18, %s8654_s26  ;;  %v1027_v8 = vsel %vm1007_vm0, %v890_v60, %v9730_v55  ;;  %7837 = vmatprep.subr.bf16.mxu0 %v9648_v28  ;;  %13747 = vst [vmem:[#allocation98_spill] sm:$0xff] %v9746_v22  ;;  %v9751_v60 = vld [vmem:[#allocation3 + $0x218] ss:$36 sps:$4 sm:$0xff]  }
  0xf8   :  { %973 = vrot.lane.b32.xlu0 %v9726_v37, %s8654_s26  ;;  %1156 = vmatprep.subr.bf16.mxu1 %v1027_v8  ;;  %v8574_v8 = vld [vmem:[#allocation3 + $0x200] sm:$0xff] }
  0xf9   :  { %1157 = vmatpush1.bf16.msra.mxu1 %v1026_v19  ;;  %v9741_v3 = vpop.permute.xlu1 %1775  ;;  %v8575_v19 = vld [vmem:[#allocation3 + $0x224] sm:$0xff] }
  0xfa   :  { %13746 = vst [vmem:[#allocation97_spill] sm:$0xff] %v9741_v3  ;;  %7838 = vmatpush3.bf16.msra.mxu0 %v9648_v28  ;;  %v9744_v27 = vpop.permute.xlu0 %1773  ;;  %v9755_v57 = vcombine.high %v8574_v8, %v8575_v19 }
  0xfb   :  { %1861 = vrot.lane.b32.xlu1 %v9746_v22, %s8655_s15  ;;  %7839 = vmatprep.subr.bf16.mxu0 %v9673_v43 }
  0xfc   :  { %1859 = vrot.lane.b32.xlu0 %v9751_v60, %s8655_s15  ;;  %13748 = vst [vmem:[#allocation99_spill] sm:$0xff] %v9755_v57 }
  0xfd   :  { %v910_v37 = vpop.permute.xlu1 %909 }
  0xfe   :  { %7840 = vmatpush3.bf16.msra.mxu0 %v9673_v43  ;;  %v9758_v28 = vpop.permute.xlu0 %1771 }
  0xff   :  { %13749 = vst [vmem:[#allocation100_spill] sm:$0xff] %v9758_v28  ;;  %995 = vrot.lane.b32.xlu1 %v13715_v23, %s8654_s26  ;;  %7841 = vmatprep.subr.bf16.mxu0 %v9696_v17 }
 0x100   :  { %993 = vrot.lane.b32.xlu0 %v9755_v57, %s8654_s26 }
 0x101   :  { %v908_v22 = vpop.permute.xlu1 %907 }
 0x102   :  { %7842 = vmatpush3.bf16.msra.mxu0 %v9696_v17  ;;  %v9766_v51 = vpop.permute.xlu0 %911  ;;  %v1035_v8 = vsel %vm1007_vm0, %v908_v22, %v910_v37 }
 0x103   :  { %2326 = vrot.lane.b32.xlu1 %v8996_v20, %s8657_s12  ;;  %v1036_v19 = vsel %vm1007_vm0, %v910_v37, %v9766_v51  ;;  %7843 = vmatprep.subr.bf16.mxu0 %v9722_v5 }
 0x104   :  { %2324 = vrot.lane.b32.xlu0 %v9019_v24, %s8657_s12  ;;  %1158 = vmatprep.subr.bf16.mxu1 %v1036_v19  ;;  %v1864_v19 = vsel %vm1863_vm1, %v9491_v44, %v9474_v34 }
 0x105   :  { %1159 = vmatpush1.bf16.msra.mxu1 %v1035_v8  ;;  %v9776_v57 = vpop.permute.xlu1 %1795  ;;  %v1865_v8 = vsel %vm1863_vm1, %v9474_v34, %v9472_v33 }
 0x106   :  { %13750 = vst [vmem:[#allocation101_spill] sm:$0xff] %v9776_v57  ;;  %7844 = vmatpush3.bf16.msra.mxu0 %v9722_v5  ;;  %v9779_v17 = vpop.permute.xlu0 %1793 }
 0x107   :  { %857 = vrot.lane.b32.xlu1 %v9338_v10, %s8654_s26  ;;  %7845 = vmatprep.subr.bf16.mxu0 %v9751_v60 }
 0x108   :  { %2322 = vrot.lane.b32.xlu0 %v9097_v41, %s8657_s12 }
 0x109   :  { %v930_v37 = vpop.permute.xlu1 %929 }
 0x10a   :  { %7846 = vmatpush3.bf16.msra.mxu0 %v9751_v60  ;;  %v9787_v22 = vpop.permute.xlu0 %1791 }
 0x10b   :  { %13751 = vst [vmem:[#allocation102_spill] sm:$0xff] %v9787_v22  ;;  %2008 = vmatprep.subr.bf16.mxu0 %v1865_v8  ;;  %2344 = vrot.lane.b32.xlu1 %v9074_v35, %s8657_s12  ;;  %v1874_v8 = vsel %vm1863_vm1, %v9489_v63, %v9503_v29  ;;  %v13770_v29 = vld [vmem:[#allocation58_spill] sm:$0xff] }
 0x10c   :  { %859 = vrot.lane.b32.xlu0 %v9332_v9, %s8654_s26 }
 0x10d   :  { %7848 = vmatmul.mubr.bf16.vlgmr.msra.gmra.mrb[0].mxu0 %v9612_v6  ;;  %v928_v41 = vpop.permute.xlu1 %927  ;;  %v1873_v6 = vsel %vm1863_vm1, %v9500_v16, %v9489_v63 }
 0x10e   :  { %2009 = vmatpush1.bf16.msra.mxu0 %v1864_v19  ;;  %v9800_v24 = vpop.permute.xlu0 %931  ;;  %v1044_v33 = vsel %vm1007_vm0, %v928_v41, %v930_v37  ;;  %2040 = vmatprep.mubr.bf16.mxu0 %v13707_v25  ;;  %v1883_v19 = vsel %vm1863_vm1, %v9513_v30, %v9511_v40  ;;  %v13769_v40 = vld [vmem:[#allocation34_spill] sm:$0xff] }
 0x10f   :  { %2010 = vmatprep.subr.bf16.mxu0 %v1874_v8  ;;  %2342 = vrot.lane.b32.xlu1 %v9142_v32, %s8657_s12  ;;  %v1045_v44 = vsel %vm1007_vm0, %v930_v37, %v9800_v24  ;;  %v1892_v37 = vsel %vm1863_vm1, %v9525_v13, %v9537_v26  ;;  %v1891_v8 = vsel %vm1863_vm1, %v9535_v45, %v9525_v13 }
 0x110   :  { %2346 = vrot.lane.b32.xlu0 %v9165_v47, %s8657_s12  ;;  %1160 = vmatprep.subr.bf16.mxu1 %v1045_v44  ;;  %v1901_v44 = vsel %vm1863_vm1, %v9547_v50, %v9545_v21  ;;  %v1900_v13 = vsel %vm1863_vm1, %v9557_v2, %v9547_v50  ;;  %v1909_v2 = vsel %vm1863_vm1, %v9569_v53, %v9555_v15  ;;  %v9934_v21 = vld [vmem:[%s13291_s2 + $0x28] sm:$0xff]  }
 0x111   :  { %1161 = vmatpush1.bf16.msra.mxu1 %v1044_v33  ;;  %v9816_v34 = vpop.permute.xlu1 %1815  ;;  %v1882_v33 = vsel %vm1863_vm1, %v9527_v14, %v9513_v30 }
 0x112   :  { %13752 = vst [vmem:[#allocation103_spill] sm:$0xff] %v9816_v34  ;;  %2011 = vmatpush1.bf16.msra.mxu0 %v1873_v6  ;;  %v9818_v41 = vpop.permute.xlu0 %1813 }
 0x113   :  { %2012 = vmatprep.subr.bf16.mxu0 %v1883_v19  ;;  %879 = vrot.lane.b32.xlu1 %v9360_v11, %s8654_s26 }
 0x114   :  { %877 = vrot.lane.b32.xlu0 %v9366_v0, %s8654_s26 }
 0x115   :  { %v950_v63 = vpop.permute.xlu1 %949 }
 0x116   :  { %2013 = vmatpush1.bf16.msra.mxu0 %v1882_v33  ;;  %v9830_v16 = vpop.permute.xlu0 %1811 }
 0x117   :  { %13753 = vst [vmem:[#allocation104_spill] sm:$0xff] %v9830_v16  ;;  %2014 = vmatprep.subr.bf16.mxu0 %v1892_v37  ;;  %2366 = vrot.lane.b32.xlu1 %v9200_v4, %s8657_s12  ;;  %v1910_v37 = vsel %vm1863_vm1, %v9555_v15, %v9571_v38  ;;  %v13768_v38 = vld [vmem:[#allocation35_spill] sm:$0xff] }
 0x118   :  { %2364 = vrot.lane.b32.xlu0 %v9211_v31, %s8657_s12 }
 0x119   :  { %v948_v14 = vpop.permute.xlu1 %947 }
 0x11a   :  { %2015 = vmatpush1.bf16.msra.mxu0 %v1891_v8  ;;  %v9842_v30 = vpop.permute.xlu0 %951  ;;  %v1053_v6 = vsel %vm1007_vm0, %v948_v14, %v950_v63  ;;  %v1919_v8 = vsel %vm1863_vm1, %v9586_v56, %v9584_v7  ;;  %v1918_v14 = vsel %vm1863_vm1, %v9602_v52, %v9586_v56  ;;  %v13759_v56 = vld [vmem:[#allocation76_spill] sm:$0xff] }
 0x11b   :  { %2016 = vmatprep.subr.bf16.mxu0 %v1901_v44  ;;  %897 = vrot.lane.b32.xlu1 %v9076_v36, %s8654_s26  ;;  %v1054_v19 = vsel %vm1007_vm0, %v950_v63, %v9842_v30  ;;  %v13756_v44 = vld [vmem:[#allocation75_spill] sm:$0xff] }
 0x11c   :  { %2362 = vrot.lane.b32.xlu0 %v9223_v59, %s8657_s12  ;;  %1162 = vmatprep.subr.bf16.mxu1 %v1054_v19  ;;  %v1927_v52 = vsel %vm1863_vm1, %v13759_v56, %v13756_v44 }
 0x11d   :  { %1163 = vmatpush1.bf16.msra.mxu1 %v1053_v6  ;;  %v9857_v45 = vpop.permute.xlu1 %1835  ;;  %v1928_v6 = vsel %vm1863_vm1, %v13756_v44, %v9617_v54  ;;  %v13764_v44 = vld [vmem:[#allocation33_spill] sm:$0xff] }
 0x11e   :  { %13754 = vst [vmem:[#allocation105_spill] sm:$0xff] %v9857_v45  ;;  %2017 = vmatpush1.bf16.msra.mxu0 %v1900_v13  ;;  %v9859_v33 = vpop.permute.xlu0 %1833  ;;  %v13757_v13 = vld [vmem:[#allocation54_spill] sm:$0xff] }
 0x11f   :  { %2018 = vmatprep.subr.bf16.mxu0 %v1910_v37  ;;  %2384 = vrot.lane.b32.xlu1 %v9217_v61, %s8657_s12 }
 0x120   :  { %899 = vrot.lane.b32.xlu0 %v9380_v1, %s8654_s26 }
 0x121   :  { %v970_v50 = vpop.permute.xlu1 %969 }
 0x122   :  { %2019 = vmatpush1.bf16.msra.mxu0 %v1909_v2  ;;  %v9871_v63 = vpop.permute.xlu0 %1831  ;;  %v13758_v2 = vld [vmem:[#allocation11_spill] sm:$0xff] }
 0x123   :  { %13755 = vst [vmem:[#allocation106_spill] sm:$0xff] %v9871_v63  ;;  %2020 = vmatprep.subr.bf16.mxu0 %v1919_v8  ;;  %2382 = vrot.lane.b32.xlu1 %v9229_v48, %s8657_s12 }
 0x124   :  { %2386 = vrot.lane.b32.xlu0 %v9235_v39, %s8657_s12 }
 0x125   :  { %v968_v53 = vpop.permute.xlu1 %967 }
 0x126   :  { %2021 = vmatpush1.bf16.msra.mxu0 %v1918_v14  ;;  %v9883_v15 = vpop.permute.xlu0 %971  ;;  %v1062_v19 = vsel %vm1007_vm0, %v968_v53, %v970_v50  ;;  %v9903_v14 = vld [vmem:[%s13291_s2 + $0x20] sm:$0xff]  }
 0x127   :  { %2022 = vmatprep.subr.bf16.mxu0 %v1928_v6  ;;  %919 = vrot.lane.b32.xlu1 %v13757_v13, %s8654_s26  ;;  %v1063_v37 = vsel %vm1007_vm0, %v970_v50, %v9883_v15  ;;  %v13761_v50 = vld [vmem:[#allocation80_spill] sm:$0xff]  ;;  %v13762_v6 = vld [vmem:[#allocation81_spill] sm:$0xff] }
 0x128   :  { %917 = vrot.lane.b32.xlu0 %v13758_v2, %s8654_s26  ;;  %1164 = vmatprep.subr.bf16.mxu1 %v1063_v37  ;;  %v1869_v54 = vsel %vm1863_vm1, %v13762_v6, %v13761_v50  ;;  %v13763_v37 = vld [vmem:[#allocation32_spill] sm:$0xff]  ;;  %v13767_v50 = vld [vmem:[#allocation13_spill] sm:$0xff] }
 0x129   :  { %1165 = vmatpush1.bf16.msra.mxu1 %v1062_v19  ;;  %v9898_v8 = vpop.permute.xlu1 %1855  ;;  %v13765_v19 = vld [vmem:[#allocation82_spill] sm:$0xff] }
 0x12a   :  { %13760 = vst [vmem:[#allocation75_spill] sm:$0xff] %v9898_v8  ;;  %2023 = vmatpush1.bf16.msra.mxu0 %v1927_v52  ;;  %v9905_v53 = vpop.permute.xlu0 %1853  ;;  %v1868_v56 = vsel %vm1863_vm1, %v13765_v19, %v13762_v6  ;;  %v1877_v6 = vsel %vm1863_vm1, %v9678_v58, %v9666_v42  ;;  %v13775_v19 = vld [vmem:[#allocation85_spill] sm:$0xff] }
 0x12b   :  { %2114 = vmatprep.subr.bf16.mxu0 %v1869_v54  ;;  %2406 = vrot.lane.b32.xlu1 %v13763_v37, %s8657_s12  ;;  %v1878_v54 = vsel %vm1863_vm1, %v9666_v42, %v9664_v46 }
 0x12c   :  { %2404 = vrot.lane.b32.xlu0 %v13764_v44, %s8657_s12 }
 0x12d   :  { %2041 = vmatmul.mubr.bf16.vlgmr.msra.gmra.mrb[4].mxu0 %v9903_v14  ;;  %v990_v52 = vpop.permute.xlu1 %989 }
 0x12e   :  { %2115 = vmatpush1.bf16.msra.mxu0 %v1868_v56  ;;  %v9918_v7 = vpop.permute.xlu0 %1851  ;;  %2050 = vmatprep.mubr.bf16.mxu0 %v13707_v25 }
 0x12f   :  { %13766 = vst [vmem:[#allocation76_spill] sm:$0xff] %v9918_v7  ;;  %2116 = vmatprep.subr.bf16.mxu0 %v1878_v54  ;;  %937 = vrot.lane.b32.xlu1 %v13767_v50, %s8654_s26  ;;  %v1887_v54 = vsel %vm1863_vm1, %v9706_v49, %v9703_v12  ;;  %v13774_v12 = vld [vmem:[#allocation15_spill] sm:$0xff] }
 0x130   :  { %2402 = vrot.lane.b32.xlu0 %v13768_v38, %s8657_s12 }
 0x131   :  { %v988_v56 = vpop.permute.xlu1 %987 }
 0x132   :  { %2117 = vmatpush1.bf16.msra.mxu0 %v1877_v6  ;;  %v9936_v46 = vpop.permute.xlu0 %991  ;;  %v1071_v26 = vsel %vm1007_vm0, %v988_v56, %v990_v52  ;;  %v1886_v6 = vsel %vm1863_vm1, %v9715_v62, %v9706_v49  ;;  %v9965_v49 = vld [vmem:[%s13291_s2 + $0x10] sm:$0xff]  }
 0x133   :  { %2118 = vmatprep.subr.bf16.mxu0 %v1887_v54  ;;  %2424 = vrot.lane.b32.xlu1 %v13769_v40, %s8657_s12  ;;  %v1072_v42 = vsel %vm1007_vm0, %v990_v52, %v9936_v46  ;;  %v1896_v54 = vsel %vm1863_vm1, %v9744_v27, %v9741_v3  ;;  %v13772_v52 = vld [vmem:[#allocation37_spill] sm:$0xff]  ;;  %v1905_v3 = vsel %vm1863_vm1, %v9779_v17, %v9776_v57 }
 0x134   :  { %939 = vrot.lane.b32.xlu0 %v13770_v29, %s8654_s26  ;;  %1166 = vmatprep.subr.bf16.mxu1 %v1072_v42  ;;  %v1895_v42 = vsel %vm1863_vm1, %v9758_v28, %v9744_v27  ;;  %v13776_v28 = vld [vmem:[#allocation17_spill] sm:$0xff] }
 0x135   :  { %1167 = vmatpush1.bf16.msra.mxu1 %v1071_v26  ;;  %v1722_v58 = vpop.permute.xlu1 %1721  ;;  %2051 = vmatmul.mubr.bf16.gmra.mrb[8].mxu0 %v9934_v21  ;;  %v13773_v26 = vld [vmem:[#allocation38_spill] sm:$0xff] }
 0x136   :  { %2119 = vmatpush1.bf16.msra.mxu0 %v1886_v6  ;;  %v9952_v56 = vpop.permute.xlu0 %1719  ;;  %2146 = vmatprep.mubr.bf16.mxu0 %v13707_v25 }
 0x137   :  { %13771 = vst [vmem:[#allocation81_spill] sm:$0xff] %v9952_v56  ;;  %2120 = vmatprep.subr.bf16.mxu0 %v1896_v54  ;;  %2422 = vrot.lane.b32.xlu1 %v13772_v52, %s8657_s12 }
 0x138   :  { %2426 = vrot.lane.b32.xlu0 %v13773_v26, %s8657_s12  ;;  %1185 = vmatmul.mubr.bf16.vlgmr.msra.gmra.mrb[0].mxu1 %v9965_v49  ;;  %v1914_v26 = vsel %vm1863_vm1, %v9818_v41, %v9816_v34  ;;  %v13781_v34 = vld [vmem:[#allocation21_spill] sm:$0xff] }
 0x139   :  { %v9971_v6 = vpop.permute.xlu1 %855  ;;  %1194 = vmatprep.mubr.bf16.mxu1 %v13707_v25 }
 0x13a   :  { %2121 = vmatpush1.bf16.msra.mxu0 %v1895_v42  ;;  %v854_v54 = vpop.permute.xlu0 %853  ;;  %v1904_v42 = vsel %vm1863_vm1, %v9787_v22, %v9779_v17  ;;  %v1913_v17 = vsel %vm1863_vm1, %v9830_v16, %v9818_v41  ;;  %v13783_v16 = vld [vmem:[#allocation43_spill] sm:$0xff] }
 0x13b   :  { %2122 = vmatprep.subr.bf16.mxu0 %v1905_v3  ;;  %959 = vrot.lane.b32.xlu1 %v13774_v12, %s8654_s26  ;;  %v1011_v62 = vsel %vm1007_vm0, %v854_v54, %v9971_v6  ;;  %v1010_v27 = vsel %vm1007_vm0, %v13775_v19, %v854_v54  ;;  %v13778_v19 = vld [vmem:[#allocation39_spill] sm:$0xff]  ;;  %v13779_v54 = vld [vmem:[#allocation40_spill] sm:$0xff] }
 0x13c   :  { %957 = vrot.lane.b32.xlu0 %v13776_v28, %s8654_s26  ;;  %1205 = vmatprep.subr.bf16.mxu1 %v1011_v62  ;;  %v13780_v62 = vld [vmem:[#allocation19_spill] sm:$0xff] }
 0x13d   :  { %1206 = vmatpush1.bf16.msra.mxu1 %v1010_v27  ;;  %v1742_v57 = vpop.permute.xlu1 %1741 }
 0x13e   :  { %2123 = vmatpush1.bf16.msra.mxu0 %v1904_v42  ;;  %v9988_v3 = vpop.permute.xlu0 %1739 }
 0x13f   :  { %13777 = vst [vmem:[#allocation85_spill] sm:$0xff] %v9988_v3  ;;  %2124 = vmatprep.subr.bf16.mxu0 %v1914_v26  ;;  %2446 = vrot.lane.b32.xlu1 %v13778_v19, %s8657_s12  ;;  %v1923_v26 = vsel %vm1863_vm1, %v9859_v33, %v9857_v45  ;;  %v1932_v19 = vsel %vm1863_vm1, %v9905_v53, %v9898_v8 }
 0x140   :  { %2444 = vrot.lane.b32.xlu0 %v13779_v54, %s8657_s12  ;;  %1195 = vmatmul.mubr.bf16.gmra.mrb[4].mxu1 %v13780_v62  ;;  %v13782_v54 = vld [vmem:[#allocation89_spill] sm:$0xff] }
 0x141   :  { %v10001_v27 = vpop.permute.xlu1 %875  ;;  %1237 = vmatprep.mubr.bf16.mxu1 %v13707_v25 }
 0x142   :  { %2125 = vmatpush1.bf16.msra.mxu0 %v1913_v17  ;;  %v874_v42 = vpop.permute.xlu0 %873  ;;  %v1922_v17 = vsel %vm1863_vm1, %v9871_v63, %v9859_v33 }
 0x143   :  { %2126 = vmatprep.subr.bf16.mxu0 %v1923_v26  ;;  %977 = vrot.lane.b32.xlu1 %v13781_v34, %s8654_s26  ;;  %v1020_v22 = vsel %vm1007_vm0, %v874_v42, %v10001_v27  ;;  %v1019_v41 = vsel %vm1007_vm0, %v13782_v54, %v874_v42  ;;  %v13785_v54 = vld [vmem:[#allocation42_spill] sm:$0xff]  ;;  %v13786_v42 = vld [vmem:[#allocation20_spill] sm:$0xff] }
 0x144   :  { %2442 = vrot.lane.b32.xlu0 %v13783_v16, %s8657_s12  ;;  %1207 = vmatprep.subr.bf16.mxu1 %v1020_v22  ;;  %v1931_v22 = vsel %vm1863_vm1, %v9918_v7, %v9905_v53  ;;  %v13788_v16 = vld [vmem:[#allocation45_spill] sm:$0xff] }
 0x145   :  { %1208 = vmatpush1.bf16.msra.mxu1 %v1019_v41  ;;  %v1762_v45 = vpop.permute.xlu1 %1761  ;;  %v8578_v7 = vld [vmem:[#allocation3 + $0x3c] sm:$0xff] }
 0x146   :  { %2127 = vmatpush1.bf16.msra.mxu0 %v1922_v17  ;;  %v10018_v26 = vpop.permute.xlu0 %1759  ;;  %v1872_v17 = vsel %vm1863_vm1, %v9952_v56, %v1722_v58  ;;  %v13790_v56 = vld [vmem:[#allocation23_spill] sm:$0xff] }
 0x147   :  { %13784 = vst [vmem:[#allocation19_spill] sm:$0xff] %v10018_v26  ;;  %2128 = vmatprep.subr.bf16.mxu0 %v1932_v19  ;;  %2464 = vrot.lane.b32.xlu1 %v13785_v54, %s8657_s12  ;;  %v13787_v19 = vld [vmem:[#allocation44_spill] sm:$0xff] }
 0x148   :  { %979 = vrot.lane.b32.xlu0 %v13786_v42, %s8654_s26 }
 0x149   :  { %v10030_v33 = vpop.permute.xlu1 %895 }
 0x14a   :  { %2129 = vmatpush1.bf16.msra.mxu0 %v1931_v22  ;;  %v894_v41 = vpop.permute.xlu0 %893  ;;  %v1881_v22 = vsel %vm1863_vm1, %v9988_v3, %v1742_v57  ;;  %v8577_v3 = vld [vmem:[#allocation3 + $0x18] sm:$0xff] }
 0x14b   :  { %7851 = vmatprep.subr.bf16.mxu0 %v1872_v17  ;;  %2462 = vrot.lane.b32.xlu1 %v13787_v19, %s8657_s12  ;;  %v1029_v8 = vsel %vm1007_vm0, %v894_v41, %v10030_v33  ;;  %v1028_v63 = vsel %vm1007_vm0, %v9730_v55, %v894_v41  ;;  %v13791_v55 = vld [vmem:[#allocation25_spill] sm:$0xff]  ;;  %v1890_v41 = vsel %vm1863_vm1, %v10018_v26, %v1762_v45 }
 0x14c   :  { %2466 = vrot.lane.b32.xlu0 %v13788_v16, %s8657_s12  ;;  %1209 = vmatprep.subr.bf16.mxu1 %v1029_v8  ;;  %v10062_v16 = vcombine.high %v8577_v3, %v8578_v7 }
 0x14d   :  { %1210 = vmatpush1.bf16.msra.mxu1 %v1028_v63  ;;  %2147 = vmatmul.mubr.bf16.vlgmr.msra.gmra.mrb[12].mxu0 %v9903_v14  ;;  %v1782_v53 = vpop.permute.xlu1 %1781 }
 0x14e   :  { %7852 = vmatpush3.bf16.msra.mxu0 %v1872_v17  ;;  %v10043_v58 = vpop.permute.xlu0 %1779  ;;  %2156 = vmatprep.mubr.bf16.mxu0 %v13707_v25  ;;  %13792 = vst [vmem:[#allocation107_spill] sm:$0xff] %v10062_v16 }
 0x14f   :  { %13789 = vst [vmem:[#allocation89_spill] sm:$0xff] %v10043_v58  ;;  %7853 = vmatprep.subr.bf16.mxu0 %v1881_v22  ;;  %999 = vrot.lane.b32.xlu1 %v13790_v56, %s8654_s26  ;;  %v1899_v26 = vsel %vm1863_vm1, %v10043_v58, %v1782_v53 }
 0x150   :  { %997 = vrot.lane.b32.xlu0 %v13791_v55, %s8654_s26 }
 0x151   :  { %v10052_v8 = vpop.permute.xlu1 %915 }
 0x152   :  { %7854 = vmatpush3.bf16.msra.mxu0 %v1881_v22  ;;  %v914_v63 = vpop.permute.xlu0 %913 }
 0x153   :  { %7855 = vmatprep.subr.bf16.mxu0 %v1890_v41  ;;  %2334 = vrot.lane.b32.xlu1 %v9332_v9, %s8657_s12  ;;  %v1038_v57 = vsel %vm1007_vm0, %v914_v63, %v10052_v8  ;;  %v1037_v17 = vsel %vm1007_vm0, %v9766_v51, %v914_v63  ;;  %v13794_v51 = vld [vmem:[#allocation49_spill] sm:$0xff] }
 0x154   :  { %2332 = vrot.lane.b32.xlu0 %v9338_v10, %s8657_s12  ;;  %1211 = vmatprep.subr.bf16.mxu1 %v1038_v57  ;;  %v8580_v57 = vld [vmem:[#allocation3 + $0x84] sm:$0xff] }
 0x155   :  { %1212 = vmatpush1.bf16.msra.mxu1 %v1037_v17  ;;  %v1802_v45 = vpop.permute.xlu1 %1801  ;;  %2157 = vmatmul.mubr.bf16.gmra.mrb[16].mxu0 %v9934_v21 }
 0x156   :  { %7856 = vmatpush3.bf16.msra.mxu0 %v1890_v41  ;;  %v10067_v22 = vpop.permute.xlu0 %1799  ;;  %7867 = vmatprep.mubr.bf16.mxu0 %v9903_v14  ;;  %v8579_v41 = vld [vmem:[#allocation3 + $0x60] sm:$0xff] }
 0x157   :  { %13793 = vst [vmem:[#allocation108_spill] sm:$0xff] %v10067_v22  ;;  %7857 = vmatprep.subr.bf16.mxu0 %v1899_v26  ;;  %861 = vrot.lane.b32.xlu1 %v10062_v16, %s8654_s26  ;;  %v1908_v63 = vsel %vm1863_vm1, %v10067_v22, %v1802_v45  ;;  %v10086_v17 = vcombine.high %v8579_v41, %v8580_v57  ;;  %v8582_v57 = vld [vmem:[#allocation3 + $0xcc] sm:$0xff] }
 0x158   :  { %2330 = vrot.lane.b32.xlu0 %v13794_v51, %s8657_s12 }
 0x159   :  { %v10076_v7 = vpop.permute.xlu1 %935  ;;  %13795 = vst [vmem:[#allocation109_spill] sm:$0xff] %v10086_v17 }
 0x15a   :  { %7858 = vmatpush3.bf16.msra.mxu0 %v1899_v26  ;;  %v934_v3 = vpop.permute.xlu0 %933 }
 0x15b   :  { %7859 = vmatprep.subr.bf16.mxu0 %v1908_v63  ;;  %2354 = vrot.lane.b32.xlu1 %v9360_v11, %s8657_s12  ;;  %v1047_v14 = vsel %vm1007_vm0, %v934_v3, %v10076_v7  ;;  %v1046_v53 = vsel %vm1007_vm0, %v9800_v24, %v934_v3  ;;  %v13797_v24 = vld [vmem:[#allocation6_spill] sm:$0xff] }
 0x15c   :  { %2352 = vrot.lane.b32.xlu0 %v9366_v0, %s8657_s12  ;;  %1213 = vmatprep.subr.bf16.mxu1 %v1047_v14 }
 0x15d   :  { %1214 = vmatpush1.bf16.msra.mxu1 %v1046_v53  ;;  %v1822_v26 = vpop.permute.xlu1 %1821  ;;  %v8581_v53 = vld [vmem:[#allocation3 + $0xa8] sm:$0xff] }
 0x15e   :  { %7860 = vmatpush3.bf16.msra.mxu0 %v1908_v63  ;;  %v10090_v45 = vpop.permute.xlu0 %1819 }
 0x15f   :  { %13796 = vst [vmem:[#allocation110_spill] sm:$0xff] %v10090_v45  ;;  %881 = vrot.lane.b32.xlu1 %v10086_v17, %s8654_s26  ;;  %v1917_v22 = vsel %vm1863_vm1, %v10090_v45, %v1822_v26  ;;  %v10106_v26 = vcombine.high %v8581_v53, %v8582_v57  ;;  %v8583_v57 = vld [vmem:[#allocation3 + $0xf0] sm:$0xff] }
 0x160   :  { %2350 = vrot.lane.b32.xlu0 %v13797_v24, %s8657_s12  ;;  %7861 = vmatprep.subr.bf16.mxu0 %v1917_v22 }
 0x161   :  { %v10098_v3 = vpop.permute.xlu1 %955  ;;  %13798 = vst [vmem:[#allocation6_spill] sm:$0xff] %v10106_v26 }
 0x162   :  { %7862 = vmatpush3.bf16.msra.mxu0 %v1917_v22  ;;  %v954_v41 = vpop.permute.xlu0 %953 }
 0x163   :  { %2374 = vrot.lane.b32.xlu1 %v9380_v1, %s8657_s12  ;;  %v1056_v63 = vsel %vm1007_vm0, %v954_v41, %v10098_v3  ;;  %v1055_v14 = vsel %vm1007_vm0, %v9842_v30, %v954_v41  ;;  %v13800_v30 = vld [vmem:[#allocation9_spill] sm:$0xff] }
 0x164   :  { %2372 = vrot.lane.b32.xlu0 %v9076_v36, %s8657_s12  ;;  %1215 = vmatprep.subr.bf16.mxu1 %v1056_v63 }
 0x165   :  { %1216 = vmatpush1.bf16.msra.mxu1 %v1055_v14  ;;  %v1842_v22 = vpop.permute.xlu1 %1841 }
 0x166   :  { %v10110_v45 = vpop.permute.xlu0 %1839 }
 0x167   :  { %13799 = vst [vmem:[#allocation111_spill] sm:$0xff] %v10110_v45  ;;  %901 = vrot.lane.b32.xlu1 %v10106_v26, %s8654_s26  ;;  %v1926_v58 = vsel %vm1863_vm1, %v10110_v45, %v1842_v22  ;;  %v8584_v26 = vld [vmem:[#allocation3 + $0x114] sm:$0xff] }
 0x168   :  { %2370 = vrot.lane.b32.xlu0 %v13800_v30, %s8657_s12  ;;  %7863 = vmatprep.subr.bf16.mxu0 %v1926_v58  ;;  %v10126_v22 = vcombine.high %v8583_v57, %v8584_v26  ;;  %v8585_v57 = vld [vmem:[#allocation3 + $0x138] sm:$0xff] }
 0x169   :  { %7864 = vmatpush3.bf16.msra.mxu0 %v1926_v58  ;;  %v10118_v41 = vpop.permute.xlu1 %975 }
 0x16a   :  { %v974_v53 = vpop.permute.xlu0 %973  ;;  %13801 = vst [vmem:[#allocation9_spill] sm:$0xff] %v10126_v22 }
 0x16b   :  { %2394 = vrot.lane.b32.xlu1 %v13757_v13, %s8657_s12  ;;  %v1065_v63 = vsel %vm1007_vm0, %v974_v53, %v10118_v41  ;;  %v1064_v14 = vsel %vm1007_vm0, %v9883_v15, %v974_v53  ;;  %v13803_v15 = vld [vmem:[#allocation12_spill] sm:$0xff] }
 0x16c   :  { %2392 = vrot.lane.b32.xlu0 %v13758_v2, %s8657_s12  ;;  %1217 = vmatprep.subr.bf16.mxu1 %v1065_v63 }
 0x16d   :  { %1218 = vmatpush1.bf16.msra.mxu1 %v1064_v14  ;;  %v1862_v58 = vpop.permute.xlu1 %1861 }
 0x16e   :  { %v10130_v45 = vpop.permute.xlu0 %1859 }
 0x16f   :  { %13802 = vst [vmem:[#allocation112_spill] sm:$0xff] %v10130_v45  ;;  %921 = vrot.lane.b32.xlu1 %v10126_v22, %s8654_s26  ;;  %v1935_v17 = vsel %vm1863_vm1, %v10130_v45, %v1862_v58  ;;  %v8586_v22 = vld [vmem:[#allocation3 + $0x15c] sm:$0xff] }
 0x170   :  { %2390 = vrot.lane.b32.xlu0 %v13803_v15, %s8657_s12  ;;  %7865 = vmatprep.subr.bf16.mxu0 %v1935_v17  ;;  %v10146_v58 = vcombine.high %v8585_v57, %v8586_v22  ;;  %v13806_v22 = vld [vmem:[#allocation14_spill] sm:$0xff] }
 0x171   :  { %7866 = vmatpush3.bf16.msra.mxu0 %v1935_v17  ;;  %v10138_v26 = vpop.permute.xlu1 %995  ;;  %v8588_v57 = vld [vmem:[#allocation3 + $0x1a4] sm:$0xff] }
 0x172   :  { %v994_v53 = vpop.permute.xlu0 %993  ;;  %13804 = vst [vmem:[#allocation113_spill] sm:$0xff] %v10146_v58 }
 0x173   :  { %2414 = vrot.lane.b32.xlu1 %v13770_v29, %s8657_s12  ;;  %v1074_v63 = vsel %vm1007_vm0, %v994_v53, %v10138_v26  ;;  %v1073_v14 = vsel %vm1007_vm0, %v9936_v46, %v994_v53 }
 0x174   :  { %2412 = vrot.lane.b32.xlu0 %v13767_v50, %s8657_s12  ;;  %1219 = vmatprep.subr.bf16.mxu1 %v1074_v63 }
 0x175   :  { %1220 = vmatpush1.bf16.msra.mxu1 %v1073_v14  ;;  %v10150_v17 = vpop.permute.xlu1 %2326  ;;  %7868 = vmatmul.mubr.bf16.vlgmr.msra.gmra.mrb[0].mxu0 %v9934_v21  ;;  %v8587_v14 = vld [vmem:[#allocation3 + $0x180] sm:$0xff] }
 0x176   :  { %13805 = vst [vmem:[#allocation114_spill] sm:$0xff] %v10150_v17  ;;  %v2325_v45 = vpop.permute.xlu0 %2324  ;;  %2659 = vmatprep.mubr.bf16.mxu0 %v13707_v25 }
 0x177   :  { %941 = vrot.lane.b32.xlu1 %v10146_v58, %s8654_s26  ;;  %v2484_v46 = vsel %vm2482_vm2, %v2325_v45, %v10150_v17  ;;  %v10165_v58 = vcombine.high %v8587_v14, %v8588_v57 }
 0x178   :  { %2410 = vrot.lane.b32.xlu0 %v13806_v22, %s8657_s12  ;;  %2627 = vmatprep.subr.bf16.mxu0 %v2484_v46 }
 0x179   :  { %v858_v53 = vpop.permute.xlu1 %857  ;;  %1238 = vmatmul.mubr.bf16.vlgmr.msra.gmra.mrb[8].mxu1 %v9965_v49  ;;  %13807 = vst [vmem:[#allocation115_spill] sm:$0xff] %v10165_v58 }
 0x17a   :  { %v2323_v63 = vpop.permute.xlu0 %2322  ;;  %1247 = vmatprep.mubr.bf16.mxu1 %v13707_v25  ;;  %v1012_v14 = vsel %vm1007_vm0, %v9971_v6, %v858_v53 }
 0x17b   :  { %v2483_v21 = vsel %vm2482_vm2, %v2323_v63, %v2325_v45  ;;  %2434 = vrot.lane.b32.xlu1 %v13774_v12, %s8657_s12  ;;  %v13808_v63 = vld [vmem:[#allocation18_spill] sm:$0xff] }
 0x17c   :  { %2432 = vrot.lane.b32.xlu0 %v13776_v28, %s8657_s12  ;;  %2628 = vmatpush1.bf16.msra.mxu0 %v2483_v21  ;;  %v8589_v28 = vld [vmem:[#allocation3 + $0x1c8] sm:$0xff] }
 0x17d   :  { %v2345_v46 = vpop.permute.xlu1 %2344 }
 0x17e   :  { %v10169_v17 = vpop.permute.xlu0 %859 }
 0x17f   :  { %961 = vrot.lane.b32.xlu1 %v10165_v58, %s8654_s26  ;;  %v1013_v45 = vsel %vm1007_vm0, %v858_v53, %v10169_v17 }
 0x180   :  { %2430 = vrot.lane.b32.xlu0 %v13808_v63, %s8657_s12  ;;  %1258 = vmatprep.subr.bf16.mxu1 %v1013_v45  ;;  %v8590_v63 = vld [vmem:[#allocation3 + $0x1ec] sm:$0xff] }
 0x181   :  { %1259 = vmatpush1.bf16.msra.mxu1 %v1012_v14  ;;  %v2343_v57 = vpop.permute.xlu1 %2342  ;;  %v10187_v45 = vcombine.high %v8589_v28, %v8590_v63  ;;  %v8591_v14 = vld [vmem:[#allocation3 + $0x210] sm:$0xff] }
 0x182   :  { %v2492_v21 = vsel %vm2482_vm2, %v2343_v57, %v2345_v46  ;;  %v10180_v16 = vpop.permute.xlu0 %2346  ;;  %1248 = vmatmul.mubr.bf16.gmra.mrb[12].mxu1 %v13780_v62  ;;  %v8592_v57 = vld [vmem:[#allocation3 + $0x234] sm:$0xff] }
 0x183   :  { %13809 = vst [vmem:[#allocation116_spill] sm:$0xff] %v10180_v16  ;;  %2454 = vrot.lane.b32.xlu1 %v13786_v42, %s8657_s12  ;;  %v2493_v58 = vsel %vm2482_vm2, %v2345_v46, %v10180_v16  ;;  %13810 = vst [vmem:[#allocation117_spill] sm:$0xff] %v10187_v45  ;;  %1290 = vmatprep.mubr.bf16.mxu1 %v13707_v25 }
 0x184   :  { %2452 = vrot.lane.b32.xlu0 %v13781_v34, %s8657_s12  ;;  %2629 = vmatprep.subr.bf16.mxu0 %v2493_v58 }
 0x185   :  { %2630 = vmatpush1.bf16.msra.mxu0 %v2492_v21  ;;  %v10192_v6 = vpop.permute.xlu1 %879  ;;  %v10208_v21 = vcombine.high %v8591_v14, %v8592_v57  ;;  %v13813_v14 = vld [vmem:[#allocation69_spill] sm:$0xff]  ;;  %v13814_v57 = vld [vmem:[#allocation70_spill] sm:$0xff] }
 0x186   :  { %v878_v62 = vpop.permute.xlu0 %877 }
 0x187   :  { %981 = vrot.lane.b32.xlu1 %v10187_v45, %s8654_s26  ;;  %v1022_v53 = vsel %vm1007_vm0, %v878_v62, %v10192_v6  ;;  %v1021_v28 = vsel %vm1007_vm0, %v10001_v27, %v878_v62  ;;  %13812 = vst [vmem:[#allocation119_spill] sm:$0xff] %v10208_v21  ;;  %v13817_v45 = vld [vmem:[#allocation74_spill] sm:$0xff] }
 0x188   :  { %2450 = vrot.lane.b32.xlu0 %v13709_v18, %s8657_s12  ;;  %1260 = vmatprep.subr.bf16.mxu1 %v1022_v53 }
 0x189   :  { %1261 = vmatpush1.bf16.msra.mxu1 %v1021_v28  ;;  %v10202_v46 = vpop.permute.xlu1 %2366 }
 0x18a   :  { %13811 = vst [vmem:[#allocation118_spill] sm:$0xff] %v10202_v46  ;;  %v2365_v58 = vpop.permute.xlu0 %2364 }
 0x18b   :  { %2474 = vrot.lane.b32.xlu1 %v13790_v56, %s8657_s12  ;;  %v2502_v63 = vsel %vm2482_vm2, %v2365_v58, %v10202_v46 }
 0x18c   :  { %2472 = vrot.lane.b32.xlu0 %v13791_v55, %s8657_s12  ;;  %2631 = vmatprep.subr.bf16.mxu0 %v2502_v63 }
 0x18d   :  { %v898_v27 = vpop.permute.xlu1 %897 }
 0x18e   :  { %v2363_v62 = vpop.permute.xlu0 %2362 }
 0x18f   :  { %v2501_v53 = vsel %vm2482_vm2, %v2363_v62, %v2365_v58  ;;  %1001 = vrot.lane.b32.xlu1 %v10208_v21, %s8654_s26  ;;  %v1030_v58 = vsel %vm1007_vm0, %v10030_v33, %v898_v27  ;;  %v13816_v21 = vld [vmem:[#allocation73_spill] sm:$0xff]  ;;  %s8658_s26 = smov 118  }
 0x190   :  { %2470 = vrot.lane.b32.xlu0 %v13715_v23, %s8657_s12  ;;  %2632 = vmatpush1.bf16.msra.mxu0 %v2501_v53 }
 0x191   :  { %v2385_v28 = vpop.permute.xlu1 %2384 }
 0x192   :  { %v10217_v46 = vpop.permute.xlu0 %899 }
 0x193   :  { %2340 = vrot.lane.b32.xlu1 %v13813_v14, %s8657_s12  ;;  %v1031_v63 = vsel %vm1007_vm0, %v898_v27, %v10217_v46  ;;  %v13818_v27 = vld [vmem:[#allocation78_spill] sm:$0xff] }
 0x194   :  { %2338 = vrot.lane.b32.xlu0 %v13814_v57, %s8657_s12  ;;  %1262 = vmatprep.subr.bf16.mxu1 %v1031_v63 }
 0x195   :  { %1263 = vmatpush1.bf16.msra.mxu1 %v1030_v58  ;;  %v2383_v62 = vpop.permute.xlu1 %2382  ;;  %v13819_v58 = vld [vmem:[#allocation79_spill] sm:$0xff] }
 0x196   :  { %v2510_v53 = vsel %vm2482_vm2, %v2383_v62, %v2385_v28  ;;  %v10228_v16 = vpop.permute.xlu0 %2386  ;;  %v13821_v62 = vld [vmem:[#allocation83_spill] sm:$0xff] }
 0x197   :  { %13815 = vst [vmem:[#allocation69_spill] sm:$0xff] %v10228_v16  ;;  %2360 = vrot.lane.b32.xlu1 %v13816_v21, %s8657_s12  ;;  %v2511_v14 = vsel %vm2482_vm2, %v2385_v28, %v10228_v16  ;;  %v13841_v16 = vld [vmem:[#allocation39_spill] sm:$0xff] }
 0x198   :  { %2358 = vrot.lane.b32.xlu0 %v13817_v45, %s8657_s12  ;;  %2633 = vmatprep.subr.bf16.mxu0 %v2511_v14  ;;  %v13822_v14 = vld [vmem:[#allocation84_spill] sm:$0xff] }
 0x199   :  { %2634 = vmatpush1.bf16.msra.mxu0 %v2510_v53  ;;  %v10236_v63 = vpop.permute.xlu1 %919 }
 0x19a   :  { %v918_v33 = vpop.permute.xlu0 %917 }
 0x19b   :  { %2380 = vrot.lane.b32.xlu1 %v13818_v27, %s8657_s12  ;;  %v1040_v57 = vsel %vm1007_vm0, %v918_v33, %v10236_v63  ;;  %v1039_v21 = vsel %vm1007_vm0, %v10052_v8, %v918_v33 }
 0x19c   :  { %2378 = vrot.lane.b32.xlu0 %v13819_v58, %s8657_s12  ;;  %1264 = vmatprep.subr.bf16.mxu1 %v1040_v57  ;;  %v13823_v57 = vld [vmem:[#allocation87_spill] sm:$0xff] }
 0x19d   :  { %1265 = vmatpush1.bf16.msra.mxu1 %v1039_v21  ;;  %v10246_v45 = vpop.permute.xlu1 %2406 }
 0x19e   :  { %13820 = vst [vmem:[#allocation70_spill] sm:$0xff] %v10246_v45  ;;  %v2405_v28 = vpop.permute.xlu0 %2404 }
 0x19f   :  { %2400 = vrot.lane.b32.xlu1 %v13821_v62, %s8657_s12  ;;  %v2520_v53 = vsel %vm2482_vm2, %v2405_v28, %v10246_v45  ;;  %v13824_v62 = vld [vmem:[#allocation90_spill] sm:$0xff] }
 0x1a0   :  { %2398 = vrot.lane.b32.xlu0 %v13822_v14, %s8657_s12  ;;  %2635 = vmatprep.subr.bf16.mxu0 %v2520_v53  ;;  %v13825_v14 = vld [vmem:[#allocation91_spill] sm:$0xff] }
 0x1a1   :  { %v938_v27 = vpop.permute.xlu1 %937 }
 0x1a2   :  { %v2403_v8 = vpop.permute.xlu0 %2402 }
 0x1a3   :  { %v2519_v33 = vsel %vm2482_vm2, %v2403_v8, %v2405_v28  ;;  %2420 = vrot.lane.b32.xlu1 %v13823_v57, %s8657_s12  ;;  %v1048_v28 = vsel %vm1007_vm0, %v10076_v7, %v938_v27  ;;  %v13827_v57 = vld [vmem:[#allocation95_spill] sm:$0xff] }
 0x1a4   :  { %2418 = vrot.lane.b32.xlu0 %v9673_v43, %s8657_s12  ;;  %2636 = vmatpush1.bf16.msra.mxu0 %v2519_v33 }
 0x1a5   :  { %v2425_v21 = vpop.permute.xlu1 %2424 }
 0x1a6   :  { %v10259_v58 = vpop.permute.xlu0 %939 }
 0x1a7   :  { %2440 = vrot.lane.b32.xlu1 %v13824_v62, %s8657_s12  ;;  %v1049_v53 = vsel %vm1007_vm0, %v938_v27, %v10259_v58  ;;  %v13828_v27 = vld [vmem:[#allocation98_spill] sm:$0xff] }
 0x1a8   :  { %2438 = vrot.lane.b32.xlu0 %v13825_v14, %s8657_s12  ;;  %1266 = vmatprep.subr.bf16.mxu1 %v1049_v53 }
 0x1a9   :  { %1267 = vmatpush1.bf16.msra.mxu1 %v1048_v28  ;;  %v2423_v8 = vpop.permute.xlu1 %2422 }
 0x1aa   :  { %v2528_v43 = vsel %vm2482_vm2, %v2423_v8, %v2425_v21  ;;  %v10270_v33 = vpop.permute.xlu0 %2426 }
 0x1ab   :  { %13826 = vst [vmem:[#allocation73_spill] sm:$0xff] %v10270_v33  ;;  %2460 = vrot.lane.b32.xlu1 %v13827_v57, %s8657_s12  ;;  %v2529_v62 = vsel %vm2482_vm2, %v2425_v21, %v10270_v33  ;;  %v13839_v33 = vld [vmem:[#allocation38_spill] sm:$0xff] }
 0x1ac   :  { %2458 = vrot.lane.b32.xlu0 %v9722_v5, %s8657_s12  ;;  %2637 = vmatprep.subr.bf16.mxu0 %v2529_v62  ;;  %v13831_v62 = vld [vmem:[#allocation10_spill] sm:$0xff] }
 0x1ad   :  { %2638 = vmatpush1.bf16.msra.mxu0 %v2528_v43  ;;  %v10278_v53 = vpop.permute.xlu1 %959  ;;  %v13830_v43 = vld [vmem:[#allocation5_spill] sm:$0xff] }
 0x1ae   :  { %v958_v7 = vpop.permute.xlu0 %957 }
 0x1af   :  { %2480 = vrot.lane.b32.xlu1 %v13828_v27, %s8657_s12  ;;  %v1058_v14 = vsel %vm1007_vm0, %v958_v7, %v10278_v53  ;;  %v1057_v28 = vsel %vm1007_vm0, %v10098_v3, %v958_v7 }
 0x1b0   :  { %2478 = vrot.lane.b32.xlu0 %v9751_v60, %s8657_s12  ;;  %1268 = vmatprep.subr.bf16.mxu1 %v1058_v14 }
 0x1b1   :  { %1269 = vmatpush1.bf16.msra.mxu1 %v1057_v28  ;;  %v10288_v5 = vpop.permute.xlu1 %2446 }
 0x1b2   :  { %13829 = vst [vmem:[#allocation74_spill] sm:$0xff] %v10288_v5  ;;  %v2445_v21 = vpop.permute.xlu0 %2444 }
 0x1b3   :  { %2945 = vrot.lane.b32.xlu1 %v8996_v20, %s8658_s26  ;;  %v2538_v8 = vsel %vm2482_vm2, %v2445_v21, %v10288_v5 }
 0x1b4   :  { %2943 = vrot.lane.b32.xlu0 %v13830_v43, %s8658_s26  ;;  %2639 = vmatprep.subr.bf16.mxu0 %v2538_v8 }
 0x1b5   :  { %v978_v3 = vpop.permute.xlu1 %977 }
 0x1b6   :  { %v2443_v57 = vpop.permute.xlu0 %2442  ;;  %v1066_v28 = vsel %vm1007_vm0, %v10118_v41, %v978_v3  ;;  %v10325_v41 = vld [vmem:[%s13291_s2 + $0x30] sm:$0xff]  }
 0x1b7   :  { %v2537_v60 = vsel %vm2482_vm2, %v2443_v57, %v2445_v21  ;;  %2963 = vrot.lane.b32.xlu1 %v9074_v35, %s8658_s26 }
 0x1b8   :  { %2941 = vrot.lane.b32.xlu0 %v13831_v62, %s8658_s26  ;;  %2640 = vmatpush1.bf16.msra.mxu0 %v2537_v60 }
 0x1b9   :  { %v2465_v7 = vpop.permute.xlu1 %2464 }
 0x1ba   :  { %v10301_v27 = vpop.permute.xlu0 %979 }
 0x1bb   :  { %2961 = vrot.lane.b32.xlu1 %v9142_v32, %s8658_s26  ;;  %v1067_v14 = vsel %vm1007_vm0, %v978_v3, %v10301_v27 }
 0x1bc   :  { %2965 = vrot.lane.b32.xlu0 %v9165_v47, %s8658_s26  ;;  %1270 = vmatprep.subr.bf16.mxu1 %v1067_v14 }
 0x1bd   :  { %1271 = vmatpush1.bf16.msra.mxu1 %v1066_v28  ;;  %v2463_v21 = vpop.permute.xlu1 %2462 }
 0x1be   :  { %v2546_v8 = vsel %vm2482_vm2, %v2463_v21, %v2465_v7  ;;  %v10312_v57 = vpop.permute.xlu0 %2466 }
 0x1bf   :  { %13832 = vst [vmem:[#allocation78_spill] sm:$0xff] %v10312_v57  ;;  %2985 = vrot.lane.b32.xlu1 %v9200_v4, %s8658_s26  ;;  %v2547_v60 = vsel %vm2482_vm2, %v2465_v7, %v10312_v57 }
 0x1c0   :  { %2983 = vrot.lane.b32.xlu0 %v9211_v31, %s8658_s26  ;;  %2641 = vmatprep.subr.bf16.mxu0 %v2547_v60 }
 0x1c1   :  { %2642 = vmatpush1.bf16.msra.mxu0 %v2546_v8  ;;  %v10320_v14 = vpop.permute.xlu1 %999 }
 0x1c2   :  { %v998_v3 = vpop.permute.xlu0 %997 }
 0x1c3   :  { %3003 = vrot.lane.b32.xlu1 %v9217_v61, %s8658_s26  ;;  %v1076_v28 = vsel %vm1007_vm0, %v998_v3, %v10320_v14  ;;  %v1075_v7 = vsel %vm1007_vm0, %v10138_v26, %v998_v3  ;;  %v10349_v3 = vld [vmem:[%s13291_s2 + $0x38] sm:$0xff]  }
 0x1c4   :  { %2981 = vrot.lane.b32.xlu0 %v9223_v59, %s8658_s26  ;;  %1272 = vmatprep.subr.bf16.mxu1 %v1076_v28 }
 0x1c5   :  { %1273 = vmatpush1.bf16.msra.mxu1 %v1075_v7  ;;  %v10335_v21 = vpop.permute.xlu1 %2334  ;;  %2660 = vmatmul.mubr.bf16.vlgmr.msra.gmra.mrb[4].mxu0 %v10325_v41  ;;  %v13835_v7 = vld [vmem:[#allocation56_spill] sm:$0xff] }
 0x1c6   :  { %13833 = vst [vmem:[#allocation79_spill] sm:$0xff] %v10335_v21  ;;  %v2333_v8 = vpop.permute.xlu0 %2332  ;;  %2669 = vmatprep.mubr.bf16.mxu0 %v13707_v25 }
 0x1c7   :  { %3001 = vrot.lane.b32.xlu1 %v9229_v48, %s8658_s26  ;;  %v2488_v60 = vsel %vm2482_vm2, %v2333_v8, %v10335_v21 }
 0x1c8   :  { %3005 = vrot.lane.b32.xlu0 %v9235_v39, %s8658_s26  ;;  %2733 = vmatprep.subr.bf16.mxu0 %v2488_v60 }
 0x1c9   :  { %v862_v26 = vpop.permute.xlu1 %861  ;;  %1291 = vmatmul.mubr.bf16.vlgmr.msra.gmra.mrb[16].mxu1 %v9965_v49 }
 0x1ca   :  { %v10351_v28 = vpop.permute.xlu0 %2330  ;;  %v1015_v57 = vsel %vm1007_vm0, %v862_v26, %v13835_v7  ;;  %v1014_v21 = vsel %vm1007_vm0, %v10169_v17, %v862_v26  ;;  %1300 = vmatprep.mubr.bf16.mxu1 %v13707_v25  ;;  %v13838_v26 = vld [vmem:[#allocation55_spill] sm:$0xff] }
 0x1cb   :  { %13834 = vst [vmem:[#allocation83_spill] sm:$0xff] %v10351_v28  ;;  %3025 = vrot.lane.b32.xlu1 %v13763_v37, %s8658_s26  ;;  %1311 = vmatprep.subr.bf16.mxu1 %v1015_v57  ;;  %v2487_v60 = vsel %vm2482_vm2, %v10351_v28, %v2333_v8  ;;  %v13845_v28 = vld [vmem:[#allocation43_spill] sm:$0xff] }
 0x1cc   :  { %3023 = vrot.lane.b32.xlu0 %v13764_v44, %s8658_s26  ;;  %2734 = vmatpush1.bf16.msra.mxu0 %v2487_v60 }
 0x1cd   :  { %1312 = vmatpush1.bf16.msra.mxu1 %v1014_v21  ;;  %v10364_v5 = vpop.permute.xlu1 %2354  ;;  %2670 = vmatmul.mubr.bf16.gmra.mrb[8].mxu0 %v10349_v3  ;;  %v10377_v21 = vld [vmem:[%s13291_s2 + $0x18] sm:$0xff]  }
 0x1ce   :  { %13836 = vst [vmem:[#allocation84_spill] sm:$0xff] %v10364_v5  ;;  %v2353_v7 = vpop.permute.xlu0 %2352  ;;  %2765 = vmatprep.mubr.bf16.mxu0 %v13707_v25 }
 0x1cf   :  { %3043 = vrot.lane.b32.xlu1 %v13769_v40, %s8658_s26  ;;  %v2497_v17 = vsel %vm2482_vm2, %v2353_v7, %v10364_v5 }
 0x1d0   :  { %3021 = vrot.lane.b32.xlu0 %v13768_v38, %s8658_s26  ;;  %2735 = vmatprep.subr.bf16.mxu0 %v2497_v17 }
 0x1d1   :  { %v882_v57 = vpop.permute.xlu1 %881  ;;  %1301 = vmatmul.mubr.bf16.gmra.mrb[20].mxu1 %v10377_v21 }
 0x1d2   :  { %v10380_v8 = vpop.permute.xlu0 %2350  ;;  %v1024_v60 = vsel %vm1007_vm0, %v882_v57, %v13838_v26  ;;  %v1023_v5 = vsel %vm1007_vm0, %v10192_v6, %v882_v57  ;;  %1343 = vmatprep.mubr.bf16.mxu1 %v13707_v25  ;;  %v13842_v57 = vld [vmem:[#allocation40_spill] sm:$0xff] }
 0x1d3   :  { %13837 = vst [vmem:[#allocation87_spill] sm:$0xff] %v10380_v8  ;;  %3041 = vrot.lane.b32.xlu1 %v13772_v52, %s8658_s26  ;;  %1313 = vmatprep.subr.bf16.mxu1 %v1024_v60  ;;  %v2496_v17 = vsel %vm2482_vm2, %v10380_v8, %v2353_v7  ;;  %v13844_v8 = vld [vmem:[#allocation57_spill] sm:$0xff] }
 0x1d4   :  { %3045 = vrot.lane.b32.xlu0 %v13839_v33, %s8658_s26  ;;  %2736 = vmatpush1.bf16.msra.mxu0 %v2496_v17 }
 0x1d5   :  { %1314 = vmatpush1.bf16.msra.mxu1 %v1023_v5  ;;  %v10393_v45 = vpop.permute.xlu1 %2374 }
 0x1d6   :  { %13840 = vst [vmem:[#allocation90_spill] sm:$0xff] %v10393_v45  ;;  %v2373_v26 = vpop.permute.xlu0 %2372 }
 0x1d7   :  { %3065 = vrot.lane.b32.xlu1 %v13841_v16, %s8658_s26  ;;  %v2506_v6 = vsel %vm2482_vm2, %v2373_v26, %v10393_v45 }
 0x1d8   :  { %3063 = vrot.lane.b32.xlu0 %v13842_v57, %s8658_s26  ;;  %2737 = vmatprep.subr.bf16.mxu0 %v2506_v6 }
 0x1d9   :  { %v902_v60 = vpop.permute.xlu1 %901 }
 0x1da   :  { %v10401_v7 = vpop.permute.xlu0 %2370  ;;  %v1033_v17 = vsel %vm1007_vm0, %v902_v60, %v13844_v8  ;;  %v1032_v5 = vsel %vm1007_vm0, %v10217_v46, %v902_v60  ;;  %v13847_v8 = vld [vmem:[#allocation45_spill] sm:$0xff] }
 0x1db   :  { %13843 = vst [vmem:[#allocation91_spill] sm:$0xff] %v10401_v7  ;;  %3083 = vrot.lane.b32.xlu1 %v13785_v54, %s8658_s26  ;;  %1315 = vmatprep.subr.bf16.mxu1 %v1033_v17  ;;  %v2505_v45 = vsel %vm2482_vm2, %v10401_v7, %v2373_v26  ;;  %v13849_v17 = vld [vmem:[#allocation59_spill] sm:$0xff] }
 0x1dc   :  { %3061 = vrot.lane.b32.xlu0 %v13845_v28, %s8658_s26  ;;  %2738 = vmatpush1.bf16.msra.mxu0 %v2505_v45 }
 0x1dd   :  { %1316 = vmatpush1.bf16.msra.mxu1 %v1032_v5  ;;  %v10413_v6 = vpop.permute.xlu1 %2394 }
 0x1de   :  { %13846 = vst [vmem:[#allocation95_spill] sm:$0xff] %v10413_v6  ;;  %v2393_v57 = vpop.permute.xlu0 %2392 }
 0x1df   :  { %3081 = vrot.lane.b32.xlu1 %v13787_v19, %s8658_s26  ;;  %v2515_v46 = vsel %vm2482_vm2, %v2393_v57, %v10413_v6 }
 0x1e0   :  { %3085 = vrot.lane.b32.xlu0 %v13847_v8, %s8658_s26  ;;  %2739 = vmatprep.subr.bf16.mxu0 %v2515_v46 }
 0x1e1   :  { %v922_v60 = vpop.permute.xlu1 %921 }
 0x1e2   :  { %v10421_v26 = vpop.permute.xlu0 %2390  ;;  %v1042_v45 = vsel %vm1007_vm0, %v922_v60, %v13849_v17  ;;  %v1041_v5 = vsel %vm1007_vm0, %v10236_v63, %v922_v60  ;;  %v13851_v17 = vld [vmem:[#allocation31_spill] sm:$0xff] }
 0x1e3   :  { %13848 = vst [vmem:[#allocation98_spill] sm:$0xff] %v10421_v26  ;;  %2953 = vrot.lane.b32.xlu1 %v9332_v9, %s8658_s26  ;;  %1317 = vmatprep.subr.bf16.mxu1 %v1042_v45  ;;  %v2514_v6 = vsel %vm2482_vm2, %v10421_v26, %v2393_v57  ;;  %v13853_v45 = vld [vmem:[#allocation60_spill] sm:$0xff] }
 0x1e4   :  { %2951 = vrot.lane.b32.xlu0 %v9338_v10, %s8658_s26  ;;  %2740 = vmatpush1.bf16.msra.mxu0 %v2514_v6 }
 0x1e5   :  { %1318 = vmatpush1.bf16.msra.mxu1 %v1041_v5  ;;  %v10433_v46 = vpop.permute.xlu1 %2414 }
 0x1e6   :  { %13850 = vst [vmem:[#allocation10_spill] sm:$0xff] %v10433_v46  ;;  %v2413_v7 = vpop.permute.xlu0 %2412 }
 0x1e7   :  { %1709 = vrot.lane.b32.xlu1 %v13851_v17, %s8655_s15  ;;  %v2524_v63 = vsel %vm2482_vm2, %v2413_v7, %v10433_v46 }
 0x1e8   :  { %2949 = vrot.lane.b32.xlu0 %v13794_v51, %s8658_s26  ;;  %2741 = vmatprep.subr.bf16.mxu0 %v2524_v63 }
 0x1e9   :  { %v942_v60 = vpop.permute.xlu1 %941 }
 0x1ea   :  { %v10441_v57 = vpop.permute.xlu0 %2410  ;;  %v1051_v6 = vsel %vm1007_vm0, %v942_v60, %v13853_v45  ;;  %v1050_v5 = vsel %vm1007_vm0, %v10259_v58, %v942_v60  ;;  %v13855_v45 = vld [vmem:[#allocation36_spill] sm:$0xff] }
 0x1eb   :  { %13852 = vst [vmem:[#allocation56_spill] sm:$0xff] %v10441_v57  ;;  %2973 = vrot.lane.b32.xlu1 %v9360_v11, %s8658_s26  ;;  %1319 = vmatprep.subr.bf16.mxu1 %v1051_v6  ;;  %v2523_v46 = vsel %vm2482_vm2, %v10441_v57, %v2413_v7  ;;  %v13857_v6 = vld [vmem:[#allocation61_spill] sm:$0xff] }
 0x1ec   :  { %2971 = vrot.lane.b32.xlu0 %v9366_v0, %s8658_s26  ;;  %2742 = vmatpush1.bf16.msra.mxu0 %v2523_v46 }
 0x1ed   :  { %1320 = vmatpush1.bf16.msra.mxu1 %v1050_v5  ;;  %v10453_v63 = vpop.permute.xlu1 %2434 }
 0x1ee   :  { %13854 = vst [vmem:[#allocation55_spill] sm:$0xff] %v10453_v63  ;;  %v2433_v26 = vpop.permute.xlu0 %2432 }
 0x1ef   :  { %1729 = vrot.lane.b32.xlu1 %v13855_v45, %s8655_s15  ;;  %v2533_v58 = vsel %vm2482_vm2, %v2433_v26, %v10453_v63 }
 0x1f0   :  { %2969 = vrot.lane.b32.xlu0 %v13797_v24, %s8658_s26  ;;  %2743 = vmatprep.subr.bf16.mxu0 %v2533_v58 }
 0x1f1   :  { %v962_v60 = vpop.permute.xlu1 %961 }
 0x1f2   :  { %v10461_v7 = vpop.permute.xlu0 %2430  ;;  %v1060_v46 = vsel %vm1007_vm0, %v962_v60, %v13857_v6  ;;  %v1059_v5 = vsel %vm1007_vm0, %v10278_v53, %v962_v60  ;;  %v13859_v6 = vld [vmem:[#allocation41_spill] sm:$0xff] }
 0x1f3   :  { %13856 = vst [vmem:[#allocation57_spill] sm:$0xff] %v10461_v7  ;;  %2993 = vrot.lane.b32.xlu1 %v9380_v1, %s8658_s26  ;;  %1321 = vmatprep.subr.bf16.mxu1 %v1060_v46  ;;  %v2532_v63 = vsel %vm2482_vm2, %v10461_v7, %v2433_v26  ;;  %v13861_v46 = vld [vmem:[#allocation62_spill] sm:$0xff] }
 0x1f4   :  { %2991 = vrot.lane.b32.xlu0 %v9076_v36, %s8658_s26  ;;  %2744 = vmatpush1.bf16.msra.mxu0 %v2532_v63 }
 0x1f5   :  { %1322 = vmatpush1.bf16.msra.mxu1 %v1059_v5  ;;  %v10473_v58 = vpop.permute.xlu1 %2454 }
 0x1f6   :  { %13858 = vst [vmem:[#allocation59_spill] sm:$0xff] %v10473_v58  ;;  %v2453_v57 = vpop.permute.xlu0 %2452 }
 0x1f7   :  { %1749 = vrot.lane.b32.xlu1 %v13859_v6, %s8655_s15  ;;  %v2542_v53 = vsel %vm2482_vm2, %v2453_v57, %v10473_v58 }
 0x1f8   :  { %2989 = vrot.lane.b32.xlu0 %v13800_v30, %s8658_s26  ;;  %2745 = vmatprep.subr.bf16.mxu0 %v2542_v53 }
 0x1f9   :  { %v982_v60 = vpop.permute.xlu1 %981 }
 0x1fa   :  { %v10481_v26 = vpop.permute.xlu0 %2450  ;;  %v1069_v63 = vsel %vm1007_vm0, %v982_v60, %v13861_v46  ;;  %v1068_v5 = vsel %vm1007_vm0, %v10301_v27, %v982_v60  ;;  %v13863_v46 = vld [vmem:[#allocation46_spill] sm:$0xff] }
 0x1fb   :  { %13860 = vst [vmem:[#allocation31_spill] sm:$0xff] %v10481_v26  ;;  %3013 = vrot.lane.b32.xlu1 %v13757_v13, %s8658_s26  ;;  %1323 = vmatprep.subr.bf16.mxu1 %v1069_v63  ;;  %v2541_v58 = vsel %vm2482_vm2, %v10481_v26, %v2453_v57  ;;  %v13865_v63 = vld [vmem:[#allocation63_spill] sm:$0xff] }
 0x1fc   :  { %3011 = vrot.lane.b32.xlu0 %v13758_v2, %s8658_s26  ;;  %2746 = vmatpush1.bf16.msra.mxu0 %v2541_v58 }
 0x1fd   :  { %1324 = vmatpush1.bf16.msra.mxu1 %v1068_v5  ;;  %v10493_v53 = vpop.permute.xlu1 %2474 }
 0x1fe   :  { %13862 = vst [vmem:[#allocation60_spill] sm:$0xff] %v10493_v53  ;;  %v2473_v7 = vpop.permute.xlu0 %2472 }
 0x1ff   :  { %1769 = vrot.lane.b32.xlu1 %v13863_v46, %s8655_s15  ;;  %v2551_v27 = vsel %vm2482_vm2, %v2473_v7, %v10493_v53 }
 0x200   :  { %3009 = vrot.lane.b32.xlu0 %v13803_v15, %s8658_s26  ;;  %2747 = vmatprep.subr.bf16.mxu0 %v2551_v27  ;;  %v10688_v15 = vld [vmem:[#allocation3 + $0x140] ss:$36 sps:$4 sm:$0xff]  }
 0x201   :  { %v1002_v60 = vpop.permute.xlu1 %1001 }
 0x202   :  { %v10501_v57 = vpop.permute.xlu0 %2470  ;;  %v1078_v58 = vsel %vm1007_vm0, %v1002_v60, %v13865_v63  ;;  %v1077_v5 = vsel %vm1007_vm0, %v10320_v14, %v1002_v60  ;;  %v13867_v63 = vld [vmem:[#allocation50_spill] sm:$0xff] }
 0x203   :  { %13864 = vst [vmem:[#allocation36_spill] sm:$0xff] %v10501_v57  ;;  %3033 = vrot.lane.b32.xlu1 %v13770_v29, %s8658_s26  ;;  %1325 = vmatprep.subr.bf16.mxu1 %v1078_v58  ;;  %v2550_v53 = vsel %vm2482_vm2, %v10501_v57, %v2473_v7  ;;  %v13869_v58 = vld [vmem:[#allocation17_spill] sm:$0xff] }
 0x204   :  { %3031 = vrot.lane.b32.xlu0 %v13767_v50, %s8658_s26  ;;  %2748 = vmatpush1.bf16.msra.mxu0 %v2550_v53  ;;  %v10681_v50 = vld [vmem:[#allocation4 + $0x20] sm:$0xff]  }
 0x205   :  { %1326 = vmatpush1.bf16.msra.mxu1 %v1077_v5  ;;  %v2341_v27 = vpop.permute.xlu1 %2340  ;;  %13897 = vst [vmem:[#allocation126_spill] sm:$0xff] %v10681_v50 }
 0x206   :  { %v10513_v26 = vpop.permute.xlu0 %2338  ;;  %1478 = vmatprep.subr.bf16.mxu1 %v13851_v17 }
 0x207   :  { %13866 = vst [vmem:[#allocation61_spill] sm:$0xff] %v10513_v26  ;;  %1789 = vrot.lane.b32.xlu1 %v13867_v63, %s8655_s15  ;;  %v2491_v14 = vsel %vm2482_vm2, %v10513_v26, %v2341_v27  ;;  %2766 = vmatmul.mubr.bf16.vlgmr.msra.gmra.mrb[12].mxu0 %v10325_v41  ;;  %v13871_v27 = vld [vmem:[#allocation92_spill] sm:$0xff] }
 0x208   :  { %3029 = vrot.lane.b32.xlu0 %v13806_v22, %s8658_s26  ;;  %7871 = vmatprep.subr.bf16.mxu0 %v2491_v14 }
 0x209   :  { %7872 = vmatpush3.bf16.msra.mxu0 %v2491_v14  ;;  %v2361_v7 = vpop.permute.xlu1 %2360  ;;  %1344 = vmatmul.mubr.bf16.vlgmr.msra.gmra.mrb[24].mxu1 %v9965_v49 }
 0x20a   :  { %v10524_v53 = vpop.permute.xlu0 %2358  ;;  %1479 = vmatpush1.bf16.msra.mxu1 %v8996_v20  ;;  %2775 = vmatprep.mubr.bf16.mxu0 %v13707_v25 }
 0x20b   :  { %13868 = vst [vmem:[#allocation41_spill] sm:$0xff] %v10524_v53  ;;  %3053 = vrot.lane.b32.xlu1 %v13774_v12, %s8658_s26  ;;  %v2500_v60 = vsel %vm2482_vm2, %v10524_v53, %v2361_v7  ;;  %1480 = vmatprep.subr.bf16.mxu1 %v13855_v45  ;;  %v13872_v7 = vld [vmem:[#allocation18_spill] sm:$0xff] }
 0x20c   :  { %3051 = vrot.lane.b32.xlu0 %v13869_v58, %s8658_s26  ;;  %7873 = vmatprep.subr.bf16.mxu0 %v2500_v60  ;;  %v13894_v58 = vld [vmem:[#allocation113_spill] sm:$0xff] }
 0x20d   :  { %7874 = vmatpush3.bf16.msra.mxu0 %v2500_v60  ;;  %v2381_v49 = vpop.permute.xlu1 %2380  ;;  %1353 = vmatprep.mubr.bf16.mxu1 %v13707_v25 }
 0x20e   :  { %v10536_v5 = vpop.permute.xlu0 %2378  ;;  %1481 = vmatpush1.bf16.msra.mxu1 %v9165_v47 }
 0x20f   :  { %13870 = vst [vmem:[#allocation62_spill] sm:$0xff] %v10536_v5  ;;  %1809 = vrot.lane.b32.xlu1 %v13871_v27, %s8655_s15  ;;  %v2509_v14 = vsel %vm2482_vm2, %v10536_v5, %v2381_v49  ;;  %1482 = vmatprep.subr.bf16.mxu1 %v13859_v6  ;;  %v13875_v5 = vld [vmem:[#allocation96_spill] sm:$0xff] }
 0x210   :  { %3049 = vrot.lane.b32.xlu0 %v13872_v7, %s8658_s26  ;;  %7875 = vmatprep.subr.bf16.mxu0 %v2509_v14 }
 0x211   :  { %7876 = vmatpush3.bf16.msra.mxu0 %v2509_v14  ;;  %v2401_v60 = vpop.permute.xlu1 %2400  ;;  %1354 = vmatmul.mubr.bf16.gmra.mrb[28].mxu1 %v10377_v21 }
 0x212   :  { %v10547_v53 = vpop.permute.xlu0 %2398  ;;  %2776 = vmatmul.mubr.bf16.gmra.mrb[16].mxu0 %v10349_v3  ;;  %1483 = vmatpush1.bf16.msra.mxu1 %v9200_v4 }
 0x213   :  { %13873 = vst [vmem:[#allocation46_spill] sm:$0xff] %v10547_v53  ;;  %3073 = vrot.lane.b32.xlu1 %v13786_v42, %s8658_s26  ;;  %v2518_v49 = vsel %vm2482_vm2, %v10547_v53, %v2401_v60  ;;  %1484 = vmatprep.subr.bf16.mxu1 %v13863_v46 }
 0x214   :  { %3071 = vrot.lane.b32.xlu0 %v13781_v34, %s8658_s26  ;;  %7877 = vmatprep.subr.bf16.mxu0 %v2518_v49  ;;  %v13889_v34 = vld [vmem:[#allocation6_spill] sm:$0xff] }
 0x215   :  { %7878 = vmatpush3.bf16.msra.mxu0 %v2518_v49  ;;  %v2421_v21 = vpop.permute.xlu1 %2420  ;;  %7887 = vmatprep.mubr.bf16.mxu0 %v10325_v41 }
 0x216   :  { %v10559_v14 = vpop.permute.xlu0 %2418  ;;  %1485 = vmatpush1.bf16.msra.mxu1 %v9235_v39  ;;  %1510 = vmatprep.mubr.bf16.mxu1 %v13707_v25 }
 0x217   :  { %13874 = vst [vmem:[#allocation63_spill] sm:$0xff] %v10559_v14  ;;  %1829 = vrot.lane.b32.xlu1 %v13875_v5, %s8655_s15  ;;  %v2527_v60 = vsel %vm2482_vm2, %v10559_v14, %v2421_v21  ;;  %1486 = vmatprep.subr.bf16.mxu1 %v13867_v63  ;;  %v13878_v14 = vld [vmem:[#allocation99_spill] sm:$0xff] }
 0x218   :  { %3069 = vrot.lane.b32.xlu0 %v13709_v18, %s8658_s26  ;;  %7879 = vmatprep.subr.bf16.mxu0 %v2527_v60 }
 0x219   :  { %7880 = vmatpush3.bf16.msra.mxu0 %v2527_v60  ;;  %v2441_v41 = vpop.permute.xlu1 %2440 }
 0x21a   :  { %v10570_v49 = vpop.permute.xlu0 %2438  ;;  %1487 = vmatpush1.bf16.msra.mxu1 %v13763_v37 }
 0x21b   :  { %13876 = vst [vmem:[#allocation50_spill] sm:$0xff] %v10570_v49  ;;  %3093 = vrot.lane.b32.xlu1 %v13790_v56, %s8658_s26  ;;  %v2536_v53 = vsel %vm2482_vm2, %v10570_v49, %v2441_v41  ;;  %1488 = vmatprep.subr.bf16.mxu1 %v13871_v27  ;;  %v10593_v49 = vld [vmem:[#allocation4] sm:$0xff]  }
 0x21c   :  { %3091 = vrot.lane.b32.xlu0 %v13791_v55, %s8658_s26  ;;  %7881 = vmatprep.subr.bf16.mxu0 %v2536_v53  ;;  %13880 = vst [vmem:[#allocation99_spill] sm:$0xff] %v10593_v49 }
 0x21d   :  { %7882 = vmatpush3.bf16.msra.mxu0 %v2536_v53  ;;  %v2461_v21 = vpop.permute.xlu1 %2460 }
 0x21e   :  { %v10580_v60 = vpop.permute.xlu0 %2458  ;;  %1489 = vmatpush1.bf16.msra.mxu1 %v13839_v33 }
 0x21f   :  { %13877 = vst [vmem:[#allocation92_spill] sm:$0xff] %v10580_v60  ;;  %1849 = vrot.lane.b32.xlu1 %v13878_v14, %s8655_s15  ;;  %v2545_v26 = vsel %vm2482_vm2, %v10580_v60, %v2461_v21  ;;  %1490 = vmatprep.subr.bf16.mxu1 %v13875_v5  ;;  %v10600_v60 = vld [vmem:[#allocation3 + $0x20] ss:$36 sps:$4 sm:$0xff]  }
 0x220   :  { %3089 = vrot.lane.b32.xlu0 %v13715_v23, %s8658_s26  ;;  %7883 = vmatprep.subr.bf16.mxu0 %v2545_v26  ;;  %13881 = vst [vmem:[#allocation120_spill] sm:$0xff] %v10600_v60  ;;  %v10607_v23 = vld [vmem:[#allocation3 + $0x68] ss:$36 sps:$4 sm:$0xff]  }
 0x221   :  { %7884 = vmatpush3.bf16.msra.mxu0 %v2545_v26  ;;  %v2481_v41 = vpop.permute.xlu1 %2480  ;;  %13883 = vst [vmem:[#allocation122_spill] sm:$0xff] %v10607_v23 }
 0x222   :  { %v10590_v53 = vpop.permute.xlu0 %2478  ;;  %1491 = vmatpush1.bf16.msra.mxu1 %v13841_v16 }
 0x223   :  { %13879 = vst [vmem:[#allocation96_spill] sm:$0xff] %v10590_v53  ;;  %2959 = vrot.lane.b32.xlu1 %v10593_v49, %s8658_s26  ;;  %v2554_v21 = vsel %vm2482_vm2, %v10590_v53, %v2481_v41  ;;  %1492 = vmatprep.subr.bf16.mxu1 %v13878_v14  ;;  %v13884_v53 = vld [vmem:[#allocation107_spill] sm:$0xff]  ;;  %v13885_v49 = vld [vmem:[#allocation109_spill] sm:$0xff] }
 0x224   :  { %2957 = vrot.lane.b32.xlu0 %v10600_v60, %s8658_s26  ;;  %7885 = vmatprep.subr.bf16.mxu0 %v2554_v21  ;;  %v10620_v60 = vld [vmem:[%s13291_s2] sm:$0xff]  }
 0x225   :  { %7886 = vmatpush3.bf16.msra.mxu0 %v2554_v21  ;;  %v10604_v26 = vpop.permute.xlu1 %2945 }
 0x226   :  { %13882 = vst [vmem:[#allocation121_spill] sm:$0xff] %v10604_v26  ;;  %v2944_v57 = vpop.permute.xlu0 %2943  ;;  %1493 = vmatpush1.bf16.msra.mxu1 %v13847_v8 }
 0x227   :  { %2977 = vrot.lane.b32.xlu1 %v10607_v23, %s8658_s26  ;;  %v3103_v41 = vsel %vm3101_vm3, %v2944_v57, %v10604_v26  ;;  %1584 = vmatprep.subr.bf16.mxu1 %v13884_v53 }
 0x228   :  { %1717 = vrot.lane.b32.xlu0 %v13884_v53, %s8655_s15  ;;  %3246 = vmatprep.subr.bf16.mxu0 %v3103_v41 }
 0x229   :  { %v2964_v21 = vpop.permute.xlu1 %2963  ;;  %7888 = vmatmul.mubr.bf16.vlgmr.msra.gmra.mrb[0].mxu0 %v10349_v3  ;;  %1511 = vmatmul.mubr.bf16.vlgmr.msra.gmra.mrb[8].mxu1 %v10620_v60  ;;  %v10629_v3 = vld [vmem:[#allocation4 + $0x8] sm:$0xff]  }
 0x22a   :  { %v2942_v23 = vpop.permute.xlu0 %2941  ;;  %1585 = vmatpush1.bf16.msra.mxu1 %v9332_v9  ;;  %1520 = vmatprep.mubr.bf16.mxu1 %v13707_v25  ;;  %13886 = vst [vmem:[#allocation107_spill] sm:$0xff] %v10629_v3 }
 0x22b   :  { %v3102_v26 = vsel %vm3101_vm3, %v2942_v23, %v2944_v57  ;;  %1737 = vrot.lane.b32.xlu1 %v13885_v49, %s8655_s15  ;;  %1586 = vmatprep.subr.bf16.mxu1 %v13885_v49  ;;  %v10638_v23 = vld [vmem:[#allocation4 + $0x10] sm:$0xff]  }
 0x22c   :  { %2979 = vrot.lane.b32.xlu0 %v10629_v3, %s8658_s26  ;;  %3247 = vmatpush1.bf16.msra.mxu0 %v3102_v26  ;;  %13888 = vst [vmem:[#allocation123_spill] sm:$0xff] %v10638_v23  ;;  %v10645_v26 = vld [vmem:[#allocation3 + $0xb0] ss:$36 sps:$4 sm:$0xff]   ;;  %v10654_v3 = vld [vmem:[%s13291_s2 + $0x8] sm:$0xff]  }
 0x22d   :  { %v2962_v41 = vpop.permute.xlu1 %2961  ;;  %3278 = vmatprep.mubr.bf16.mxu0 %v13707_v25  ;;  %13890 = vst [vmem:[#allocation6_spill] sm:$0xff] %v10645_v26 }
 0x22e   :  { %v3111_v55 = vsel %vm3101_vm3, %v2962_v41, %v2964_v21  ;;  %v10635_v18 = vpop.permute.xlu0 %2965  ;;  %1587 = vmatpush1.bf16.msra.mxu1 %v9360_v11 }
 0x22f   :  { %13887 = vst [vmem:[#allocation109_spill] sm:$0xff] %v10635_v18  ;;  %2999 = vrot.lane.b32.xlu1 %v10638_v23, %s8658_s26  ;;  %v3112_v57 = vsel %vm3101_vm3, %v2964_v21, %v10635_v18  ;;  %1588 = vmatprep.subr.bf16.mxu1 %v13889_v34  ;;  %v10659_v21 = vld [vmem:[#allocation3 + $0xf8] ss:$36 sps:$4 sm:$0xff]  }
 0x230   :  { %2997 = vrot.lane.b32.xlu0 %v10645_v26, %s8658_s26  ;;  %3248 = vmatprep.subr.bf16.mxu0 %v3112_v57  ;;  %13892 = vst [vmem:[#allocation125_spill] sm:$0xff] %v10659_v21  ;;  %v13893_v57 = vld [vmem:[#allocation9_spill] sm:$0xff] }
 0x231   :  { %3249 = vmatpush1.bf16.msra.mxu0 %v3111_v55  ;;  %v10649_v41 = vpop.permute.xlu1 %2985  ;;  %1521 = vmatmul.mubr.bf16.gmra.mrb[12].mxu1 %v10654_v3 }
 0x232   :  { %13891 = vst [vmem:[#allocation124_spill] sm:$0xff] %v10649_v41  ;;  %v2984_v23 = vpop.permute.xlu0 %2983  ;;  %1589 = vmatpush1.bf16.msra.mxu1 %v9380_v1  ;;  %1616 = vmatprep.mubr.bf16.mxu1 %v13707_v25 }
 0x233   :  { %3017 = vrot.lane.b32.xlu1 %v10659_v21, %s8658_s26  ;;  %v3121_v55 = vsel %vm3101_vm3, %v2984_v23, %v10649_v41  ;;  %1590 = vmatprep.subr.bf16.mxu1 %v13893_v57  ;;  %v10673_v21 = vld [vmem:[#allocation4 + $0x18] sm:$0xff]  }
 0x234   :  { %1757 = vrot.lane.b32.xlu0 %v13889_v34, %s8655_s15  ;;  %3250 = vmatprep.subr.bf16.mxu0 %v3121_v55  ;;  %13895 = vst [vmem:[#allocation9_spill] sm:$0xff] %v10673_v21 }
 0x235   :  { %v3004_v18 = vpop.permute.xlu1 %3003 }
 0x236   :  { %v2982_v26 = vpop.permute.xlu0 %2981  ;;  %1591 = vmatpush1.bf16.msra.mxu1 %v13757_v13 }
 0x237   :  { %v3120_v7 = vsel %vm3101_vm3, %v2982_v26, %v2984_v23  ;;  %1777 = vrot.lane.b32.xlu1 %v13893_v57, %s8655_s15  ;;  %1592 = vmatprep.subr.bf16.mxu1 %v13894_v58  ;;  %v13898_v26 = vld [vmem:[#allocation115_spill] sm:$0xff] }
 0x238   :  { %3019 = vrot.lane.b32.xlu0 %v10673_v21, %s8658_s26  ;;  %3251 = vmatpush1.bf16.msra.mxu0 %v3120_v7  ;;  %13899 = vst [vmem:[#allocation115_spill] sm:$0xff] %v10688_v15  ;;  %v10695_v21 = vld [vmem:[#allocation3 + $0x188] ss:$36 sps:$4 sm:$0xff]  }
 0x239   :  { %v3002_v41 = vpop.permute.xlu1 %3001  ;;  %13901 = vst [vmem:[#allocation128_spill] sm:$0xff] %v10695_v21 }
 0x23a   :  { %v3129_v55 = vsel %vm3101_vm3, %v3002_v41, %v3004_v18  ;;  %v10678_v22 = vpop.permute.xlu0 %3005  ;;  %1593 = vmatpush1.bf16.msra.mxu1 %v13770_v29 }
 0x23b   :  { %13896 = vst [vmem:[#allocation113_spill] sm:$0xff] %v10678_v22  ;;  %3039 = vrot.lane.b32.xlu1 %v10681_v50, %s8658_s26  ;;  %v3130_v23 = vsel %vm3101_vm3, %v3004_v18, %v10678_v22  ;;  %1594 = vmatprep.subr.bf16.mxu1 %v13898_v26  ;;  %v13902_v22 = vld [vmem:[#allocation117_spill] sm:$0xff]  ;;  %v13903_v50 = vld [vmem:[#allocation119_spill] sm:$0xff] }
 0x23c   :  { %3037 = vrot.lane.b32.xlu0 %v10688_v15, %s8658_s26  ;;  %3252 = vmatprep.subr.bf16.mxu0 %v3130_v23 }
 0x23d   :  { %3253 = vmatpush1.bf16.msra.mxu0 %v3129_v55  ;;  %v10692_v7 = vpop.permute.xlu1 %3025 }
 0x23e   :  { %13900 = vst [vmem:[#allocation127_spill] sm:$0xff] %v10692_v7  ;;  %v3024_v41 = vpop.permute.xlu0 %3023  ;;  %1595 = vmatpush1.bf16.msra.mxu1 %v13774_v12 }
 0x23f   :  { %3057 = vrot.lane.b32.xlu1 %v10695_v21, %s8658_s26  ;;  %v3139_v18 = vsel %vm3101_vm3, %v3024_v41, %v10692_v7  ;;  %1596 = vmatprep.subr.bf16.mxu1 %v13902_v22  ;;  %v10709_v21 = vld [vmem:[#allocation4 + $0x28] sm:$0xff]  }
 0x240   :  { %1797 = vrot.lane.b32.xlu0 %v13894_v58, %s8655_s15  ;;  %3254 = vmatprep.subr.bf16.mxu0 %v3139_v18  ;;  %13904 = vst [vmem:[#allocation117_spill] sm:$0xff] %v10709_v21 }
 0x241   :  { %v3044_v55 = vpop.permute.xlu1 %3043 }
 0x242   :  { %v3022_v23 = vpop.permute.xlu0 %3021  ;;  %1597 = vmatpush1.bf16.msra.mxu1 %v13786_v42  ;;  %v10717_v42 = vld [vmem:[#allocation4 + $0x30] sm:$0xff]  }
 0x243   :  { %v3138_v15 = vsel %vm3101_vm3, %v3022_v23, %v3024_v41  ;;  %1817 = vrot.lane.b32.xlu1 %v13898_v26, %s8655_s15  ;;  %1598 = vmatprep.subr.bf16.mxu1 %v13903_v50  ;;  %v10723_v23 = vld [vmem:[#allocation3 + $0x1d0] ss:$36 sps:$4 sm:$0xff]  }
 0x244   :  { %3059 = vrot.lane.b32.xlu0 %v10709_v21, %s8658_s26  ;;  %3255 = vmatpush1.bf16.msra.mxu0 %v3138_v15  ;;  %13906 = vst [vmem:[#allocation129_spill] sm:$0xff] %v10723_v23  ;;  %v10731_v21 = vld [vmem:[#allocation3 + $0x218] ss:$36 sps:$4 sm:$0xff]  }
 0x245   :  { %v3042_v7 = vpop.permute.xlu1 %3041  ;;  %13908 = vst [vmem:[#allocation131_spill] sm:$0xff] %v10731_v21 }
 0x246   :  { %v3147_v18 = vsel %vm3101_vm3, %v3042_v7, %v3044_v55  ;;  %v10714_v12 = vpop.permute.xlu0 %3045  ;;  %1599 = vmatpush1.bf16.msra.mxu1 %v13790_v56 }
 0x247   :  { %13905 = vst [vmem:[#allocation119_spill] sm:$0xff] %v10714_v12  ;;  %3079 = vrot.lane.b32.xlu1 %v10717_v42, %s8658_s26  ;;  %v3148_v41 = vsel %vm3101_vm3, %v3044_v55, %v10714_v12 }
 0x248   :  { %3077 = vrot.lane.b32.xlu0 %v10723_v23, %s8658_s26  ;;  %3256 = vmatprep.subr.bf16.mxu0 %v3148_v41 }
 0x249   :  { %3257 = vmatpush1.bf16.msra.mxu0 %v3147_v18  ;;  %v10727_v15 = vpop.permute.xlu1 %3065  ;;  %1617 = vmatmul.mubr.bf16.vlgmr.msra.gmra.mrb[24].mxu1 %v10620_v60  ;;  %v10742_v60 = vld [vmem:[#allocation4 + $0x38] sm:$0xff]  }
 0x24a   :  { %13907 = vst [vmem:[#allocation130_spill] sm:$0xff] %v10727_v15  ;;  %v3064_v7 = vpop.permute.xlu0 %3063  ;;  %1626 = vmatprep.mubr.bf16.mxu1 %v13707_v25 }
 0x24b   :  { %3097 = vrot.lane.b32.xlu1 %v10731_v21, %s8658_s26  ;;  %v3157_v55 = vsel %vm3101_vm3, %v3064_v7, %v10727_v15 }
 0x24c   :  { %1837 = vrot.lane.b32.xlu0 %v13902_v22, %s8655_s15  ;;  %3258 = vmatprep.subr.bf16.mxu0 %v3157_v55 }
 0x24d   :  { %v3084_v18 = vpop.permute.xlu1 %3083 }
 0x24e   :  { %v3062_v41 = vpop.permute.xlu0 %3061 }
 0x24f   :  { %v3156_v12 = vsel %vm3101_vm3, %v3062_v41, %v3064_v7  ;;  %1857 = vrot.lane.b32.xlu1 %v13903_v50, %s8655_s15  ;;  %v13912_v41 = vld [vmem:[#allocation82_spill] sm:$0xff] }
 0x250   :  { %3099 = vrot.lane.b32.xlu0 %v10742_v60, %s8658_s26  ;;  %3259 = vmatpush1.bf16.msra.mxu0 %v3156_v12 }
 0x251   :  { %v3082_v21 = vpop.permute.xlu1 %3081  ;;  %1627 = vmatmul.mubr.bf16.gmra.mrb[28].mxu1 %v10654_v3  ;;  %v10762_v3 = vld [vmem:[%s13291_s2 + $0x40] sm:$0xff]  }
 0x252   :  { %v3165_v15 = vsel %vm3101_vm3, %v3082_v21, %v3084_v18  ;;  %v10748_v23 = vpop.permute.xlu0 %3085  ;;  %2093 = vmatprep.mubr.bf16.mxu1 %v13707_v25 }
 0x253   :  { %13909 = vst [vmem:[#allocation132_spill] sm:$0xff] %v10748_v23  ;;  %3564 = vrot.lane.b32.xlu1 %v8996_v20, %s8659_s30  ;;  %v3166_v7 = vsel %vm3101_vm3, %v3084_v18, %v10748_v23  ;;  %v13913_v23 = vld [vmem:[#allocation64_spill] sm:$0xff] }
 0x254   :  { %3562 = vrot.lane.b32.xlu0 %v13830_v43, %s8659_s30  ;;  %3260 = vmatprep.subr.bf16.mxu0 %v3166_v7 }
 0x255   :  { %3261 = vmatpush1.bf16.msra.mxu0 %v3165_v15  ;;  %v10757_v12 = vpop.permute.xlu1 %2953 }
 0x256   :  { %13910 = vst [vmem:[#allocation133_spill] sm:$0xff] %v10757_v12  ;;  %v2952_v21 = vpop.permute.xlu0 %2951 }
 0x257   :  { %2328 = vrot.lane.b32.xlu1 %v13851_v17, %s8657_s12  ;;  %v3107_v55 = vsel %vm3101_vm3, %v2952_v21, %v10757_v12 }
 0x258   :  { %3560 = vrot.lane.b32.xlu0 %v13831_v62, %s8659_s30  ;;  %3352 = vmatprep.subr.bf16.mxu0 %v3107_v55 }
 0x259   :  { %v1710_v18 = vpop.permute.xlu1 %1709  ;;  %3279 = vmatmul.mubr.bf16.vlgmr.msra.gmra.mrb[4].mxu0 %v10762_v3 }
 0x25a   :  { %v10771_v15 = vpop.permute.xlu0 %2949  ;;  %v1867_v7 = vsel %vm1863_vm1, %v1710_v18, %v13912_v41  ;;  %v1866_v43 = vsel %vm1863_vm1, %v13913_v23, %v1710_v18  ;;  %3288 = vmatprep.mubr.bf16.mxu0 %v13707_v25  ;;  %v10789_v23 = vld [vmem:[%s13291_s2 + $0x48] sm:$0xff]  }
 0x25b   :  { %13911 = vst [vmem:[#allocation134_spill] sm:$0xff] %v10771_v15  ;;  %3584 = vrot.lane.b32.xlu1 %v9165_v47, %s8659_s30  ;;  %2061 = vmatprep.subr.bf16.mxu1 %v1867_v7  ;;  %v3106_v55 = vsel %vm3101_vm3, %v10771_v15, %v2952_v21  ;;  %v13916_v7 = vld [vmem:[#allocation88_spill] sm:$0xff]  ;;  %v13917_v15 = vld [vmem:[#allocation65_spill] sm:$0xff] }
 0x25c   :  { %3582 = vrot.lane.b32.xlu0 %v9074_v35, %s8659_s30  ;;  %3353 = vmatpush1.bf16.msra.mxu0 %v3106_v55 }
 0x25d   :  { %2062 = vmatpush1.bf16.msra.mxu1 %v1866_v43  ;;  %v10784_v12 = vpop.permute.xlu1 %2973 }
 0x25e   :  { %13914 = vst [vmem:[#allocation82_spill] sm:$0xff] %v10784_v12  ;;  %v2972_v18 = vpop.permute.xlu0 %2971 }
 0x25f   :  { %2348 = vrot.lane.b32.xlu1 %v13855_v45, %s8657_s12  ;;  %v3116_v41 = vsel %vm3101_vm3, %v2972_v18, %v10784_v12 }
 0x260   :  { %3580 = vrot.lane.b32.xlu0 %v9142_v32, %s8659_s30  ;;  %3354 = vmatprep.subr.bf16.mxu0 %v3116_v41 }
 0x261   :  { %v1730_v21 = vpop.permute.xlu1 %1729  ;;  %3289 = vmatmul.mubr.bf16.gmra.mrb[8].mxu0 %v10789_v23 }
 0x262   :  { %v10798_v43 = vpop.permute.xlu0 %2969  ;;  %v1876_v55 = vsel %vm1863_vm1, %v1730_v21, %v13916_v7  ;;  %v1875_v35 = vsel %vm1863_vm1, %v13917_v15, %v1730_v21  ;;  %3384 = vmatprep.mubr.bf16.mxu0 %v13707_v25 }
 0x263   :  { %13915 = vst [vmem:[#allocation64_spill] sm:$0xff] %v10798_v43  ;;  %3604 = vrot.lane.b32.xlu1 %v9200_v4, %s8659_s30  ;;  %2063 = vmatprep.subr.bf16.mxu1 %v1876_v55  ;;  %v3115_v41 = vsel %vm3101_vm3, %v10798_v43, %v2972_v18  ;;  %v13920_v55 = vld [vmem:[#allocation94_spill] sm:$0xff] }
 0x264   :  { %3602 = vrot.lane.b32.xlu0 %v9211_v31, %s8659_s30  ;;  %3355 = vmatpush1.bf16.msra.mxu0 %v3115_v41 }
 0x265   :  { %2064 = vmatpush1.bf16.msra.mxu1 %v1875_v35  ;;  %v10811_v12 = vpop.permute.xlu1 %2993  ;;  %v13921_v35 = vld [vmem:[#allocation66_spill] sm:$0xff] }
 0x266   :  { %13918 = vst [vmem:[#allocation88_spill] sm:$0xff] %v10811_v12  ;;  %v2992_v7 = vpop.permute.xlu0 %2991 }
 0x267   :  { %2368 = vrot.lane.b32.xlu1 %v13859_v6, %s8657_s12  ;;  %v3125_v15 = vsel %vm3101_vm3, %v2992_v7, %v10811_v12 }
 0x268   :  { %3600 = vrot.lane.b32.xlu0 %v9223_v59, %s8659_s30  ;;  %3356 = vmatprep.subr.bf16.mxu0 %v3125_v15 }
 0x269   :  { %v1750_v21 = vpop.permute.xlu1 %1749 }
 0x26a   :  { %v10819_v18 = vpop.permute.xlu0 %2989  ;;  %v1885_v41 = vsel %vm1863_vm1, %v1750_v21, %v13920_v55  ;;  %v1884_v43 = vsel %vm1863_vm1, %v13921_v35, %v1750_v21 }
 0x26b   :  { %13919 = vst [vmem:[#allocation65_spill] sm:$0xff] %v10819_v18  ;;  %3624 = vrot.lane.b32.xlu1 %v9235_v39, %s8659_s30  ;;  %2065 = vmatprep.subr.bf16.mxu1 %v1885_v41  ;;  %v3124_v12 = vsel %vm3101_vm3, %v10819_v18, %v2992_v7  ;;  %v13924_v41 = vld [vmem:[#allocation100_spill] sm:$0xff] }
 0x26c   :  { %3622 = vrot.lane.b32.xlu0 %v9217_v61, %s8659_s30  ;;  %3357 = vmatpush1.bf16.msra.mxu0 %v3124_v12 }
 0x26d   :  { %2066 = vmatpush1.bf16.msra.mxu1 %v1884_v43  ;;  %v10831_v15 = vpop.permute.xlu1 %3013  ;;  %v13925_v43 = vld [vmem:[#allocation67_spill] sm:$0xff] }
 0x26e   :  { %13922 = vst [vmem:[#allocation94_spill] sm:$0xff] %v10831_v15  ;;  %v3012_v59 = vpop.permute.xlu0 %3011 }
 0x26f   :  { %2388 = vrot.lane.b32.xlu1 %v13863_v46, %s8657_s12  ;;  %v3134_v21 = vsel %vm3101_vm3, %v3012_v59, %v10831_v15 }
 0x270   :  { %3620 = vrot.lane.b32.xlu0 %v9229_v48, %s8659_s30  ;;  %3358 = vmatprep.subr.bf16.mxu0 %v3134_v21 }
 0x271   :  { %v1770_v55 = vpop.permute.xlu1 %1769 }
 0x272   :  { %v10839_v7 = vpop.permute.xlu0 %3009  ;;  %v1894_v12 = vsel %vm1863_vm1, %v1770_v55, %v13924_v41  ;;  %v1893_v35 = vsel %vm1863_vm1, %v13925_v43, %v1770_v55  ;;  %v13929_v43 = vld [vmem:[#allocation68_spill] sm:$0xff] }
 0x273   :  { %13923 = vst [vmem:[#allocation66_spill] sm:$0xff] %v10839_v7  ;;  %3644 = vrot.lane.b32.xlu1 %v13763_v37, %s8659_s30  ;;  %2067 = vmatprep.subr.bf16.mxu1 %v1894_v12  ;;  %v3133_v15 = vsel %vm3101_vm3, %v10839_v7, %v3012_v59  ;;  %v13928_v12 = vld [vmem:[#allocation102_spill] sm:$0xff] }
 0x274   :  { %3642 = vrot.lane.b32.xlu0 %v13764_v44, %s8659_s30  ;;  %3359 = vmatpush1.bf16.msra.mxu0 %v3133_v15 }
 0x275   :  { %2068 = vmatpush1.bf16.msra.mxu1 %v1893_v35  ;;  %v10851_v21 = vpop.permute.xlu1 %3033 }
 0x276   :  { %13926 = vst [vmem:[#allocation100_spill] sm:$0xff] %v10851_v21  ;;  %v3032_v18 = vpop.permute.xlu0 %3031 }
 0x277   :  { %2408 = vrot.lane.b32.xlu1 %v13867_v63, %s8657_s12  ;;  %v3143_v55 = vsel %vm3101_vm3, %v3032_v18, %v10851_v21 }
 0x278   :  { %3640 = vrot.lane.b32.xlu0 %v13768_v38, %s8659_s30  ;;  %3360 = vmatprep.subr.bf16.mxu0 %v3143_v55 }
 0x279   :  { %v1790_v41 = vpop.permute.xlu1 %1789 }
 0x27a   :  { %v10859_v59 = vpop.permute.xlu0 %3029  ;;  %v1903_v15 = vsel %vm1863_vm1, %v1790_v41, %v13928_v12  ;;  %v1902_v35 = vsel %vm1863_vm1, %v13929_v43, %v1790_v41  ;;  %v13933_v43 = vld [vmem:[#allocation71_spill] sm:$0xff] }
 0x27b   :  { %13927 = vst [vmem:[#allocation67_spill] sm:$0xff] %v10859_v59  ;;  %3664 = vrot.lane.b32.xlu1 %v13839_v33, %s8659_s30  ;;  %2069 = vmatprep.subr.bf16.mxu1 %v1903_v15  ;;  %v3142_v21 = vsel %vm3101_vm3, %v10859_v59, %v3032_v18  ;;  %v13932_v15 = vld [vmem:[#allocation104_spill] sm:$0xff] }
 0x27c   :  { %3662 = vrot.lane.b32.xlu0 %v13769_v40, %s8659_s30  ;;  %3361 = vmatpush1.bf16.msra.mxu0 %v3142_v21  ;;  %v13934_v59 = vld [vmem:[#allocation40_spill] sm:$0xff] }
 0x27d   :  { %2070 = vmatpush1.bf16.msra.mxu1 %v1902_v35  ;;  %v10871_v55 = vpop.permute.xlu1 %3053 }
 0x27e   :  { %13930 = vst [vmem:[#allocation102_spill] sm:$0xff] %v10871_v55  ;;  %v3052_v7 = vpop.permute.xlu0 %3051 }
 0x27f   :  { %2428 = vrot.lane.b32.xlu1 %v13871_v27, %s8657_s12  ;;  %v3152_v41 = vsel %vm3101_vm3, %v3052_v7, %v10871_v55 }
 0x280   :  { %3660 = vrot.lane.b32.xlu0 %v13772_v52, %s8659_s30  ;;  %3362 = vmatprep.subr.bf16.mxu0 %v3152_v41 }
 0x281   :  { %v1810_v12 = vpop.permute.xlu1 %1809 }
 0x282   :  { %v10879_v18 = vpop.permute.xlu0 %3049  ;;  %v1912_v21 = vsel %vm1863_vm1, %v1810_v12, %v13932_v15  ;;  %v1911_v35 = vsel %vm1863_vm1, %v13933_v43, %v1810_v12  ;;  %v13938_v43 = vld [vmem:[#allocation72_spill] sm:$0xff] }
 0x283   :  { %13931 = vst [vmem:[#allocation68_spill] sm:$0xff] %v10879_v18  ;;  %3684 = vrot.lane.b32.xlu1 %v13841_v16, %s8659_s30  ;;  %2071 = vmatprep.subr.bf16.mxu1 %v1912_v21  ;;  %v3151_v55 = vsel %vm3101_vm3, %v10879_v18, %v3052_v7  ;;  %v13937_v21 = vld [vmem:[#allocation106_spill] sm:$0xff] }
 0x284   :  { %3682 = vrot.lane.b32.xlu0 %v13934_v59, %s8659_s30  ;;  %3363 = vmatpush1.bf16.msra.mxu0 %v3151_v55 }
 0x285   :  { %2072 = vmatpush1.bf16.msra.mxu1 %v1911_v35  ;;  %v10891_v41 = vpop.permute.xlu1 %3073 }
 0x286   :  { %13935 = vst [vmem:[#allocation104_spill] sm:$0xff] %v10891_v41  ;;  %v3072_v52 = vpop.permute.xlu0 %3071 }
 0x287   :  { %2448 = vrot.lane.b32.xlu1 %v13875_v5, %s8657_s12  ;;  %v3161_v12 = vsel %vm3101_vm3, %v3072_v52, %v10891_v41 }
 0x288   :  { %3680 = vrot.lane.b32.xlu0 %v13845_v28, %s8659_s30  ;;  %3364 = vmatprep.subr.bf16.mxu0 %v3161_v12 }
 0x289   :  { %v1830_v15 = vpop.permute.xlu1 %1829 }
 0x28a   :  { %v10899_v7 = vpop.permute.xlu0 %3069  ;;  %v1921_v55 = vsel %vm1863_vm1, %v1830_v15, %v13937_v21  ;;  %v1920_v35 = vsel %vm1863_vm1, %v13938_v43, %v1830_v15  ;;  %v13942_v43 = vld [vmem:[#allocation77_spill] sm:$0xff] }
 0x28b   :  { %13936 = vst [vmem:[#allocation71_spill] sm:$0xff] %v10899_v7  ;;  %3704 = vrot.lane.b32.xlu1 %v13847_v8, %s8659_s30  ;;  %2073 = vmatprep.subr.bf16.mxu1 %v1921_v55  ;;  %v3160_v41 = vsel %vm3101_vm3, %v10899_v7, %v3072_v52  ;;  %v13941_v55 = vld [vmem:[#allocation76_spill] sm:$0xff] }
 0x28c   :  { %3702 = vrot.lane.b32.xlu0 %v13785_v54, %s8659_s30  ;;  %3365 = vmatpush1.bf16.msra.mxu0 %v3160_v41 }
 0x28d   :  { %2074 = vmatpush1.bf16.msra.mxu1 %v1920_v35  ;;  %v10911_v12 = vpop.permute.xlu1 %3093 }
 0x28e   :  { %13939 = vst [vmem:[#allocation106_spill] sm:$0xff] %v10911_v12  ;;  %v3092_v18 = vpop.permute.xlu0 %3091 }
 0x28f   :  { %2468 = vrot.lane.b32.xlu1 %v13878_v14, %s8657_s12  ;;  %v3170_v15 = vsel %vm3101_vm3, %v3092_v18, %v10911_v12 }
 0x290   :  { %3700 = vrot.lane.b32.xlu0 %v13787_v19, %s8659_s30  ;;  %3366 = vmatprep.subr.bf16.mxu0 %v3170_v15 }
 0x291   :  { %v1850_v21 = vpop.permute.xlu1 %1849 }
 0x292   :  { %v10919_v52 = vpop.permute.xlu0 %3089  ;;  %v1930_v41 = vsel %vm1863_vm1, %v1850_v21, %v13941_v55  ;;  %v1929_v35 = vsel %vm1863_vm1, %v13942_v43, %v1850_v21 }
 0x293   :  { %13940 = vst [vmem:[#allocation72_spill] sm:$0xff] %v10919_v52  ;;  %3572 = vrot.lane.b32.xlu1 %v9332_v9, %s8659_s30  ;;  %2075 = vmatprep.subr.bf16.mxu1 %v1930_v41  ;;  %v3169_v12 = vsel %vm3101_vm3, %v10919_v52, %v3092_v18  ;;  %v13945_v41 = vld [vmem:[#allocation81_spill] sm:$0xff] }
 0x294   :  { %3570 = vrot.lane.b32.xlu0 %v9338_v10, %s8659_s30  ;;  %3367 = vmatpush1.bf16.msra.mxu0 %v3169_v12  ;;  %v10945_v12 = vld [vmem:[%s13291_s2 + $0x20] sm:$0xff]   ;;  %v13948_v10 = vld [vmem:[#allocation86_spill] sm:$0xff] }
 0x295   :  { %2076 = vmatpush1.bf16.msra.mxu1 %v1929_v35  ;;  %v2960_v15 = vpop.permute.xlu1 %2959  ;;  %v13946_v35 = vld [vmem:[#allocation80_spill] sm:$0xff]  ;;  %v13947_v52 = vld [vmem:[#allocation85_spill] sm:$0xff] }
 0x296   :  { %v10931_v7 = vpop.permute.xlu0 %2957 }
 0x297   :  { %13943 = vst [vmem:[#allocation76_spill] sm:$0xff] %v10931_v7  ;;  %2336 = vrot.lane.b32.xlu1 %v13884_v53, %s8657_s12  ;;  %v3110_v21 = vsel %vm3101_vm3, %v10931_v7, %v2960_v15  ;;  %3385 = vmatmul.mubr.bf16.vlgmr.msra.gmra.mrb[12].mxu0 %v10762_v3 }
 0x298   :  { %3568 = vrot.lane.b32.xlu0 %v13794_v51, %s8659_s30  ;;  %7891 = vmatprep.subr.bf16.mxu0 %v3110_v21 }
 0x299   :  { %7892 = vmatpush3.bf16.msra.mxu0 %v3110_v21  ;;  %v10940_v18 = vpop.permute.xlu1 %2977  ;;  %2094 = vmatmul.mubr.bf16.vlgmr.msra.gmra.mrb[8].mxu1 %v10945_v12 }
 0x29a   :  { %13944 = vst [vmem:[#allocation77_spill] sm:$0xff] %v10940_v18  ;;  %v1718_v55 = vpop.permute.xlu0 %1717  ;;  %3394 = vmatprep.mubr.bf16.mxu0 %v13707_v25  ;;  %2103 = vmatprep.mubr.bf16.mxu1 %v13707_v25 }
 0x29b   :  { %3592 = vrot.lane.b32.xlu1 %v9360_v11, %s8659_s30  ;;  %v1871_v43 = vsel %vm1863_vm1, %v1718_v55, %v13945_v41  ;;  %v1870_v15 = vsel %vm1863_vm1, %v13946_v35, %v1718_v55 }
 0x29c   :  { %3590 = vrot.lane.b32.xlu0 %v9366_v0, %s8659_s30  ;;  %2167 = vmatprep.subr.bf16.mxu1 %v1871_v43 }
 0x29d   :  { %2168 = vmatpush1.bf16.msra.mxu1 %v1870_v15  ;;  %v1738_v21 = vpop.permute.xlu1 %1737  ;;  %v13952_v15 = vld [vmem:[#allocation93_spill] sm:$0xff] }
 0x29e   :  { %v2980_v7 = vpop.permute.xlu0 %2979  ;;  %v1880_v51 = vsel %vm1863_vm1, %v1738_v21, %v13947_v52  ;;  %v1879_v9 = vsel %vm1863_vm1, %v13948_v10, %v1738_v21  ;;  %v10974_v10 = vld [vmem:[%s13291_s2 + $0x28] sm:$0xff]   ;;  %v13951_v52 = vld [vmem:[#allocation19_spill] sm:$0xff] }
 0x29f   :  { %2356 = vrot.lane.b32.xlu1 %v13885_v49, %s8657_s12  ;;  %2169 = vmatprep.subr.bf16.mxu1 %v1880_v51  ;;  %v3119_v55 = vsel %vm3101_vm3, %v10940_v18, %v2980_v7 }
 0x2a0   :  { %3588 = vrot.lane.b32.xlu0 %v13797_v24, %s8659_s30  ;;  %7893 = vmatprep.subr.bf16.mxu0 %v3119_v55 }
 0x2a1   :  { %2170 = vmatpush1.bf16.msra.mxu1 %v1879_v9  ;;  %7894 = vmatpush3.bf16.msra.mxu0 %v3119_v55  ;;  %v3000_v41 = vpop.permute.xlu1 %2999 }
 0x2a2   :  { %v10968_v43 = vpop.permute.xlu0 %2997  ;;  %3395 = vmatmul.mubr.bf16.gmra.mrb[16].mxu0 %v10789_v23  ;;  %2104 = vmatmul.mubr.bf16.gmra.mrb[12].mxu1 %v10974_v10 }
 0x2a3   :  { %13949 = vst [vmem:[#allocation81_spill] sm:$0xff] %v10968_v43  ;;  %3612 = vrot.lane.b32.xlu1 %v9380_v1, %s8659_s30  ;;  %v3128_v51 = vsel %vm3101_vm3, %v10968_v43, %v3000_v41  ;;  %7907 = vmatprep.mubr.bf16.mxu0 %v10762_v3  ;;  %v13953_v41 = vld [vmem:[#allocation89_spill] sm:$0xff] }
 0x2a4   :  { %3610 = vrot.lane.b32.xlu0 %v9076_v36, %s8659_s30  ;;  %7895 = vmatprep.subr.bf16.mxu0 %v3128_v51  ;;  %v13954_v43 = vld [vmem:[#allocation97_spill] sm:$0xff] }
 0x2a5   :  { %7896 = vmatpush3.bf16.msra.mxu0 %v3128_v51  ;;  %v10984_v9 = vpop.permute.xlu1 %3017  ;;  %2199 = vmatprep.mubr.bf16.mxu1 %v13707_v25 }
 0x2a6   :  { %13950 = vst [vmem:[#allocation80_spill] sm:$0xff] %v10984_v9  ;;  %v1758_v7 = vpop.permute.xlu0 %1757 }
 0x2a7   :  { %2376 = vrot.lane.b32.xlu1 %v13889_v34, %s8657_s12  ;;  %v1889_v35 = vsel %vm1863_vm1, %v1758_v7, %v13951_v52  ;;  %v1888_v21 = vsel %vm1863_vm1, %v13952_v15, %v1758_v7  ;;  %v13956_v15 = vld [vmem:[#allocation12_spill] sm:$0xff] }
 0x2a8   :  { %3608 = vrot.lane.b32.xlu0 %v13800_v30, %s8659_s30  ;;  %2171 = vmatprep.subr.bf16.mxu1 %v1889_v35 }
 0x2a9   :  { %2172 = vmatpush1.bf16.msra.mxu1 %v1888_v21  ;;  %v1778_v3 = vpop.permute.xlu1 %1777 }
 0x2aa   :  { %v3020_v55 = vpop.permute.xlu0 %3019  ;;  %v1898_v51 = vsel %vm1863_vm1, %v1778_v3, %v13953_v41  ;;  %v1897_v18 = vsel %vm1863_vm1, %v13954_v43, %v1778_v3  ;;  %v13959_v41 = vld [vmem:[#allocation101_spill] sm:$0xff] }
 0x2ab   :  { %3632 = vrot.lane.b32.xlu1 %v13757_v13, %s8659_s30  ;;  %2173 = vmatprep.subr.bf16.mxu1 %v1898_v51  ;;  %v3137_v7 = vsel %vm3101_vm3, %v10984_v9, %v3020_v55 }
 0x2ac   :  { %3630 = vrot.lane.b32.xlu0 %v13758_v2, %s8659_s30  ;;  %7897 = vmatprep.subr.bf16.mxu0 %v3137_v7 }
 0x2ad   :  { %2174 = vmatpush1.bf16.msra.mxu1 %v1897_v18  ;;  %7898 = vmatpush3.bf16.msra.mxu0 %v3137_v7  ;;  %v3040_v52 = vpop.permute.xlu1 %3039  ;;  %v13958_v18 = vld [vmem:[#allocation108_spill] sm:$0xff]  ;;  %v13960_v7 = vld [vmem:[#allocation13_spill] sm:$0xff] }
 0x2ae   :  { %v11005_v35 = vpop.permute.xlu0 %3037 }
 0x2af   :  { %13955 = vst [vmem:[#allocation85_spill] sm:$0xff] %v11005_v35  ;;  %2396 = vrot.lane.b32.xlu1 %v13893_v57, %s8657_s12  ;;  %v3146_v43 = vsel %vm3101_vm3, %v11005_v35, %v3040_v52 }
 0x2b0   :  { %3628 = vrot.lane.b32.xlu0 %v13956_v15, %s8659_s30  ;;  %7899 = vmatprep.subr.bf16.mxu0 %v3146_v43  ;;  %v13962_v15 = vld [vmem:[#allocation103_spill] sm:$0xff] }
 0x2b1   :  { %7900 = vmatpush3.bf16.msra.mxu0 %v3146_v43  ;;  %v11013_v21 = vpop.permute.xlu1 %3057  ;;  %v13961_v43 = vld [vmem:[#allocation110_spill] sm:$0xff] }
 0x2b2   :  { %13957 = vst [vmem:[#allocation86_spill] sm:$0xff] %v11013_v21  ;;  %v1798_v3 = vpop.permute.xlu0 %1797 }
 0x2b3   :  { %3652 = vrot.lane.b32.xlu1 %v13770_v29, %s8659_s30  ;;  %v1907_v55 = vsel %vm1863_vm1, %v1798_v3, %v13958_v18  ;;  %v1906_v51 = vsel %vm1863_vm1, %v13959_v41, %v1798_v3  ;;  %v13963_v18 = vld [vmem:[#allocation14_spill] sm:$0xff]  ;;  %v13973_v29 = vld [vmem:[#allocation20_spill] sm:$0xff] }
 0x2b4   :  { %3650 = vrot.lane.b32.xlu0 %v13960_v7, %s8659_s30  ;;  %2175 = vmatprep.subr.bf16.mxu1 %v1907_v55 }
 0x2b5   :  { %2176 = vmatpush1.bf16.msra.mxu1 %v1906_v51  ;;  %v1818_v52 = vpop.permute.xlu1 %1817  ;;  %v13965_v51 = vld [vmem:[#allocation15_spill] sm:$0xff] }
 0x2b6   :  { %v3060_v35 = vpop.permute.xlu0 %3059  ;;  %v1916_v9 = vsel %vm1863_vm1, %v1818_v52, %v13961_v43  ;;  %v1915_v2 = vsel %vm1863_vm1, %v13962_v15, %v1818_v52 }
 0x2b7   :  { %2416 = vrot.lane.b32.xlu1 %v13894_v58, %s8657_s12  ;;  %2177 = vmatprep.subr.bf16.mxu1 %v1916_v9  ;;  %v3155_v3 = vsel %vm3101_vm3, %v11013_v21, %v3060_v35  ;;  %v13966_v9 = vld [vmem:[#allocation17_spill] sm:$0xff] }
 0x2b8   :  { %3648 = vrot.lane.b32.xlu0 %v13963_v18, %s8659_s30  ;;  %7901 = vmatprep.subr.bf16.mxu0 %v3155_v3  ;;  %v13972_v18 = vld [vmem:[#allocation75_spill] sm:$0xff] }
 0x2b9   :  { %2178 = vmatpush1.bf16.msra.mxu1 %v1915_v2  ;;  %7902 = vmatpush3.bf16.msra.mxu0 %v3155_v3  ;;  %v3080_v55 = vpop.permute.xlu1 %3079  ;;  %v13968_v2 = vld [vmem:[#allocation111_spill] sm:$0xff]  ;;  %v13969_v3 = vld [vmem:[#allocation105_spill] sm:$0xff] }
 0x2ba   :  { %v11033_v41 = vpop.permute.xlu0 %3077 }
 0x2bb   :  { %13964 = vst [vmem:[#allocation19_spill] sm:$0xff] %v11033_v41  ;;  %3672 = vrot.lane.b32.xlu1 %v13965_v51, %s8659_s30  ;;  %v3164_v15 = vsel %vm3101_vm3, %v11033_v41, %v3080_v55  ;;  %v13970_v51 = vld [vmem:[#allocation18_spill] sm:$0xff] }
 0x2bc   :  { %3670 = vrot.lane.b32.xlu0 %v13966_v9, %s8659_s30  ;;  %7903 = vmatprep.subr.bf16.mxu0 %v3164_v15 }
 0x2bd   :  { %7904 = vmatpush3.bf16.msra.mxu0 %v3164_v15  ;;  %v11041_v35 = vpop.permute.xlu1 %3097  ;;  %v13971_v15 = vld [vmem:[#allocation112_spill] sm:$0xff] }
 0x2be   :  { %13967 = vst [vmem:[#allocation93_spill] sm:$0xff] %v11041_v35  ;;  %v1838_v52 = vpop.permute.xlu0 %1837 }
 0x2bf   :  { %2436 = vrot.lane.b32.xlu1 %v13898_v26, %s8657_s12  ;;  %v1925_v43 = vsel %vm1863_vm1, %v1838_v52, %v13968_v2  ;;  %v1924_v21 = vsel %vm1863_vm1, %v13969_v3, %v1838_v52  ;;  %v13974_v2 = vld [vmem:[#allocation21_spill] sm:$0xff]  ;;  %v13977_v3 = vld [vmem:[#allocation83_spill] sm:$0xff] }
 0x2c0   :  { %3668 = vrot.lane.b32.xlu0 %v13970_v51, %s8659_s30  ;;  %2179 = vmatprep.subr.bf16.mxu1 %v1925_v43 }
 0x2c1   :  { %2180 = vmatpush1.bf16.msra.mxu1 %v1924_v21  ;;  %v1858_v55 = vpop.permute.xlu1 %1857 }
 0x2c2   :  { %v3100_v41 = vpop.permute.xlu0 %3099  ;;  %v1934_v9 = vsel %vm1863_vm1, %v1858_v55, %v13971_v15  ;;  %v1933_v7 = vsel %vm1863_vm1, %v13972_v18, %v1858_v55  ;;  %v13978_v15 = vld [vmem:[#allocation114_spill] sm:$0xff] }
 0x2c3   :  { %3692 = vrot.lane.b32.xlu1 %v13973_v29, %s8659_s30  ;;  %2181 = vmatprep.subr.bf16.mxu1 %v1934_v9  ;;  %v3173_v52 = vsel %vm3101_vm3, %v11041_v35, %v3100_v41  ;;  %v13976_v9 = vld [vmem:[#allocation22_spill] sm:$0xff] }
 0x2c4   :  { %3690 = vrot.lane.b32.xlu0 %v13974_v2, %s8659_s30  ;;  %7905 = vmatprep.subr.bf16.mxu0 %v3173_v52 }
 0x2c5   :  { %2182 = vmatpush1.bf16.msra.mxu1 %v1933_v7  ;;  %7906 = vmatpush3.bf16.msra.mxu0 %v3173_v52  ;;  %v11061_v21 = vpop.permute.xlu1 %3564 }
 0x2c6   :  { %13975 = vst [vmem:[#allocation89_spill] sm:$0xff] %v11061_v21  ;;  %v3563_v43 = vpop.permute.xlu0 %3562 }
 0x2c7   :  { %2456 = vrot.lane.b32.xlu1 %v13902_v22, %s8657_s12  ;;  %v3722_v18 = vsel %vm3720_vm4, %v3563_v43, %v11061_v21 }
 0x2c8   :  { %3688 = vrot.lane.b32.xlu0 %v13976_v9, %s8659_s30  ;;  %3865 = vmatprep.subr.bf16.mxu0 %v3722_v18 }
 0x2c9   :  { %v2329_v41 = vpop.permute.xlu1 %2328  ;;  %7908 = vmatmul.mubr.bf16.vlgmr.msra.gmra.mrb[0].mxu0 %v10789_v23  ;;  %2200 = vmatmul.mubr.bf16.vlgmr.msra.gmra.mrb[24].mxu1 %v10945_v12  ;;  %v13979_v23 = vld [vmem:[#allocation25_spill] sm:$0xff] }
 0x2ca   :  { %v3561_v7 = vpop.permute.xlu0 %3560  ;;  %v2486_v55 = vsel %vm2482_vm2, %v2329_v41, %v13977_v3  ;;  %v2485_v52 = vsel %vm2482_vm2, %v13978_v15, %v2329_v41  ;;  %2209 = vmatprep.mubr.bf16.mxu1 %v13707_v25  ;;  %3897 = vmatprep.mubr.bf16.mxu0 %v13707_v25  ;;  %v13983_v15 = vld [vmem:[#allocation116_spill] sm:$0xff] }
 0x2cb   :  { %v3721_v21 = vsel %vm3720_vm4, %v3561_v7, %v3563_v43  ;;  %3712 = vrot.lane.b32.xlu1 %v13790_v56, %s8659_s30  ;;  %2680 = vmatprep.subr.bf16.mxu1 %v2486_v55  ;;  %v13981_v43 = vld [vmem:[#allocation26_spill] sm:$0xff]  ;;  %v13982_v55 = vld [vmem:[#allocation87_spill] sm:$0xff] }
 0x2cc   :  { %3710 = vrot.lane.b32.xlu0 %v13979_v23, %s8659_s30  ;;  %3866 = vmatpush1.bf16.msra.mxu0 %v3721_v21  ;;  %v13996_v23 = vld [vmem:[#allocation125_spill] sm:$0xff] }
 0x2cd   :  { %2681 = vmatpush1.bf16.msra.mxu1 %v2485_v52  ;;  %v11082_v12 = vpop.permute.xlu1 %3584 }
 0x2ce   :  { %13980 = vst [vmem:[#allocation97_spill] sm:$0xff] %v11082_v12  ;;  %v3583_v18 = vpop.permute.xlu0 %3582 }
 0x2cf   :  { %2476 = vrot.lane.b32.xlu1 %v13903_v50, %s8657_s12  ;;  %v3731_v41 = vsel %vm3720_vm4, %v3583_v18, %v11082_v12  ;;  %v13984_v12 = vld [vmem:[#allocation99_spill] sm:$0xff]  ;;  %s8660_s12 = smov 110  }
 0x2d0   :  { %3708 = vrot.lane.b32.xlu0 %v13981_v43, %s8659_s30  ;;  %3867 = vmatprep.subr.bf16.mxu0 %v3731_v41  ;;  %v13985_v41 = vld [vmem:[#allocation120_spill] sm:$0xff] }
 0x2d1   :  { %v2349_v7 = vpop.permute.xlu1 %2348  ;;  %2210 = vmatmul.mubr.bf16.gmra.mrb[28].mxu1 %v10974_v10 }
 0x2d2   :  { %v3581_v3 = vpop.permute.xlu0 %3580  ;;  %v2495_v21 = vsel %vm2482_vm2, %v2349_v7, %v13982_v55  ;;  %v2494_v52 = vsel %vm2482_vm2, %v13983_v15, %v2349_v7  ;;  %2712 = vmatprep.mubr.bf16.mxu1 %v13707_v25  ;;  %v13987_v55 = vld [vmem:[#allocation122_spill] sm:$0xff] }
 0x2d3   :  { %v3730_v35 = vsel %vm3720_vm4, %v3581_v3, %v3583_v18  ;;  %3578 = vrot.lane.b32.xlu1 %v13984_v12, %s8659_s30  ;;  %2682 = vmatprep.subr.bf16.mxu1 %v2495_v21  ;;  %v13988_v3 = vld [vmem:[#allocation91_spill] sm:$0xff] }
 0x2d4   :  { %3576 = vrot.lane.b32.xlu0 %v13985_v41, %s8659_s30  ;;  %3868 = vmatpush1.bf16.msra.mxu0 %v3730_v35  ;;  %v13989_v35 = vld [vmem:[#allocation118_spill] sm:$0xff]  ;;  %v13990_v41 = vld [vmem:[#allocation107_spill] sm:$0xff] }
 0x2d5   :  { %2683 = vmatpush1.bf16.msra.mxu1 %v2494_v52  ;;  %v11101_v10 = vpop.permute.xlu1 %3604 }
 0x2d6   :  { %13986 = vst [vmem:[#allocation108_spill] sm:$0xff] %v11101_v10  ;;  %v3603_v43 = vpop.permute.xlu0 %3602 }
 0x2d7   :  { %3596 = vrot.lane.b32.xlu1 %v13987_v55, %s8659_s30  ;;  %v3740_v7 = vsel %vm3720_vm4, %v3603_v43, %v11101_v10  ;;  %v13992_v10 = vld [vmem:[#allocation123_spill] sm:$0xff] }
 0x2d8   :  { %2947 = vrot.lane.b32.xlu0 %v13851_v17, %s8658_s26  ;;  %3869 = vmatprep.subr.bf16.mxu0 %v3740_v7 }
 0x2d9   :  { %v2369_v12 = vpop.permute.xlu1 %2368 }
 0x2da   :  { %v3601_v18 = vpop.permute.xlu0 %3600  ;;  %v2504_v21 = vsel %vm2482_vm2, %v2369_v12, %v13988_v3  ;;  %v2503_v15 = vsel %vm2482_vm2, %v13989_v35, %v2369_v12 }
 0x2db   :  { %v3739_v52 = vsel %vm3720_vm4, %v3601_v18, %v3603_v43  ;;  %2967 = vrot.lane.b32.xlu1 %v13855_v45, %s8658_s26  ;;  %2684 = vmatprep.subr.bf16.mxu1 %v2504_v21  ;;  %v13993_v43 = vld [vmem:[#allocation6_spill] sm:$0xff] }
 0x2dc   :  { %3598 = vrot.lane.b32.xlu0 %v13990_v41, %s8659_s30  ;;  %3870 = vmatpush1.bf16.msra.mxu0 %v3739_v52  ;;  %v13994_v21 = vld [vmem:[#allocation98_spill] sm:$0xff]  ;;  %v13995_v52 = vld [vmem:[#allocation69_spill] sm:$0xff] }
 0x2dd   :  { %2685 = vmatpush1.bf16.msra.mxu1 %v2503_v15  ;;  %v11118_v55 = vpop.permute.xlu1 %3624 }
 0x2de   :  { %13991 = vst [vmem:[#allocation101_spill] sm:$0xff] %v11118_v55  ;;  %v3623_v7 = vpop.permute.xlu0 %3622 }
 0x2df   :  { %3618 = vrot.lane.b32.xlu1 %v13992_v10, %s8659_s30  ;;  %v3749_v12 = vsel %vm3720_vm4, %v3623_v7, %v11118_v55  ;;  %v14004_v55 = vld [vmem:[#allocation128_spill] sm:$0xff] }
 0x2e0   :  { %3616 = vrot.lane.b32.xlu0 %v13993_v43, %s8659_s30  ;;  %3871 = vmatprep.subr.bf16.mxu0 %v3749_v12 }
 0x2e1   :  { %v2389_v18 = vpop.permute.xlu1 %2388 }
 0x2e2   :  { %v3621_v3 = vpop.permute.xlu0 %3620  ;;  %v2513_v35 = vsel %vm2482_vm2, %v2389_v18, %v13994_v21  ;;  %v2512_v15 = vsel %vm2482_vm2, %v13995_v52, %v2389_v18 }
 0x2e3   :  { %v3748_v41 = vsel %vm3720_vm4, %v3621_v3, %v3623_v7  ;;  %3636 = vrot.lane.b32.xlu1 %v13996_v23, %s8659_s30  ;;  %2686 = vmatprep.subr.bf16.mxu1 %v2513_v35  ;;  %v13998_v7 = vld [vmem:[#allocation9_spill] sm:$0xff]  ;;  %v13999_v3 = vld [vmem:[#allocation56_spill] sm:$0xff]  ;;  %v14000_v35 = vld [vmem:[#allocation70_spill] sm:$0xff] }
 0x2e4   :  { %2987 = vrot.lane.b32.xlu0 %v13859_v6, %s8658_s26  ;;  %3872 = vmatpush1.bf16.msra.mxu0 %v3748_v41  ;;  %v14001_v41 = vld [vmem:[#allocation126_spill] sm:$0xff] }
 0x2e5   :  { %2687 = vmatpush1.bf16.msra.mxu1 %v2512_v15  ;;  %v11135_v10 = vpop.permute.xlu1 %3644 }
 0x2e6   :  { %13997 = vst [vmem:[#allocation110_spill] sm:$0xff] %v11135_v10  ;;  %v3643_v12 = vpop.permute.xlu0 %3642 }
 0x2e7   :  { %3007 = vrot.lane.b32.xlu1 %v13863_v46, %s8658_s26  ;;  %v3758_v43 = vsel %vm3720_vm4, %v3643_v12, %v11135_v10  ;;  %v14002_v10 = vld [vmem:[#allocation115_spill] sm:$0xff] }
 0x2e8   :  { %3638 = vrot.lane.b32.xlu0 %v13998_v7, %s8659_s30  ;;  %3873 = vmatprep.subr.bf16.mxu0 %v3758_v43 }
 0x2e9   :  { %v2409_v23 = vpop.permute.xlu1 %2408 }
 0x2ea   :  { %v3641_v18 = vpop.permute.xlu0 %3640  ;;  %v2522_v21 = vsel %vm2482_vm2, %v2409_v23, %v13999_v3  ;;  %v2521_v52 = vsel %vm2482_vm2, %v14000_v35, %v2409_v23  ;;  %v14005_v3 = vld [vmem:[#allocation57_spill] sm:$0xff] }
 0x2eb   :  { %v3757_v15 = vsel %vm3720_vm4, %v3641_v18, %v3643_v12  ;;  %3658 = vrot.lane.b32.xlu1 %v14001_v41, %s8659_s30  ;;  %2688 = vmatprep.subr.bf16.mxu1 %v2522_v21  ;;  %v14006_v21 = vld [vmem:[#allocation73_spill] sm:$0xff] }
 0x2ec   :  { %3656 = vrot.lane.b32.xlu0 %v14002_v10, %s8659_s30  ;;  %3874 = vmatpush1.bf16.msra.mxu0 %v3757_v15 }
 0x2ed   :  { %2689 = vmatpush1.bf16.msra.mxu1 %v2521_v52  ;;  %v11152_v43 = vpop.permute.xlu1 %3664 }
 0x2ee   :  { %14003 = vst [vmem:[#allocation103_spill] sm:$0xff] %v11152_v43  ;;  %v3663_v7 = vpop.permute.xlu0 %3662 }
 0x2ef   :  { %3676 = vrot.lane.b32.xlu1 %v14004_v55, %s8659_s30  ;;  %v3767_v23 = vsel %vm3720_vm4, %v3663_v7, %v11152_v43  ;;  %v14007_v55 = vld [vmem:[#allocation117_spill] sm:$0xff] }
 0x2f0   :  { %3027 = vrot.lane.b32.xlu0 %v13867_v63, %s8658_s26  ;;  %3875 = vmatprep.subr.bf16.mxu0 %v3767_v23 }
 0x2f1   :  { %v2429_v12 = vpop.permute.xlu1 %2428 }
 0x2f2   :  { %v3661_v18 = vpop.permute.xlu0 %3660  ;;  %v2531_v10 = vsel %vm2482_vm2, %v2429_v12, %v14005_v3  ;;  %v2530_v35 = vsel %vm2482_vm2, %v14006_v21, %v2429_v12  ;;  %v14010_v3 = vld [vmem:[#allocation31_spill] sm:$0xff]  ;;  %v14011_v21 = vld [vmem:[#allocation74_spill] sm:$0xff] }
 0x2f3   :  { %v3766_v52 = vsel %vm3720_vm4, %v3661_v18, %v3663_v7  ;;  %3047 = vrot.lane.b32.xlu1 %v13871_v27, %s8658_s26  ;;  %2690 = vmatprep.subr.bf16.mxu1 %v2531_v10  ;;  %v14009_v7 = vld [vmem:[#allocation129_spill] sm:$0xff] }
 0x2f4   :  { %3678 = vrot.lane.b32.xlu0 %v14007_v55, %s8659_s30  ;;  %3876 = vmatpush1.bf16.msra.mxu0 %v3766_v52  ;;  %v14012_v55 = vld [vmem:[#allocation131_spill] sm:$0xff] }
 0x2f5   :  { %2691 = vmatpush1.bf16.msra.mxu1 %v2530_v35  ;;  %v11169_v15 = vpop.permute.xlu1 %3684 }
 0x2f6   :  { %14008 = vst [vmem:[#allocation111_spill] sm:$0xff] %v11169_v15  ;;  %v3683_v41 = vpop.permute.xlu0 %3682 }
 0x2f7   :  { %3698 = vrot.lane.b32.xlu1 %v10717_v42, %s8659_s30  ;;  %v3776_v23 = vsel %vm3720_vm4, %v3683_v41, %v11169_v15  ;;  %v14023_v15 = vld [vmem:[#allocation84_spill] sm:$0xff] }
 0x2f8   :  { %3696 = vrot.lane.b32.xlu0 %v14009_v7, %s8659_s30  ;;  %3877 = vmatprep.subr.bf16.mxu0 %v3776_v23 }
 0x2f9   :  { %v2449_v12 = vpop.permute.xlu1 %2448 }
 0x2fa   :  { %v3681_v18 = vpop.permute.xlu0 %3680  ;;  %v2540_v10 = vsel %vm2482_vm2, %v2449_v12, %v14010_v3  ;;  %v2539_v35 = vsel %vm2482_vm2, %v14011_v21, %v2449_v12 }
 0x2fb   :  { %v3775_v52 = vsel %vm3720_vm4, %v3681_v18, %v3683_v41  ;;  %3716 = vrot.lane.b32.xlu1 %v14012_v55, %s8659_s30  ;;  %2692 = vmatprep.subr.bf16.mxu1 %v2540_v10  ;;  %v14014_v18 = vld [vmem:[#allocation36_spill] sm:$0xff]  ;;  %v14015_v10 = vld [vmem:[#allocation78_spill] sm:$0xff] }
 0x2fc   :  { %3067 = vrot.lane.b32.xlu0 %v13875_v5, %s8658_s26  ;;  %3878 = vmatpush1.bf16.msra.mxu0 %v3775_v52  ;;  %v14016_v52 = vld [vmem:[#allocation5_spill] sm:$0xff] }
 0x2fd   :  { %2693 = vmatpush1.bf16.msra.mxu1 %v2539_v35  ;;  %v11186_v42 = vpop.permute.xlu1 %3704 }
 0x2fe   :  { %14013 = vst [vmem:[#allocation105_spill] sm:$0xff] %v11186_v42  ;;  %v3703_v23 = vpop.permute.xlu0 %3702 }
 0x2ff   :  { %3087 = vrot.lane.b32.xlu1 %v13878_v14, %s8658_s26  ;;  %v3785_v7 = vsel %vm3720_vm4, %v3703_v23, %v11186_v42  ;;  %v14020_v42 = vld [vmem:[#allocation7_spill] sm:$0xff] }
 0x300   :  { %3718 = vrot.lane.b32.xlu0 %v10742_v60, %s8659_s30  ;;  %3879 = vmatprep.subr.bf16.mxu0 %v3785_v7  ;;  %v11204_v60 = vld [vmem:[%s13291_s2 + $0x50] sm:$0xff]  }
 0x301   :  { %v2469_v41 = vpop.permute.xlu1 %2468 }
 0x302   :  { %v3701_v12 = vpop.permute.xlu0 %3700  ;;  %v2549_v3 = vsel %vm2482_vm2, %v2469_v41, %v14014_v18  ;;  %v2548_v21 = vsel %vm2482_vm2, %v14015_v10, %v2469_v41 }
 0x303   :  { %v3784_v35 = vsel %vm3720_vm4, %v3701_v12, %v3703_v23  ;;  %4183 = vrot.lane.b32.xlu1 %v8996_v20, %s8660_s12  ;;  %2694 = vmatprep.subr.bf16.mxu1 %v2549_v3  ;;  %v11220_v12 = vld [vmem:[%s13291_s2 + $0x30] sm:$0xff]   ;;  %v14018_v3 = vld [vmem:[#allocation61_spill] sm:$0xff] }
 0x304   :  { %4181 = vrot.lane.b32.xlu0 %v14016_v52, %s8660_s12  ;;  %3880 = vmatpush1.bf16.msra.mxu0 %v3784_v35 }
 0x305   :  { %2695 = vmatpush1.bf16.msra.mxu1 %v2548_v21  ;;  %v11208_v55 = vpop.permute.xlu1 %3572  ;;  %v14019_v21 = vld [vmem:[#allocation79_spill] sm:$0xff] }
 0x306   :  { %14017 = vst [vmem:[#allocation18_spill] sm:$0xff] %v11208_v55  ;;  %v3571_v7 = vpop.permute.xlu0 %3570 }
 0x307   :  { %2955 = vrot.lane.b32.xlu1 %v13884_v53, %s8658_s26  ;;  %v3726_v23 = vsel %vm3720_vm4, %v3571_v7, %v11208_v55  ;;  %3898 = vmatmul.mubr.bf16.vlgmr.msra.gmra.mrb[4].mxu0 %v11204_v60  ;;  %v11238_v55 = vld [vmem:[%s13291_s2 + $0x58] sm:$0xff]  }
 0x308   :  { %4179 = vrot.lane.b32.xlu0 %v13831_v62, %s8660_s12  ;;  %3971 = vmatprep.subr.bf16.mxu0 %v3726_v23 }
 0x309   :  { %v2337_v41 = vpop.permute.xlu1 %2336  ;;  %2713 = vmatmul.mubr.bf16.vlgmr.msra.gmra.mrb[8].mxu1 %v11220_v12  ;;  %3907 = vmatprep.mubr.bf16.mxu0 %v13707_v25 }
 0x30a   :  { %v11224_v18 = vpop.permute.xlu0 %3568  ;;  %v2490_v10 = vsel %vm2482_vm2, %v2337_v41, %v14018_v3  ;;  %v2489_v35 = vsel %vm2482_vm2, %v14019_v21, %v2337_v41  ;;  %2722 = vmatprep.mubr.bf16.mxu1 %v13707_v25  ;;  %v11254_v21 = vld [vmem:[%s13291_s2 + $0x38] sm:$0xff]  }
 0x30b   :  { %4203 = vrot.lane.b32.xlu1 %v9165_v47, %s8660_s12  ;;  %2786 = vmatprep.subr.bf16.mxu1 %v2490_v10  ;;  %v3725_v23 = vsel %vm3720_vm4, %v11224_v18, %v3571_v7 }
 0x30c   :  { %4201 = vrot.lane.b32.xlu0 %v14020_v42, %s8660_s12  ;;  %3972 = vmatpush1.bf16.msra.mxu0 %v3725_v23  ;;  %v14022_v23 = vld [vmem:[#allocation41_spill] sm:$0xff] }
 0x30d   :  { %2787 = vmatpush1.bf16.msra.mxu1 %v2489_v35  ;;  %v11242_v41 = vpop.permute.xlu1 %3592 }
 0x30e   :  { %14021 = vst [vmem:[#allocation112_spill] sm:$0xff] %v11242_v41  ;;  %v3591_v3 = vpop.permute.xlu0 %3590 }
 0x30f   :  { %2975 = vrot.lane.b32.xlu1 %v13885_v49, %s8658_s26  ;;  %v3735_v10 = vsel %vm3720_vm4, %v3591_v3, %v11242_v41  ;;  %3908 = vmatmul.mubr.bf16.gmra.mrb[8].mxu0 %v11238_v55 }
 0x310   :  { %4199 = vrot.lane.b32.xlu0 %v9142_v32, %s8660_s12  ;;  %3973 = vmatprep.subr.bf16.mxu0 %v3735_v10 }
 0x311   :  { %v2357_v7 = vpop.permute.xlu1 %2356  ;;  %2723 = vmatmul.mubr.bf16.gmra.mrb[12].mxu1 %v11254_v21  ;;  %4003 = vmatprep.mubr.bf16.mxu0 %v13707_v25 }
 0x312   :  { %v11258_v35 = vpop.permute.xlu0 %3588  ;;  %v2499_v41 = vsel %vm2482_vm2, %v2357_v7, %v14022_v23  ;;  %v2498_v43 = vsel %vm2482_vm2, %v14023_v15, %v2357_v7  ;;  %2818 = vmatprep.mubr.bf16.mxu1 %v13707_v25  ;;  %v14025_v7 = vld [vmem:[#allocation29_spill] sm:$0xff] }
 0x313   :  { %4223 = vrot.lane.b32.xlu1 %v9200_v4, %s8660_s12  ;;  %2788 = vmatprep.subr.bf16.mxu1 %v2499_v41  ;;  %v3734_v10 = vsel %vm3720_vm4, %v11258_v35, %v3591_v3  ;;  %v14026_v4 = vld [vmem:[#allocation62_spill] sm:$0xff] }
 0x314   :  { %4221 = vrot.lane.b32.xlu0 %v9211_v31, %s8660_s12  ;;  %3974 = vmatpush1.bf16.msra.mxu0 %v3734_v10 }
 0x315   :  { %2789 = vmatpush1.bf16.msra.mxu1 %v2498_v43  ;;  %v11271_v32 = vpop.permute.xlu1 %3612  ;;  %v14027_v43 = vld [vmem:[#allocation90_spill] sm:$0xff] }
 0x316   :  { %14024 = vst [vmem:[#allocation75_spill] sm:$0xff] %v11271_v32  ;;  %v3611_v23 = vpop.permute.xlu0 %3610 }
 0x317   :  { %2995 = vrot.lane.b32.xlu1 %v13889_v34, %s8658_s26  ;;  %v3744_v15 = vsel %vm3720_vm4, %v3611_v23, %v11271_v32 }
 0x318   :  { %4219 = vrot.lane.b32.xlu0 %v14025_v7, %s8660_s12  ;;  %3975 = vmatprep.subr.bf16.mxu0 %v3744_v15 }
 0x319   :  { %v2377_v41 = vpop.permute.xlu1 %2376 }
 0x31a   :  { %v11279_v3 = vpop.permute.xlu0 %3608  ;;  %v2508_v10 = vsel %vm2482_vm2, %v2377_v41, %v14026_v4  ;;  %v2507_v31 = vsel %vm2482_vm2, %v14027_v43, %v2377_v41 }
 0x31b   :  { %4243 = vrot.lane.b32.xlu1 %v9235_v39, %s8660_s12  ;;  %2790 = vmatprep.subr.bf16.mxu1 %v2508_v10  ;;  %v3743_v32 = vsel %vm3720_vm4, %v11279_v3, %v3611_v23  ;;  %v14029_v10 = vld [vmem:[#allocation46_spill] sm:$0xff] }
 0x31c   :  { %4241 = vrot.lane.b32.xlu0 %v9217_v61, %s8660_s12  ;;  %3976 = vmatpush1.bf16.msra.mxu0 %v3743_v32 }
 0x31d   :  { %2791 = vmatpush1.bf16.msra.mxu1 %v2507_v31  ;;  %v11291_v15 = vpop.permute.xlu1 %3632  ;;  %v14030_v31 = vld [vmem:[#allocation95_spill] sm:$0xff] }
 0x31e   :  { %14028 = vst [vmem:[#allocation83_spill] sm:$0xff] %v11291_v15  ;;  %v3631_v7 = vpop.permute.xlu0 %3630 }
 0x31f   :  { %3015 = vrot.lane.b32.xlu1 %v13893_v57, %s8658_s26  ;;  %v3753_v4 = vsel %vm3720_vm4, %v3631_v7, %v11291_v15 }
 0x320   :  { %4239 = vrot.lane.b32.xlu0 %v9229_v48, %s8660_s12  ;;  %3977 = vmatprep.subr.bf16.mxu0 %v3753_v4 }
 0x321   :  { %v2397_v41 = vpop.permute.xlu1 %2396 }
 0x322   :  { %v11299_v23 = vpop.permute.xlu0 %3628  ;;  %v2517_v32 = vsel %vm2482_vm2, %v2397_v41, %v14029_v10  ;;  %v2516_v43 = vsel %vm2482_vm2, %v14030_v31, %v2397_v41  ;;  %v14033_v31 = vld [vmem:[#allocation10_spill] sm:$0xff] }
 0x323   :  { %4263 = vrot.lane.b32.xlu1 %v13763_v37, %s8660_s12  ;;  %2792 = vmatprep.subr.bf16.mxu1 %v2517_v32  ;;  %v3752_v15 = vsel %vm3720_vm4, %v11299_v23, %v3631_v7  ;;  %v14032_v32 = vld [vmem:[#allocation63_spill] sm:$0xff] }
 0x324   :  { %4261 = vrot.lane.b32.xlu0 %v13764_v44, %s8660_s12  ;;  %3978 = vmatpush1.bf16.msra.mxu0 %v3752_v15 }
 0x325   :  { %2793 = vmatpush1.bf16.msra.mxu1 %v2516_v43  ;;  %v11311_v4 = vpop.permute.xlu1 %3652 }
 0x326   :  { %14031 = vst [vmem:[#allocation114_spill] sm:$0xff] %v11311_v4  ;;  %v3651_v48 = vpop.permute.xlu0 %3650 }
 0x327   :  { %3035 = vrot.lane.b32.xlu1 %v13894_v58, %s8658_s26  ;;  %v3762_v41 = vsel %vm3720_vm4, %v3651_v48, %v11311_v4 }
 0x328   :  { %4259 = vrot.lane.b32.xlu0 %v13768_v38, %s8660_s12  ;;  %3979 = vmatprep.subr.bf16.mxu0 %v3762_v41 }
 0x329   :  { %v2417_v10 = vpop.permute.xlu1 %2416 }
 0x32a   :  { %v11319_v7 = vpop.permute.xlu0 %3648  ;;  %v2526_v15 = vsel %vm2482_vm2, %v2417_v10, %v14032_v32  ;;  %v2525_v43 = vsel %vm2482_vm2, %v14033_v31, %v2417_v10  ;;  %v14035_v32 = vld [vmem:[#allocation37_spill] sm:$0xff]  ;;  %v14036_v31 = vld [vmem:[#allocation50_spill] sm:$0xff] }
 0x32b   :  { %4283 = vrot.lane.b32.xlu1 %v13839_v33, %s8660_s12  ;;  %2794 = vmatprep.subr.bf16.mxu1 %v2526_v15  ;;  %v3761_v4 = vsel %vm3720_vm4, %v11319_v7, %v3651_v48 }
 0x32c   :  { %4281 = vrot.lane.b32.xlu0 %v13769_v40, %s8660_s12  ;;  %3980 = vmatpush1.bf16.msra.mxu0 %v3761_v4 }
 0x32d   :  { %2795 = vmatpush1.bf16.msra.mxu1 %v2525_v43  ;;  %v11331_v41 = vpop.permute.xlu1 %3672  ;;  %v14037_v43 = vld [vmem:[#allocation55_spill] sm:$0xff] }
 0x32e   :  { %14034 = vst [vmem:[#allocation87_spill] sm:$0xff] %v11331_v41  ;;  %v3671_v38 = vpop.permute.xlu0 %3670 }
 0x32f   :  { %3055 = vrot.lane.b32.xlu1 %v13898_v26, %s8658_s26  ;;  %v3771_v10 = vsel %vm3720_vm4, %v3671_v38, %v11331_v41 }
 0x330   :  { %4279 = vrot.lane.b32.xlu0 %v14035_v32, %s8660_s12  ;;  %3981 = vmatprep.subr.bf16.mxu0 %v3771_v10 }
 0x331   :  { %v2437_v15 = vpop.permute.xlu1 %2436 }
 0x332   :  { %v11339_v48 = vpop.permute.xlu0 %3668  ;;  %v2535_v4 = vsel %vm2482_vm2, %v2437_v15, %v14036_v31  ;;  %v2534_v40 = vsel %vm2482_vm2, %v14037_v43, %v2437_v15 }
 0x333   :  { %4303 = vrot.lane.b32.xlu1 %v13841_v16, %s8660_s12  ;;  %2796 = vmatprep.subr.bf16.mxu1 %v2535_v4  ;;  %v3770_v41 = vsel %vm3720_vm4, %v11339_v48, %v3671_v38  ;;  %v14039_v4 = vld [vmem:[#allocation92_spill] sm:$0xff] }
 0x334   :  { %4301 = vrot.lane.b32.xlu0 %v13934_v59, %s8660_s12  ;;  %3982 = vmatpush1.bf16.msra.mxu0 %v3770_v41 }
 0x335   :  { %2797 = vmatpush1.bf16.msra.mxu1 %v2534_v40  ;;  %v11351_v10 = vpop.permute.xlu1 %3692  ;;  %v14040_v40 = vld [vmem:[#allocation59_spill] sm:$0xff] }
 0x336   :  { %14038 = vst [vmem:[#allocation116_spill] sm:$0xff] %v11351_v10  ;;  %v3691_v32 = vpop.permute.xlu0 %3690 }
 0x337   :  { %3075 = vrot.lane.b32.xlu1 %v13902_v22, %s8658_s26  ;;  %v3780_v15 = vsel %vm3720_vm4, %v3691_v32, %v11351_v10 }
 0x338   :  { %4299 = vrot.lane.b32.xlu0 %v13845_v28, %s8660_s12  ;;  %3983 = vmatprep.subr.bf16.mxu0 %v3780_v15 }
 0x339   :  { %v2457_v31 = vpop.permute.xlu1 %2456 }
 0x33a   :  { %v11359_v38 = vpop.permute.xlu0 %3688  ;;  %v2544_v41 = vsel %vm2482_vm2, %v2457_v31, %v14039_v4  ;;  %v2543_v43 = vsel %vm2482_vm2, %v14040_v40, %v2457_v31  ;;  %v14044_v40 = vld [vmem:[#allocation60_spill] sm:$0xff] }
 0x33b   :  { %4323 = vrot.lane.b32.xlu1 %v13847_v8, %s8660_s12  ;;  %2798 = vmatprep.subr.bf16.mxu1 %v2544_v41  ;;  %v3779_v10 = vsel %vm3720_vm4, %v11359_v38, %v3691_v32  ;;  %v14043_v41 = vld [vmem:[#allocation96_spill] sm:$0xff] }
 0x33c   :  { %4321 = vrot.lane.b32.xlu0 %v13785_v54, %s8660_s12  ;;  %3984 = vmatpush1.bf16.msra.mxu0 %v3779_v10  ;;  %v14045_v54 = vld [vmem:[#allocation47_spill] sm:$0xff]  ;;  %v14046_v8 = vld [vmem:[#allocation48_spill] sm:$0xff] }
 0x33d   :  { %2799 = vmatpush1.bf16.msra.mxu1 %v2543_v43  ;;  %v11371_v15 = vpop.permute.xlu1 %3712 }
 0x33e   :  { %14041 = vst [vmem:[#allocation99_spill] sm:$0xff] %v11371_v15  ;;  %v3711_v28 = vpop.permute.xlu0 %3710 }
 0x33f   :  { %3095 = vrot.lane.b32.xlu1 %v13903_v50, %s8658_s26  ;;  %v3789_v31 = vsel %vm3720_vm4, %v3711_v28, %v11371_v15 }
 0x340   :  { %4319 = vrot.lane.b32.xlu0 %v13787_v19, %s8660_s12  ;;  %3985 = vmatprep.subr.bf16.mxu0 %v3789_v31 }
 0x341   :  { %v2477_v4 = vpop.permute.xlu1 %2476 }
 0x342   :  { %v11379_v32 = vpop.permute.xlu0 %3708  ;;  %v2553_v10 = vsel %vm2482_vm2, %v2477_v4, %v14043_v41  ;;  %v2552_v43 = vsel %vm2482_vm2, %v14044_v40, %v2477_v4  ;;  %v14048_v41 = vld [vmem:[#allocation49_spill] sm:$0xff]  ;;  %v14050_v40 = vld [vmem:[#allocation134_spill] sm:$0xff] }
 0x343   :  { %14042 = vst [vmem:[#allocation120_spill] sm:$0xff] %v11379_v32  ;;  %4191 = vrot.lane.b32.xlu1 %v14045_v54, %s8660_s12  ;;  %2800 = vmatprep.subr.bf16.mxu1 %v2553_v10  ;;  %v3788_v15 = vsel %vm3720_vm4, %v11379_v32, %v3711_v28  ;;  %v11405_v10 = vpop.f32.mrb[0].mxu1 }
 0x344   :  { %4189 = vrot.lane.b32.xlu0 %v14046_v8, %s8660_s12  ;;  %3986 = vmatpush1.bf16.msra.mxu0 %v3788_v15  ;;  %14049 = vst [vmem:[#allocation91_spill] sm:$0xff] %v11405_v10 }
 0x345   :  { %2801 = vmatpush1.bf16.msra.mxu1 %v2552_v43  ;;  %v3579_v31 = vpop.permute.xlu1 %3578 }
 0x346   :  { %v11391_v19 = vpop.permute.xlu0 %3576 }
 0x347   :  { %14047 = vst [vmem:[#allocation122_spill] sm:$0xff] %v11391_v19  ;;  %3566 = vrot.lane.b32.xlu1 %v13851_v17, %s8659_s30  ;;  %v3729_v4 = vsel %vm3720_vm4, %v11391_v19, %v3579_v31  ;;  %4004 = vmatmul.mubr.bf16.vlgmr.msra.gmra.mrb[12].mxu0 %v11204_v60  ;;  %v14051_v31 = vld [vmem:[#allocation121_spill] sm:$0xff]  ;;  %v11413_v19 = vpop.f32.mrb[1].mxu1 }
 0x348   :  { %4187 = vrot.lane.b32.xlu0 %v14048_v41, %s8660_s12  ;;  %7911 = vmatprep.subr.bf16.mxu0 %v3729_v4  ;;  %14052 = vst [vmem:[#allocation118_spill] sm:$0xff] %v11413_v19 }
 0x349   :  { %7912 = vmatpush3.bf16.msra.mxu0 %v3729_v4  ;;  %v11400_v28 = vpop.permute.xlu1 %3596  ;;  %2819 = vmatmul.mubr.bf16.vlgmr.msra.gmra.mrb[24].mxu1 %v11220_v12  ;;  %v11417_v12 = vpop.f32.mrb[2].mxu1 }
 0x34a   :  { %v2948_v15 = vpop.permute.xlu0 %2947  ;;  %4013 = vmatprep.mubr.bf16.mxu0 %v13707_v25  ;;  %2828 = vmatprep.mubr.bf16.mxu1 %v13707_v25  ;;  %14053 = vst [vmem:[#allocation107_spill] sm:$0xff] %v11417_v12  ;;  %v11419_v10 = vpop.f32.mrb[3].mxu1  ;;  %v14068_v12 = vld [vmem:[#allocation127_spill] sm:$0xff] }
 0x34b   :  { %4211 = vrot.lane.b32.xlu1 %v9360_v11, %s8660_s12  ;;  %v3105_v43 = vsel %vm3101_vm3, %v2948_v15, %v14050_v40  ;;  %v3104_v4 = vsel %vm3101_vm3, %v14051_v31, %v2948_v15  ;;  %14054 = vst [vmem:[#allocation123_spill] sm:$0xff] %v11419_v10  ;;  %v14055_v11 = vld [vmem:[#allocation64_spill] sm:$0xff]  ;;  %v14056_v40 = vld [vmem:[#allocation109_spill] sm:$0xff] }
 0x34c   :  { %4209 = vrot.lane.b32.xlu0 %v9366_v0, %s8660_s12  ;;  %3299 = vmatprep.subr.bf16.mxu1 %v3105_v43 }
 0x34d   :  { %3300 = vmatpush1.bf16.msra.mxu1 %v3104_v4  ;;  %v2968_v41 = vpop.permute.xlu1 %2967 }
 0x34e   :  { %v3599_v8 = vpop.permute.xlu0 %3598  ;;  %v3114_v54 = vsel %vm3101_vm3, %v2968_v41, %v14055_v11  ;;  %v3113_v32 = vsel %vm3101_vm3, %v14056_v40, %v2968_v41  ;;  %v14059_v41 = vld [vmem:[#allocation124_spill] sm:$0xff] }
 0x34f   :  { %3586 = vrot.lane.b32.xlu1 %v13855_v45, %s8659_s30  ;;  %3301 = vmatprep.subr.bf16.mxu1 %v3114_v54  ;;  %v3738_v15 = vsel %vm3720_vm4, %v11400_v28, %v3599_v8 }
 0x350   :  { %4207 = vrot.lane.b32.xlu0 %v13797_v24, %s8660_s12  ;;  %7913 = vmatprep.subr.bf16.mxu0 %v3738_v15 }
 0x351   :  { %3302 = vmatpush1.bf16.msra.mxu1 %v3113_v32  ;;  %7914 = vmatpush3.bf16.msra.mxu0 %v3738_v15  ;;  %v3619_v43 = vpop.permute.xlu1 %3618  ;;  %v14060_v15 = vld [vmem:[#allocation66_spill] sm:$0xff] }
 0x352   :  { %v11431_v31 = vpop.permute.xlu0 %3616  ;;  %4014 = vmatmul.mubr.bf16.gmra.mrb[16].mxu0 %v11238_v55  ;;  %2829 = vmatmul.mubr.bf16.gmra.mrb[28].mxu1 %v11254_v21  ;;  %v14058_v21 = vld [vmem:[#allocation65_spill] sm:$0xff] }
 0x353   :  { %4231 = vrot.lane.b32.xlu1 %v9380_v1, %s8660_s12  ;;  %v3747_v11 = vsel %vm3720_vm4, %v11431_v31, %v3619_v43  ;;  %7927 = vmatprep.mubr.bf16.mxu0 %v11204_v60 }
 0x354   :  { %4229 = vrot.lane.b32.xlu0 %v9076_v36, %s8660_s12  ;;  %7915 = vmatprep.subr.bf16.mxu0 %v3747_v11 }
 0x355   :  { %7916 = vmatpush3.bf16.msra.mxu0 %v3747_v11  ;;  %v11442_v54 = vpop.permute.xlu1 %3636  ;;  %3331 = vmatprep.mubr.bf16.mxu1 %v13707_v25  ;;  %v14061_v11 = vld [vmem:[#allocation113_spill] sm:$0xff] }
 0x356   :  { %14057 = vst [vmem:[#allocation6_spill] sm:$0xff] %v11442_v54  ;;  %v2988_v8 = vpop.permute.xlu0 %2987 }
 0x357   :  { %3606 = vrot.lane.b32.xlu1 %v13859_v6, %s8659_s30  ;;  %v3123_v32 = vsel %vm3101_vm3, %v2988_v8, %v14058_v21  ;;  %v3122_v4 = vsel %vm3101_vm3, %v14059_v41, %v2988_v8  ;;  %v14062_v21 = vld [vmem:[#allocation11_spill] sm:$0xff] }
 0x358   :  { %4227 = vrot.lane.b32.xlu0 %v13800_v30, %s8660_s12  ;;  %3303 = vmatprep.subr.bf16.mxu1 %v3123_v32 }
 0x359   :  { %3304 = vmatpush1.bf16.msra.mxu1 %v3122_v4  ;;  %v3008_v60 = vpop.permute.xlu1 %3007 }
 0x35a   :  { %v3639_v40 = vpop.permute.xlu0 %3638  ;;  %v3132_v43 = vsel %vm3101_vm3, %v3008_v60, %v14060_v15  ;;  %v3131_v10 = vsel %vm3101_vm3, %v14061_v11, %v3008_v60  ;;  %v14064_v60 = vld [vmem:[#allocation12_spill] sm:$0xff]  ;;  %v14067_v11 = vld [vmem:[#allocation67_spill] sm:$0xff] }
 0x35b   :  { %4251 = vrot.lane.b32.xlu1 %v13757_v13, %s8660_s12  ;;  %3305 = vmatprep.subr.bf16.mxu1 %v3132_v43  ;;  %v3756_v8 = vsel %vm3720_vm4, %v11442_v54, %v3639_v40  ;;  %v11473_v43 = vpop.f32.mrb[4].mxu1 }
 0x35c   :  { %4249 = vrot.lane.b32.xlu0 %v14062_v21, %s8660_s12  ;;  %7917 = vmatprep.subr.bf16.mxu0 %v3756_v8  ;;  %14065 = vst [vmem:[#allocation69_spill] sm:$0xff] %v11473_v43 }
 0x35d   :  { %3306 = vmatpush1.bf16.msra.mxu1 %v3131_v10  ;;  %7918 = vmatpush3.bf16.msra.mxu0 %v3756_v8  ;;  %v3659_v32 = vpop.permute.xlu1 %3658  ;;  %v14066_v10 = vld [vmem:[#allocation58_spill] sm:$0xff] }
 0x35e   :  { %v11463_v41 = vpop.permute.xlu0 %3656 }
 0x35f   :  { %14063 = vst [vmem:[#allocation98_spill] sm:$0xff] %v11463_v41  ;;  %3626 = vrot.lane.b32.xlu1 %v13863_v46, %s8659_s30  ;;  %v3765_v4 = vsel %vm3720_vm4, %v11463_v41, %v3659_v32  ;;  %v11481_v32 = vpop.f32.mrb[5].mxu1  ;;  %v14070_v41 = vld [vmem:[#allocation13_spill] sm:$0xff] }
 0x360   :  { %4247 = vrot.lane.b32.xlu0 %v14064_v60, %s8660_s12  ;;  %7919 = vmatprep.subr.bf16.mxu0 %v3765_v4  ;;  %14069 = vst [vmem:[#allocation125_spill] sm:$0xff] %v11481_v32 }
 0x361   :  { %7920 = vmatpush3.bf16.msra.mxu0 %v3765_v4  ;;  %v11471_v40 = vpop.permute.xlu1 %3676  ;;  %v11485_v4 = vpop.f32.mrb[6].mxu1 }
 0x362   :  { %v3028_v15 = vpop.permute.xlu0 %3027  ;;  %14071 = vst [vmem:[#allocation9_spill] sm:$0xff] %v11485_v4  ;;  %v11487_v43 = vpop.f32.mrb[7].mxu1 }
 0x363   :  { %4271 = vrot.lane.b32.xlu1 %v14066_v10, %s8660_s12  ;;  %v3141_v8 = vsel %vm3101_vm3, %v3028_v15, %v14067_v11  ;;  %v3140_v19 = vsel %vm3101_vm3, %v14068_v12, %v3028_v15  ;;  %14072 = vst [vmem:[#allocation56_spill] sm:$0xff] %v11487_v43  ;;  %v14073_v10 = vld [vmem:[#allocation68_spill] sm:$0xff]  ;;  %v14074_v11 = vld [vmem:[#allocation119_spill] sm:$0xff]  ;;  %v14075_v15 = vld [vmem:[#allocation14_spill] sm:$0xff] }
 0x364   :  { %4269 = vrot.lane.b32.xlu0 %v14070_v41, %s8660_s12  ;;  %3307 = vmatprep.subr.bf16.mxu1 %v3141_v8  ;;  %v14080_v43 = vld [vmem:[#allocation130_spill] sm:$0xff] }
 0x365   :  { %3308 = vmatpush1.bf16.msra.mxu1 %v3140_v19  ;;  %v3048_v60 = vpop.permute.xlu1 %3047 }
 0x366   :  { %v3679_v21 = vpop.permute.xlu0 %3678  ;;  %v3150_v13 = vsel %vm3101_vm3, %v3048_v60, %v14073_v10  ;;  %v3149_v54 = vsel %vm3101_vm3, %v14074_v11, %v3048_v60  ;;  %v14077_v10 = vld [vmem:[#allocation15_spill] sm:$0xff] }
 0x367   :  { %3646 = vrot.lane.b32.xlu1 %v13867_v63, %s8659_s30  ;;  %3309 = vmatprep.subr.bf16.mxu1 %v3150_v13  ;;  %v3774_v12 = vsel %vm3720_vm4, %v11471_v40, %v3679_v21  ;;  %v14078_v13 = vld [vmem:[#allocation17_spill] sm:$0xff] }
 0x368   :  { %4267 = vrot.lane.b32.xlu0 %v14075_v15, %s8660_s12  ;;  %7921 = vmatprep.subr.bf16.mxu0 %v3774_v12 }
 0x369   :  { %3310 = vmatpush1.bf16.msra.mxu1 %v3149_v54  ;;  %7922 = vmatpush3.bf16.msra.mxu0 %v3774_v12  ;;  %v3699_v19 = vpop.permute.xlu1 %3698  ;;  %v14079_v54 = vld [vmem:[#allocation71_spill] sm:$0xff] }
 0x36a   :  { %v11499_v8 = vpop.permute.xlu0 %3696 }
 0x36b   :  { %14076 = vst [vmem:[#allocation70_spill] sm:$0xff] %v11499_v8  ;;  %4291 = vrot.lane.b32.xlu1 %v14077_v10, %s8660_s12  ;;  %v3783_v60 = vsel %vm3720_vm4, %v11499_v8, %v3699_v19 }
 0x36c   :  { %4289 = vrot.lane.b32.xlu0 %v14078_v13, %s8660_s12  ;;  %7923 = vmatprep.subr.bf16.mxu0 %v3783_v60  ;;  %v14082_v13 = vld [vmem:[#allocation132_spill] sm:$0xff] }
 0x36d   :  { %7924 = vmatpush3.bf16.msra.mxu0 %v3783_v60  ;;  %v11507_v21 = vpop.permute.xlu1 %3716  ;;  %v14081_v60 = vld [vmem:[#allocation72_spill] sm:$0xff] }
 0x36e   :  { %v3068_v11 = vpop.permute.xlu0 %3067 }
 0x36f   :  { %3666 = vrot.lane.b32.xlu1 %v13871_v27, %s8659_s30  ;;  %v3159_v12 = vsel %vm3101_vm3, %v3068_v11, %v14079_v54  ;;  %v3158_v4 = vsel %vm3101_vm3, %v14080_v43, %v3068_v11  ;;  %v14084_v54 = vld [vmem:[#allocation76_spill] sm:$0xff] }
 0x370   :  { %4287 = vrot.lane.b32.xlu0 %v13970_v51, %s8660_s12  ;;  %3311 = vmatprep.subr.bf16.mxu1 %v3159_v12 }
 0x371   :  { %3312 = vmatpush1.bf16.msra.mxu1 %v3158_v4  ;;  %v3088_v19 = vpop.permute.xlu1 %3087 }
 0x372   :  { %v3719_v32 = vpop.permute.xlu0 %3718  ;;  %v3168_v8 = vsel %vm3101_vm3, %v3088_v19, %v14081_v60  ;;  %v3167_v10 = vsel %vm3101_vm3, %v14082_v13, %v3088_v19  ;;  %v14085_v19 = vld [vmem:[#allocation133_spill] sm:$0xff] }
 0x373   :  { %4311 = vrot.lane.b32.xlu1 %v13973_v29, %s8660_s12  ;;  %3313 = vmatprep.subr.bf16.mxu1 %v3168_v8  ;;  %v3792_v43 = vsel %vm3720_vm4, %v11507_v21, %v3719_v32  ;;  %v11539_v8 = vld [vmem:[%s13291_s2 + $0x40] sm:$0xff]  }
 0x374   :  { %4309 = vrot.lane.b32.xlu0 %v13974_v2, %s8660_s12  ;;  %7925 = vmatprep.subr.bf16.mxu0 %v3792_v43 }
 0x375   :  { %3314 = vmatpush1.bf16.msra.mxu1 %v3167_v10  ;;  %7926 = vmatpush3.bf16.msra.mxu0 %v3792_v43  ;;  %v11527_v4 = vpop.permute.xlu1 %4183  ;;  %v14086_v43 = vld [vmem:[#allocation25_spill] sm:$0xff] }
 0x376   :  { %14083 = vst [vmem:[#allocation126_spill] sm:$0xff] %v11527_v4  ;;  %v4182_v11 = vpop.permute.xlu0 %4181 }
 0x377   :  { %3686 = vrot.lane.b32.xlu1 %v13875_v5, %s8659_s30  ;;  %v4341_v13 = vsel %vm4339_vm5, %v4182_v11, %v11527_v4  ;;  %v11595_v4 = vpop.f32.mrb[16].mxu1 }
 0x378   :  { %4307 = vrot.lane.b32.xlu0 %v13976_v9, %s8660_s12  ;;  %4484 = vmatprep.subr.bf16.mxu0 %v4341_v13  ;;  %14097 = vst [vmem:[#allocation129_spill] sm:$0xff] %v11595_v4 }
 0x379   :  { %v2956_v32 = vpop.permute.xlu1 %2955  ;;  %7928 = vmatmul.mubr.bf16.vlgmr.msra.gmra.mrb[0].mxu0 %v11238_v55  ;;  %3332 = vmatmul.mubr.bf16.vlgmr.msra.gmra.mrb[8].mxu1 %v11539_v8 }
 0x37a   :  { %v4180_v10 = vpop.permute.xlu0 %4179  ;;  %v3109_v12 = vsel %vm3101_vm3, %v2956_v32, %v14084_v54  ;;  %v3108_v60 = vsel %vm3101_vm3, %v14085_v19, %v2956_v32  ;;  %3341 = vmatprep.mubr.bf16.mxu1 %v13707_v25  ;;  %4516 = vmatprep.mubr.bf16.mxu0 %v13707_v25 }
 0x37b   :  { %v4340_v55 = vsel %vm4339_vm5, %v4180_v10, %v4182_v11  ;;  %4331 = vrot.lane.b32.xlu1 %v13790_v56, %s8660_s12  ;;  %3405 = vmatprep.subr.bf16.mxu1 %v3109_v12  ;;  %v14088_v11 = vld [vmem:[#allocation26_spill] sm:$0xff] }
 0x37c   :  { %4329 = vrot.lane.b32.xlu0 %v14086_v43, %s8660_s12  ;;  %4485 = vmatpush1.bf16.msra.mxu0 %v4340_v55  ;;  %v11564_v12 = vld [vmem:[%s13291_s2 + $0x48] sm:$0xff]  }
 0x37d   :  { %3406 = vmatpush1.bf16.msra.mxu1 %v3108_v60  ;;  %v11553_v13 = vpop.permute.xlu1 %4203  ;;  %v14089_v60 = vld [vmem:[#allocation77_spill] sm:$0xff]  ;;  %v14090_v43 = vld [vmem:[#allocation82_spill] sm:$0xff] }
 0x37e   :  { %14087 = vst [vmem:[#allocation115_spill] sm:$0xff] %v11553_v13  ;;  %v4202_v54 = vpop.permute.xlu0 %4201 }
 0x37f   :  { %3706 = vrot.lane.b32.xlu1 %v13878_v14, %s8659_s30  ;;  %v4350_v32 = vsel %vm4339_vm5, %v4202_v54, %v11553_v13 }
 0x380   :  { %4327 = vrot.lane.b32.xlu0 %v14088_v11, %s8660_s12  ;;  %4486 = vmatprep.subr.bf16.mxu0 %v4350_v32  ;;  %v11573_v32 = vld [vmem:[#allocation4] sm:$0xff]  }
 0x381   :  { %v2976_v10 = vpop.permute.xlu1 %2975  ;;  %3342 = vmatmul.mubr.bf16.gmra.mrb[12].mxu1 %v11564_v12  ;;  %14091 = vst [vmem:[#allocation128_spill] sm:$0xff] %v11573_v32  ;;  %v11577_v11 = vld [vmem:[#allocation3 + $0x20] ss:$36 sps:$4 sm:$0xff]  }
 0x382   :  { %v4200_v19 = vpop.permute.xlu0 %4199  ;;  %v3118_v55 = vsel %vm3101_vm3, %v2976_v10, %v14089_v60  ;;  %v3117_v56 = vsel %vm3101_vm3, %v14090_v43, %v2976_v10  ;;  %3437 = vmatprep.mubr.bf16.mxu1 %v13707_v25  ;;  %14092 = vst [vmem:[#allocation57_spill] sm:$0xff] %v11577_v11  ;;  %v11583_v10 = vld [vmem:[#allocation3 + $0x68] ss:$36 sps:$4 sm:$0xff]  }
 0x383   :  { %v4349_v13 = vsel %vm4339_vm5, %v4200_v19, %v4202_v54  ;;  %4197 = vrot.lane.b32.xlu1 %v11573_v32, %s8660_s12  ;;  %3407 = vmatprep.subr.bf16.mxu1 %v3118_v55  ;;  %14094 = vst [vmem:[#allocation117_spill] sm:$0xff] %v11583_v10 }
 0x384   :  { %4195 = vrot.lane.b32.xlu0 %v11577_v11, %s8660_s12  ;;  %4487 = vmatpush1.bf16.msra.mxu0 %v4349_v13  ;;  %v14095_v11 = vld [vmem:[#allocation81_spill] sm:$0xff]  ;;  %v14096_v13 = vld [vmem:[#allocation88_spill] sm:$0xff] }
 0x385   :  { %3408 = vmatpush1.bf16.msra.mxu1 %v3117_v56  ;;  %v11581_v60 = vpop.permute.xlu1 %4223 }
 0x386   :  { %14093 = vst [vmem:[#allocation73_spill] sm:$0xff] %v11581_v60  ;;  %v4222_v43 = vpop.permute.xlu0 %4221 }
 0x387   :  { %4215 = vrot.lane.b32.xlu1 %v11583_v10, %s8660_s12  ;;  %v4359_v54 = vsel %vm4339_vm5, %v4222_v43, %v11581_v60  ;;  %v11600_v60 = vpop.f32.mrb[17].mxu1  ;;  %v11602_v10 = vld [vmem:[#allocation4 + $0x8] sm:$0xff]  }
 0x388   :  { %3574 = vrot.lane.b32.xlu0 %v13884_v53, %s8659_s30  ;;  %4488 = vmatprep.subr.bf16.mxu0 %v4359_v54  ;;  %14098 = vst [vmem:[#allocation31_spill] sm:$0xff] %v11600_v60  ;;  %14099 = vst [vmem:[#allocation74_spill] sm:$0xff] %v11602_v10  ;;  %v14106_v60 = vld [vmem:[#allocation94_spill] sm:$0xff] }
 0x389   :  { %v2996_v19 = vpop.permute.xlu1 %2995 }
 0x38a   :  { %v4220_v55 = vpop.permute.xlu0 %4219  ;;  %v3127_v56 = vsel %vm3101_vm3, %v2996_v19, %v14095_v11  ;;  %v3126_v32 = vsel %vm3101_vm3, %v14096_v13, %v2996_v19  ;;  %v11606_v11 = vpop.f32.mrb[18].mxu1  ;;  %v11618_v13 = vld [vmem:[#allocation3 + $0xb0] ss:$36 sps:$4 sm:$0xff]  }
 0x38b   :  { %v4358_v9 = vsel %vm4339_vm5, %v4220_v55, %v4222_v43  ;;  %3594 = vrot.lane.b32.xlu1 %v13885_v49, %s8659_s30  ;;  %3409 = vmatprep.subr.bf16.mxu1 %v3127_v56  ;;  %14100 = vst [vmem:[#allocation131_spill] sm:$0xff] %v11606_v11  ;;  %v11610_v19 = vpop.f32.mrb[19].mxu1  ;;  %v11612_v55 = vld [vmem:[#allocation4 + $0x10] sm:$0xff]   ;;  %14104 = vst [vmem:[#allocation61_spill] sm:$0xff] %v11618_v13  ;;  %v14105_v11 = vld [vmem:[#allocation80_spill] sm:$0xff] }
 0x38c   :  { %4217 = vrot.lane.b32.xlu0 %v11602_v10, %s8660_s12  ;;  %4489 = vmatpush1.bf16.msra.mxu0 %v4358_v9  ;;  %14102 = vst [vmem:[#allocation78_spill] sm:$0xff] %v11610_v19  ;;  %14103 = vst [vmem:[#allocation5_spill] sm:$0xff] %v11612_v55 }
 0x38d   :  { %3410 = vmatpush1.bf16.msra.mxu1 %v3126_v32  ;;  %v11608_v54 = vpop.permute.xlu1 %4243 }
 0x38e   :  { %14101 = vst [vmem:[#allocation36_spill] sm:$0xff] %v11608_v54  ;;  %v4242_v43 = vpop.permute.xlu0 %4241 }
 0x38f   :  { %4237 = vrot.lane.b32.xlu1 %v11612_v55, %s8660_s12  ;;  %v4368_v56 = vsel %vm4339_vm5, %v4242_v43, %v11608_v54  ;;  %v11627_v55 = vld [vmem:[#allocation3 + $0xf8] ss:$36 sps:$4 sm:$0xff]  }
 0x390   :  { %4235 = vrot.lane.b32.xlu0 %v11618_v13, %s8660_s12  ;;  %4490 = vmatprep.subr.bf16.mxu0 %v4368_v56  ;;  %14107 = vst [vmem:[#allocation79_spill] sm:$0xff] %v11627_v55  ;;  %v11648_v13 = vld [vmem:[#allocation4 + $0x20] sm:$0xff]  }
 0x391   :  { %v3016_v9 = vpop.permute.xlu1 %3015  ;;  %14112 = vst [vmem:[#allocation62_spill] sm:$0xff] %v11648_v13 }
 0x392   :  { %v4240_v32 = vpop.permute.xlu0 %4239  ;;  %v3136_v19 = vsel %vm3101_vm3, %v3016_v9, %v14105_v11  ;;  %v3135_v4 = vsel %vm3101_vm3, %v14106_v60, %v3016_v9  ;;  %v11639_v11 = vld [vmem:[#allocation4 + $0x18] sm:$0xff]   ;;  %v14110_v9 = vld [vmem:[#allocation85_spill] sm:$0xff] }
 0x393   :  { %v4367_v10 = vsel %vm4339_vm5, %v4240_v32, %v4242_v43  ;;  %4255 = vrot.lane.b32.xlu1 %v11627_v55, %s8660_s12  ;;  %3411 = vmatprep.subr.bf16.mxu1 %v3136_v19  ;;  %14109 = vst [vmem:[#allocation84_spill] sm:$0xff] %v11639_v11 }
 0x394   :  { %3614 = vrot.lane.b32.xlu0 %v13889_v34, %s8659_s30  ;;  %4491 = vmatpush1.bf16.msra.mxu0 %v4367_v10  ;;  %v14111_v10 = vld [vmem:[#allocation100_spill] sm:$0xff] }
 0x395   :  { %3412 = vmatpush1.bf16.msra.mxu1 %v3135_v4  ;;  %v11633_v56 = vpop.permute.xlu1 %4263 }
 0x396   :  { %14108 = vst [vmem:[#allocation41_spill] sm:$0xff] %v11633_v56  ;;  %v4262_v54 = vpop.permute.xlu0 %4261 }
 0x397   :  { %3634 = vrot.lane.b32.xlu1 %v13893_v57, %s8659_s30  ;;  %v4377_v60 = vsel %vm4339_vm5, %v4262_v54, %v11633_v56  ;;  %v11652_v56 = vld [vmem:[#allocation3 + $0x140] ss:$36 sps:$4 sm:$0xff]  }
 0x398   :  { %4257 = vrot.lane.b32.xlu0 %v11639_v11, %s8660_s12  ;;  %4492 = vmatprep.subr.bf16.mxu0 %v4377_v60  ;;  %14113 = vst [vmem:[#allocation90_spill] sm:$0xff] %v11652_v56  ;;  %v11658_v11 = vld [vmem:[#allocation3 + $0x188] ss:$36 sps:$4 sm:$0xff]  }
 0x399   :  { %v3036_v19 = vpop.permute.xlu1 %3035  ;;  %14115 = vst [vmem:[#allocation95_spill] sm:$0xff] %v11658_v11 }
 0x39a   :  { %v4260_v43 = vpop.permute.xlu0 %4259  ;;  %v3145_v4 = vsel %vm3101_vm3, %v3036_v19, %v14110_v9  ;;  %v3144_v32 = vsel %vm3101_vm3, %v14111_v10, %v3036_v19  ;;  %v14117_v10 = vld [vmem:[#allocation102_spill] sm:$0xff] }
 0x39b   :  { %v4376_v55 = vsel %vm4339_vm5, %v4260_v43, %v4262_v54  ;;  %4277 = vrot.lane.b32.xlu1 %v11648_v13, %s8660_s12  ;;  %3413 = vmatprep.subr.bf16.mxu1 %v3145_v4  ;;  %v14116_v4 = vld [vmem:[#allocation86_spill] sm:$0xff] }
 0x39c   :  { %4275 = vrot.lane.b32.xlu0 %v11652_v56, %s8660_s12  ;;  %4493 = vmatpush1.bf16.msra.mxu0 %v4376_v55  ;;  %v11670_v56 = vpop.f32.mrb[20].mxu1 }
 0x39d   :  { %3414 = vmatpush1.bf16.msra.mxu1 %v3144_v32  ;;  %v11656_v60 = vpop.permute.xlu1 %4283  ;;  %14118 = vst [vmem:[#allocation63_spill] sm:$0xff] %v11670_v56 }
 0x39e   :  { %14114 = vst [vmem:[#allocation46_spill] sm:$0xff] %v11656_v60  ;;  %v4282_v9 = vpop.permute.xlu0 %4281 }
 0x39f   :  { %4295 = vrot.lane.b32.xlu1 %v11658_v11, %s8660_s12  ;;  %v4386_v54 = vsel %vm4339_vm5, %v4282_v9, %v11656_v60  ;;  %v11675_v60 = vpop.f32.mrb[21].mxu1  ;;  %v11677_v11 = vld [vmem:[#allocation4 + $0x28] sm:$0xff]  }
 0x3a0   :  { %3654 = vrot.lane.b32.xlu0 %v13894_v58, %s8659_s30  ;;  %4494 = vmatprep.subr.bf16.mxu0 %v4386_v54  ;;  %14119 = vst [vmem:[#allocation10_spill] sm:$0xff] %v11675_v60  ;;  %14120 = vst [vmem:[#allocation50_spill] sm:$0xff] %v11677_v11  ;;  %v11681_v54 = vpop.f32.mrb[22].mxu1  ;;  %v14126_v60 = vld [vmem:[#allocation104_spill] sm:$0xff] }
 0x3a1   :  { %v3056_v19 = vpop.permute.xlu1 %3055  ;;  %14121 = vst [vmem:[#allocation55_spill] sm:$0xff] %v11681_v54  ;;  %v14125_v54 = vld [vmem:[#allocation19_spill] sm:$0xff] }
 0x3a2   :  { %v4280_v43 = vpop.permute.xlu0 %4279  ;;  %v3154_v55 = vsel %vm3101_vm3, %v3056_v19, %v14116_v4  ;;  %v3153_v32 = vsel %vm3101_vm3, %v14117_v10, %v3056_v19  ;;  %v11685_v4 = vpop.f32.mrb[23].mxu1  ;;  %v11693_v10 = vld [vmem:[#allocation3 + $0x1d0] ss:$36 sps:$4 sm:$0xff]  }
 0x3a3   :  { %v4385_v13 = vsel %vm4339_vm5, %v4280_v43, %v4282_v9  ;;  %3674 = vrot.lane.b32.xlu1 %v13898_v26, %s8659_s30  ;;  %3415 = vmatprep.subr.bf16.mxu1 %v3154_v55  ;;  %14123 = vst [vmem:[#allocation59_spill] sm:$0xff] %v11685_v4  ;;  %v11687_v43 = vld [vmem:[#allocation4 + $0x30] sm:$0xff]  }
 0x3a4   :  { %4297 = vrot.lane.b32.xlu0 %v11677_v11, %s8660_s12  ;;  %4495 = vmatpush1.bf16.msra.mxu0 %v4385_v13  ;;  %14124 = vst [vmem:[#allocation96_spill] sm:$0xff] %v11687_v43 }
 0x3a5   :  { %3416 = vmatpush1.bf16.msra.mxu1 %v3153_v32  ;;  %v11683_v19 = vpop.permute.xlu1 %4303 }
 0x3a6   :  { %14122 = vst [vmem:[#allocation92_spill] sm:$0xff] %v11683_v19  ;;  %v4302_v9 = vpop.permute.xlu0 %4301 }
 0x3a7   :  { %4317 = vrot.lane.b32.xlu1 %v11687_v43, %s8660_s12  ;;  %v4395_v55 = vsel %vm4339_vm5, %v4302_v9, %v11683_v19  ;;  %v11702_v43 = vld [vmem:[#allocation3 + $0x218] ss:$36 sps:$4 sm:$0xff]  }
 0x3a8   :  { %4315 = vrot.lane.b32.xlu0 %v11693_v10, %s8660_s12  ;;  %4496 = vmatprep.subr.bf16.mxu0 %v4395_v55  ;;  %14127 = vst [vmem:[#allocation60_spill] sm:$0xff] %v11702_v43 }
 0x3a9   :  { %v3076_v13 = vpop.permute.xlu1 %3075 }
 0x3aa   :  { %v4300_v32 = vpop.permute.xlu0 %4299  ;;  %v3163_v4 = vsel %vm3101_vm3, %v3076_v13, %v14125_v54  ;;  %v3162_v56 = vsel %vm3101_vm3, %v14126_v60, %v3076_v13  ;;  %v11714_v54 = vld [vmem:[#allocation4 + $0x38] sm:$0xff]   ;;  %v14129_v13 = vld [vmem:[#allocation93_spill] sm:$0xff] }
 0x3ab   :  { %v4394_v11 = vsel %vm4339_vm5, %v4300_v32, %v4302_v9  ;;  %4335 = vrot.lane.b32.xlu1 %v11702_v43, %s8660_s12  ;;  %3417 = vmatprep.subr.bf16.mxu1 %v3163_v4 }
 0x3ac   :  { %3694 = vrot.lane.b32.xlu0 %v13902_v22, %s8659_s30  ;;  %4497 = vmatpush1.bf16.msra.mxu0 %v4394_v11  ;;  %v14130_v11 = vld [vmem:[#allocation106_spill] sm:$0xff] }
 0x3ad   :  { %3418 = vmatpush1.bf16.msra.mxu1 %v3162_v56  ;;  %v11708_v55 = vpop.permute.xlu1 %4323 }
 0x3ae   :  { %14128 = vst [vmem:[#allocation134_spill] sm:$0xff] %v11708_v55  ;;  %v4322_v19 = vpop.permute.xlu0 %4321 }
 0x3af   :  { %3714 = vrot.lane.b32.xlu1 %v13903_v50, %s8659_s30  ;;  %v4404_v60 = vsel %vm4339_vm5, %v4322_v19, %v11708_v55  ;;  %v11728_v55 = vld [vmem:[%s13291_s2 + $0x60] sm:$0xff]  }
 0x3b0   :  { %4337 = vrot.lane.b32.xlu0 %v11714_v54, %s8660_s12  ;;  %4498 = vmatprep.subr.bf16.mxu0 %v4404_v60 }
 0x3b1   :  { %v3096_v4 = vpop.permute.xlu1 %3095 }
 0x3b2   :  { %v4320_v9 = vpop.permute.xlu0 %4319  ;;  %v3172_v56 = vsel %vm3101_vm3, %v3096_v4, %v14129_v13  ;;  %v3171_v32 = vsel %vm3101_vm3, %v14130_v11, %v3096_v4 }
 0x3b3   :  { %v4403_v43 = vsel %vm4339_vm5, %v4320_v9, %v4322_v19  ;;  %4802 = vrot.lane.b32.xlu1 %v8996_v20, %s8661_s25  ;;  %3419 = vmatprep.subr.bf16.mxu1 %v3172_v56  ;;  %v14131_v56 = vld [vmem:[#allocation89_spill] sm:$0xff] }
 0x3b4   :  { %4800 = vrot.lane.b32.xlu0 %v14016_v52, %s8661_s25  ;;  %4499 = vmatpush1.bf16.msra.mxu0 %v4403_v43 }
 0x3b5   :  { %3420 = vmatpush1.bf16.msra.mxu1 %v3171_v32  ;;  %v11732_v60 = vpop.permute.xlu1 %4191 }
 0x3b6   :  { %v4190_v4 = vpop.permute.xlu0 %4189 }
 0x3b7   :  { %4185 = vrot.lane.b32.xlu1 %v13851_v17, %s8660_s12  ;;  %v4345_v19 = vsel %vm4339_vm5, %v4190_v4, %v11732_v60  ;;  %4517 = vmatmul.mubr.bf16.vlgmr.msra.gmra.mrb[4].mxu0 %v11728_v55 }
 0x3b8   :  { %4798 = vrot.lane.b32.xlu0 %v13831_v62, %s8661_s25  ;;  %4590 = vmatprep.subr.bf16.mxu0 %v4345_v19 }
 0x3b9   :  { %v3567_v9 = vpop.permute.xlu1 %3566  ;;  %3438 = vmatmul.mubr.bf16.vlgmr.msra.gmra.mrb[24].mxu1 %v11539_v8  ;;  %4526 = vmatprep.mubr.bf16.mxu0 %v13707_v25  ;;  %v11757_v8 = vld [vmem:[%s13291_s2 + $0x68] sm:$0xff]  }
 0x3ba   :  { %v11743_v43 = vpop.permute.xlu0 %4187  ;;  %v3724_v13 = vsel %vm3720_vm4, %v3567_v9, %v11224_v18  ;;  %v3723_v11 = vsel %vm3720_vm4, %v14131_v56, %v3567_v9  ;;  %3447 = vmatprep.mubr.bf16.mxu1 %v13707_v25 }
 0x3bb   :  { %4822 = vrot.lane.b32.xlu1 %v9165_v47, %s8661_s25  ;;  %3918 = vmatprep.subr.bf16.mxu1 %v3724_v13  ;;  %v4344_v32 = vsel %vm4339_vm5, %v11743_v43, %v4190_v4  ;;  %v14133_v4 = vld [vmem:[#allocation16_spill] sm:$0xff] }
 0x3bc   :  { %4820 = vrot.lane.b32.xlu0 %v14020_v42, %s8661_s25  ;;  %4591 = vmatpush1.bf16.msra.mxu0 %v4344_v32  ;;  %v14134_v32 = vld [vmem:[#allocation97_spill] sm:$0xff] }
 0x3bd   :  { %3919 = vmatpush1.bf16.msra.mxu1 %v3723_v11  ;;  %v11761_v18 = vpop.permute.xlu1 %4211 }
 0x3be   :  { %14132 = vst [vmem:[#allocation121_spill] sm:$0xff] %v11761_v18  ;;  %v4210_v19 = vpop.permute.xlu0 %4209 }
 0x3bf   :  { %4205 = vrot.lane.b32.xlu1 %v13855_v45, %s8660_s12  ;;  %v4354_v9 = vsel %vm4339_vm5, %v4210_v19, %v11761_v18  ;;  %4527 = vmatmul.mubr.bf16.gmra.mrb[8].mxu0 %v11757_v8  ;;  %v14135_v18 = vld [vmem:[#allocation24_spill] sm:$0xff] }
 0x3c0   :  { %4818 = vrot.lane.b32.xlu0 %v14133_v4, %s8661_s25  ;;  %4592 = vmatprep.subr.bf16.mxu0 %v4354_v9 }
 0x3c1   :  { %v3587_v13 = vpop.permute.xlu1 %3586  ;;  %3448 = vmatmul.mubr.bf16.gmra.mrb[28].mxu1 %v11564_v12  ;;  %4622 = vmatprep.mubr.bf16.mxu0 %v13707_v25  ;;  %v14136_v12 = vld [vmem:[#allocation27_spill] sm:$0xff] }
 0x3c2   :  { %v11772_v56 = vpop.permute.xlu0 %4207  ;;  %v3733_v11 = vsel %vm3720_vm4, %v3587_v13, %v11258_v35  ;;  %v3732_v42 = vsel %vm3720_vm4, %v14134_v32, %v3587_v13  ;;  %3950 = vmatprep.mubr.bf16.mxu1 %v13707_v25  ;;  %v14138_v32 = vld [vmem:[#allocation29_spill] sm:$0xff] }
 0x3c3   :  { %4842 = vrot.lane.b32.xlu1 %v14135_v18, %s8661_s25  ;;  %3920 = vmatprep.subr.bf16.mxu1 %v3733_v11  ;;  %v4353_v9 = vsel %vm4339_vm5, %v11772_v56, %v4210_v19 }
 0x3c4   :  { %4840 = vrot.lane.b32.xlu0 %v14136_v12, %s8661_s25  ;;  %4593 = vmatpush1.bf16.msra.mxu0 %v4353_v9 }
 0x3c5   :  { %3921 = vmatpush1.bf16.msra.mxu1 %v3732_v42  ;;  %v11785_v4 = vpop.permute.xlu1 %4231  ;;  %v14139_v42 = vld [vmem:[#allocation108_spill] sm:$0xff] }
 0x3c6   :  { %14137 = vst [vmem:[#allocation64_spill] sm:$0xff] %v11785_v4  ;;  %v4230_v35 = vpop.permute.xlu0 %4229 }
 0x3c7   :  { %4225 = vrot.lane.b32.xlu1 %v13859_v6, %s8660_s12  ;;  %v4363_v13 = vsel %vm4339_vm5, %v4230_v35, %v11785_v4 }
 0x3c8   :  { %4838 = vrot.lane.b32.xlu0 %v14138_v32, %s8661_s25  ;;  %4594 = vmatprep.subr.bf16.mxu0 %v4363_v13 }
 0x3c9   :  { %v3607_v11 = vpop.permute.xlu1 %3606 }
 0x3ca   :  { %v11793_v19 = vpop.permute.xlu0 %4227  ;;  %v3742_v9 = vsel %vm3720_vm4, %v3607_v11, %v11279_v3  ;;  %v3741_v12 = vsel %vm3720_vm4, %v14139_v42, %v3607_v11  ;;  %v14141_v11 = vld [vmem:[#allocation30_spill] sm:$0xff] }
 0x3cb   :  { %4862 = vrot.lane.b32.xlu1 %v9235_v39, %s8661_s25  ;;  %3922 = vmatprep.subr.bf16.mxu1 %v3742_v9  ;;  %v4362_v4 = vsel %vm4339_vm5, %v11793_v19, %v4230_v35 }
 0x3cc   :  { %4860 = vrot.lane.b32.xlu0 %v9217_v61, %s8661_s25  ;;  %4595 = vmatpush1.bf16.msra.mxu0 %v4362_v4 }
 0x3cd   :  { %3923 = vmatpush1.bf16.msra.mxu1 %v3741_v12  ;;  %v11805_v13 = vpop.permute.xlu1 %4251  ;;  %v14142_v12 = vld [vmem:[#allocation101_spill] sm:$0xff] }
 0x3ce   :  { %14140 = vst [vmem:[#allocation109_spill] sm:$0xff] %v11805_v13  ;;  %v4250_v32 = vpop.permute.xlu0 %4249 }
 0x3cf   :  { %4245 = vrot.lane.b32.xlu1 %v13863_v46, %s8660_s12  ;;  %v4372_v3 = vsel %vm4339_vm5, %v4250_v32, %v11805_v13 }
 0x3d0   :  { %4858 = vrot.lane.b32.xlu0 %v14141_v11, %s8661_s25  ;;  %4596 = vmatprep.subr.bf16.mxu0 %v4372_v3 }
 0x3d1   :  { %v3627_v9 = vpop.permute.xlu1 %3626 }
 0x3d2   :  { %v11813_v35 = vpop.permute.xlu0 %4247  ;;  %v3751_v4 = vsel %vm3720_vm4, %v3627_v9, %v11299_v23  ;;  %v3750_v42 = vsel %vm3720_vm4, %v14142_v12, %v3627_v9  ;;  %v14144_v9 = vld [vmem:[#allocation35_spill] sm:$0xff]  ;;  %v14145_v12 = vld [vmem:[#allocation110_spill] sm:$0xff] }
 0x3d3   :  { %4882 = vrot.lane.b32.xlu1 %v13763_v37, %s8661_s25  ;;  %3924 = vmatprep.subr.bf16.mxu1 %v3751_v4  ;;  %v4371_v13 = vsel %vm4339_vm5, %v11813_v35, %v4250_v32  ;;  %v14165_v37 = vld [vmem:[#allocation112_spill] sm:$0xff] }
 0x3d4   :  { %4880 = vrot.lane.b32.xlu0 %v13764_v44, %s8661_s25  ;;  %4597 = vmatpush1.bf16.msra.mxu0 %v4371_v13  ;;  %v14146_v44 = vld [vmem:[#allocation34_spill] sm:$0xff] }
 0x3d5   :  { %3925 = vmatpush1.bf16.msra.mxu1 %v3750_v42  ;;  %v11825_v3 = vpop.permute.xlu1 %4271 }
 0x3d6   :  { %14143 = vst [vmem:[#allocation65_spill] sm:$0xff] %v11825_v3  ;;  %v4270_v11 = vpop.permute.xlu0 %4269 }
 0x3d7   :  { %4265 = vrot.lane.b32.xlu1 %v13867_v63, %s8660_s12  ;;  %v4381_v23 = vsel %vm4339_vm5, %v4270_v11, %v11825_v3 }
 0x3d8   :  { %4878 = vrot.lane.b32.xlu0 %v14144_v9, %s8661_s25  ;;  %4598 = vmatprep.subr.bf16.mxu0 %v4381_v23 }
 0x3d9   :  { %v3647_v4 = vpop.permute.xlu1 %3646 }
 0x3da   :  { %v11833_v32 = vpop.permute.xlu0 %4267  ;;  %v3760_v13 = vsel %vm3720_vm4, %v3647_v4, %v11319_v7  ;;  %v3759_v42 = vsel %vm3720_vm4, %v14145_v12, %v3647_v4  ;;  %v14148_v4 = vld [vmem:[#allocation37_spill] sm:$0xff]  ;;  %v14149_v12 = vld [vmem:[#allocation103_spill] sm:$0xff] }
 0x3db   :  { %4902 = vrot.lane.b32.xlu1 %v13839_v33, %s8661_s25  ;;  %3926 = vmatprep.subr.bf16.mxu1 %v3760_v13  ;;  %v4380_v3 = vsel %vm4339_vm5, %v11833_v32, %v4270_v11 }
 0x3dc   :  { %4900 = vrot.lane.b32.xlu0 %v14146_v44, %s8661_s25  ;;  %4599 = vmatpush1.bf16.msra.mxu0 %v4380_v3  ;;  %v14160_v44 = vld [vmem:[#allocation48_spill] sm:$0xff] }
 0x3dd   :  { %3927 = vmatpush1.bf16.msra.mxu1 %v3759_v42  ;;  %v11845_v23 = vpop.permute.xlu1 %4291 }
 0x3de   :  { %14147 = vst [vmem:[#allocation124_spill] sm:$0xff] %v11845_v23  ;;  %v4290_v9 = vpop.permute.xlu0 %4289 }
 0x3df   :  { %4285 = vrot.lane.b32.xlu1 %v13871_v27, %s8660_s12  ;;  %v4390_v7 = vsel %vm4339_vm5, %v4290_v9, %v11845_v23 }
 0x3e0   :  { %4898 = vrot.lane.b32.xlu0 %v14148_v4, %s8661_s25  ;;  %4600 = vmatprep.subr.bf16.mxu0 %v4390_v7 }
 0x3e1   :  { %v3667_v13 = vpop.permute.xlu1 %3666 }
 0x3e2   :  { %v11853_v11 = vpop.permute.xlu0 %4287  ;;  %v3769_v3 = vsel %vm3720_vm4, %v3667_v13, %v11339_v48  ;;  %v3768_v42 = vsel %vm3720_vm4, %v14149_v12, %v3667_v13  ;;  %v14151_v13 = vld [vmem:[#allocation43_spill] sm:$0xff] }
 0x3e3   :  { %4922 = vrot.lane.b32.xlu1 %v13841_v16, %s8661_s25  ;;  %3928 = vmatprep.subr.bf16.mxu1 %v3769_v3  ;;  %v4389_v23 = vsel %vm4339_vm5, %v11853_v11, %v4290_v9  ;;  %v14152_v12 = vld [vmem:[#allocation111_spill] sm:$0xff]  ;;  %v14154_v16 = vld [vmem:[#allocation42_spill] sm:$0xff] }
 0x3e4   :  { %4920 = vrot.lane.b32.xlu0 %v13934_v59, %s8661_s25  ;;  %4601 = vmatpush1.bf16.msra.mxu0 %v4389_v23  ;;  %v14153_v59 = vld [vmem:[#allocation45_spill] sm:$0xff] }
 0x3e5   :  { %3929 = vmatpush1.bf16.msra.mxu1 %v3768_v42  ;;  %v11865_v7 = vpop.permute.xlu1 %4311 }
 0x3e6   :  { %14150 = vst [vmem:[#allocation66_spill] sm:$0xff] %v11865_v7  ;;  %v4310_v4 = vpop.permute.xlu0 %4309 }
 0x3e7   :  { %4305 = vrot.lane.b32.xlu1 %v13875_v5, %s8660_s12  ;;  %v4399_v48 = vsel %vm4339_vm5, %v4310_v4, %v11865_v7 }
 0x3e8   :  { %4918 = vrot.lane.b32.xlu0 %v14151_v13, %s8661_s25  ;;  %4602 = vmatprep.subr.bf16.mxu0 %v4399_v48 }
 0x3e9   :  { %v3687_v3 = vpop.permute.xlu1 %3686 }
 0x3ea   :  { %v11873_v9 = vpop.permute.xlu0 %4307  ;;  %v3778_v23 = vsel %vm3720_vm4, %v3687_v3, %v11359_v38  ;;  %v3777_v42 = vsel %vm3720_vm4, %v14152_v12, %v3687_v3  ;;  %v14156_v3 = vld [vmem:[#allocation44_spill] sm:$0xff] }
 0x3eb   :  { %4942 = vrot.lane.b32.xlu1 %v14153_v59, %s8661_s25  ;;  %3930 = vmatprep.subr.bf16.mxu1 %v3778_v23  ;;  %v4398_v7 = vsel %vm4339_vm5, %v11873_v9, %v4310_v4  ;;  %v14157_v12 = vld [vmem:[#allocation120_spill] sm:$0xff]  ;;  %v14159_v59 = vld [vmem:[#allocation47_spill] sm:$0xff] }
 0x3ec   :  { %4940 = vrot.lane.b32.xlu0 %v14154_v16, %s8661_s25  ;;  %4603 = vmatpush1.bf16.msra.mxu0 %v4398_v7 }
 0x3ed   :  { %3931 = vmatpush1.bf16.msra.mxu1 %v3777_v42  ;;  %v11885_v48 = vpop.permute.xlu1 %4331  ;;  %v14158_v42 = vld [vmem:[#allocation105_spill] sm:$0xff] }
 0x3ee   :  { %14155 = vst [vmem:[#allocation113_spill] sm:$0xff] %v11885_v48  ;;  %v4330_v13 = vpop.permute.xlu0 %4329 }
 0x3ef   :  { %4325 = vrot.lane.b32.xlu1 %v13878_v14, %s8660_s12  ;;  %v4408_v38 = vsel %vm4339_vm5, %v4330_v13, %v11885_v48 }
 0x3f0   :  { %4938 = vrot.lane.b32.xlu0 %v14156_v3, %s8661_s25  ;;  %4604 = vmatprep.subr.bf16.mxu0 %v4408_v38 }
 0x3f1   :  { %v3707_v23 = vpop.permute.xlu1 %3706 }
 0x3f2   :  { %v11893_v4 = vpop.permute.xlu0 %4327  ;;  %v3787_v7 = vsel %vm3720_vm4, %v3707_v23, %v14157_v12  ;;  %v3786_v16 = vsel %vm3720_vm4, %v14158_v42, %v3707_v23  ;;  %v14161_v12 = vld [vmem:[#allocation49_spill] sm:$0xff]  ;;  %v14163_v42 = vld [vmem:[#allocation122_spill] sm:$0xff] }
 0x3f3   :  { %4810 = vrot.lane.b32.xlu1 %v14159_v59, %s8661_s25  ;;  %3932 = vmatprep.subr.bf16.mxu1 %v3787_v7  ;;  %v4407_v48 = vsel %vm4339_vm5, %v11893_v4, %v4330_v13  ;;  %v14162_v7 = vld [vmem:[#allocation51_spill] sm:$0xff] }
 0x3f4   :  { %4808 = vrot.lane.b32.xlu0 %v14160_v44, %s8661_s25  ;;  %4605 = vmatpush1.bf16.msra.mxu0 %v4407_v48 }
 0x3f5   :  { %3933 = vmatpush1.bf16.msra.mxu1 %v3786_v16  ;;  %v4198_v38 = vpop.permute.xlu1 %4197  ;;  %v11919_v16 = vld [vmem:[%s13291_s2 + $0x50] sm:$0xff]  }
 0x3f6   :  { %v11905_v3 = vpop.permute.xlu0 %4195 }
 0x3f7   :  { %4193 = vrot.lane.b32.xlu1 %v13884_v53, %s8660_s12  ;;  %v4348_v23 = vsel %vm4339_vm5, %v11905_v3, %v4198_v38  ;;  %4623 = vmatmul.mubr.bf16.vlgmr.msra.gmra.mrb[12].mxu0 %v11728_v55 }
 0x3f8   :  { %4806 = vrot.lane.b32.xlu0 %v14161_v12, %s8661_s25  ;;  %7931 = vmatprep.subr.bf16.mxu0 %v4348_v23 }
 0x3f9   :  { %7932 = vmatpush3.bf16.msra.mxu0 %v4348_v23  ;;  %v11914_v13 = vpop.permute.xlu1 %4215  ;;  %3951 = vmatmul.mubr.bf16.vlgmr.msra.gmra.mrb[8].mxu1 %v11919_v16  ;;  %v14164_v23 = vld [vmem:[#allocation18_spill] sm:$0xff] }
 0x3fa   :  { %v3575_v48 = vpop.permute.xlu0 %3574  ;;  %4632 = vmatprep.mubr.bf16.mxu0 %v13707_v25  ;;  %3960 = vmatprep.mubr.bf16.mxu1 %v13707_v25 }
 0x3fb   :  { %4830 = vrot.lane.b32.xlu1 %v14162_v7, %s8661_s25  ;;  %v3728_v38 = vsel %vm3720_vm4, %v3575_v48, %v14163_v42  ;;  %v3727_v44 = vsel %vm3720_vm4, %v14164_v23, %v3575_v48  ;;  %v14175_v7 = vld [vmem:[#allocation87_spill] sm:$0xff] }
 0x3fc   :  { %4828 = vrot.lane.b32.xlu0 %v9366_v0, %s8661_s25  ;;  %4024 = vmatprep.subr.bf16.mxu1 %v3728_v38  ;;  %v14169_v0 = vld [vmem:[#allocation54_spill] sm:$0xff] }
 0x3fd   :  { %4025 = vmatpush1.bf16.msra.mxu1 %v3727_v44  ;;  %v3595_v59 = vpop.permute.xlu1 %3594 }
 0x3fe   :  { %v4218_v12 = vpop.permute.xlu0 %4217  ;;  %v3737_v33 = vsel %vm3720_vm4, %v3595_v59, %v11400_v28  ;;  %v3736_v61 = vsel %vm3720_vm4, %v14165_v37, %v3595_v59  ;;  %v11948_v37 = vld [vmem:[%s13291_s2 + $0x58] sm:$0xff]  }
 0x3ff   :  { %4213 = vrot.lane.b32.xlu1 %v13885_v49, %s8660_s12  ;;  %4026 = vmatprep.subr.bf16.mxu1 %v3737_v33  ;;  %v4357_v48 = vsel %vm4339_vm5, %v11914_v13, %v4218_v12  ;;  %v14166_v12 = vld [vmem:[#allocation75_spill] sm:$0xff] }
 0x400   :  { %4826 = vrot.lane.b32.xlu0 %v13797_v24, %s8661_s25  ;;  %7933 = vmatprep.subr.bf16.mxu0 %v4357_v48 }
 0x401   :  { %4027 = vmatpush1.bf16.msra.mxu1 %v3736_v61  ;;  %7934 = vmatpush3.bf16.msra.mxu0 %v4357_v48  ;;  %v4238_v44 = vpop.permute.xlu1 %4237 }
 0x402   :  { %v11942_v42 = vpop.permute.xlu0 %4235  ;;  %4633 = vmatmul.mubr.bf16.gmra.mrb[16].mxu0 %v11757_v8  ;;  %3961 = vmatmul.mubr.bf16.gmra.mrb[12].mxu1 %v11948_v37 }
 0x403   :  { %4850 = vrot.lane.b32.xlu1 %v9380_v1, %s8661_s25  ;;  %v4366_v33 = vsel %vm4339_vm5, %v11942_v42, %v4238_v44  ;;  %7947 = vmatprep.mubr.bf16.mxu0 %v11728_v55  ;;  %v14167_v44 = vld [vmem:[#allocation6_spill] sm:$0xff] }
 0x404   :  { %4848 = vrot.lane.b32.xlu0 %v9076_v36, %s8661_s25  ;;  %7935 = vmatprep.subr.bf16.mxu0 %v4366_v33  ;;  %v14168_v36 = vld [vmem:[#allocation83_spill] sm:$0xff] }
 0x405   :  { %7936 = vmatpush3.bf16.msra.mxu0 %v4366_v33  ;;  %v11958_v61 = vpop.permute.xlu1 %4255  ;;  %4056 = vmatprep.mubr.bf16.mxu1 %v13707_v25 }
 0x406   :  { %v3615_v59 = vpop.permute.xlu0 %3614 }
 0x407   :  { %4233 = vrot.lane.b32.xlu1 %v13889_v34, %s8660_s12  ;;  %v3746_v28 = vsel %vm3720_vm4, %v3615_v59, %v11431_v31  ;;  %v3745_v38 = vsel %vm3720_vm4, %v14166_v12, %v3615_v59  ;;  %v14170_v59 = vld [vmem:[#allocation11_spill] sm:$0xff] }
 0x408   :  { %4846 = vrot.lane.b32.xlu0 %v13800_v30, %s8661_s25  ;;  %4028 = vmatprep.subr.bf16.mxu1 %v3746_v28 }
 0x409   :  { %4029 = vmatpush1.bf16.msra.mxu1 %v3745_v38  ;;  %v3635_v23 = vpop.permute.xlu1 %3634  ;;  %v14171_v38 = vld [vmem:[#allocation12_spill] sm:$0xff] }
 0x40a   :  { %v4258_v48 = vpop.permute.xlu0 %4257  ;;  %v3755_v33 = vsel %vm3720_vm4, %v3635_v23, %v14167_v44  ;;  %v3754_v1 = vsel %vm3720_vm4, %v14168_v36, %v3635_v23  ;;  %v14173_v44 = vld [vmem:[#allocation98_spill] sm:$0xff] }
 0x40b   :  { %4870 = vrot.lane.b32.xlu1 %v14169_v0, %s8661_s25  ;;  %4030 = vmatprep.subr.bf16.mxu1 %v3755_v33  ;;  %v4375_v31 = vsel %vm4339_vm5, %v11958_v61, %v4258_v48 }
 0x40c   :  { %4868 = vrot.lane.b32.xlu0 %v14170_v59, %s8661_s25  ;;  %7937 = vmatprep.subr.bf16.mxu0 %v4375_v31 }
 0x40d   :  { %4031 = vmatpush1.bf16.msra.mxu1 %v3754_v1  ;;  %7938 = vmatpush3.bf16.msra.mxu0 %v4375_v31  ;;  %v4278_v28 = vpop.permute.xlu1 %4277  ;;  %v14172_v1 = vld [vmem:[#allocation58_spill] sm:$0xff] }
 0x40e   :  { %v11979_v12 = vpop.permute.xlu0 %4275  ;;  %v14174_v31 = vld [vmem:[#allocation114_spill] sm:$0xff] }
 0x40f   :  { %4253 = vrot.lane.b32.xlu1 %v13893_v57, %s8660_s12  ;;  %v4384_v36 = vsel %vm4339_vm5, %v11979_v12, %v4278_v28 }
 0x410   :  { %4866 = vrot.lane.b32.xlu0 %v14171_v38, %s8661_s25  ;;  %7939 = vmatprep.subr.bf16.mxu0 %v4384_v36 }
 0x411   :  { %7940 = vmatpush3.bf16.msra.mxu0 %v4384_v36  ;;  %v11987_v23 = vpop.permute.xlu1 %4295 }
 0x412   :  { %v3655_v48 = vpop.permute.xlu0 %3654 }
 0x413   :  { %4890 = vrot.lane.b32.xlu1 %v14172_v1, %s8661_s25  ;;  %v3764_v33 = vsel %vm3720_vm4, %v3655_v48, %v14173_v44  ;;  %v3763_v59 = vsel %vm3720_vm4, %v14174_v31, %v3655_v48 }
 0x414   :  { %4888 = vrot.lane.b32.xlu0 %v14070_v41, %s8661_s25  ;;  %4032 = vmatprep.subr.bf16.mxu1 %v3764_v33  ;;  %v14177_v33 = vld [vmem:[#allocation17_spill] sm:$0xff] }
 0x415   :  { %4033 = vmatpush1.bf16.msra.mxu1 %v3763_v59  ;;  %v3675_v28 = vpop.permute.xlu1 %3674 }
 0x416   :  { %v4298_v0 = vpop.permute.xlu0 %4297  ;;  %v3773_v36 = vsel %vm3720_vm4, %v3675_v28, %v11471_v40  ;;  %v3772_v38 = vsel %vm3720_vm4, %v14175_v7, %v3675_v28  ;;  %v14176_v40 = vld [vmem:[#allocation15_spill] sm:$0xff] }
 0x417   :  { %4273 = vrot.lane.b32.xlu1 %v13894_v58, %s8660_s12  ;;  %4034 = vmatprep.subr.bf16.mxu1 %v3773_v36  ;;  %v4393_v48 = vsel %vm4339_vm5, %v11987_v23, %v4298_v0  ;;  %v14179_v36 = vld [vmem:[#allocation116_spill] sm:$0xff] }
 0x418   :  { %4886 = vrot.lane.b32.xlu0 %v14075_v15, %s8661_s25  ;;  %7941 = vmatprep.subr.bf16.mxu0 %v4393_v48 }
 0x419   :  { %4035 = vmatpush1.bf16.msra.mxu1 %v3772_v38  ;;  %7942 = vmatpush3.bf16.msra.mxu0 %v4393_v48  ;;  %v4318_v59 = vpop.permute.xlu1 %4317  ;;  %v14178_v38 = vld [vmem:[#allocation70_spill] sm:$0xff] }
 0x41a   :  { %v12007_v44 = vpop.permute.xlu0 %4315 }
 0x41b   :  { %4910 = vrot.lane.b32.xlu1 %v14176_v40, %s8661_s25  ;;  %v4402_v7 = vsel %vm4339_vm5, %v12007_v44, %v4318_v59  ;;  %v14180_v40 = vld [vmem:[#allocation99_spill] sm:$0xff] }
 0x41c   :  { %4908 = vrot.lane.b32.xlu0 %v14177_v33, %s8661_s25  ;;  %7943 = vmatprep.subr.bf16.mxu0 %v4402_v7 }
 0x41d   :  { %7944 = vmatpush3.bf16.msra.mxu0 %v4402_v7  ;;  %v12015_v0 = vpop.permute.xlu1 %4335 }
 0x41e   :  { %v3695_v31 = vpop.permute.xlu0 %3694 }
 0x41f   :  { %4293 = vrot.lane.b32.xlu1 %v13898_v26, %s8660_s12  ;;  %v3782_v28 = vsel %vm3720_vm4, %v3695_v31, %v14178_v38  ;;  %v3781_v48 = vsel %vm3720_vm4, %v14179_v36, %v3695_v31 }
 0x420   :  { %4906 = vrot.lane.b32.xlu0 %v13970_v51, %s8661_s25  ;;  %4036 = vmatprep.subr.bf16.mxu1 %v3782_v28  ;;  %v14181_v28 = vld [vmem:[#allocation22_spill] sm:$0xff] }
 0x421   :  { %4037 = vmatpush1.bf16.msra.mxu1 %v3781_v48  ;;  %v3715_v59 = vpop.permute.xlu1 %3714  ;;  %v14182_v48 = vld [vmem:[#allocation126_spill] sm:$0xff] }
 0x422   :  { %v4338_v33 = vpop.permute.xlu0 %4337  ;;  %v3791_v7 = vsel %vm3720_vm4, %v3715_v59, %v11507_v21  ;;  %v3790_v41 = vsel %vm3720_vm4, %v14180_v40, %v3715_v59 }
 0x423   :  { %4930 = vrot.lane.b32.xlu1 %v13973_v29, %s8661_s25  ;;  %4038 = vmatprep.subr.bf16.mxu1 %v3791_v7  ;;  %v4411_v31 = vsel %vm4339_vm5, %v12015_v0, %v4338_v33  ;;  %v14200_v29 = vld [vmem:[#allocation95_spill] sm:$0xff] }
 0x424   :  { %4928 = vrot.lane.b32.xlu0 %v13974_v2, %s8661_s25  ;;  %7945 = vmatprep.subr.bf16.mxu0 %v4411_v31 }
 0x425   :  { %4039 = vmatpush1.bf16.msra.mxu1 %v3790_v41  ;;  %7946 = vmatpush3.bf16.msra.mxu0 %v4411_v31  ;;  %v12035_v38 = vpop.permute.xlu1 %4802  ;;  %v14183_v31 = vld [vmem:[#allocation23_spill] sm:$0xff] }
 0x426   :  { %v4801_v21 = vpop.permute.xlu0 %4800 }
 0x427   :  { %4313 = vrot.lane.b32.xlu1 %v13902_v22, %s8660_s12  ;;  %v4960_v40 = vsel %vm4958_vm6, %v4801_v21, %v12035_v38 }
 0x428   :  { %4926 = vrot.lane.b32.xlu0 %v14181_v28, %s8661_s25  ;;  %5103 = vmatprep.subr.bf16.mxu0 %v4960_v40  ;;  %v14184_v40 = vld [vmem:[#allocation25_spill] sm:$0xff] }
 0x429   :  { %v4186_v33 = vpop.permute.xlu1 %4185  ;;  %7948 = vmatmul.mubr.bf16.vlgmr.msra.gmra.mrb[0].mxu0 %v11757_v8  ;;  %4057 = vmatmul.mubr.bf16.vlgmr.msra.gmra.mrb[24].mxu1 %v11919_v16 }
 0x42a   :  { %v4799_v41 = vpop.permute.xlu0 %4798  ;;  %v4343_v36 = vsel %vm4339_vm5, %v4186_v33, %v11743_v43  ;;  %v4342_v59 = vsel %vm4339_vm5, %v14182_v48, %v4186_v33  ;;  %4066 = vmatprep.mubr.bf16.mxu1 %v13707_v25  ;;  %5135 = vmatprep.mubr.bf16.mxu0 %v13707_v25 }
 0x42b   :  { %v4959_v7 = vsel %vm4958_vm6, %v4799_v41, %v4801_v21  ;;  %4950 = vrot.lane.b32.xlu1 %v14183_v31, %s8661_s25  ;;  %4537 = vmatprep.subr.bf16.mxu1 %v4343_v36  ;;  %v14185_v21 = vld [vmem:[#allocation26_spill] sm:$0xff]  ;;  %v14187_v31 = vld [vmem:[#allocation128_spill] sm:$0xff] }
 0x42c   :  { %4948 = vrot.lane.b32.xlu0 %v14184_v40, %s8661_s25  ;;  %5104 = vmatpush1.bf16.msra.mxu0 %v4959_v7 }
 0x42d   :  { %4538 = vmatpush1.bf16.msra.mxu1 %v4342_v59  ;;  %v12056_v16 = vpop.permute.xlu1 %4822  ;;  %v14186_v59 = vld [vmem:[#allocation115_spill] sm:$0xff] }
 0x42e   :  { %v4821_v43 = vpop.permute.xlu0 %4820 }
 0x42f   :  { %4333 = vrot.lane.b32.xlu1 %v13903_v50, %s8660_s12  ;;  %v4969_v33 = vsel %vm4958_vm6, %v4821_v43, %v12056_v16 }
 0x430   :  { %4946 = vrot.lane.b32.xlu0 %v14185_v21, %s8661_s25  ;;  %5105 = vmatprep.subr.bf16.mxu0 %v4969_v33  ;;  %v14188_v33 = vld [vmem:[#allocation57_spill] sm:$0xff] }
 0x431   :  { %v4206_v41 = vpop.permute.xlu1 %4205  ;;  %4067 = vmatmul.mubr.bf16.gmra.mrb[28].mxu1 %v11948_v37 }
 0x432   :  { %v4819_v36 = vpop.permute.xlu0 %4818  ;;  %v4352_v48 = vsel %vm4339_vm5, %v4206_v41, %v11772_v56  ;;  %v4351_v7 = vsel %vm4339_vm5, %v14186_v59, %v4206_v41  ;;  %4569 = vmatprep.mubr.bf16.mxu1 %v13707_v25  ;;  %v14189_v56 = vld [vmem:[#allocation117_spill] sm:$0xff] }
 0x433   :  { %v4968_v40 = vsel %vm4958_vm6, %v4819_v36, %v4821_v43  ;;  %4816 = vrot.lane.b32.xlu1 %v14187_v31, %s8661_s25  ;;  %4539 = vmatprep.subr.bf16.mxu1 %v4352_v48 }
 0x434   :  { %4814 = vrot.lane.b32.xlu0 %v14188_v33, %s8661_s25  ;;  %5106 = vmatpush1.bf16.msra.mxu0 %v4968_v40  ;;  %v14190_v40 = vld [vmem:[#allocation73_spill] sm:$0xff] }
 0x435   :  { %4540 = vmatpush1.bf16.msra.mxu1 %v4351_v7  ;;  %v12075_v37 = vpop.permute.xlu1 %4842  ;;  %v14191_v7 = vld [vmem:[#allocation74_spill] sm:$0xff] }
 0x436   :  { %v4841_v2 = vpop.permute.xlu0 %4840 }
 0x437   :  { %4834 = vrot.lane.b32.xlu1 %v14189_v56, %s8661_s25  ;;  %v4978_v41 = vsel %vm4958_vm6, %v4841_v2, %v12075_v37 }
 0x438   :  { %4804 = vrot.lane.b32.xlu0 %v13851_v17, %s8661_s25  ;;  %5107 = vmatprep.subr.bf16.mxu0 %v4978_v41  ;;  %v14192_v41 = vld [vmem:[#allocation5_spill] sm:$0xff] }
 0x439   :  { %v4226_v31 = vpop.permute.xlu1 %4225 }
 0x43a   :  { %v4839_v43 = vpop.permute.xlu0 %4838  ;;  %v4361_v36 = vsel %vm4339_vm5, %v4226_v31, %v11793_v19  ;;  %v4360_v48 = vsel %vm4339_vm5, %v14190_v40, %v4226_v31  ;;  %v14194_v40 = vld [vmem:[#allocation36_spill] sm:$0xff] }
 0x43b   :  { %v4977_v59 = vsel %vm4958_vm6, %v4839_v43, %v4841_v2  ;;  %4824 = vrot.lane.b32.xlu1 %v13855_v45, %s8661_s25  ;;  %4541 = vmatprep.subr.bf16.mxu1 %v4361_v36  ;;  %v14193_v2 = vld [vmem:[#allocation61_spill] sm:$0xff] }
 0x43c   :  { %4836 = vrot.lane.b32.xlu0 %v14191_v7, %s8661_s25  ;;  %5108 = vmatpush1.bf16.msra.mxu0 %v4977_v59  ;;  %v14195_v7 = vld [vmem:[#allocation79_spill] sm:$0xff] }
 0x43d   :  { %4542 = vmatpush1.bf16.msra.mxu1 %v4360_v48  ;;  %v12092_v33 = vpop.permute.xlu1 %4862 }
 0x43e   :  { %v4861_v56 = vpop.permute.xlu0 %4860 }
 0x43f   :  { %4856 = vrot.lane.b32.xlu1 %v14192_v41, %s8661_s25  ;;  %v4987_v19 = vsel %vm4958_vm6, %v4861_v56, %v12092_v33 }
 0x440   :  { %4854 = vrot.lane.b32.xlu0 %v14193_v2, %s8661_s25  ;;  %5109 = vmatprep.subr.bf16.mxu0 %v4987_v19 }
 0x441   :  { %v4246_v31 = vpop.permute.xlu1 %4245 }
 0x442   :  { %v4859_v43 = vpop.permute.xlu0 %4858  ;;  %v4370_v36 = vsel %vm4339_vm5, %v4246_v31, %v11813_v35  ;;  %v4369_v48 = vsel %vm4339_vm5, %v14194_v40, %v4246_v31 }
 0x443   :  { %v4986_v59 = vsel %vm4958_vm6, %v4859_v43, %v4861_v56  ;;  %4874 = vrot.lane.b32.xlu1 %v14195_v7, %s8661_s25  ;;  %4543 = vmatprep.subr.bf16.mxu1 %v4370_v36  ;;  %v14196_v56 = vld [vmem:[#allocation84_spill] sm:$0xff]  ;;  %v14197_v36 = vld [vmem:[#allocation41_spill] sm:$0xff]  ;;  %v14199_v7 = vld [vmem:[#allocation90_spill] sm:$0xff] }
 0x444   :  { %4844 = vrot.lane.b32.xlu0 %v13859_v6, %s8661_s25  ;;  %5110 = vmatpush1.bf16.msra.mxu0 %v4986_v59  ;;  %v14198_v59 = vld [vmem:[#allocation62_spill] sm:$0xff] }
 0x445   :  { %4544 = vmatpush1.bf16.msra.mxu1 %v4369_v48  ;;  %v12109_v41 = vpop.permute.xlu1 %4882 }
 0x446   :  { %v4881_v19 = vpop.permute.xlu0 %4880 }
 0x447   :  { %4864 = vrot.lane.b32.xlu1 %v13863_v46, %s8661_s25  ;;  %v4996_v35 = vsel %vm4958_vm6, %v4881_v19, %v12109_v41 }
 0x448   :  { %4876 = vrot.lane.b32.xlu0 %v14196_v56, %s8661_s25  ;;  %5111 = vmatprep.subr.bf16.mxu0 %v4996_v35 }
 0x449   :  { %v4266_v2 = vpop.permute.xlu1 %4265 }
 0x44a   :  { %v4879_v31 = vpop.permute.xlu0 %4878  ;;  %v4379_v43 = vsel %vm4339_vm5, %v4266_v2, %v11833_v32  ;;  %v4378_v40 = vsel %vm4339_vm5, %v14197_v36, %v4266_v2 }
 0x44b   :  { %v4995_v48 = vsel %vm4958_vm6, %v4879_v31, %v4881_v19  ;;  %4896 = vrot.lane.b32.xlu1 %v14198_v59, %s8661_s25  ;;  %4545 = vmatprep.subr.bf16.mxu1 %v4379_v43  ;;  %v14201_v43 = vld [vmem:[#allocation46_spill] sm:$0xff] }
 0x44c   :  { %4894 = vrot.lane.b32.xlu0 %v14199_v7, %s8661_s25  ;;  %5112 = vmatpush1.bf16.msra.mxu0 %v4995_v48  ;;  %v14203_v7 = vld [vmem:[#allocation96_spill] sm:$0xff] }
 0x44d   :  { %4546 = vmatpush1.bf16.msra.mxu1 %v4378_v40  ;;  %v12126_v35 = vpop.permute.xlu1 %4902 }
 0x44e   :  { %v4901_v56 = vpop.permute.xlu0 %4900 }
 0x44f   :  { %4914 = vrot.lane.b32.xlu1 %v14200_v29, %s8661_s25  ;;  %v5005_v32 = vsel %vm4958_vm6, %v4901_v56, %v12126_v35  ;;  %v14202_v29 = vld [vmem:[#allocation50_spill] sm:$0xff] }
 0x450   :  { %4884 = vrot.lane.b32.xlu0 %v13867_v63, %s8661_s25  ;;  %5113 = vmatprep.subr.bf16.mxu0 %v5005_v32 }
 0x451   :  { %v4286_v19 = vpop.permute.xlu1 %4285 }
 0x452   :  { %v4899_v2 = vpop.permute.xlu0 %4898  ;;  %v4388_v31 = vsel %vm4339_vm5, %v4286_v19, %v11853_v11  ;;  %v4387_v36 = vsel %vm4339_vm5, %v14201_v43, %v4286_v19 }
 0x453   :  { %v5004_v40 = vsel %vm4958_vm6, %v4899_v2, %v4901_v56  ;;  %4904 = vrot.lane.b32.xlu1 %v13871_v27, %s8661_s25  ;;  %4547 = vmatprep.subr.bf16.mxu1 %v4388_v31  ;;  %v14204_v2 = vld [vmem:[#allocation92_spill] sm:$0xff] }
 0x454   :  { %4916 = vrot.lane.b32.xlu0 %v14202_v29, %s8661_s25  ;;  %5114 = vmatpush1.bf16.msra.mxu0 %v5004_v40 }
 0x455   :  { %4548 = vmatpush1.bf16.msra.mxu1 %v4387_v36  ;;  %v12143_v48 = vpop.permute.xlu1 %4922  ;;  %v14205_v36 = vld [vmem:[#allocation60_spill] sm:$0xff] }
 0x456   :  { %v4921_v59 = vpop.permute.xlu0 %4920 }
 0x457   :  { %4936 = vrot.lane.b32.xlu1 %v14203_v7, %s8661_s25  ;;  %v5014_v11 = vsel %vm4958_vm6, %v4921_v59, %v12143_v48 }
 0x458   :  { %4934 = vrot.lane.b32.xlu0 %v11693_v10, %s8661_s25  ;;  %5115 = vmatprep.subr.bf16.mxu0 %v5014_v11  ;;  %v14206_v11 = vld [vmem:[#allocation134_spill] sm:$0xff] }
 0x459   :  { %v4306_v56 = vpop.permute.xlu1 %4305 }
 0x45a   :  { %v4919_v32 = vpop.permute.xlu0 %4918  ;;  %v4397_v19 = vsel %vm4339_vm5, %v4306_v56, %v11873_v9  ;;  %v4396_v31 = vsel %vm4339_vm5, %v14204_v2, %v4306_v56 }
 0x45b   :  { %v5013_v43 = vsel %vm4958_vm6, %v4919_v32, %v4921_v59  ;;  %4954 = vrot.lane.b32.xlu1 %v14205_v36, %s8661_s25  ;;  %4549 = vmatprep.subr.bf16.mxu1 %v4397_v19  ;;  %v14207_v36 = vld [vmem:[#allocation7_spill] sm:$0xff] }
 0x45c   :  { %4924 = vrot.lane.b32.xlu0 %v13875_v5, %s8661_s25  ;;  %5116 = vmatpush1.bf16.msra.mxu0 %v5013_v43 }
 0x45d   :  { %4550 = vmatpush1.bf16.msra.mxu1 %v4396_v31  ;;  %v12160_v10 = vpop.permute.xlu1 %4942 }
 0x45e   :  { %v4941_v40 = vpop.permute.xlu0 %4940 }
 0x45f   :  { %4944 = vrot.lane.b32.xlu1 %v13878_v14, %s8661_s25  ;;  %v5023_v9 = vsel %vm4958_vm6, %v4941_v40, %v12160_v10 }
 0x460   :  { %4956 = vrot.lane.b32.xlu0 %v11714_v54, %s8661_s25  ;;  %5117 = vmatprep.subr.bf16.mxu0 %v5023_v9  ;;  %v12178_v54 = vld [vmem:[%s13291_s2 + $0x70] sm:$0xff]  }
 0x461   :  { %v4326_v29 = vpop.permute.xlu1 %4325 }
 0x462   :  { %v4939_v59 = vpop.permute.xlu0 %4938  ;;  %v4406_v7 = vsel %vm4339_vm5, %v4326_v29, %v11893_v4  ;;  %v4405_v56 = vsel %vm4339_vm5, %v14206_v11, %v4326_v29 }
 0x463   :  { %v5022_v32 = vsel %vm4958_vm6, %v4939_v59, %v4941_v40  ;;  %5421 = vrot.lane.b32.xlu1 %v8996_v20, %s8662_s10  ;;  %4551 = vmatprep.subr.bf16.mxu1 %v4406_v7  ;;  %v14208_v40 = vld [vmem:[#allocation16_spill] sm:$0xff]  ;;  %v14209_v7 = vld [vmem:[#allocation121_spill] sm:$0xff] }
 0x464   :  { %5419 = vrot.lane.b32.xlu0 %v14016_v52, %s8662_s10  ;;  %5118 = vmatpush1.bf16.msra.mxu0 %v5022_v32 }
 0x465   :  { %4552 = vmatpush1.bf16.msra.mxu1 %v4405_v56  ;;  %v12182_v4 = vpop.permute.xlu1 %4810 }
 0x466   :  { %v4809_v19 = vpop.permute.xlu0 %4808 }
 0x467   :  { %4812 = vrot.lane.b32.xlu1 %v13884_v53, %s8661_s25  ;;  %v4964_v20 = vsel %vm4958_vm6, %v4809_v19, %v12182_v4  ;;  %5136 = vmatmul.mubr.bf16.vlgmr.msra.gmra.mrb[4].mxu0 %v12178_v54 }
 0x468   :  { %5417 = vrot.lane.b32.xlu0 %v13831_v62, %s8662_s10  ;;  %5209 = vmatprep.subr.bf16.mxu0 %v4964_v20 }
 0x469   :  { %v4194_v2 = vpop.permute.xlu1 %4193  ;;  %4570 = vmatmul.mubr.bf16.vlgmr.msra.gmra.mrb[8].mxu1 %v11728_v55  ;;  %5145 = vmatprep.mubr.bf16.mxu0 %v13707_v25  ;;  %v12207_v55 = vld [vmem:[%s13291_s2 + $0x78] sm:$0xff]  }
 0x46a   :  { %v12193_v52 = vpop.permute.xlu0 %4806  ;;  %v4347_v31 = vsel %vm4339_vm5, %v4194_v2, %v11905_v3  ;;  %v4346_v43 = vsel %vm4339_vm5, %v11732_v60, %v4194_v2  ;;  %4579 = vmatprep.mubr.bf16.mxu1 %v13707_v25 }
 0x46b   :  { %5441 = vrot.lane.b32.xlu1 %v9165_v47, %s8662_s10  ;;  %4643 = vmatprep.subr.bf16.mxu1 %v4347_v31  ;;  %v4963_v62 = vsel %vm4958_vm6, %v12193_v52, %v4809_v19 }
 0x46c   :  { %5439 = vrot.lane.b32.xlu0 %v14207_v36, %s8662_s10  ;;  %5210 = vmatpush1.bf16.msra.mxu0 %v4963_v62 }
 0x46d   :  { %4644 = vmatpush1.bf16.msra.mxu1 %v4346_v43  ;;  %v12211_v60 = vpop.permute.xlu1 %4830  ;;  %v14212_v43 = vld [vmem:[#allocation64_spill] sm:$0xff] }
 0x46e   :  { %v4829_v3 = vpop.permute.xlu0 %4828 }
 0x46f   :  { %4832 = vrot.lane.b32.xlu1 %v13885_v49, %s8661_s25  ;;  %v4973_v47 = vsel %vm4958_vm6, %v4829_v3, %v12211_v60  ;;  %5146 = vmatmul.mubr.bf16.gmra.mrb[8].mxu0 %v12207_v55 }
 0x470   :  { %5437 = vrot.lane.b32.xlu0 %v14208_v40, %s8662_s10  ;;  %5211 = vmatprep.subr.bf16.mxu0 %v4973_v47 }
 0x471   :  { %v4214_v9 = vpop.permute.xlu1 %4213  ;;  %4580 = vmatmul.mubr.bf16.gmra.mrb[12].mxu1 %v11757_v8  ;;  %5241 = vmatprep.mubr.bf16.mxu0 %v13707_v25  ;;  %v14210_v8 = vld [vmem:[#allocation27_spill] sm:$0xff] }
 0x472   :  { %v12222_v29 = vpop.permute.xlu0 %4826  ;;  %v4356_v59 = vsel %vm4339_vm5, %v4214_v9, %v11914_v13  ;;  %v4355_v11 = vsel %vm4339_vm5, %v14209_v7, %v4214_v9  ;;  %4675 = vmatprep.mubr.bf16.mxu1 %v13707_v25 }
 0x473   :  { %5461 = vrot.lane.b32.xlu1 %v14135_v18, %s8662_s10  ;;  %4645 = vmatprep.subr.bf16.mxu1 %v4356_v59  ;;  %v4972_v56 = vsel %vm4958_vm6, %v12222_v29, %v4829_v3  ;;  %v14211_v18 = vld [vmem:[#allocation29_spill] sm:$0xff]  ;;  %v14213_v3 = vld [vmem:[#allocation28_spill] sm:$0xff] }
 0x474   :  { %5459 = vrot.lane.b32.xlu0 %v14210_v8, %s8662_s10  ;;  %5212 = vmatpush1.bf16.msra.mxu0 %v4972_v56  ;;  %v14216_v8 = vld [vmem:[#allocation32_spill] sm:$0xff] }
 0x475   :  { %4646 = vmatpush1.bf16.msra.mxu1 %v4355_v11  ;;  %v12235_v32 = vpop.permute.xlu1 %4850  ;;  %v14215_v11 = vld [vmem:[#allocation109_spill] sm:$0xff] }
 0x476   :  { %v4849_v13 = vpop.permute.xlu0 %4848 }
 0x477   :  { %4852 = vrot.lane.b32.xlu1 %v13889_v34, %s8661_s25  ;;  %v4982_v19 = vsel %vm4958_vm6, %v4849_v13, %v12235_v32 }
 0x478   :  { %5457 = vrot.lane.b32.xlu0 %v14211_v18, %s8662_s10  ;;  %5213 = vmatprep.subr.bf16.mxu0 %v4982_v19  ;;  %v14217_v19 = vld [vmem:[#allocation33_spill] sm:$0xff] }
 0x479   :  { %v4234_v20 = vpop.permute.xlu1 %4233 }
 0x47a   :  { %v12243_v2 = vpop.permute.xlu0 %4846  ;;  %v4365_v31 = vsel %vm4339_vm5, %v4234_v20, %v11942_v42  ;;  %v4364_v62 = vsel %vm4339_vm5, %v14212_v43, %v4234_v20 }
 0x47b   :  { %5481 = vrot.lane.b32.xlu1 %v9235_v39, %s8662_s10  ;;  %4647 = vmatprep.subr.bf16.mxu1 %v4365_v31  ;;  %v4981_v36 = vsel %vm4958_vm6, %v12243_v2, %v4849_v13  ;;  %v14214_v39 = vld [vmem:[#allocation30_spill] sm:$0xff]  ;;  %v14218_v31 = vld [vmem:[#allocation35_spill] sm:$0xff] }
 0x47c   :  { %5479 = vrot.lane.b32.xlu0 %v14213_v3, %s8662_s10  ;;  %5214 = vmatpush1.bf16.msra.mxu0 %v4981_v36  ;;  %v14219_v3 = vld [vmem:[#allocation65_spill] sm:$0xff] }
 0x47d   :  { %4648 = vmatpush1.bf16.msra.mxu1 %v4364_v62  ;;  %v12255_v47 = vpop.permute.xlu1 %4870 }
 0x47e   :  { %v4869_v40 = vpop.permute.xlu0 %4868 }
 0x47f   :  { %4872 = vrot.lane.b32.xlu1 %v13893_v57, %s8661_s25  ;;  %v4991_v42 = vsel %vm4958_vm6, %v4869_v40, %v12255_v47 }
 0x480   :  { %5477 = vrot.lane.b32.xlu0 %v14214_v39, %s8662_s10  ;;  %5215 = vmatprep.subr.bf16.mxu0 %v4991_v42  ;;  %v14220_v42 = vld [vmem:[#allocation38_spill] sm:$0xff] }
 0x481   :  { %v4254_v9 = vpop.permute.xlu1 %4253 }
 0x482   :  { %v12263_v59 = vpop.permute.xlu0 %4866  ;;  %v4374_v7 = vsel %vm4339_vm5, %v4254_v9, %v11958_v61  ;;  %v4373_v56 = vsel %vm4339_vm5, %v14215_v11, %v4254_v9  ;;  %v14221_v9 = vld [vmem:[#allocation34_spill] sm:$0xff] }
 0x483   :  { %5501 = vrot.lane.b32.xlu1 %v14216_v8, %s8662_s10  ;;  %4649 = vmatprep.subr.bf16.mxu1 %v4374_v7  ;;  %v4990_v13 = vsel %vm4958_vm6, %v12263_v59, %v4869_v40 }
 0x484   :  { %5499 = vrot.lane.b32.xlu0 %v14217_v19, %s8662_s10  ;;  %5216 = vmatpush1.bf16.msra.mxu0 %v4990_v13 }
 0x485   :  { %4650 = vmatpush1.bf16.msra.mxu1 %v4373_v56  ;;  %v12275_v18 = vpop.permute.xlu1 %4890  ;;  %v14222_v56 = vld [vmem:[#allocation37_spill] sm:$0xff] }
 0x486   :  { %v4889_v20 = vpop.permute.xlu0 %4888 }
 0x487   :  { %4892 = vrot.lane.b32.xlu1 %v13894_v58, %s8661_s25  ;;  %v5000_v61 = vsel %vm4958_vm6, %v4889_v20, %v12275_v18 }
 0x488   :  { %5497 = vrot.lane.b32.xlu0 %v14218_v31, %s8662_s10  ;;  %5217 = vmatprep.subr.bf16.mxu0 %v5000_v61  ;;  %v14224_v31 = vld [vmem:[#allocation39_spill] sm:$0xff] }
 0x489   :  { %v4274_v43 = vpop.permute.xlu1 %4273 }
 0x48a   :  { %v12283_v62 = vpop.permute.xlu0 %4886  ;;  %v4383_v36 = vsel %vm4339_vm5, %v4274_v43, %v11979_v12  ;;  %v4382_v40 = vsel %vm4339_vm5, %v14219_v3, %v4274_v43 }
 0x48b   :  { %5521 = vrot.lane.b32.xlu1 %v14220_v42, %s8662_s10  ;;  %4651 = vmatprep.subr.bf16.mxu1 %v4383_v36  ;;  %v4999_v39 = vsel %vm4958_vm6, %v12283_v62, %v4889_v20  ;;  %v14223_v20 = vld [vmem:[#allocation124_spill] sm:$0xff]  ;;  %v14226_v42 = vld [vmem:[#allocation43_spill] sm:$0xff] }
 0x48c   :  { %5519 = vrot.lane.b32.xlu0 %v14221_v9, %s8662_s10  ;;  %5218 = vmatpush1.bf16.msra.mxu0 %v4999_v39  ;;  %v14225_v36 = vld [vmem:[#allocation40_spill] sm:$0xff] }
 0x48d   :  { %4652 = vmatpush1.bf16.msra.mxu1 %v4382_v40  ;;  %v12295_v7 = vpop.permute.xlu1 %4910 }
 0x48e   :  { %v4909_v11 = vpop.permute.xlu0 %4908 }
 0x48f   :  { %4912 = vrot.lane.b32.xlu1 %v13898_v26, %s8661_s25  ;;  %v5009_v12 = vsel %vm4958_vm6, %v4909_v11, %v12295_v7 }
 0x490   :  { %5517 = vrot.lane.b32.xlu0 %v14222_v56, %s8662_s10  ;;  %5219 = vmatprep.subr.bf16.mxu0 %v5009_v12  ;;  %v14227_v12 = vld [vmem:[#allocation66_spill] sm:$0xff] }
 0x491   :  { %v4294_v8 = vpop.permute.xlu1 %4293 }
 0x492   :  { %v12303_v13 = vpop.permute.xlu0 %4906  ;;  %v4392_v19 = vsel %vm4339_vm5, %v4294_v8, %v11987_v23  ;;  %v4391_v61 = vsel %vm4339_vm5, %v14223_v20, %v4294_v8  ;;  %v14228_v8 = vld [vmem:[#allocation45_spill] sm:$0xff]  ;;  %v14229_v20 = vld [vmem:[#allocation42_spill] sm:$0xff] }
 0x493   :  { %5541 = vrot.lane.b32.xlu1 %v14224_v31, %s8662_s10  ;;  %4653 = vmatprep.subr.bf16.mxu1 %v4392_v19  ;;  %v5008_v43 = vsel %vm4958_vm6, %v12303_v13, %v4909_v11 }
 0x494   :  { %5539 = vrot.lane.b32.xlu0 %v14225_v36, %s8662_s10  ;;  %5220 = vmatpush1.bf16.msra.mxu0 %v5008_v43  ;;  %v14230_v43 = vld [vmem:[#allocation44_spill] sm:$0xff] }
 0x495   :  { %4654 = vmatpush1.bf16.msra.mxu1 %v4391_v61  ;;  %v12315_v3 = vpop.permute.xlu1 %4930 }
 0x496   :  { %v4929_v40 = vpop.permute.xlu0 %4928 }
 0x497   :  { %4932 = vrot.lane.b32.xlu1 %v13902_v22, %s8661_s25  ;;  %v5018_v23 = vsel %vm4958_vm6, %v4929_v40, %v12315_v3 }
 0x498   :  { %5537 = vrot.lane.b32.xlu0 %v14226_v42, %s8662_s10  ;;  %5221 = vmatprep.subr.bf16.mxu0 %v5018_v23  ;;  %v14231_v42 = vld [vmem:[#allocation113_spill] sm:$0xff] }
 0x499   :  { %v4314_v39 = vpop.permute.xlu1 %4313 }
 0x49a   :  { %v12323_v9 = vpop.permute.xlu0 %4926  ;;  %v4401_v11 = vsel %vm4339_vm5, %v4314_v39, %v12007_v44  ;;  %v4400_v56 = vsel %vm4339_vm5, %v14227_v12, %v4314_v39 }
 0x49b   :  { %5561 = vrot.lane.b32.xlu1 %v14228_v8, %s8662_s10  ;;  %4655 = vmatprep.subr.bf16.mxu1 %v4401_v11  ;;  %v5017_v19 = vsel %vm4958_vm6, %v12323_v9, %v4929_v40  ;;  %v14232_v11 = vld [vmem:[#allocation49_spill] sm:$0xff] }
 0x49c   :  { %5559 = vrot.lane.b32.xlu0 %v14229_v20, %s8662_s10  ;;  %5222 = vmatpush1.bf16.msra.mxu0 %v5017_v19 }
 0x49d   :  { %4656 = vmatpush1.bf16.msra.mxu1 %v4400_v56  ;;  %v12335_v61 = vpop.permute.xlu1 %4950 }
 0x49e   :  { %v4949_v31 = vpop.permute.xlu0 %4948 }
 0x49f   :  { %4952 = vrot.lane.b32.xlu1 %v13903_v50, %s8661_s25  ;;  %v5027_v44 = vsel %vm4958_vm6, %v4949_v31, %v12335_v61 }
 0x4a0   :  { %5557 = vrot.lane.b32.xlu0 %v14230_v43, %s8662_s10  ;;  %5223 = vmatprep.subr.bf16.mxu0 %v5027_v44 }
 0x4a1   :  { %v4334_v36 = vpop.permute.xlu1 %4333 }
 0x4a2   :  { %v12343_v40 = vpop.permute.xlu0 %4946  ;;  %v4410_v23 = vsel %vm4339_vm5, %v4334_v36, %v12015_v0  ;;  %v4409_v39 = vsel %vm4339_vm5, %v14231_v42, %v4334_v36 }
 0x4a3   :  { %5425 = vrot.lane.b32.xlu1 %v14232_v11, %s8662_s10  ;;  %4657 = vmatprep.subr.bf16.mxu1 %v4410_v23  ;;  %v5026_v12 = vsel %vm4958_vm6, %v12343_v40, %v4949_v31 }
 0x4a4   :  { %5423 = vrot.lane.b32.xlu0 %v13851_v17, %s8662_s10  ;;  %5224 = vmatpush1.bf16.msra.mxu0 %v5026_v12  ;;  %v8636_v17 = vld [vmem:[%s13291_s2 + $0x60] sm:$0xff]  }
 0x4a5   :  { %4658 = vmatpush1.bf16.msra.mxu1 %v4409_v39  ;;  %v4817_v56 = vpop.permute.xlu1 %4816 }
 0x4a6   :  { %v12355_v8 = vpop.permute.xlu0 %4814 }
 0x4a7   :  { %5445 = vrot.lane.b32.xlu1 %v13797_v24, %s8662_s10  ;;  %v4967_v0 = vsel %vm4958_vm6, %v12355_v8, %v4817_v56  ;;  %5242 = vmatmul.mubr.bf16.vlgmr.msra.gmra.mrb[12].mxu0 %v12178_v54  ;;  %v14235_v56 = vld [vmem:[#allocation48_spill] sm:$0xff] }
 0x4a8   :  { %5443 = vrot.lane.b32.xlu0 %v13855_v45, %s8662_s10  ;;  %7951 = vmatprep.subr.bf16.mxu0 %v4967_v0 }
 0x4a9   :  { %7952 = vmatpush3.bf16.msra.mxu0 %v4967_v0  ;;  %v12364_v19 = vpop.permute.xlu1 %4834  ;;  %4676 = vmatmul.mubr.bf16.vlgmr.msra.gmra.mrb[24].mxu1 %v8636_v17 }
 0x4aa   :  { %v4805_v20 = vpop.permute.xlu0 %4804  ;;  %5251 = vmatprep.mubr.bf16.mxu0 %v13707_v25  ;;  %4685 = vmatprep.mubr.bf16.mxu1 %v13707_v25 }
 0x4ab   :  { %5465 = vrot.lane.b32.xlu1 %v13800_v30, %s8662_s10  ;;  %v4962_v24 = vsel %vm4958_vm6, %v4805_v20, %v12193_v52  ;;  %v4961_v45 = vsel %vm4958_vm6, %v12035_v38, %v4805_v20  ;;  %v14233_v30 = vld [vmem:[#allocation12_spill] sm:$0xff] }
 0x4ac   :  { %5463 = vrot.lane.b32.xlu0 %v13859_v6, %s8662_s10  ;;  %5156 = vmatprep.subr.bf16.mxu1 %v4962_v24  ;;  %v14236_v24 = vld [vmem:[#allocation51_spill] sm:$0xff] }
 0x4ad   :  { %5157 = vmatpush1.bf16.msra.mxu1 %v4961_v45  ;;  %v4825_v31 = vpop.permute.xlu1 %4824 }
 0x4ae   :  { %v4837_v44 = vpop.permute.xlu0 %4836  ;;  %v4971_v43 = vsel %vm4958_vm6, %v4825_v31, %v12222_v29  ;;  %v4970_v36 = vsel %vm4958_vm6, %v12056_v16, %v4825_v31  ;;  %v8637_v16 = vld [vmem:[%s13291_s2 + $0x68] sm:$0xff]  }
 0x4af   :  { %5485 = vrot.lane.b32.xlu1 %v14233_v30, %s8662_s10  ;;  %5158 = vmatprep.subr.bf16.mxu1 %v4971_v43  ;;  %v4976_v38 = vsel %vm4958_vm6, %v12364_v19, %v4837_v44  ;;  %v14239_v44 = vld [vmem:[#allocation8_spill] sm:$0xff] }
 0x4b0   :  { %5483 = vrot.lane.b32.xlu0 %v13863_v46, %s8662_s10  ;;  %7953 = vmatprep.subr.bf16.mxu0 %v4976_v38 }
 0x4b1   :  { %5159 = vmatpush1.bf16.msra.mxu1 %v4970_v36  ;;  %7954 = vmatpush3.bf16.msra.mxu0 %v4976_v38  ;;  %v4857_v6 = vpop.permute.xlu1 %4856  ;;  %v14240_v38 = vld [vmem:[#allocation54_spill] sm:$0xff] }
 0x4b2   :  { %v12389_v52 = vpop.permute.xlu0 %4854  ;;  %5252 = vmatmul.mubr.bf16.gmra.mrb[16].mxu0 %v12207_v55  ;;  %4686 = vmatmul.mubr.bf16.gmra.mrb[28].mxu1 %v8637_v16  ;;  %v14241_v16 = vld [vmem:[#allocation11_spill] sm:$0xff] }
 0x4b3   :  { %5505 = vrot.lane.b32.xlu1 %v14075_v15, %s8662_s10  ;;  %v4985_v29 = vsel %vm4958_vm6, %v12389_v52, %v4857_v6  ;;  %7967 = vmatprep.mubr.bf16.mxu0 %v12178_v54 }
 0x4b4   :  { %5503 = vrot.lane.b32.xlu0 %v13867_v63, %s8662_s10  ;;  %7955 = vmatprep.subr.bf16.mxu0 %v4985_v29 }
 0x4b5   :  { %7956 = vmatpush3.bf16.msra.mxu0 %v4985_v29  ;;  %v12402_v46 = vpop.permute.xlu1 %4874  ;;  %5188 = vmatprep.mubr.bf16.mxu1 %v13707_v25 }
 0x4b6   :  { %v4845_v23 = vpop.permute.xlu0 %4844 }
 0x4b7   :  { %5525 = vrot.lane.b32.xlu1 %v13970_v51, %s8662_s10  ;;  %v4980_v15 = vsel %vm4958_vm6, %v4845_v23, %v12243_v2  ;;  %v4979_v42 = vsel %vm4958_vm6, %v12075_v37, %v4845_v23  ;;  %v14234_v2 = vld [vmem:[#allocation47_spill] sm:$0xff] }
 0x4b8   :  { %5523 = vrot.lane.b32.xlu0 %v13871_v27, %s8662_s10  ;;  %5160 = vmatprep.subr.bf16.mxu1 %v4980_v15 }
 0x4b9   :  { %5161 = vmatpush1.bf16.msra.mxu1 %v4979_v42  ;;  %v4865_v63 = vpop.permute.xlu1 %4864 }
 0x4ba   :  { %v4877_v39 = vpop.permute.xlu0 %4876  ;;  %v4989_v11 = vsel %vm4958_vm6, %v4865_v63, %v12263_v59  ;;  %v4988_v12 = vsel %vm4958_vm6, %v12092_v33, %v4865_v63 }
 0x4bb   :  { %5545 = vrot.lane.b32.xlu1 %v14181_v28, %s8662_s10  ;;  %5162 = vmatprep.subr.bf16.mxu1 %v4989_v11  ;;  %v4994_v51 = vsel %vm4958_vm6, %v12402_v46, %v4877_v39  ;;  %v14243_v39 = vld [vmem:[#allocation15_spill] sm:$0xff] }
 0x4bc   :  { %5543 = vrot.lane.b32.xlu0 %v13875_v5, %s8662_s10  ;;  %7957 = vmatprep.subr.bf16.mxu0 %v4994_v51 }
 0x4bd   :  { %5163 = vmatpush1.bf16.msra.mxu1 %v4988_v12  ;;  %7958 = vmatpush3.bf16.msra.mxu0 %v4994_v51  ;;  %v4897_v27 = vpop.permute.xlu1 %4896 }
 0x4be   :  { %v12423_v37 = vpop.permute.xlu0 %4894 }
 0x4bf   :  { %5565 = vrot.lane.b32.xlu1 %v14185_v21, %s8662_s10  ;;  %v5003_v33 = vsel %vm4958_vm6, %v12423_v37, %v4897_v27 }
 0x4c0   :  { %5563 = vrot.lane.b32.xlu0 %v13878_v14, %s8662_s10  ;;  %7959 = vmatprep.subr.bf16.mxu0 %v5003_v33 }
 0x4c1   :  { %7960 = vmatpush3.bf16.msra.mxu0 %v5003_v33  ;;  %v12431_v28 = vpop.permute.xlu1 %4914 }
 0x4c2   :  { %v4885_v5 = vpop.permute.xlu0 %4884 }
 0x4c3   :  { %5429 = vrot.lane.b32.xlu1 %v14234_v2, %s8662_s10  ;;  %v4998_v59 = vsel %vm4958_vm6, %v4885_v5, %v12283_v62  ;;  %v4997_v21 = vsel %vm4958_vm6, %v12109_v41, %v4885_v5  ;;  %v14237_v62 = vld [vmem:[#allocation52_spill] sm:$0xff]  ;;  %v14246_v2 = vld [vmem:[#allocation21_spill] sm:$0xff] }
 0x4c4   :  { %5427 = vrot.lane.b32.xlu0 %v14235_v56, %s8662_s10  ;;  %5164 = vmatprep.subr.bf16.mxu1 %v4998_v59  ;;  %v14245_v5 = vld [vmem:[#allocation20_spill] sm:$0xff]  ;;  %v14248_v56 = vld [vmem:[#allocation25_spill] sm:$0xff] }
 0x4c5   :  { %5165 = vmatpush1.bf16.msra.mxu1 %v4997_v21  ;;  %v4905_v14 = vpop.permute.xlu1 %4904 }
 0x4c6   :  { %v4917_v0 = vpop.permute.xlu0 %4916  ;;  %v5007_v17 = vsel %vm4958_vm6, %v4905_v14, %v12303_v13  ;;  %v5006_v20 = vsel %vm4958_vm6, %v12126_v35, %v4905_v14  ;;  %v14238_v13 = vld [vmem:[#allocation53_spill] sm:$0xff] }
 0x4c7   :  { %5449 = vrot.lane.b32.xlu1 %v14236_v24, %s8662_s10  ;;  %5166 = vmatprep.subr.bf16.mxu1 %v5007_v17  ;;  %v5012_v41 = vsel %vm4958_vm6, %v12431_v28, %v4917_v0 }
 0x4c8   :  { %5447 = vrot.lane.b32.xlu0 %v14237_v62, %s8662_s10  ;;  %7961 = vmatprep.subr.bf16.mxu0 %v5012_v41 }
 0x4c9   :  { %5167 = vmatpush1.bf16.msra.mxu1 %v5006_v20  ;;  %7962 = vmatpush3.bf16.msra.mxu0 %v5012_v41  ;;  %v4937_v45 = vpop.permute.xlu1 %4936  ;;  %v8638_v41 = vld [vmem:[#allocation3 + $0x20] ss:$36 sps:$4 sm:$0xff]  }
 0x4ca   :  { %v12451_v31 = vpop.permute.xlu0 %4934 }
 0x4cb   :  { %5469 = vrot.lane.b32.xlu1 %v14238_v13, %s8662_s10  ;;  %v5021_v35 = vsel %vm4958_vm6, %v12451_v31, %v4937_v45  ;;  %v8639_v45 = vld [vmem:[#allocation3 + $0x68] ss:$36 sps:$4 sm:$0xff]  }
 0x4cc   :  { %5467 = vrot.lane.b32.xlu0 %v14239_v44, %s8662_s10  ;;  %7963 = vmatprep.subr.bf16.mxu0 %v5021_v35 }
 0x4cd   :  { %7964 = vmatpush3.bf16.msra.mxu0 %v5021_v35  ;;  %v12459_v43 = vpop.permute.xlu1 %4954 }
 0x4ce   :  { %v4925_v36 = vpop.permute.xlu0 %4924 }
 0x4cf   :  { %v5015_v30 = vsel %vm4958_vm6, %v12143_v48, %v4925_v36  ;;  %5489 = vrot.lane.b32.xlu1 %v14240_v38, %s8662_s10  ;;  %v5016_v6 = vsel %vm4958_vm6, %v4925_v36, %v12323_v9  ;;  %v14242_v9 = vld [vmem:[#allocation13_spill] sm:$0xff] }
 0x4d0   :  { %5487 = vrot.lane.b32.xlu0 %v14241_v16, %s8662_s10  ;;  %5168 = vmatprep.subr.bf16.mxu1 %v5016_v6  ;;  %v8641_v6 = vld [vmem:[#allocation3 + $0xf8] ss:$36 sps:$4 sm:$0xff]  }
 0x4d1   :  { %5169 = vmatpush1.bf16.msra.mxu1 %v5015_v30  ;;  %v4945_v29 = vpop.permute.xlu1 %4944  ;;  %v8640_v30 = vld [vmem:[#allocation3 + $0xb0] ss:$36 sps:$4 sm:$0xff]  }
 0x4d2   :  { %v5024_v23 = vsel %vm4958_vm6, %v12160_v10, %v4945_v29  ;;  %v4957_v15 = vpop.permute.xlu0 %4956  ;;  %v5025_v42 = vsel %vm4958_vm6, %v4945_v29, %v12343_v40  ;;  %v14244_v40 = vld [vmem:[#allocation17_spill] sm:$0xff] }
 0x4d3   :  { %5509 = vrot.lane.b32.xlu1 %v14172_v1, %s8662_s10  ;;  %5170 = vmatprep.subr.bf16.mxu1 %v5025_v42  ;;  %v5030_v48 = vsel %vm4958_vm6, %v12459_v43, %v4957_v15  ;;  %v8642_v15 = vld [vmem:[#allocation3 + $0x140] ss:$36 sps:$4 sm:$0xff]  }
 0x4d4   :  { %5507 = vrot.lane.b32.xlu0 %v14242_v9, %s8662_s10  ;;  %7965 = vmatprep.subr.bf16.mxu0 %v5030_v48 }
 0x4d5   :  { %5171 = vmatpush1.bf16.msra.mxu1 %v5024_v23  ;;  %7966 = vmatpush3.bf16.msra.mxu0 %v5030_v48  ;;  %v12479_v63 = vpop.permute.xlu1 %5421  ;;  %v8643_v48 = vld [vmem:[#allocation3 + $0x188] ss:$36 sps:$4 sm:$0xff]  }
 0x4d6   :  { %v5420_v10 = vpop.permute.xlu0 %5419 }
 0x4d7   :  { %5529 = vrot.lane.b32.xlu1 %v14243_v39, %s8662_s10  ;;  %v5579_v1 = vsel %vm5577_vm7, %v5420_v10, %v12479_v63 }
 0x4d8   :  { %5527 = vrot.lane.b32.xlu0 %v14244_v40, %s8662_s10  ;;  %5722 = vmatprep.subr.bf16.mxu0 %v5579_v1  ;;  %v8644_v1 = vld [vmem:[#allocation3 + $0x1d0] ss:$36 sps:$4 sm:$0xff]  }
 0x4d9   :  { %v4813_v11 = vpop.permute.xlu1 %4812  ;;  %7968 = vmatmul.mubr.bf16.vlgmr.msra.gmra.mrb[0].mxu0 %v12207_v55  ;;  %5189 = vmatmul.mubr.bf16.vlgmr.msra.gmra.mrb[8].mxu1 %v12178_v54 }
 0x4da   :  { %v4965_v12 = vsel %vm4958_vm6, %v12182_v4, %v4813_v11  ;;  %v5418_v51 = vpop.permute.xlu0 %5417  ;;  %v4966_v27 = vsel %vm4958_vm6, %v4813_v11, %v12355_v8  ;;  %5198 = vmatprep.mubr.bf16.mxu1 %v13707_v25  ;;  %5754 = vmatprep.mubr.bf16.mxu0 %v13707_v25  ;;  %v14247_v8 = vld [vmem:[#allocation23_spill] sm:$0xff]  ;;  %v8645_v11 = vld [vmem:[#allocation3 + $0x218] ss:$36 sps:$4 sm:$0xff]  }
 0x4db   :  { %v5578_v33 = vsel %vm5577_vm7, %v5418_v51, %v5420_v10  ;;  %5549 = vrot.lane.b32.xlu1 %v14245_v5, %s8662_s10  ;;  %5262 = vmatprep.subr.bf16.mxu1 %v4966_v27  ;;  %v8647_v5 = vld [vmem:[#allocation4] sm:$0xff]  }
 0x4dc   :  { %5547 = vrot.lane.b32.xlu0 %v14246_v2, %s8662_s10  ;;  %5723 = vmatpush1.bf16.msra.mxu0 %v5578_v33  ;;  %v8646_v33 = vld [vmem:[#allocation4 + $0x8] sm:$0xff]  }
 0x4dd   :  { %5263 = vmatpush1.bf16.msra.mxu1 %v4965_v12  ;;  %v12500_v4 = vpop.permute.xlu1 %5441 }
 0x4de   :  { %v5440_v59 = vpop.permute.xlu0 %5439 }
 0x4df   :  { %5569 = vrot.lane.b32.xlu1 %v14247_v8, %s8662_s10  ;;  %v5588_v21 = vsel %vm5577_vm7, %v5440_v59, %v12500_v4 }
 0x4e0   :  { %5567 = vrot.lane.b32.xlu0 %v14248_v56, %s8662_s10  ;;  %5724 = vmatprep.subr.bf16.mxu0 %v5588_v21 }
 0x4e1   :  { %v4833_v14 = vpop.permute.xlu1 %4832  ;;  %5199 = vmatmul.mubr.bf16.gmra.mrb[12].mxu1 %v12207_v55 }
 0x4e2   :  { %v4974_v0 = vsel %vm4958_vm6, %v12211_v60, %v4833_v14  ;;  %v5438_v17 = vpop.permute.xlu0 %5437  ;;  %v4975_v20 = vsel %vm4958_vm6, %v4833_v14, %v12364_v19  ;;  %5294 = vmatprep.mubr.bf16.mxu1 %v13707_v25 }
 0x4e3   :  { %v5587_v24 = vsel %vm5577_vm7, %v5438_v17, %v5440_v59  ;;  %5433 = vrot.lane.b32.xlu1 %v8638_v41, %s8662_s10  ;;  %5264 = vmatprep.subr.bf16.mxu1 %v4975_v20  ;;  %v8648_v59 = vld [vmem:[#allocation4 + $0x18] sm:$0xff]   ;;  %v8650_v17 = vld [vmem:[#allocation4 + $0x28] sm:$0xff]   ;;  %v8651_v20 = vld [vmem:[#allocation4 + $0x20] sm:$0xff]  }
 0x4e4   :  { %5431 = vrot.lane.b32.xlu0 %v13884_v53, %s8662_s10  ;;  %5725 = vmatpush1.bf16.msra.mxu0 %v5587_v24 }
 0x4e5   :  { %5265 = vmatpush1.bf16.msra.mxu1 %v4974_v0  ;;  %v12518_v62 = vpop.permute.xlu1 %5461 }
 0x4e6   :  { %v5460_v60 = vpop.permute.xlu0 %5459 }
 0x4e7   :  { %5453 = vrot.lane.b32.xlu1 %v8639_v45, %s8662_s10  ;;  %v5597_v19 = vsel %vm5577_vm7, %v5460_v60, %v12518_v62  ;;  %v6020_v45 = vld [vmem:[%s13292_s3 + $0x8] sm:$0xff] }
 0x4e8   :  { %5451 = vrot.lane.b32.xlu0 %v13885_v49, %s8662_s10  ;;  %5726 = vmatprep.subr.bf16.mxu0 %v5597_v19 }
 0x4e9   :  { %v4853_v13 = vpop.permute.xlu1 %4852 }
 0x4ea   :  { %v4983_v35 = vsel %vm4958_vm6, %v12235_v32, %v4853_v13  ;;  %v5458_v53 = vpop.permute.xlu0 %5457  ;;  %v4984_v44 = vsel %vm4958_vm6, %v4853_v13, %v12389_v52 }
 0x4eb   :  { %v5596_v36 = vsel %vm5577_vm7, %v5458_v53, %v5460_v60  ;;  %5473 = vrot.lane.b32.xlu1 %v8640_v30, %s8662_s10  ;;  %5266 = vmatprep.subr.bf16.mxu1 %v4984_v44  ;;  %v8652_v60 = vld [vmem:[#allocation4 + $0x38] sm:$0xff]  }
 0x4ec   :  { %5471 = vrot.lane.b32.xlu0 %v13889_v34, %s8662_s10  ;;  %5727 = vmatpush1.bf16.msra.mxu0 %v5596_v36  ;;  %v6019_v44 = vld [vmem:[%s13292_s3] sm:$0xff] }
 0x4ed   :  { %5267 = vmatpush1.bf16.msra.mxu1 %v4983_v35  ;;  %v12533_v49 = vpop.permute.xlu1 %5481  ;;  %v12610_v30 = vld [vmem:[%s13291_s2 + $0x80] sm:$0xff]  }
 0x4ee   :  { %v5480_v38 = vpop.permute.xlu0 %5479 }
 0x4ef   :  { %5493 = vrot.lane.b32.xlu1 %v8641_v6, %s8662_s10  ;;  %v5606_v32 = vsel %vm5577_vm7, %v5480_v38, %v12533_v49 }
 0x4f0   :  { %5491 = vrot.lane.b32.xlu0 %v13893_v57, %s8662_s10  ;;  %5728 = vmatprep.subr.bf16.mxu0 %v5606_v32  ;;  %v6021_v32 = vld [vmem:[%s13292_s3 + $0x10] sm:$0xff] }
 0x4f1   :  { %v4873_v52 = vpop.permute.xlu1 %4872 }
 0x4f2   :  { %v4992_v16 = vsel %vm4958_vm6, %v12255_v47, %v4873_v52  ;;  %v5478_v34 = vpop.permute.xlu0 %5477  ;;  %v4993_v29 = vsel %vm4958_vm6, %v4873_v52, %v12402_v46  ;;  %v6022_v52 = vld [vmem:[%s13292_s3 + $0x18] sm:$0xff] }
 0x4f3   :  { %v5605_v23 = vsel %vm5577_vm7, %v5478_v34, %v5480_v38  ;;  %5513 = vrot.lane.b32.xlu1 %v8642_v15, %s8662_s10  ;;  %5268 = vmatprep.subr.bf16.mxu1 %v4993_v29  ;;  %v12637_v29 = vld [vmem:[%s13291_s2 + $0x88] sm:$0xff]  }
 0x4f4   :  { %5511 = vrot.lane.b32.xlu0 %v13894_v58, %s8662_s10  ;;  %5729 = vmatpush1.bf16.msra.mxu0 %v5605_v23  ;;  %v6693_v23 = vld [vmem:[#allocation2] sm:$0x1] }
 0x4f5   :  { %5269 = vmatpush1.bf16.msra.mxu1 %v4992_v16  ;;  %v12548_v57 = vpop.permute.xlu1 %5501 }
 0x4f6   :  { %v5500_v42 = vpop.permute.xlu0 %5499 }
 0x4f7   :  { %5533 = vrot.lane.b32.xlu1 %v8643_v48, %s8662_s10  ;;  %v5615_v47 = vsel %vm5577_vm7, %v5500_v42, %v12548_v57 }
 0x4f8   :  { %5531 = vrot.lane.b32.xlu0 %v13898_v26, %s8662_s10  ;;  %5730 = vmatprep.subr.bf16.mxu0 %v5615_v47 }
 0x4f9   :  { %v4893_v46 = vpop.permute.xlu1 %4892 }
 0x4fa   :  { %v5001_v9 = vsel %vm4958_vm6, %v12275_v18, %v4893_v46  ;;  %v5498_v58 = vpop.permute.xlu0 %5497  ;;  %v5002_v10 = vsel %vm4958_vm6, %v4893_v46, %v12423_v37 }
 0x4fb   :  { %v5614_v39 = vsel %vm5577_vm7, %v5498_v58, %v5500_v42  ;;  %5553 = vrot.lane.b32.xlu1 %v8644_v1, %s8662_s10  ;;  %5270 = vmatprep.subr.bf16.mxu1 %v5002_v10 }
 0x4fc   :  { %5551 = vrot.lane.b32.xlu0 %v13902_v22, %s8662_s10  ;;  %5731 = vmatpush1.bf16.msra.mxu0 %v5614_v39 }
 0x4fd   :  { %5271 = vmatpush1.bf16.msra.mxu1 %v5001_v9  ;;  %v12563_v26 = vpop.permute.xlu1 %5521 }
 0x4fe   :  { %v5520_v40 = vpop.permute.xlu0 %5519 }
 0x4ff   :  { %5573 = vrot.lane.b32.xlu1 %v8645_v11, %s8662_s10  ;;  %v5624_v18 = vsel %vm5577_vm7, %v5520_v40, %v12563_v26 }
 0x500   :  { %5571 = vrot.lane.b32.xlu0 %v13903_v50, %s8662_s10  ;;  %5732 = vmatprep.subr.bf16.mxu0 %v5624_v18 }
 0x501   :  { %v4913_v37 = vpop.permute.xlu1 %4912 }
 0x502   :  { %v5010_v12 = vsel %vm4958_vm6, %v12295_v7, %v4913_v37  ;;  %v5518_v22 = vpop.permute.xlu0 %5517  ;;  %v5011_v51 = vsel %vm4958_vm6, %v4913_v37, %v12431_v28  ;;  %v8649_v28 = vld [vmem:[#allocation4 + $0x10] sm:$0xff]  }
 0x503   :  { %v5623_v27 = vsel %vm5577_vm7, %v5518_v22, %v5520_v40  ;;  %5455 = vrot.lane.b32.xlu1 %v8646_v33, %s8662_s10  ;;  %5272 = vmatprep.subr.bf16.mxu1 %v5011_v51 }
 0x504   :  { %5435 = vrot.lane.b32.xlu0 %v8647_v5, %s8662_s10  ;;  %5733 = vmatpush1.bf16.msra.mxu0 %v5623_v27 }
 0x505   :  { %5273 = vmatpush1.bf16.msra.mxu1 %v5010_v12  ;;  %v12577_v50 = vpop.permute.xlu1 %5541 }
 0x506   :  { %v5540_v2 = vpop.permute.xlu0 %5539 }
 0x507   :  { %5495 = vrot.lane.b32.xlu1 %v8648_v59, %s8662_s10  ;;  %v5633_v7 = vsel %vm5577_vm7, %v5540_v2, %v12577_v50 }
 0x508   :  { %5475 = vrot.lane.b32.xlu0 %v8649_v28, %s8662_s10  ;;  %5734 = vmatprep.subr.bf16.mxu0 %v5633_v7 }
 0x509   :  { %v4933_v8 = vpop.permute.xlu1 %4932 }
 0x50a   :  { %v5019_v21 = vsel %vm4958_vm6, %v12315_v3, %v4933_v8  ;;  %v5538_v56 = vpop.permute.xlu0 %5537  ;;  %v5020_v14 = vsel %vm4958_vm6, %v4933_v8, %v12451_v31  ;;  %v8653_v31 = vld [vmem:[#allocation4 + $0x30] sm:$0xff]  }
 0x50b   :  { %v5632_v0 = vsel %vm5577_vm7, %v5538_v56, %v5540_v2  ;;  %5535 = vrot.lane.b32.xlu1 %v8650_v17, %s8662_s10  ;;  %5274 = vmatprep.subr.bf16.mxu1 %v5020_v14 }
 0x50c   :  { %5515 = vrot.lane.b32.xlu0 %v8651_v20, %s8662_s10  ;;  %5735 = vmatpush1.bf16.msra.mxu0 %v5632_v0 }
 0x50d   :  { %5275 = vmatpush1.bf16.msra.mxu1 %v5019_v21  ;;  %v12590_v24 = vpop.permute.xlu1 %5561 }
 0x50e   :  { %v5560_v41 = vpop.permute.xlu0 %5559 }
 0x50f   :  { %5575 = vrot.lane.b32.xlu1 %v8652_v60, %s8662_s10  ;;  %v5642_v3 = vsel %vm5577_vm7, %v5560_v41, %v12590_v24 }
 0x510   :  { %5555 = vrot.lane.b32.xlu0 %v8653_v31, %s8662_s10  ;;  %5736 = vmatprep.subr.bf16.mxu0 %v5642_v3 }
 0x511   :  { %v4953_v19 = vpop.permute.xlu1 %4952 }
 0x512   :  { %v5028_v13 = vsel %vm4958_vm6, %v12335_v61, %v4953_v19  ;;  %v5558_v35 = vpop.permute.xlu0 %5557  ;;  %v5029_v53 = vsel %vm4958_vm6, %v4953_v19, %v12459_v43 }
 0x513   :  { %v5641_v36 = vsel %vm5577_vm7, %v5558_v35, %v5560_v41  ;;  %5276 = vmatprep.subr.bf16.mxu1 %v5029_v53  ;;  %6030 = vperm.xlu1 %8311, %v6020_v45  }
 0x514   :  { %5737 = vmatpush1.bf16.msra.mxu0 %v5641_v36  ;;  %5277 = vmatpush1.bf16.msra.mxu1 %v5028_v13 }
 0x515   :  { %v12612_v61 = vpop.permute.xlu1 %5425  ;;  %6025 = vperm.xlu0 %8310, %v6019_v44  }
 0x516   :  { %v5424_v38 = vpop.permute.xlu0 %5423 }
 0x517   :  { %v5580_v43 = vsel %vm5577_vm7, %v12479_v63, %v5424_v38  ;;  %5755 = vmatmul.mubr.bf16.vlgmr.msra.gmra.mrb[4].mxu0 %v12610_v30  ;;  %v5581_v6 = vsel %vm5577_vm7, %v5424_v38, %v12612_v61  ;;  %5295 = vmatmul.mubr.bf16.vlgmr.msra.gmra.mrb[24].mxu1 %v12178_v54 }
 0x518   :  { %5775 = vmatprep.subr.bf16.mxu1 %v5581_v6  ;;  %5764 = vmatprep.mubr.bf16.mxu0 %v13707_v25 }
 0x519   :  { %5776 = vmatpush1.bf16.msra.mxu1 %v5580_v43  ;;  %v12627_v63 = vpop.permute.xlu1 %5445  ;;  %5304 = vmatprep.mubr.bf16.mxu1 %v13707_v25 }
 0x51a   :  { %v5444_v16 = vpop.permute.xlu0 %5443  ;;  %6035 = vperm.xlu1 %8311, %v6021_v32   ;;  %6040 = vperm.xlu0 %8310, %v6022_v52  }
 0x51b   :  { %v5589_v54 = vsel %vm5577_vm7, %v12500_v4, %v5444_v16  ;;  %v5590_v34 = vsel %vm5577_vm7, %v5444_v16, %v12627_v63 }
 0x51c   :  { %5777 = vmatprep.subr.bf16.mxu1 %v5590_v34 }
 0x51d   :  { %5778 = vmatpush1.bf16.msra.mxu1 %v5589_v54  ;;  %v5466_v15 = vpop.permute.xlu1 %5465 }
 0x51e   :  { %v5464_v42 = vpop.permute.xlu0 %5463  ;;  %6696 = vperm.xlu1 %8311, %v6693_v23  }
 0x51f   :  { %v5598_v48 = vsel %vm5577_vm7, %v12518_v62, %v5464_v42  ;;  %5765 = vmatmul.mubr.bf16.gmra.mrb[8].mxu0 %v12637_v29  ;;  %v5599_v4 = vsel %vm5577_vm7, %v5464_v42, %v5466_v15  ;;  %5305 = vmatmul.mubr.bf16.gmra.mrb[28].mxu1 %v12207_v55 }
 0x520   :  { %5779 = vmatprep.subr.bf16.mxu1 %v5599_v4  ;;  %5807 = vmatprep.mubr.bf16.mxu1 %v13707_v25 }
 0x521   :  { %5780 = vmatpush1.bf16.msra.mxu1 %v5598_v48  ;;  %v5486_v47 = vpop.permute.xlu1 %5485  ;;  %5860 = vmatprep.mubr.bf16.mxu0 %v13707_v25 }
 0x522   :  { %v5484_v46 = vpop.permute.xlu0 %5483 }
 0x523   :  { %v5607_v9 = vsel %vm5577_vm7, %v12533_v49, %v5484_v46  ;;  %v5608_v58 = vsel %vm5577_vm7, %v5484_v46, %v5486_v47 }
 0x524   :  { %5781 = vmatprep.subr.bf16.mxu1 %v5608_v58 }
 0x525   :  { %5782 = vmatpush1.bf16.msra.mxu1 %v5607_v9  ;;  %v5506_v62 = vpop.permute.xlu1 %5505 }
 0x526   :  { %v5504_v10 = vpop.permute.xlu0 %5503 }
 0x527   :  { %v5616_v55 = vsel %vm5577_vm7, %v12548_v57, %v5504_v10  ;;  %v5617_v39 = vsel %vm5577_vm7, %v5504_v10, %v5506_v62 }
 0x528   :  { %5783 = vmatprep.subr.bf16.mxu1 %v5617_v39 }
 0x529   :  { %5784 = vmatpush1.bf16.msra.mxu1 %v5616_v55  ;;  %v5526_v1 = vpop.permute.xlu1 %5525 }
 0x52a   :  { %v5524_v40 = vpop.permute.xlu0 %5523 }
 0x52b   :  { %v5625_v11 = vsel %vm5577_vm7, %v12563_v26, %v5524_v40  ;;  %v5626_v49 = vsel %vm5577_vm7, %v5524_v40, %v5526_v1 }
 0x52c   :  { %5785 = vmatprep.subr.bf16.mxu1 %v5626_v49 }
 0x52d   :  { %5786 = vmatpush1.bf16.msra.mxu1 %v5625_v11  ;;  %v5546_v18 = vpop.permute.xlu1 %5545 }
 0x52e   :  { %v5544_v37 = vpop.permute.xlu0 %5543 }
 0x52f   :  { %v5634_v12 = vsel %vm5577_vm7, %v12577_v50, %v5544_v37  ;;  %v5635_v57 = vsel %vm5577_vm7, %v5544_v37, %v5546_v18 }
 0x530   :  { %5787 = vmatprep.subr.bf16.mxu1 %v5635_v57 }
 0x531   :  { %5788 = vmatpush1.bf16.msra.mxu1 %v5634_v12  ;;  %v5566_v22 = vpop.permute.xlu1 %5565 }
 0x532   :  { %v5564_v51 = vpop.permute.xlu0 %5563 }
 0x533   :  { %v5643_v27 = vsel %vm5577_vm7, %v12590_v24, %v5564_v51  ;;  %v5644_v26 = vsel %vm5577_vm7, %v5564_v51, %v5566_v22 }
 0x534   :  { %5789 = vmatprep.subr.bf16.mxu1 %v5644_v26 }
 0x535   :  { %5790 = vmatpush1.bf16.msra.mxu1 %v5643_v27  ;;  %v5430_v33 = vpop.permute.xlu1 %5429 }
 0x536   :  { %v5428_v5 = vpop.permute.xlu0 %5427 }
 0x537   :  { %v5582_v2 = vsel %vm5577_vm7, %v12612_v61, %v5428_v5  ;;  %v5583_v50 = vsel %vm5577_vm7, %v5428_v5, %v5430_v33 }
 0x538   :  { %5808 = vmatmul.mubr.bf16.vlgmr.msra.gmra.mrb[8].mxu1 %v12610_v30  ;;  %5828 = vmatprep.subr.bf16.mxu0 %v5583_v50 }
 0x539   :  { %5829 = vmatpush1.bf16.msra.mxu0 %v5582_v2  ;;  %v5450_v59 = vpop.permute.xlu1 %5449  ;;  %5817 = vmatprep.mubr.bf16.mxu1 %v13707_v25 }
 0x53a   :  { %v5448_v7 = vpop.permute.xlu0 %5447 }
 0x53b   :  { %v5591_v28 = vsel %vm5577_vm7, %v12627_v63, %v5448_v7  ;;  %v5592_v8 = vsel %vm5577_vm7, %v5448_v7, %v5450_v59 }
 0x53c   :  { %5830 = vmatprep.subr.bf16.mxu0 %v5592_v8 }
 0x53d   :  { %5831 = vmatpush1.bf16.msra.mxu0 %v5591_v28  ;;  %v5470_v21 = vpop.permute.xlu1 %5469 }
 0x53e   :  { %v5468_v56 = vpop.permute.xlu0 %5467 }
 0x53f   :  { %v5600_v14 = vsel %vm5577_vm7, %v5466_v15, %v5468_v56  ;;  %v5601_v0 = vsel %vm5577_vm7, %v5468_v56, %v5470_v21 }
 0x540   :  { %5818 = vmatmul.mubr.bf16.gmra.mrb[12].mxu1 %v12637_v29  ;;  %5832 = vmatprep.subr.bf16.mxu0 %v5601_v0 }
 0x541   :  { %5833 = vmatpush1.bf16.msra.mxu0 %v5600_v14  ;;  %v5490_v17 = vpop.permute.xlu1 %5489  ;;  %5913 = vmatprep.mubr.bf16.mxu1 %v13707_v25 }
 0x542   :  { %v5488_v20 = vpop.permute.xlu0 %5487 }
 0x543   :  { %v5609_v24 = vsel %vm5577_vm7, %v5486_v47, %v5488_v20  ;;  %v5610_v41 = vsel %vm5577_vm7, %v5488_v20, %v5490_v17  ;;  %v8412_v20 = vld [vmem:[%s13294_s5 + $0x48] sm:$0xff]  }
 0x544   :  { %5834 = vmatprep.subr.bf16.mxu0 %v5610_v41  ;;  %v8413_v41 = vld [vmem:[%s13294_s5 + $0x8] sm:$0xff]  }
 0x545   :  { %5835 = vmatpush1.bf16.msra.mxu0 %v5609_v24  ;;  %v5510_v60 = vpop.permute.xlu1 %5509 }
 0x546   :  { %v5508_v3 = vpop.permute.xlu0 %5507 }
 0x547   :  { %v5618_v31 = vsel %vm5577_vm7, %v5506_v62, %v5508_v3  ;;  %v5619_v45 = vsel %vm5577_vm7, %v5508_v3, %v5510_v60  ;;  %v8414_v3 = vld [vmem:[%s13294_s5 + $0x50] sm:$0xff]  }
 0x548   :  { %5836 = vmatprep.subr.bf16.mxu0 %v5619_v45  ;;  %v8415_v45 = vld [vmem:[%s13294_s5 + $0x10] sm:$0xff]  }
 0x549   :  { %5837 = vmatpush1.bf16.msra.mxu0 %v5618_v31  ;;  %v5530_v19 = vpop.permute.xlu1 %5529 }
 0x54a   :  { %v5528_v13 = vpop.permute.xlu0 %5527 }
 0x54b   :  { %v5627_v35 = vsel %vm5577_vm7, %v5526_v1, %v5528_v13  ;;  %v5628_v53 = vsel %vm5577_vm7, %v5528_v13, %v5530_v19 }
 0x54c   :  { %5838 = vmatprep.subr.bf16.mxu0 %v5628_v53  ;;  %v8417_v53 = vld [vmem:[%s13294_s5 + $0x18] sm:$0xff]  }
 0x54d   :  { %5839 = vmatpush1.bf16.msra.mxu0 %v5627_v35  ;;  %v5550_v44 = vpop.permute.xlu1 %5549  ;;  %v8416_v35 = vld [vmem:[%s13294_s5 + $0x58] sm:$0xff]  }
 0x54e   :  { %v5548_v36 = vpop.permute.xlu0 %5547 }
 0x54f   :  { %v5636_v61 = vsel %vm5577_vm7, %v5546_v18, %v5548_v36  ;;  %v5637_v38 = vsel %vm5577_vm7, %v5548_v36, %v5550_v44  ;;  %v8418_v36 = vld [vmem:[%s13294_s5 + $0x60] sm:$0xff]  }
 0x550   :  { %5840 = vmatprep.subr.bf16.mxu0 %v5637_v38  ;;  %v8420_v38 = vld [vmem:[%s13294_s5 + $0x68] sm:$0xff]  }
 0x551   :  { %5841 = vmatpush1.bf16.msra.mxu0 %v5636_v61  ;;  %v5570_v43 = vpop.permute.xlu1 %5569  ;;  %v8419_v61 = vld [vmem:[%s13294_s5 + $0x20] sm:$0xff]  }
 0x552   :  { %v5568_v6 = vpop.permute.xlu0 %5567 }
 0x553   :  { %v5645_v32 = vsel %vm5577_vm7, %v5566_v22, %v5568_v6  ;;  %v5646_v52 = vsel %vm5577_vm7, %v5568_v6, %v5570_v43  ;;  %v8422_v6 = vld [vmem:[%s13294_s5 + $0x70] sm:$0xff]  }
 0x554   :  { %5842 = vmatprep.subr.bf16.mxu0 %v5646_v52  ;;  %v8424_v52 = vld [vmem:[%s13294_s5 + $0x78] sm:$0xff]  }
 0x555   :  { %5843 = vmatpush1.bf16.msra.mxu0 %v5645_v32  ;;  %v5434_v63 = vpop.permute.xlu1 %5433  ;;  %v8423_v32 = vld [vmem:[%s13294_s5 + $0x30] sm:$0xff]  }
 0x556   :  { %v5432_v16 = vpop.permute.xlu0 %5431 }
 0x557   :  { %v5584_v54 = vsel %vm5577_vm7, %v5430_v33, %v5432_v16  ;;  %v5585_v34 = vsel %vm5577_vm7, %v5432_v16, %v5434_v63 }
 0x558   :  { %5861 = vmatmul.mubr.bf16.vlgmr.msra.gmra.mrb[12].mxu0 %v12610_v30  ;;  %5881 = vmatprep.subr.bf16.mxu1 %v5585_v34  ;;  %v14249_v34 = vld [vmem:[#allocation91_spill] sm:$0xff] }
 0x559   :  { %5882 = vmatpush1.bf16.msra.mxu1 %v5584_v54  ;;  %v5454_v23 = vpop.permute.xlu1 %5453  ;;  %5870 = vmatprep.mubr.bf16.mxu0 %v13707_v25 }
 0x55a   :  { %v5452_v15 = vpop.permute.xlu0 %5451 }
 0x55b   :  { %v5593_v42 = vsel %vm5577_vm7, %v5450_v59, %v5452_v15  ;;  %v5594_v48 = vsel %vm5577_vm7, %v5452_v15, %v5454_v23 }
 0x55c   :  { %5883 = vmatprep.subr.bf16.mxu1 %v5594_v48 }
 0x55d   :  { %5884 = vmatpush1.bf16.msra.mxu1 %v5593_v42  ;;  %v5474_v4 = vpop.permute.xlu1 %5473  ;;  %v14250_v42 = vld [vmem:[#allocation118_spill] sm:$0xff] }
 0x55e   :  { %v5472_v47 = vpop.permute.xlu0 %5471 }
 0x55f   :  { %v5602_v46 = vsel %vm5577_vm7, %v5470_v21, %v5472_v47  ;;  %v5603_v9 = vsel %vm5577_vm7, %v5472_v47, %v5474_v4  ;;  %v14251_v47 = vld [vmem:[#allocation107_spill] sm:$0xff] }
 0x560   :  { %5871 = vmatmul.mubr.bf16.gmra.mrb[16].mxu0 %v12637_v29  ;;  %5885 = vmatprep.subr.bf16.mxu1 %v5603_v9 }
 0x561   :  { %5886 = vmatpush1.bf16.msra.mxu1 %v5602_v46  ;;  %v5494_v58 = vpop.permute.xlu1 %5493  ;;  %7987 = vmatprep.mubr.bf16.mxu0 %v12610_v30 }
 0x562   :  { %v5492_v62 = vpop.permute.xlu0 %5491 }
 0x563   :  { %v5611_v10 = vsel %vm5577_vm7, %v5490_v17, %v5492_v62  ;;  %v5612_v55 = vsel %vm5577_vm7, %v5492_v62, %v5494_v58 }
 0x564   :  { %5887 = vmatprep.subr.bf16.mxu1 %v5612_v55 }
 0x565   :  { %5888 = vmatpush1.bf16.msra.mxu1 %v5611_v10  ;;  %v5514_v39 = vpop.permute.xlu1 %5513  ;;  %v14252_v10 = vld [vmem:[#allocation123_spill] sm:$0xff] }
 0x566   :  { %v5512_v1 = vpop.permute.xlu0 %5511 }
 0x567   :  { %v5620_v40 = vsel %vm5577_vm7, %v5510_v60, %v5512_v1  ;;  %v5621_v11 = vsel %vm5577_vm7, %v5512_v1, %v5514_v39 }
 0x568   :  { %5889 = vmatprep.subr.bf16.mxu1 %v5621_v11 }
 0x569   :  { %5890 = vmatpush1.bf16.msra.mxu1 %v5620_v40  ;;  %v5534_v49 = vpop.permute.xlu1 %5533 }
 0x56a   :  { %v5532_v18 = vpop.permute.xlu0 %5531 }
 0x56b   :  { %v5629_v37 = vsel %vm5577_vm7, %v5530_v19, %v5532_v18  ;;  %v5630_v12 = vsel %vm5577_vm7, %v5532_v18, %v5534_v49 }
 0x56c   :  { %5891 = vmatprep.subr.bf16.mxu1 %v5630_v12 }
 0x56d   :  { %5892 = vmatpush1.bf16.msra.mxu1 %v5629_v37  ;;  %v5554_v57 = vpop.permute.xlu1 %5553 }
 0x56e   :  { %v5552_v22 = vpop.permute.xlu0 %5551 }
 0x56f   :  { %v5638_v51 = vsel %vm5577_vm7, %v5550_v44, %v5552_v22  ;;  %v5639_v27 = vsel %vm5577_vm7, %v5552_v22, %v5554_v57 }
 0x570   :  { %5893 = vmatprep.subr.bf16.mxu1 %v5639_v27  ;;  %v14253_v27 = vld [vmem:[#allocation69_spill] sm:$0xff] }
 0x571   :  { %5894 = vmatpush1.bf16.msra.mxu1 %v5638_v51  ;;  %v5574_v26 = vpop.permute.xlu1 %5573 }
 0x572   :  { %v5572_v33 = vpop.permute.xlu0 %5571 }
 0x573   :  { %v5647_v5 = vsel %vm5577_vm7, %v5570_v43, %v5572_v33  ;;  %v5648_v2 = vsel %vm5577_vm7, %v5572_v33, %v5574_v26  ;;  %v8421_v43 = vld [vmem:[%s13294_s5 + $0x28] sm:$0xff]  }
 0x574   :  { %5895 = vmatprep.subr.bf16.mxu1 %v5648_v2 }
 0x575   :  { %5896 = vmatpush1.bf16.msra.mxu1 %v5647_v5  ;;  %v5456_v50 = vpop.permute.xlu1 %5455 }
 0x576   :  { %v5436_v59 = vpop.permute.xlu0 %5435  ;;  %v5595_v28 = vsel %vm5577_vm7, %v5454_v23, %v5456_v50  ;;  %v14254_v50 = vld [vmem:[#allocation125_spill] sm:$0xff] }
 0x577   :  { %v5586_v7 = vsel %vm5577_vm7, %v5434_v63, %v5436_v59  ;;  %v8426_v63 = vld [vmem:[%s13294_s5 + $0xc0] sm:$0xff]  }
 0x578   :  { %5914 = vmatmul.mubr.bf16.vlgmr.msra.gmra.mrb[24].mxu1 %v12610_v30  ;;  %7971 = vmatprep.subr.bf16.mxu0 %v5586_v7  ;;  %v8410_v30 = vld [vmem:[%s13294_s5 + $0x40] sm:$0xff]  }
 0x579   :  { %7972 = vmatpush3.bf16.msra.mxu0 %v5586_v7  ;;  %5923 = vmatprep.mubr.bf16.mxu1 %v13707_v25  ;;  %v5496_v56 = vpop.permute.xlu1 %5495  ;;  %v8411_v25 = vld [vmem:[%s13294_s5] sm:$0xff]  }
 0x57a   :  { %v5476_v8 = vpop.permute.xlu0 %5475  ;;  %7973 = vmatprep.subr.bf16.mxu0 %v5595_v28  ;;  %v5613_v14 = vsel %vm5577_vm7, %v5494_v58, %v5496_v56  ;;  %7714 = vmatprep.subr.bf16.mxu1 %v8410_v30 }
 0x57b   :  { %v5604_v21 = vsel %vm5577_vm7, %v5474_v4, %v5476_v8  ;;  %7715 = vmatpush3.bf16.msra.mxu1 %v8411_v25  ;;  %v14255_v8 = vld [vmem:[#allocation9_spill] sm:$0xff] }
 0x57c   :  { %7716 = vmatprep.subr.bf16.mxu1 %v8412_v20 }
 0x57d   :  { %7974 = vmatpush3.bf16.msra.mxu0 %v5595_v28  ;;  %v5536_v24 = vpop.permute.xlu1 %5535 }
 0x57e   :  { %7975 = vmatprep.subr.bf16.mxu0 %v5604_v21  ;;  %v5516_v0 = vpop.permute.xlu0 %5515  ;;  %v5631_v60 = vsel %vm5577_vm7, %v5534_v49, %v5536_v24 }
 0x57f   :  { %v5622_v17 = vsel %vm5577_vm7, %v5514_v39, %v5516_v0  ;;  %7717 = vmatpush3.bf16.msra.mxu1 %v8413_v41  ;;  %v14256_v0 = vld [vmem:[#allocation56_spill] sm:$0xff] }
 0x580   :  { %5924 = vmatmul.mubr.bf16.gmra.mrb[28].mxu1 %v12637_v29  ;;  %7718 = vmatprep.subr.bf16.mxu1 %v8414_v3 }
 0x581   :  { %7976 = vmatpush3.bf16.msra.mxu0 %v5604_v21  ;;  %v5576_v13 = vpop.permute.xlu1 %5575 }
 0x582   :  { %7977 = vmatprep.subr.bf16.mxu0 %v5613_v14  ;;  %v5556_v31 = vpop.permute.xlu0 %5555  ;;  %v5649_v44 = vsel %vm5577_vm7, %v5574_v26, %v5576_v13 }
 0x583   :  { %7719 = vmatpush3.bf16.msra.mxu1 %v8415_v45  ;;  %v5640_v19 = vsel %vm5577_vm7, %v5554_v57, %v5556_v31 }
 0x584   :  { %7720 = vmatprep.subr.bf16.mxu1 %v8416_v35 }
 0x585   :  { %7978 = vmatpush3.bf16.msra.mxu0 %v5613_v14 }
 0x586   :  { %7979 = vmatprep.subr.bf16.mxu0 %v5622_v17 }
 0x587   :  { %7721 = vmatpush3.bf16.msra.mxu1 %v8417_v53  ;;  %v6367_v53 = vld [vmem:[%s13293_s4] sm:$0xff] }
 0x588   :  { %7722 = vmatprep.subr.bf16.mxu1 %v8418_v36 }
 0x589   :  { %7980 = vmatpush3.bf16.msra.mxu0 %v5622_v17 }
 0x58a   :  { %7981 = vmatprep.subr.bf16.mxu0 %v5631_v60 }
 0x58b   :  { %7723 = vmatpush3.bf16.msra.mxu1 %v8419_v61 }
 0x58c   :  { %7724 = vmatprep.subr.bf16.mxu1 %v8420_v38  ;;  %v6372_v38 = vld [vmem:[%s13293_s4 + $0x24] sm:$0xff] }
 0x58d   :  { %7982 = vmatpush3.bf16.msra.mxu0 %v5631_v60 }
 0x58e   :  { %7983 = vmatprep.subr.bf16.mxu0 %v5640_v19 }
 0x58f   :  { %7725 = vmatpush3.bf16.msra.mxu1 %v8421_v43 }
 0x590   :  { %7726 = vmatprep.subr.bf16.mxu1 %v8422_v6 }
 0x591   :  { %7984 = vmatpush3.bf16.msra.mxu0 %v5640_v19 }
 0x592   :  { %7985 = vmatprep.subr.bf16.mxu0 %v5649_v44  ;;  %v12772_v62 = vpop.permute.xlu1 %6030 }
 0x593   :  { %7727 = vmatpush3.bf16.msra.mxu1 %v8423_v32 }
 0x594   :  { %7728 = vmatprep.subr.bf16.mxu1 %v8424_v52  ;;  %v12766_v54 = vpop.permute.xlu0 %6025 }
 0x595   :  { %7986 = vmatpush3.bf16.msra.mxu0 %v5649_v44 }
 0x598   :  { %7988 = vmatmul.mubr.bf16.vlgmr.msra.gmra.mrb[0].mxu0 %v12637_v29  ;;  %v8425_v29 = vld [vmem:[%s13294_s5 + $0x38] sm:$0xff]  }
 0x599   :  { %7729 = vmatpush3.bf16.msra.mxu1 %v8425_v29  ;;  %v12788_v2 = vpop.permute.xlu1 %6035  ;;  %v12798_v30 = vpop.permute.xlu0 %6040  ;;  %v6387_v29 = vunpack.c.l.bf16 %v6367_v53 }
 0x59a   :  { %7736 = vmatprep.subr.bf16.mxu1 %v8426_v63 }
 0x5ea   :  { %v5756_v16 = vpop.f32.mrb[4].mxu0 }
 0x5eb   :  { %v8011_v23 = vadd.f32 %v5756_v16, %v14249_v34  ;;  %v5758_v15 = vpop.f32.mrb[5].mxu0  ;;  %v6388_v34 = vunpack.c.h.bf16 %v6367_v53 }
 0x5ec   :  { %v8012_v48 = vadd.f32 %v5758_v15, %v14250_v42  ;;  %v5760_v4 = vpop.f32.mrb[6].mxu0  ;;  %v6396_v42 = vunpack.c.l.bf16 %v6372_v38 }
 0x5ed   :  { %v8013_v46 = vadd.f32 %v5760_v4, %v14251_v47  ;;  %v6043_v9 = vadd.f32 %v8011_v23, %v12766_v54  ;;  %v5762_v58 = vpop.f32.mrb[7].mxu0 }
 0x5ee   :  { %v8014_v55 = vadd.f32 %v5762_v58, %v14252_v10  ;;  %v12776_v39 = vadd.f32 %v8012_v48, %v12766_v54  ;;  %v6377_v48 = vld [vmem:[%s13293_s4 + $0x48] sm:$0xff] }
 0x5ef   :  { %v12779_v1 = vadd.f32 %v8013_v46, %v12772_v62  ;;  %v6079_v40 = vmin.f32 %v6043_v9, 0.0  ;;  %vm6259_vm8 = vcmp.gt.f32.partialorder %v6043_v9, 0.0  ;;  %v6382_v58 = vld [vmem:[%s13293_s4 + $0x6c] sm:$0xff] }
 0x5f0   :  { %v12782_v11 = vadd.f32 %v8014_v55, %v12772_v62  ;;  %v6080_v49 = vmin.f32 %v12776_v39, 0.0  ;;  %vm6260_vm9 = vcmp.gt.f32.partialorder %v12776_v39, 0.0  ;;  %v6397_v55 = vunpack.c.h.bf16 %v6372_v38 }
 0x5f1   :  { %v6088_v18 = vmin.f32 %v12779_v1, 0.0  ;;  %v6115_v37 = vmul.f32 1.442695, %v6079_v40  ;;  %vm6268_vm10 = vcmp.gt.f32.partialorder %v12779_v1, 0.0 }
 0x5f2   :  { %v6089_v12 = vmin.f32 %v12782_v11, 0.0  ;;  %v6117_v57 = vmul.f32 1.442695, %v6080_v49  ;;  %v5766_v22 = vpop.f32.mrb[8].mxu0  ;;  %vm6269_vm11 = vcmp.gt.f32.partialorder %v12782_v11, 0.0 }
 0x5f3   :  { %8482 = vpow2.f32 %v6115_v37  ;;  %v6133_v51 = vmul.f32 1.442695, %v6088_v18  ;;  %v8015_v26 = vadd.f32 %v5766_v22, %v14253_v27  ;;  %v5768_v33 = vpop.f32.mrb[9].mxu0  ;;  %v6405_v37 = vunpack.c.l.bf16 %v6377_v48 }
 0x5f4   :  { %8484 = vpow2.f32 %v6117_v57  ;;  %v6135_v5 = vmul.f32 1.442695, %v6089_v12  ;;  %v8016_v59 = vadd.f32 %v5768_v33, %v14254_v50  ;;  %v5770_v7 = vpop.f32.mrb[10].mxu0  ;;  %v6415_v50 = vunpack.c.h.bf16 %v6382_v58 }
 0x5f5   :  { %8486 = vpow2.f32 %v6133_v51  ;;  %v12792_v28 = vadd.f32 %v8015_v26, %v12788_v2  ;;  %v8017_v21 = vadd.f32 %v5770_v7, %v14255_v8  ;;  %v5772_v56 = vpop.f32.mrb[11].mxu0  ;;  %v6406_v51 = vunpack.c.h.bf16 %v6377_v48 }
 0x5f6   :  { %8488 = vpow2.f32 %v6135_v5  ;;  %v12796_v14 = vadd.f32 %v8016_v59, %v12788_v2  ;;  %v8018_v25 = vadd.f32 %v5772_v56, %v14256_v0 }
 0x5f7   :  { %v6097_v17 = vmin.f32 %v12792_v28, 0.0  ;;  %v12803_v20 = vadd.f32 %v8017_v21, %v12798_v30  ;;  %vm6277_vm12 = vcmp.gt.f32.partialorder %v12792_v28, 0.0 }
 0x5f8   :  { %v6098_v24 = vmin.f32 %v12796_v14, 0.0  ;;  %v12807_v41 = vadd.f32 %v8018_v25, %v12798_v30  ;;  %vm6278_vm13 = vcmp.gt.f32.partialorder %v12796_v14, 0.0 }
 0x5f9   :  { %v6151_v60 = vmul.f32 1.442695, %v6097_v17  ;;  %v6106_v3 = vmin.f32 %v12803_v20, 0.0  ;;  %vm6286_vm14 = vcmp.gt.f32.partialorder %v12803_v20, 0.0 }
 0x5fa   :  { %v6153_v31 = vmul.f32 1.442695, %v6098_v24  ;;  %v6107_v45 = vmin.f32 %v12807_v41, 0.0  ;;  %vm6287_vm15 = vcmp.gt.f32.partialorder %v12807_v41, 0.0 }
 0x5fb   :  { %8490 = vpow2.f32 %v6151_v60  ;;  %v6169_v19 = vmul.f32 1.442695, %v6106_v3 }
 0x5fc   :  { %8492 = vpow2.f32 %v6153_v31  ;;  %v6171_v13 = vmul.f32 1.442695, %v6107_v45 }
 0x5fd   :  { %v8483_v35 = vpop.eup %8482  ;;  %8494 = vpow2.f32 %v6169_v19 }
 0x5fe   :  { %v8485_v44 = vpop.eup %8484  ;;  %v7516_v36 = vadd.f32 -1.0, %v8483_v35  ;;  %8496 = vpow2.f32 %v6171_v13 }
 0x5ff   :  { %v8487_v61 = vpop.eup %8486  ;;  %v7517_v43 = vadd.f32 -1.0, %v8485_v44 }
 0x600   :  { %v8489_v6 = vpop.eup %8488  ;;  %v7525_v32 = vadd.f32 -1.0, %v8487_v61  ;;  %v6223_v52 = vmul.f32 1.6732632, %v7516_v36 }
 0x601   :  { %v7526_v63 = vadd.f32 -1.0, %v8489_v6  ;;  %v6224_v16 = vmul.f32 1.6732632, %v7517_v43 }
 0x602   :  { %v6232_v23 = vmul.f32 1.6732632, %v7525_v32  ;;  %v6295_v15 = vsel %vm6259_vm8, %v6043_v9, %v6223_v52 }
 0x603   :  { %v6331_v4 = vmul.f32 1.050701, %v6295_v15  ;;  %v6233_v47 = vmul.f32 1.6732632, %v7526_v63  ;;  %v6296_v46 = vsel %vm6260_vm9, %v12776_v39, %v6224_v16  ;;  %v6414_v39 = vunpack.c.l.bf16 %v6382_v58 }
 0x604   :  { %v6304_v10 = vsel %vm6268_vm10, %v12779_v1, %v6232_v23  ;;  %v6332_v9 = vmul.f32 1.050701, %v6296_v46 }
 0x605   :  { %v8491_v40 = vpop.eup %8490  ;;  %v6340_v49 = vmul.f32 1.050701, %v6304_v10  ;;  %v6305_v18 = vsel %vm6269_vm11, %v12782_v11, %v6233_v47  ;;  %v6423_v26 = vmul.f32 %v6387_v29, %v6331_v4 }
 0x606   :  { %v8493_v12 = vpop.eup %8492  ;;  %v6341_v57 = vmul.f32 1.050701, %v6305_v18  ;;  %v7534_v22 = vadd.f32 -1.0, %v8491_v40  ;;  %v6424_v59 = vmul.f32 %v6388_v34, %v6332_v9 }
 0x607   :  { %v8495_v27 = vpop.eup %8494  ;;  %v6432_v33 = vmul.f32 %v6396_v42, %v6340_v49  ;;  %v7535_v5 = vadd.f32 -1.0, %v8493_v12 }
 0x608   :  { %v8497_v1 = vpop.eup %8496  ;;  %v6433_v7 = vmul.f32 %v6397_v55, %v6341_v57  ;;  %v6241_v8 = vmul.f32 1.6732632, %v7534_v22  ;;  %v7543_v21 = vadd.f32 -1.0, %v8495_v27 }
 0x609   :  { %v6459_v56 = vadd.f32 %v6432_v33, %v6423_v26  ;;  %v6242_v11 = vmul.f32 1.6732632, %v7535_v5  ;;  %v7544_v0 = vadd.f32 -1.0, %v8497_v1 }
 0x60a   :  { %v6468_v25 = vadd.f32 %v6433_v7, %v6424_v59  ;;  %v6313_v17 = vsel %vm6277_vm12, %v12792_v28, %v6241_v8  ;;  %v6250_v24 = vmul.f32 1.6732632, %v7543_v21  ;;  %v12872_v21 = vld [vmem:[%s13293_s4 + $0x8] sm:$0xff] }
 0x60b   :  { %v6349_v60 = vmul.f32 1.050701, %v6313_v17  ;;  %v6314_v3 = vsel %vm6278_vm13, %v12796_v14, %v6242_v11  ;;  %v6251_v31 = vmul.f32 1.6732632, %v7544_v0  ;;  %v5809_v45 = vpop.f32.mrb[8].mxu1  ;;  %v12877_v0 = vld [vmem:[%s13293_s4 + $0x2c] sm:$0xff] }
 0x60c   :  { %v6350_v19 = vmul.f32 1.050701, %v6314_v3  ;;  %v6322_v13 = vsel %vm6286_vm14, %v12803_v20, %v6250_v24  ;;  %v12837_v35 = vadd.f32 %v12766_v54, %v5809_v45  ;;  %v5811_v53 = vpop.f32.mrb[9].mxu1 }
 0x60d   :  { %v6441_v28 = vmul.f32 %v6405_v37, %v6349_v60  ;;  %v6358_v44 = vmul.f32 1.050701, %v6322_v13  ;;  %v6323_v36 = vsel %vm6287_vm15, %v12807_v41, %v6251_v31  ;;  %v12841_v61 = vadd.f32 %v12766_v54, %v5811_v53  ;;  %v5813_v14 = vpop.f32.mrb[10].mxu1 }
 0x60e   :  { %v6442_v38 = vmul.f32 %v6406_v51, %v6350_v19  ;;  %v6359_v43 = vmul.f32 1.050701, %v6323_v36  ;;  %v6081_v6 = vmin.f32 %v12837_v35, 0.0  ;;  %v5815_v32 = vpop.f32.mrb[11].mxu1  ;;  %v12846_v23 = vadd.f32 %v12772_v62, %v5813_v14 }
 0x60f   :  { %v6460_v20 = vadd.f32 %v6459_v56, %v6441_v28  ;;  %v6450_v52 = vmul.f32 %v6414_v39, %v6358_v44  ;;  %v6082_v29 = vmin.f32 %v12841_v61, 0.0  ;;  %v12849_v42 = vadd.f32 %v12772_v62, %v5815_v32  ;;  %v12885_v28 = vld [vmem:[%s13293_s4 + $0x50] sm:$0xff] }
 0x610   :  { %v6469_v63 = vadd.f32 %v6468_v25, %v6442_v38  ;;  %v6451_v16 = vmul.f32 %v6415_v50, %v6359_v43  ;;  %v6119_v34 = vmul.f32 1.442695, %v6081_v6  ;;  %v6090_v48 = vmin.f32 %v12846_v23, 0.0  ;;  %v12892_v43 = vld [vmem:[%s13293_s4 + $0x74] sm:$0xff] }
 0x611   :  { %v6461_v41 = vadd.f32 %v6460_v20, %v6450_v52  ;;  %v6121_v15 = vmul.f32 1.442695, %v6082_v29  ;;  %v6091_v46 = vmin.f32 %v12849_v42, 0.0  ;;  %v6389_v31 = vunpack.c.l.bf16 %v12872_v21 }
 0x612   :  { %8498 = vpow2.f32 %v6119_v34  ;;  %v6470_v4 = vadd.f32 %v6469_v63, %v6451_v16  ;;  %v6137_v10 = vmul.f32 1.442695, %v6090_v48  ;;  %v6390_v13 = vunpack.c.h.bf16 %v12872_v21 }
 0x613   :  { %v6462_v47 = vrot.slane %v6461_v41, 4  ;;  %8500 = vpow2.f32 %v6121_v15  ;;  %v5819_v58 = vpop.f32.mrb[12].mxu1  ;;  %v6139_v49 = vmul.f32 1.442695, %v6091_v46  ;;  %v6398_v53 = vunpack.c.l.bf16 %v12877_v0 }
 0x614   :  { %v12854_v9 = vadd.f32 %v12788_v2, %v5819_v58  ;;  %v5821_v55 = vpop.f32.mrb[13].mxu1  ;;  %v6471_v12 = vrot.slane %v6470_v4, 4  ;;  %8502 = vpow2.f32 %v6137_v10  ;;  %vm6261_vm0 = vcmp.gt.f32.partialorder %v12837_v35, 0.0 }
 0x615   :  { %v6463_v40 = vadd.f32 %v6462_v47, %v6461_v41  ;;  %v12857_v18 = vadd.f32 %v12788_v2, %v5821_v55  ;;  %v5823_v37 = vpop.f32.mrb[14].mxu1  ;;  %8504 = vpow2.f32 %v6139_v49  ;;  %v6399_v38 = vunpack.c.h.bf16 %v12877_v0  ;;  %v8428_v47 = vld [vmem:[%s13294_s5 + $0xc8] sm:$0xff]  }
 0x616   :  { %v6099_v57 = vmin.f32 %v12854_v9, 0.0  ;;  %v12861_v22 = vadd.f32 %v12798_v30, %v5823_v37  ;;  %v5825_v51 = vpop.f32.mrb[15].mxu1  ;;  %v6472_v1 = vadd.f32 %v6471_v12, %v6470_v4  ;;  %vm6262_vm1 = vcmp.gt.f32.partialorder %v12841_v61, 0.0 }
 0x617   :  { %v6464_v39 = vrot.slane %v6463_v40, 2  ;;  %v6100_v27 = vmin.f32 %v12857_v18, 0.0  ;;  %v12866_v5 = vadd.f32 %v12798_v30, %v5825_v51  ;;  %v6407_v34 = vunpack.c.l.bf16 %v12885_v28 }
 0x618   :  { %v6155_v26 = vmul.f32 1.442695, %v6099_v57  ;;  %v6108_v33 = vmin.f32 %v12861_v22, 0.0  ;;  %v6473_v56 = vrot.slane %v6472_v1, 2  ;;  %v6408_v41 = vunpack.c.h.bf16 %v12885_v28 }
 0x619   :  { %v6157_v50 = vmul.f32 1.442695, %v6100_v27  ;;  %v6465_v59 = vadd.f32 %v6464_v39, %v6463_v40  ;;  %v6109_v8 = vmin.f32 %v12866_v5, 0.0  ;;  %vm6270_vm2 = vcmp.gt.f32.partialorder %v12846_v23, 0.0 }
 0x61a   :  { %8506 = vpow2.f32 %v6155_v26  ;;  %v6173_v7 = vmul.f32 1.442695, %v6108_v33  ;;  %v6474_v3 = vadd.f32 %v6473_v56, %v6472_v1  ;;  %v6416_v48 = vunpack.c.l.bf16 %v12892_v43  ;;  %v8429_v26 = vld [vmem:[%s13294_s5 + $0x88] sm:$0xff]  }
 0x61b   :  { %8508 = vpow2.f32 %v6157_v50  ;;  %v6175_v25 = vmul.f32 1.442695, %v6109_v8  ;;  %v6466_v17 = vrot.slane %v6465_v59, 1  ;;  %vm6271_vm3 = vcmp.gt.f32.partialorder %v12849_v42, 0.0 }
 0x61c   :  { %v8499_v11 = vpop.eup %8498  ;;  %8510 = vpow2.f32 %v6173_v7  ;;  %v6475_v44 = vrot.slane %v6474_v3, 1  ;;  %v6417_v12 = vunpack.c.h.bf16 %v12892_v43  ;;  %vm6279_vm4 = vcmp.gt.f32.partialorder %v12854_v9, 0.0  ;;  %v14258_v43 = vld [vmem:[#allocation31_spill] sm:$0xff] }
 0x61d   :  { %v8501_v24 = vpop.eup %8500  ;;  %v7518_v60 = vadd.f32 -1.0, %v8499_v11  ;;  %8512 = vpow2.f32 %v6175_v25  ;;  %v6467_v6 = vadd.f32 %v6466_v17, %v6465_v59  ;;  %vm6280_vm5 = vcmp.gt.f32.partialorder %v12857_v18, 0.0 }
 0x61e   :  { %v7519_v45 = vadd.f32 -1.0, %v8501_v24  ;;  %v8503_v36 = vpop.eup %8502  ;;  %v6476_v29 = vadd.f32 %v6475_v44, %v6474_v3  ;;  %vm6288_vm6 = vcmp.gt.f32.partialorder %v12861_v22, 0.0  ;;  %vm6289_vm7 = vcmp.gt.f32.partialorder %v12866_v5, 0.0  ;;  %v14257_v44 = vld [vmem:[#allocation129_spill] sm:$0xff] }
 0x61f   :  { %v6225_v19 = vmul.f32 1.6732632, %v7518_v60  ;;  %v8505_v32 = vpop.eup %8504  ;;  %v7527_v52 = vadd.f32 -1.0, %v8503_v36  ;;  %v6540_v55 = vpack.c.bf16 %v6467_v6, %v6467_v6 }
 0x620   :  { %v6226_v14 = vmul.f32 1.6732632, %v7519_v45  ;;  %v7528_v16 = vadd.f32 -1.0, %v8505_v32  ;;  %v6541_v4 = vpack.c.bf16 %v6476_v29, %v6476_v29 }
 0x621   :  { %v6297_v20 = vsel %vm6261_vm0, %v12837_v35, %v6225_v19  ;;  %v6234_v15 = vmul.f32 1.6732632, %v7527_v52  ;;  %v8427_v35 = vld [vmem:[%s13294_s5 + $0x80] sm:$0xff]  }
 0x622   :  { %v6298_v63 = vsel %vm6262_vm1, %v12841_v61, %v6226_v14  ;;  %v6333_v46 = vmul.f32 1.050701, %v6297_v20  ;;  %v6235_v10 = vmul.f32 1.6732632, %v7528_v16  ;;  %7167 = vmatprep.mubr.bf16.mxu1 %v6541_v4  ;;  %v8432_v14 = vld [vmem:[%s13294_s5 + $0xd8] sm:$0xff]  }
 0x623   :  { %v6334_v58 = vmul.f32 1.050701, %v6298_v63  ;;  %v6306_v49 = vsel %vm6270_vm2, %v12846_v23, %v6234_v15  ;;  %7168 = vmatmul.mubr.bf16.vlgmr.msra.gmra.mrb[32].mxu1 %v6540_v55  ;;  %v14259_v4 = vld [vmem:[#allocation131_spill] sm:$0xff] }
 0x624   :  { %v8507_v61 = vpop.eup %8506  ;;  %v6342_v51 = vmul.f32 1.050701, %v6306_v49  ;;  %v6307_v39 = vsel %vm6271_vm3, %v12849_v42, %v6235_v10  ;;  %7737 = vmatpush3.bf16.msra.mxu1 %v8427_v35  ;;  %v6425_v59 = vmul.f32 %v6389_v31, %v6333_v46  ;;  %v8430_v42 = vld [vmem:[%s13294_s5 + $0xd0] sm:$0xff]  }
 0x625   :  { %v8509_v40 = vpop.eup %8508  ;;  %v7536_v37 = vadd.f32 -1.0, %v8507_v61  ;;  %v6343_v33 = vmul.f32 1.050701, %v6307_v39  ;;  %v6426_v7 = vmul.f32 %v6390_v13, %v6334_v58  ;;  %7738 = vmatprep.subr.bf16.mxu1 %v8428_v47  ;;  %v8434_v58 = vld [vmem:[%s13294_s5 + $0xe0] sm:$0xff]  }
 0x626   :  { %v8511_v57 = vpop.eup %8510  ;;  %v7537_v27 = vadd.f32 -1.0, %v8509_v40  ;;  %v6434_v8 = vmul.f32 %v6398_v53, %v6342_v51 }
 0x627   :  { %v6243_v23 = vmul.f32 1.6732632, %v7536_v37  ;;  %v7545_v50 = vadd.f32 -1.0, %v8511_v57  ;;  %v8513_v1 = vpop.eup %8512  ;;  %v6435_v56 = vmul.f32 %v6399_v38, %v6343_v33 }
 0x628   :  { %v6244_v21 = vmul.f32 1.6732632, %v7537_v27  ;;  %v7546_v25 = vadd.f32 -1.0, %v8513_v1  ;;  %v6477_v17 = vadd.f32 %v6434_v8, %v6425_v59  ;;  %7739 = vmatpush3.bf16.msra.mxu1 %v8429_v26  ;;  %v8435_v26 = vld [vmem:[%s13294_s5 + $0xa0] sm:$0xff]   ;;  %v8436_v59 = vld [vmem:[%s13294_s5 + $0xe8] sm:$0xff]  }
 0x629   :  { %v6315_v11 = vsel %vm6279_vm4, %v12854_v9, %v6243_v23  ;;  %v6252_v0 = vmul.f32 1.6732632, %v7545_v50  ;;  %v6486_v3 = vadd.f32 %v6435_v56, %v6426_v7  ;;  %v8431_v9 = vld [vmem:[%s13294_s5 + $0x90] sm:$0xff]   ;;  %7740 = vmatprep.subr.bf16.mxu1 %v8430_v42 }
 0x62a   :  { %v6351_v24 = vmul.f32 1.050701, %v6315_v11  ;;  %v6316_v60 = vsel %vm6280_vm5, %v12857_v18, %v6244_v21  ;;  %v6253_v19 = vmul.f32 1.6732632, %v7546_v25  ;;  %v14261_v23 = vld [vmem:[#allocation63_spill] sm:$0xff]  ;;  %v14262_v21 = vld [vmem:[#allocation10_spill] sm:$0xff] }
 0x62b   :  { %v6352_v31 = vmul.f32 1.050701, %v6316_v60  ;;  %v6324_v45 = vsel %vm6288_vm6, %v12861_v22, %v6252_v0  ;;  %v5862_v13 = vpop.f32.mrb[12].mxu0  ;;  %v14263_v0 = vld [vmem:[#allocation55_spill] sm:$0xff] }
 0x62c   :  { %v6443_v53 = vmul.f32 %v6407_v34, %v6351_v24  ;;  %v6360_v28 = vmul.f32 1.050701, %v6324_v45  ;;  %v8019_v18 = vadd.f32 %v5862_v13, %v14257_v44  ;;  %v5864_v36 = vpop.f32.mrb[13].mxu0  ;;  %v6325_v38 = vsel %vm6289_vm7, %v12866_v5, %v6253_v19  ;;  %7741 = vmatpush3.bf16.msra.mxu1 %v8431_v9  ;;  %v8433_v5 = vld [vmem:[%s13294_s5 + $0x98] sm:$0xff]   ;;  %v8437_v19 = vld [vmem:[%s13294_s5 + $0xa8] sm:$0xff]  }
 0x62d   :  { %v6444_v22 = vmul.f32 %v6408_v41, %v6352_v31  ;;  %v8020_v6 = vadd.f32 %v5864_v36, %v14258_v43  ;;  %v5866_v32 = vpop.f32.mrb[14].mxu0  ;;  %v6361_v29 = vmul.f32 1.050701, %v6325_v38  ;;  %v14260_v41 = vld [vmem:[#allocation78_spill] sm:$0xff]  ;;  %7742 = vmatprep.subr.bf16.mxu1 %v8432_v14  ;;  %v14264_v31 = vld [vmem:[#allocation59_spill] sm:$0xff] }
 0x62e   :  { %v6478_v20 = vadd.f32 %v6477_v17, %v6443_v53  ;;  %v6452_v52 = vmul.f32 %v6416_v48, %v6360_v28  ;;  %v12938_v63 = vadd.f32 %v8019_v18, %v12766_v54  ;;  %v5868_v16 = vpop.f32.mrb[15].mxu0  ;;  %v8021_v35 = vadd.f32 %v5866_v32, %v14259_v4  ;;  %v8438_v53 = vld [vmem:[%s13294_s5 + $0xf0] sm:$0xff]  }
 0x62f   :  { %v6487_v34 = vadd.f32 %v6486_v3, %v6444_v22  ;;  %v12941_v15 = vadd.f32 %v8020_v6, %v12766_v54  ;;  %v8022_v47 = vadd.f32 %v5868_v16, %v14260_v41  ;;  %v6453_v48 = vmul.f32 %v6417_v12, %v6361_v29  ;;  %v8439_v6 = vld [vmem:[%s13294_s5 + $0xb0] sm:$0xff]  }
 0x630   :  { %v6479_v61 = vadd.f32 %v6478_v20, %v6452_v52  ;;  %v6083_v46 = vmin.f32 %v12938_v63, 0.0  ;;  %v12954_v55 = vadd.f32 %v8021_v35, %v12772_v62  ;;  %7743 = vmatpush3.bf16.msra.mxu1 %v8433_v5  ;;  %v8440_v52 = vld [vmem:[%s13294_s5 + $0xf8] sm:$0xff]   ;;  %v13002_v16 = vld [vmem:[%s13293_s4 + $0x10] sm:$0xff]  ;;  %vm6263_vm8 = vcmp.gt.f32.partialorder %v12938_v63, 0.0 }
 0x631   :  { %v6084_v10 = vmin.f32 %v12941_v15, 0.0  ;;  %v12957_v40 = vadd.f32 %v8022_v47, %v12772_v62  ;;  %v6488_v37 = vadd.f32 %v6487_v34, %v6453_v48  ;;  %7744 = vmatprep.subr.bf16.mxu1 %v8434_v58  ;;  %v13007_v41 = vld [vmem:[%s13293_s4 + $0x34] sm:$0xff]  ;;  %v6391_v58 = vunpack.c.l.bf16 %v13002_v16 }
 0x632   :  { %v6480_v49 = vrot.slane %v6479_v61, 4  ;;  %v6123_v57 = vmul.f32 1.442695, %v6083_v46  ;;  %v6092_v12 = vmin.f32 %v12954_v55, 0.0  ;;  %v8441_v48 = vld [vmem:[%s13294_s5 + $0xb8] sm:$0xff]   ;;  %vm6264_vm9 = vcmp.gt.f32.partialorder %v12941_v15, 0.0 }
 0x633   :  { %v6125_v51 = vmul.f32 1.442695, %v6084_v10  ;;  %v6093_v39 = vmin.f32 %v12957_v40, 0.0  ;;  %v5872_v27 = vpop.f32.mrb[16].mxu0  ;;  %v6489_v24 = vrot.slane %v6488_v37, 4  ;;  %vm6272_vm10 = vcmp.gt.f32.partialorder %v12954_v55, 0.0 }
 0x634   :  { %v6481_v33 = vadd.f32 %v6480_v49, %v6479_v61  ;;  %8514 = vpow2.f32 %v6123_v57  ;;  %v8023_v50 = vadd.f32 %v5872_v27, %v14261_v23  ;;  %v5874_v1 = vpop.f32.mrb[17].mxu0  ;;  %v6141_v7 = vmul.f32 1.442695, %v6092_v12  ;;  %7745 = vmatpush3.bf16.msra.mxu1 %v8435_v26  ;;  %v13012_v61 = vld [vmem:[%s13293_s4 + $0x58] sm:$0xff]  ;;  %v8442_v57 = vld [vmem:[%s13294_s5 + $0x140] sm:$0xff]  }
 0x635   :  { %8516 = vpow2.f32 %v6125_v51  ;;  %v6143_v8 = vmul.f32 1.442695, %v6093_v39  ;;  %v8024_v42 = vadd.f32 %v5874_v1, %v14262_v21  ;;  %v5876_v56 = vpop.f32.mrb[18].mxu0  ;;  %7746 = vmatprep.subr.bf16.mxu1 %v8436_v59  ;;  %v6490_v18 = vadd.f32 %v6489_v24, %v6488_v37  ;;  %v13029_v59 = vld [vmem:[%s13293_s4 + $0x7c] sm:$0xff] }
 0x636   :  { %v12970_v11 = vadd.f32 %v8023_v50, %v12788_v2  ;;  %v8025_v25 = vadd.f32 %v5876_v56, %v14263_v0  ;;  %v5878_v17 = vpop.f32.mrb[19].mxu0  ;;  %v6482_v60 = vrot.slane %v6481_v33, 2  ;;  %8518 = vpow2.f32 %v6141_v7 }
 0x637   :  { %v12974_v3 = vadd.f32 %v8024_v42, %v12788_v2  ;;  %v8026_v45 = vadd.f32 %v5878_v17, %v14264_v31  ;;  %8520 = vpow2.f32 %v6143_v8  ;;  %v6491_v32 = vrot.slane %v6490_v18, 2  ;;  %v8443_v42 = vld [vmem:[%s13294_s5 + $0x100] sm:$0xff]  }
 0x638   :  { %v6101_v13 = vmin.f32 %v12970_v11, 0.0  ;;  %v12982_v9 = vadd.f32 %v8025_v25, %v12798_v30  ;;  %v6483_v22 = vadd.f32 %v6482_v60, %v6481_v33  ;;  %7747 = vmatpush3.bf16.msra.mxu1 %v8437_v19  ;;  %v6392_v49 = vunpack.c.h.bf16 %v13002_v16 }
 0x639   :  { %v6102_v28 = vmin.f32 %v12974_v3, 0.0  ;;  %v12989_v44 = vadd.f32 %v8026_v45, %v12798_v30  ;;  %7748 = vmatprep.subr.bf16.mxu1 %v8438_v53  ;;  %v6492_v4 = vadd.f32 %v6491_v32, %v6490_v18  ;;  %v6400_v39 = vunpack.c.l.bf16 %v13007_v41 }
 0x63a   :  { %v6159_v36 = vmul.f32 1.442695, %v6101_v13  ;;  %v6110_v14 = vmin.f32 %v12982_v9, 0.0  ;;  %v6484_v29 = vrot.slane %v6483_v22, 1  ;;  %v6401_v27 = vunpack.c.h.bf16 %v13007_v41 }
 0x63b   :  { %v6161_v38 = vmul.f32 1.442695, %v6102_v28  ;;  %v6111_v43 = vmin.f32 %v12989_v44, 0.0  ;;  %v6493_v46 = vrot.slane %v6492_v4, 1  ;;  %v6409_v1 = vunpack.c.l.bf16 %v13012_v61 }
 0x63c   :  { %8522 = vpow2.f32 %v6159_v36  ;;  %v6177_v20 = vmul.f32 1.442695, %v6110_v14  ;;  %7749 = vmatpush3.bf16.msra.mxu1 %v8439_v6  ;;  %v6485_v37 = vadd.f32 %v6484_v29, %v6483_v22  ;;  %v6410_v25 = vunpack.c.h.bf16 %v13012_v61  ;;  %v8445_v14 = vld [vmem:[%s13294_s5 + $0x108] sm:$0xff]  }
 0x63d   :  { %8524 = vpow2.f32 %v6161_v38  ;;  %v6179_v34 = vmul.f32 1.442695, %v6111_v43  ;;  %7750 = vmatprep.subr.bf16.mxu1 %v8440_v52  ;;  %v6494_v26 = vadd.f32 %v6493_v46, %v6492_v4  ;;  %v6418_v31 = vunpack.c.l.bf16 %v13029_v59 }
 0x63e   :  { %v8515_v35 = vpop.eup %8514  ;;  %8526 = vpow2.f32 %v6177_v20  ;;  %v6542_v17 = vpack.c.bf16 %v6485_v37, %v6485_v37  ;;  %vm6273_vm11 = vcmp.gt.f32.partialorder %v12957_v40, 0.0  ;;  %v6419_v13 = vunpack.c.h.bf16 %v13029_v59 }
 0x63f   :  { %v8517_v47 = vpop.eup %8516  ;;  %v7520_v5 = vadd.f32 -1.0, %v8515_v35  ;;  %8528 = vpow2.f32 %v6179_v34  ;;  %v6543_v21 = vpack.c.bf16 %v6494_v26, %v6494_v26  ;;  %vm6281_vm12 = vcmp.gt.f32.partialorder %v12970_v11, 0.0 }
 0x640   :  { %v7521_v10 = vadd.f32 -1.0, %v8517_v47  ;;  %v8519_v51 = vpop.eup %8518  ;;  %7751 = vmatpush3.bf16.msra.mxu1 %v8441_v48  ;;  %vm6282_vm13 = vcmp.gt.f32.partialorder %v12974_v3, 0.0  ;;  %vm6290_vm14 = vcmp.gt.f32.partialorder %v12982_v9, 0.0  ;;  %vm6291_vm15 = vcmp.gt.f32.partialorder %v12989_v44, 0.0  ;;  %v8447_v48 = vld [vmem:[%s13294_s5 + $0x110] sm:$0xff]  }
 0x641   :  { %v6227_v12 = vmul.f32 1.6732632, %v7520_v5  ;;  %v8521_v33 = vpop.eup %8520  ;;  %v7529_v50 = vadd.f32 -1.0, %v8519_v51  ;;  %7758 = vmatprep.subr.bf16.mxu1 %v8442_v57  ;;  %7207 = vmatprep.mubr.bf16.mxu1 %v6543_v21 }
 0x642   :  { %v6228_v23 = vmul.f32 1.6732632, %v7521_v10  ;;  %v7530_v8 = vadd.f32 -1.0, %v8521_v33 }
 0x643   :  { %v6299_v7 = vsel %vm6263_vm8, %v12938_v63, %v6227_v12  ;;  %v6236_v0 = vmul.f32 1.6732632, %v7529_v50  ;;  %v8444_v63 = vld [vmem:[%s13294_s5 + $0x148] sm:$0xff]   ;;  %7208 = vmatmul.mubr.bf16.vlgmr.msra.gmra.mrb[36].mxu1 %v6542_v17 }
 0x644   :  { %v6300_v56 = vsel %vm6264_vm9, %v12941_v15, %v6228_v23  ;;  %v6335_v24 = vmul.f32 1.050701, %v6299_v7  ;;  %v6237_v60 = vmul.f32 1.6732632, %v7530_v8  ;;  %7759 = vmatpush3.bf16.msra.mxu1 %v8443_v42  ;;  %v8449_v8 = vld [vmem:[%s13294_s5 + $0x118] sm:$0xff]  }
 0x645   :  { %v6336_v19 = vmul.f32 1.050701, %v6300_v56  ;;  %v6308_v15 = vsel %vm6272_vm10, %v12954_v55, %v6236_v0  ;;  %7760 = vmatprep.subr.bf16.mxu1 %v8444_v63 }
 0x646   :  { %v8523_v45 = vpop.eup %8522  ;;  %v6344_v28 = vmul.f32 1.050701, %v6308_v15  ;;  %v6309_v18 = vsel %vm6273_vm11, %v12957_v40, %v6237_v60  ;;  %v8446_v40 = vld [vmem:[%s13294_s5 + $0x150] sm:$0xff]   ;;  %v6427_v6 = vmul.f32 %v6391_v58, %v6335_v24 }
 0x647   :  { %v8525_v53 = vpop.eup %8524  ;;  %v7538_v36 = vadd.f32 -1.0, %v8523_v45  ;;  %v6345_v38 = vmul.f32 1.050701, %v6309_v18  ;;  %v6428_v29 = vmul.f32 %v6392_v49, %v6336_v19  ;;  %v8451_v45 = vld [vmem:[%s13294_s5 + $0x120] sm:$0xff]  }
 0x648   :  { %v8527_v22 = vpop.eup %8526  ;;  %v7539_v55 = vadd.f32 -1.0, %v8525_v53  ;;  %v6436_v32 = vmul.f32 %v6400_v39, %v6344_v28  ;;  %7761 = vmatpush3.bf16.msra.mxu1 %v8445_v14  ;;  %v8452_v28 = vld [vmem:[%s13294_s5 + $0x168] sm:$0xff]  }
 0x649   :  { %v8529_v43 = vpop.eup %8528  ;;  %v6245_v20 = vmul.f32 1.6732632, %v7538_v36  ;;  %v7547_v52 = vadd.f32 -1.0, %v8527_v22  ;;  %v6437_v16 = vmul.f32 %v6401_v27, %v6345_v38  ;;  %7762 = vmatprep.subr.bf16.mxu1 %v8446_v40 }
 0x64a   :  { %v6246_v34 = vmul.f32 1.6732632, %v7539_v55  ;;  %v7548_v4 = vadd.f32 -1.0, %v8529_v43  ;;  %v6495_v35 = vadd.f32 %v6436_v32, %v6427_v6 }
 0x64b   :  { %v6317_v41 = vsel %vm6281_vm12, %v12970_v11, %v6245_v20  ;;  %v6254_v47 = vmul.f32 1.6732632, %v7547_v52  ;;  %v5915_v5 = vpop.f32.mrb[24].mxu1  ;;  %v6504_v46 = vadd.f32 %v6437_v16, %v6428_v29  ;;  %v8448_v11 = vld [vmem:[%s13294_s5 + $0x158] sm:$0xff]   ;;  %v8453_v20 = vld [vmem:[%s13294_s5 + $0x128] sm:$0xff]   ;;  %v8454_v16 = vld [vmem:[%s13294_s5 + $0x170] sm:$0xff]  }
 0x64c   :  { %v6353_v58 = vmul.f32 1.050701, %v6317_v41  ;;  %v6318_v10 = vsel %vm6282_vm13, %v12974_v3, %v6246_v34  ;;  %v6255_v49 = vmul.f32 1.6732632, %v7548_v4  ;;  %v5917_v37 = vpop.f32.mrb[25].mxu1  ;;  %v13073_v12 = vadd.f32 %v12766_v54, %v5915_v5  ;;  %7763 = vmatpush3.bf16.msra.mxu1 %v8447_v48  ;;  %v8455_v48 = vld [vmem:[%s13294_s5 + $0x130] sm:$0xff]  }
 0x64d   :  { %v6354_v57 = vmul.f32 1.050701, %v6318_v10  ;;  %v6326_v51 = vsel %vm6290_vm14, %v12982_v9, %v6254_v47  ;;  %v13076_v39 = vadd.f32 %v12766_v54, %v5917_v37  ;;  %v5919_v27 = vpop.f32.mrb[26].mxu1  ;;  %7764 = vmatprep.subr.bf16.mxu1 %v8448_v11  ;;  %v13133_v10 = vld [vmem:[%s13293_s4 + $0x18] sm:$0xff]  ;;  %vm8664_vm12 = vmmov 0  }
 0x64e   :  { %v6445_v3 = vmul.f32 %v6409_v1, %v6353_v58  ;;  %v6362_v26 = vmul.f32 1.050701, %v6326_v51  ;;  %v6327_v33 = vsel %vm6291_vm15, %v12989_v44, %v6255_v49  ;;  %v13084_v23 = vadd.f32 %v12772_v62, %v5919_v27  ;;  %v5921_v50 = vpop.f32.mrb[27].mxu1  ;;  %v8450_v44 = vld [vmem:[%s13294_s5 + $0x160] sm:$0xff]   ;;  %v8456_v37 = vld [vmem:[%s13294_s5 + $0x178] sm:$0xff]  }
 0x64f   :  { %v6446_v9 = vmul.f32 %v6410_v25, %v6354_v57  ;;  %v6363_v59 = vmul.f32 1.050701, %v6327_v33  ;;  %v6085_v7 = vmin.f32 %v13073_v12, 0.0  ;;  %v6086_v21 = vmin.f32 %v13076_v39, 0.0  ;;  %v13141_v57 = vld [vmem:[%s13293_s4 + $0x3c] sm:$0xff] }
 0x650   :  { %v6496_v61 = vadd.f32 %v6495_v35, %v6445_v3  ;;  %v6454_v1 = vmul.f32 %v6418_v31, %v6362_v26  ;;  %v6094_v25 = vmin.f32 %v13084_v23, 0.0  ;;  %v13096_v24 = vadd.f32 %v12772_v62, %v5921_v50  ;;  %7765 = vmatpush3.bf16.msra.mxu1 %v8449_v8 }
 0x651   :  { %v6505_v42 = vadd.f32 %v6504_v46, %v6446_v9  ;;  %v6455_v56 = vmul.f32 %v6419_v13, %v6363_v59  ;;  %v6127_v0 = vmul.f32 1.442695, %v6085_v7  ;;  %v6129_v63 = vmul.f32 1.442695, %v6086_v21  ;;  %7766 = vmatprep.subr.bf16.mxu1 %v8450_v44  ;;  %v8457_v7 = vld [vmem:[%s13294_s5 + $0x138] sm:$0xff]   ;;  %v8458_v44 = vld [vmem:[%s13294_s5 + $0x1c0] sm:$0xff]  }
 0x652   :  { %v6497_v17 = vadd.f32 %v6496_v61, %v6454_v1  ;;  %v6145_v60 = vmul.f32 1.442695, %v6094_v25  ;;  %v6095_v13 = vmin.f32 %v13096_v24, 0.0  ;;  %v6393_v50 = vunpack.c.l.bf16 %v13133_v10  ;;  %v13157_v25 = vld [vmem:[%s13293_s4 + $0x60] sm:$0xff] }
 0x653   :  { %8530 = vpow2.f32 %v6127_v0  ;;  %v5925_v31 = vpop.f32.mrb[28].mxu1  ;;  %v6506_v19 = vadd.f32 %v6505_v42, %v6455_v56  ;;  %v6394_v59 = vunpack.c.h.bf16 %v13133_v10  ;;  %v6402_v21 = vunpack.c.l.bf16 %v13141_v57 }
 0x654   :  { %v6498_v15 = vrot.slane %v6497_v17, 4  ;;  %8532 = vpow2.f32 %v6129_v63  ;;  %v5927_v53 = vpop.f32.mrb[29].mxu1  ;;  %v13106_v18 = vadd.f32 %v12788_v2, %v5925_v31  ;;  %v6147_v38 = vmul.f32 1.442695, %v6095_v13  ;;  %7767 = vmatpush3.bf16.msra.mxu1 %v8451_v45  ;;  %v13165_v45 = vld [vmem:[%s13293_s4 + $0x84] sm:$0xff] }
 0x655   :  { %8534 = vpow2.f32 %v6145_v60  ;;  %v13109_v36 = vadd.f32 %v12788_v2, %v5927_v53  ;;  %v5929_v14 = vpop.f32.mrb[30].mxu1  ;;  %v6507_v22 = vrot.slane %v6506_v19, 4  ;;  %7768 = vmatprep.subr.bf16.mxu1 %v8452_v28  ;;  %vm6265_vm0 = vcmp.gt.f32.partialorder %v13073_v12, 0.0 }
 0x656   :  { %v13112_v55 = vadd.f32 %v12798_v30, %v5929_v14  ;;  %v5931_v40 = vpop.f32.mrb[31].mxu1  ;;  %v6499_v43 = vadd.f32 %v6498_v15, %v6497_v17  ;;  %v6103_v6 = vmin.f32 %v13106_v18, 0.0  ;;  %8536 = vpow2.f32 %v6147_v38 }
 0x657   :  { %v6104_v32 = vmin.f32 %v13109_v36, 0.0  ;;  %v13121_v29 = vadd.f32 %v12798_v30, %v5931_v40  ;;  %v6508_v35 = vadd.f32 %v6507_v22, %v6506_v19  ;;  %v6403_v0 = vunpack.c.h.bf16 %v13141_v57  ;;  %v8460_v40 = vld [vmem:[%s13294_s5 + $0x1c8] sm:$0xff]  }
 0x658   :  { %v6112_v52 = vmin.f32 %v13112_v55, 0.0  ;;  %v6163_v34 = vmul.f32 1.442695, %v6103_v6  ;;  %v6500_v41 = vrot.slane %v6499_v43, 2  ;;  %7769 = vmatpush3.bf16.msra.mxu1 %v8453_v20  ;;  %vm6266_vm1 = vcmp.gt.f32.partialorder %v13076_v39, 0.0 }
 0x659   :  { %v6165_v4 = vmul.f32 1.442695, %v6104_v32  ;;  %v6113_v5 = vmin.f32 %v13121_v29, 0.0  ;;  %v6509_v46 = vrot.slane %v6508_v35, 2  ;;  %7770 = vmatprep.subr.bf16.mxu1 %v8454_v16  ;;  %vm6274_vm2 = vcmp.gt.f32.partialorder %v13084_v23, 0.0 }
 0x65a   :  { %v6181_v47 = vmul.f32 1.442695, %v6112_v52  ;;  %8538 = vpow2.f32 %v6163_v34  ;;  %v6501_v58 = vadd.f32 %v6500_v41, %v6499_v43  ;;  %v6411_v14 = vunpack.c.l.bf16 %v13157_v25 }
 0x65b   :  { %8540 = vpow2.f32 %v6165_v4  ;;  %v6183_v49 = vmul.f32 1.442695, %v6113_v5  ;;  %v6510_v51 = vadd.f32 %v6509_v46, %v6508_v35  ;;  %v6412_v22 = vunpack.c.h.bf16 %v13157_v25  ;;  %v8461_v5 = vld [vmem:[%s13294_s5 + $0x188] sm:$0xff]  }
 0x65c   :  { %8542 = vpow2.f32 %v6181_v47  ;;  %v6502_v27 = vrot.slane %v6501_v58, 1  ;;  %7771 = vmatpush3.bf16.msra.mxu1 %v8455_v48  ;;  %v6420_v32 = vunpack.c.l.bf16 %v13165_v45  ;;  %v6421_v20 = vunpack.c.h.bf16 %v13165_v45  ;;  %v8462_v48 = vld [vmem:[%s13294_s5 + $0x1d0] sm:$0xff]   ;;  %v8465_v45 = vld [vmem:[%s13294_s5 + $0x198] sm:$0xff]  }
 0x65d   :  { %v8531_v11 = vpop.eup %8530  ;;  %8544 = vpow2.f32 %v6183_v49  ;;  %v6511_v8 = vrot.slane %v6510_v51, 1  ;;  %7772 = vmatprep.subr.bf16.mxu1 %v8456_v37  ;;  %vm6275_vm3 = vcmp.gt.f32.partialorder %v13096_v24, 0.0  ;;  %vm6283_vm4 = vcmp.gt.f32.partialorder %v13106_v18, 0.0 }
 0x65e   :  { %v8533_v3 = vpop.eup %8532  ;;  %v7522_v26 = vadd.f32 -1.0, %v8531_v11  ;;  %v6503_v42 = vadd.f32 %v6502_v27, %v6501_v58  ;;  %vm6284_vm5 = vcmp.gt.f32.partialorder %v13109_v36, 0.0  ;;  %vm6292_vm6 = vcmp.gt.f32.partialorder %v13112_v55, 0.0 }
 0x65f   :  { %v8535_v33 = vpop.eup %8534  ;;  %v7523_v9 = vadd.f32 -1.0, %v8533_v3  ;;  %v6512_v17 = vadd.f32 %v6511_v8, %v6510_v51  ;;  %vm6293_vm7 = vcmp.gt.f32.partialorder %v13121_v29, 0.0  ;;  %vm7335_vm13 = vcmask 253952  }
 0x660   :  { %v6229_v61 = vmul.f32 1.6732632, %v7522_v26  ;;  %v7531_v1 = vadd.f32 -1.0, %v8535_v33  ;;  %v8537_v63 = vpop.eup %8536  ;;  %7773 = vmatpush3.bf16.msra.mxu1 %v8457_v7  ;;  %v6544_v38 = vpack.c.bf16 %v6503_v42, %v6503_v42  ;;  %v8463_v33 = vld [vmem:[%s13294_s5 + $0x190] sm:$0xff]  }
 0x661   :  { %v6230_v56 = vmul.f32 1.6732632, %v7523_v9  ;;  %v7532_v13 = vadd.f32 -1.0, %v8537_v63  ;;  %v6545_v53 = vpack.c.bf16 %v6512_v17, %v6512_v17  ;;  %7780 = vmatprep.subr.bf16.mxu1 %v8458_v44 }
 0x662   :  { %v6301_v60 = vsel %vm6265_vm0, %v13073_v12, %v6229_v61  ;;  %v6238_v31 = vmul.f32 1.6732632, %v7531_v1  ;;  %v8459_v12 = vld [vmem:[%s13294_s5 + $0x180] sm:$0xff]  }
 0x663   :  { %v6337_v19 = vmul.f32 1.050701, %v6301_v60  ;;  %v6302_v15 = vsel %vm6266_vm1, %v13076_v39, %v6230_v56  ;;  %v6239_v6 = vmul.f32 1.6732632, %v7532_v13  ;;  %7247 = vmatprep.mubr.bf16.mxu1 %v6545_v53  ;;  %v8466_v13 = vld [vmem:[%s13294_s5 + $0x1e0] sm:$0xff]  }
 0x664   :  { %v6310_v28 = vsel %vm6274_vm2, %v13084_v23, %v6238_v31  ;;  %v8539_v39 = vpop.eup %8538  ;;  %v6338_v23 = vmul.f32 1.050701, %v6302_v15  ;;  %7248 = vmatmul.mubr.bf16.vlgmr.msra.gmra.mrb[40].mxu1 %v6544_v38 }
 0x665   :  { %v6346_v43 = vmul.f32 1.050701, %v6310_v28  ;;  %v8541_v52 = vpop.eup %8540  ;;  %v7540_v16 = vadd.f32 -1.0, %v8539_v39  ;;  %v6429_v4 = vmul.f32 %v6393_v50, %v6337_v19  ;;  %v6311_v41 = vsel %vm6275_vm3, %v13096_v24, %v6239_v6  ;;  %7781 = vmatpush3.bf16.msra.mxu1 %v8459_v12 }
 0x666   :  { %v8543_v34 = vpop.eup %8542  ;;  %v7541_v47 = vadd.f32 -1.0, %v8541_v52  ;;  %v6347_v58 = vmul.f32 1.050701, %v6311_v41  ;;  %7782 = vmatprep.subr.bf16.mxu1 %v8460_v40  ;;  %v6430_v51 = vmul.f32 %v6394_v59, %v6338_v23  ;;  %v8469_v52 = vld [vmem:[%s13294_s5 + $0x1a8] sm:$0xff]   ;;  %v8471_v41 = vld [vmem:[%s13294_s5 + $0x1b0] sm:$0xff]  }
 0x667   :  { %v6438_v35 = vmul.f32 %v6402_v21, %v6346_v43  ;;  %v8545_v46 = vpop.eup %8544  ;;  %v6247_v49 = vmul.f32 1.6732632, %v7540_v16  ;;  %v7549_v37 = vadd.f32 -1.0, %v8543_v34  ;;  %v8464_v21 = vld [vmem:[%s13294_s5 + $0x1d8] sm:$0xff]   ;;  %v8470_v16 = vld [vmem:[%s13294_s5 + $0x1f0] sm:$0xff]  }
 0x668   :  { %v6248_v57 = vmul.f32 1.6732632, %v7541_v47  ;;  %v7550_v24 = vadd.f32 -1.0, %v8545_v46  ;;  %v6439_v27 = vmul.f32 %v6403_v0, %v6347_v58 }
 0x669   :  { %v6513_v11 = vadd.f32 %v6438_v35, %v6429_v4  ;;  %v6319_v3 = vsel %vm6283_vm4, %v13106_v18, %v6247_v49  ;;  %v6256_v26 = vmul.f32 1.6732632, %v7549_v37  ;;  %7783 = vmatpush3.bf16.msra.mxu1 %v8461_v5  ;;  %v8472_v5 = vld [vmem:[%s13294_s5 + $0x1f8] sm:$0xff]  }
 0x66a   :  { %v6355_v50 = vmul.f32 1.050701, %v6319_v3  ;;  %v6320_v9 = vsel %vm6284_vm5, %v13109_v36, %v6248_v57  ;;  %v6257_v7 = vmul.f32 1.6732632, %v7550_v24  ;;  %v6522_v10 = vadd.f32 %v6439_v27, %v6430_v51  ;;  %7784 = vmatprep.subr.bf16.mxu1 %v8462_v48  ;;  %v8473_v57 = vld [vmem:[%s13294_s5 + $0x1b8] sm:$0xff]  }
 0x66b   :  { %v7989_v8 = vpop.f32.mrb[0].mxu0  ;;  %v6356_v59 = vmul.f32 1.050701, %v6320_v9  ;;  %v6328_v61 = vsel %vm6292_vm6, %v13112_v55, %v6256_v26  ;;  %v6381_v27 = vld [vmem:[%s13293_s4 + $0x20] ss:$72 sps:$4 sm:$0xff]  }
 0x66c   :  { %v13202_v1 = vadd.f32 %v7989_v8, %v12788_v2  ;;  %v5968_v18 = vpop.f32.mrb[1].mxu0  ;;  %v6447_v44 = vmul.f32 %v6411_v14, %v6355_v50  ;;  %v6364_v36 = vmul.f32 1.050701, %v6328_v61  ;;  %v6329_v42 = vsel %vm6293_vm7, %v13121_v29, %v6257_v7  ;;  %v6386_v8 = vld [vmem:[%s13293_s4 + $0x44] ss:$72 sps:$4 sm:$0xff]  }
 0x66d   :  { %v13209_v56 = vadd.f32 %v12766_v54, %v5968_v18  ;;  %v7990_v0 = vpop.f32.mrb[2].mxu0  ;;  %v6448_v25 = vmul.f32 %v6412_v22, %v6356_v59  ;;  %v6365_v17 = vmul.f32 1.050701, %v6329_v42  ;;  %7785 = vmatpush3.bf16.msra.mxu1 %v8463_v33  ;;  %v6395_v59 = vunpack.c.l.bf16 %v6381_v27  ;;  %v8474_v18 = vld [vmem:[%s13294_s5 + $0x200] sm:$0xff]  }
 0x66e   :  { %v6105_v55 = vmin.f32 %v13202_v1, 0.0  ;;  %v5971_v2 = vpop.f32.mrb[3].mxu0  ;;  %v6514_v63 = vadd.f32 %v6513_v11, %v6447_v44  ;;  %v6456_v60 = vmul.f32 %v6420_v32, %v6364_v36  ;;  %v13217_v54 = vadd.f32 %v7990_v0, %v12798_v30  ;;  %7786 = vmatprep.subr.bf16.mxu1 %v8464_v21  ;;  %v8467_v30 = vld [vmem:[%s13294_s5 + $0x1a0] sm:$0xff]  }
 0x66f   :  { %v6087_v31 = vmin.f32 %v13209_v56, 0.0  ;;  %v6523_v19 = vadd.f32 %v6522_v10, %v6448_v25  ;;  %v6457_v29 = vmul.f32 %v6421_v20, %v6365_v17  ;;  %v13223_v28 = vadd.f32 %v12772_v62, %v5971_v2  ;;  %v8468_v62 = vld [vmem:[%s13294_s5 + $0x1e8] sm:$0xff]  }
 0x670   :  { %v6167_v15 = vmul.f32 1.442695, %v6105_v55  ;;  %v6515_v53 = vadd.f32 %v6514_v63, %v6456_v60  ;;  %v6114_v22 = vmin.f32 %v13217_v54, 0.0  ;;  %vm6267_vm8 = vcmp.gt.f32.partialorder %v13209_v56, 0.0 }
 0x671   :  { %v6131_v12 = vmul.f32 1.442695, %v6087_v31  ;;  %v6524_v14 = vadd.f32 %v6523_v19, %v6457_v29  ;;  %v6096_v40 = vmin.f32 %v13223_v28, 0.0  ;;  %7787 = vmatpush3.bf16.msra.mxu1 %v8465_v45  ;;  %vm6285_vm9 = vcmp.gt.f32.partialorder %v13202_v1, 0.0 }
 0x672   :  { %8546 = vpow2.f32 %v6167_v15  ;;  %v6516_v38 = vrot.slane %v6515_v53, 4  ;;  %v6185_v39 = vmul.f32 1.442695, %v6114_v22  ;;  %7788 = vmatprep.subr.bf16.mxu1 %v8466_v13  ;;  %v8663_v42 = vmov 0.0   ;;  %v8478_v22 = vld [vmem:[%s13294_s5 + $0x220] sm:$0xff]  }
 0x673   :  { %8548 = vpow2.f32 %v6131_v12  ;;  %v6525_v43 = vrot.slane %v6524_v14, 4  ;;  %v6149_v32 = vmul.f32 1.442695, %v6096_v40  ;;  %vm6294_vm10 = vcmp.gt.f32.partialorder %v13217_v54, 0.0 }
 0x674   :  { %v6517_v6 = vadd.f32 %v6516_v38, %v6515_v53  ;;  %8550 = vpow2.f32 %v6185_v39  ;;  %vm6276_vm11 = vcmp.gt.f32.partialorder %v13223_v28, 0.0  ;;  %v6404_v0 = vunpack.c.l.bf16 %v6386_v8 }
 0x675   :  { %v6526_v20 = vadd.f32 %v6525_v43, %v6524_v14  ;;  %8552 = vpow2.f32 %v6149_v32  ;;  %7789 = vmatpush3.bf16.msra.mxu1 %v8467_v30  ;;  %v6413_v2 = vunpack.c.h.bf16 %v6381_v27  ;;  %v6422_v45 = vunpack.c.h.bf16 %v6386_v8  ;;  %v8479_v30 = vld [vmem:[%s13294_s5 + $0x228] sm:$0xff]  }
 0x676   :  { %v6518_v23 = vrot.slane %v6517_v6, 2  ;;  %7790 = vmatprep.subr.bf16.mxu1 %v8468_v62  ;;  %v8480_v62 = vld [vmem:[%s13294_s5 + $0x230] sm:$0xff]  }
 0x677   :  { %v6527_v34 = vrot.slane %v6526_v20, 2 }
 0x678   :  { %v6519_v4 = vadd.f32 %v6518_v23, %v6517_v6  ;;  %v8481_v6 = vld [vmem:[%s13294_s5 + $0x238] sm:$0xff]  }
 0x679   :  { %v6528_v35 = vadd.f32 %v6527_v34, %v6526_v20  ;;  %7791 = vmatpush3.bf16.msra.mxu1 %v8469_v52 }
 0x67a   :  { %7792 = vmatprep.subr.bf16.mxu1 %v8470_v16  ;;  %v6520_v46 = vrot.slane %v6519_v4, 1 }
 0x67b   :  { %v6529_v48 = vrot.slane %v6528_v35, 1 }
 0x67c   :  { %v8547_v47 = vpop.eup %8546  ;;  %v6521_v33 = vadd.f32 %v6520_v46, %v6519_v4 }
 0x67d   :  { %v8549_v58 = vpop.eup %8548  ;;  %v7542_v49 = vadd.f32 -1.0, %v8547_v47  ;;  %v6530_v11 = vadd.f32 %v6529_v48, %v6528_v35  ;;  %7793 = vmatpush3.bf16.msra.mxu1 %v8471_v41  ;;  %v6699_v35 = vlaneseq }
 0x67e   :  { %v7524_v37 = vadd.f32 -1.0, %v8549_v58  ;;  %v8551_v24 = vpop.eup %8550  ;;  %7794 = vmatprep.subr.bf16.mxu1 %v8472_v5  ;;  %v6546_v36 = vpack.c.bf16 %v6521_v33, %v6521_v33  ;;  %v6697_v5 = vpop.permute.xlu1 %6696 }
 0x67f   :  { %v6249_v51 = vmul.f32 1.6732632, %v7542_v49  ;;  %v6547_v26 = vpack.c.bf16 %v6530_v11, %v6530_v11  ;;  %v8553_v50 = vpop.eup %8552  ;;  %v7551_v9 = vadd.f32 -1.0, %v8551_v24  ;;  %v6700_v41 = vshrl.u32 %v6699_v35, 7 }
 0x680   :  { %v6231_v3 = vmul.f32 1.6732632, %v7524_v37  ;;  %v7533_v10 = vadd.f32 -1.0, %v8553_v50 }
 0x681   :  { %7287 = vmatprep.mubr.bf16.mxu1 %v6547_v26  ;;  %v6258_v61 = vmul.f32 1.6732632, %v7551_v9  ;;  %7795 = vmatpush3.bf16.msra.mxu1 %v8473_v57  ;;  %v6321_v21 = vsel %vm6285_vm9, %v13202_v1, %v6249_v51  ;;  %v8475_v1 = vld [vmem:[%s13294_s5 + $0x208] sm:$0xff]   ;;  %v6701_v47 = vsub.s32 0, %v6700_v41 }
 0x682   :  { %v6303_v7 = vsel %vm6267_vm8, %v13209_v56, %v6231_v3  ;;  %v6240_v44 = vmul.f32 1.6732632, %v7533_v10  ;;  %7991 = vmatprep.subr.bf16.mxu1 %v8663_v42  ;;  %v6357_v55 = vmul.f32 1.050701, %v6321_v21 }
 0x683   :  { %v6339_v56 = vmul.f32 1.050701, %v6303_v7  ;;  %v6330_v25 = vsel %vm6294_vm10, %v13217_v54, %v6258_v61  ;;  %v8476_v54 = vld [vmem:[%s13294_s5 + $0x210] sm:$0xff]   ;;  %v6702_v48 = vrot.slane %v6697_v5, %v6701_v47 }
 0x684   :  { %v6312_v17 = vsel %vm6276_vm11, %v13223_v28, %v6240_v44  ;;  %7288 = vmatmul.mubr.bf16.vlgmr.msra.gmra.mrb[44].mxu1 %v6546_v36  ;;  %v6366_v31 = vmul.f32 1.050701, %v6330_v25  ;;  %v6449_v29 = vmul.f32 %v6413_v2, %v6357_v55  ;;  %v8477_v28 = vld [vmem:[%s13294_s5 + $0x218] sm:$0xff]  }
 0x685   :  { %v6348_v63 = vmul.f32 1.050701, %v6312_v17  ;;  %7992 = vmatpush3.bf16.msra.mxu1 %v8474_v18  ;;  %8007 = vmatprep.mubr.msk.bf16.mxu1 %vm8664_vm12, %v8663_v42  ;;  %v6431_v60 = vmul.f32 %v6395_v59, %v6339_v56 }
 0x686   :  { %7993 = vmatprep.subr.bf16.mxu1 %v8663_v42  ;;  %v6458_v13 = vmul.f32 %v6422_v45, %v6366_v31 }
 0x687   :  { %v6440_v19 = vmul.f32 %v6404_v0, %v6348_v63 }
 0x689   :  { %v6531_v15 = vadd.f32 %v6440_v19, %v6431_v60  ;;  %7994 = vmatpush3.bf16.msra.mxu1 %v8475_v1 }
 0x68a   :  { %7995 = vmatprep.subr.bf16.mxu1 %v8663_v42 }
 0x68b   :  { %v6532_v53 = vadd.f32 %v6531_v15, %v6449_v29 }
 0x68d   :  { %v6533_v12 = vadd.f32 %v6532_v53, %v6458_v13  ;;  %7996 = vmatpush3.bf16.msra.mxu1 %v8476_v54 }
 0x68e   :  { %7997 = vmatprep.subr.bf16.mxu1 %v8663_v42 }
 0x68f   :  { %v6534_v14 = vrot.slane %v6533_v12, 4 }
 0x691   :  { %7998 = vmatpush3.bf16.msra.mxu1 %v8477_v28  ;;  %v6535_v38 = vadd.f32 %v6534_v14, %v6533_v12 }
 0x692   :  { %7999 = vmatprep.subr.bf16.mxu1 %v8663_v42 }
 0x693   :  { %v6536_v40 = vrot.slane %v6535_v38, 2 }
 0x695   :  { %8000 = vmatpush3.bf16.msra.mxu1 %v8478_v22  ;;  %v6537_v39 = vadd.f32 %v6536_v40, %v6535_v38 }
 0x696   :  { %8001 = vmatprep.subr.bf16.mxu1 %v8663_v42 }
 0x697   :  { %v6538_v43 = vrot.slane %v6537_v39, 1 }
 0x699   :  { %8002 = vmatpush3.bf16.msra.mxu1 %v8479_v30  ;;  %v6539_v32 = vadd.f32 %v6538_v43, %v6537_v39 }
 0x69a   :  { %8003 = vmatprep.subr.bf16.mxu1 %v8663_v42 }
 0x69b   :  { %v6548_v20 = vpack.c.bf16 %v6539_v32, %v6539_v32 }
 0x69d   :  { %8004 = vmatpush3.bf16.msra.mxu1 %v8480_v62 }
 0x69e   :  { %8005 = vmatprep.subr.bf16.mxu1 %v8663_v42 }
 0x6a1   :  { %8006 = vmatpush3.bf16.msra.mxu1 %v8481_v6 }
 0x6a4   :  { %8008 = vmatmul.mubr.bf16.vlgmr.msra.gmra.mrb[48].mxu1 %v6548_v20 }
 0x6f6   :  { %v7730_v52 = vpop.f32.mrb[32].mxu1 }
 0x6f7   :  { %v7731_v23 = vpop.f32.mrb[33].mxu1 }
 0x6f8   :  { %v7732_v16 = vadd.f32 %v7731_v23, %v7730_v52  ;;  %v7733_v34 = vpop.f32.mrb[34].mxu1 }
 0x6f9   :  { %v7734_v4 = vpop.f32.mrb[35].mxu1 }
 0x6fa   :  { %v7170_v49 = vadd.f32 %v7732_v16, %v6702_v48 }
 0x716   :  { %v7752_v46 = vpop.f32.mrb[36].mxu1 }
 0x717   :  { %v7753_v58 = vpop.f32.mrb[37].mxu1 }
 0x718   :  { %v7754_v37 = vadd.f32 %v7753_v58, %v7752_v46  ;;  %v7755_v11 = vpop.f32.mrb[38].mxu1 }
 0x719   :  { %v7756_v57 = vpop.f32.mrb[39].mxu1 }
 0x71a   :  { %v7210_v24 = vadd.f32 %v7754_v37, %v7170_v49 }
 0x737   :  { %v7774_v51 = vpop.f32.mrb[40].mxu1 }
 0x738   :  { %v7775_v27 = vpop.f32.mrb[41].mxu1 }
 0x739   :  { %v7776_v3 = vadd.f32 %v7775_v27, %v7774_v51  ;;  %v7777_v26 = vpop.f32.mrb[42].mxu1 }
 0x73a   :  { %v7778_v33 = vpop.f32.mrb[43].mxu1 }
 0x73b   :  { %v7250_v50 = vadd.f32 %v7776_v3, %v7210_v24 }
 0x757   :  { %v7796_v9 = vpop.f32.mrb[44].mxu1 }
 0x758   :  { %v7797_v7 = vpop.f32.mrb[45].mxu1 }
 0x759   :  { %v7798_v8 = vadd.f32 %v7797_v7, %v7796_v9  ;;  %v7799_v10 = vpop.f32.mrb[46].mxu1 }
 0x75a   :  { %v7800_v59 = vpop.f32.mrb[47].mxu1 }
 0x75b   :  { %v7290_v61 = vadd.f32 %v7798_v8, %v7250_v50 }
 0x777   :  { %v7329_v18 = vpop.f32.mrb[48].mxu1 }
 0x778   :  { %v7330_v21 = vadd.f32 %v7329_v18, %v7290_v61  ;;  %v8009_v44 = vpop.f32.mrb[49].mxu1 }
 0x779   :  { %v7332_v36 = vpop.f32.mrb[50].mxu1 }
 0x77a   :  { %7336 = vst.msk [vmem:[%s13296_s7] sm:$0x1] %vm7335_vm13, %v7330_v21  ;;  %v8010_v42 = vpop.f32.mrb[51].mxu1 }

</bundles_post_ra>
